<compile_context>
chip_gen: v7x
topology: tpu7x:2x2x1
jax: 0.10.0
libtpu: 0.0.40
codegen_flags: <defaults>
</compile_context>

<pallas_src>
import jax
import jax.numpy as jnp
from jax.experimental import pallas as pl
from jax.experimental.pallas import tpu as pltpu

# ----------------------------- constants -----------------------------------
IMG = 336               # preprocess resize target (336 x 336)
PATCH = 14              # DINOv2 ViT-B/14 patch size
GRID = IMG // PATCH     # 24 -> 24x24 patch grid, as in get_foreground_mask
PPP = PATCH * PATCH     # 196 pixels per patch
PDIM = 3 * PPP          # 588 values per flattened patch
TOKENS = GRID * GRID    # 576 patch tokens per image
EMBED_DIM = 128         # stand-in embedding width (real model: 768); multiple
                        # of 128 keeps MXU columns / output lanes dense.

_MEAN = (0.485, 0.456, 0.406)
_STD = (0.229, 0.224, 0.225)


# ----------------------------- fused kernel ---------------------------------
def _fused_feature_kernel(p_ref, cs_ref, cb_ref, sel_ref, w_ref, b_ref, g_ref,
                          beta_ref, out_ref):
    # p_ref:   (576, 588) raw (un-normalized) flattened 14x14x3 patches, 1 image
    # cs_ref:  (1, 588)  per-column 1/std        (column order: ci, py, px)
    # cb_ref:  (1, 588)  per-column -mean/std
    # sel_ref: (588, 196) 0/1 selector summing the 3 channels of each pixel
    # w_ref:   (588, 128) patch-embed weight; b/g/beta: (1, 128)
    # out_ref: (1, 128)  masked-average foreground feature
    p = p_ref[...] * cs_ref[...] + cb_ref[...]          # torchvision Normalize

    # ---- foreground mask (get_foreground_mask) ------------------------------
    # per-pixel channel sum of the normalized image, kept in patch layout (MXU)
    s_pix = jnp.dot(p, sel_ref[...], preferred_element_type=jnp.float32)  # (576,196)
    mn = jnp.min(s_pix)                                  # global min over all pixels
    fg = jnp.where(s_pix == mn, 0.0, 1.0)                # ~(sum == min)
    # 336->24 downsample ~ 14x14 area average per patch, then >0.5 threshold
    count = jnp.sum(fg, axis=1, keepdims=True)           # (576, 1) fg pixels / patch
    mask = jnp.where(count > 0.5 * PPP, 1.0, 0.0)        # (576, 1) in {0, 1}
    total = jnp.sum(mask)
    mask = jnp.where(total == 0.0, 1.0, mask)            # all-zero fallback (fused)

    # ---- stand-in encoder: patch-embed matmul + final LayerNorm -------------
    tok = jnp.dot(p, w_ref[...], preferred_element_type=jnp.float32) + b_ref[...]
    mu = jnp.mean(tok, axis=-1, keepdims=True)
    var = jnp.mean((tok - mu) ** 2, axis=-1, keepdims=True)
    tok = (tok - mu) * jax.lax.rsqrt(var + 1e-6) * g_ref[...] + beta_ref[...]

    # ---- masked foreground feature averaging --------------------------------
    num = jnp.sum(tok * mask, axis=0, keepdims=True)     # (1, 128), lane-dense
    den = jnp.sum(mask)                                  # >= 1 thanks to fallback
    out_ref[...] = num / den


# ----------------------------- wrappers --------------------------------------
def extract_patches(x):
    """(B, 3, 336, 336) NCHW -> (B, 576, 588) raw patches, columns (ci, py, px)."""
    B = x.shape[0]
    p = x.reshape(B, 3, GRID, PATCH, GRID, PATCH)
    p = p.transpose(0, 2, 4, 1, 3, 5)                    # (B, 24, 24, 3, 14, 14)
    return p.reshape(B, TOKENS, PDIM)


def _norm_constants():
    scale = jnp.concatenate(
        [jnp.full((PPP,), 1.0 / s, jnp.float32) for s in _STD]).reshape(1, PDIM)
    bias = jnp.concatenate(
        [jnp.full((PPP,), -m / s, jnp.float32) for m, s in zip(_MEAN, _STD)]
    ).reshape(1, PDIM)
    eye = jnp.eye(PPP, dtype=jnp.float32)
    sel = jnp.concatenate([eye, eye, eye], axis=0)       # (588, 196)
    return scale, bias, sel


def foreground_features(params, x):
    """x: (B, 3, 336, 336) raw [0,1] images, background zeroed -> (B, C)."""
    B = x.shape[0]
    patches = extract_patches(x)
    scale, bias, sel = _norm_constants()
    bcast = lambda b: (0, 0)
    out = pl.pallas_call(
        _fused_feature_kernel,
        out_shape=jax.ShapeDtypeStruct((B, 1, EMBED_DIM), jnp.float32),
        grid=(B,),
        in_specs=[
            pl.BlockSpec((None, TOKENS, PDIM), lambda b: (b, 0, 0)),
            pl.BlockSpec((1, PDIM), bcast),
            pl.BlockSpec((1, PDIM), bcast),
            pl.BlockSpec((PDIM, PPP), bcast),
            pl.BlockSpec((PDIM, EMBED_DIM), bcast),
            pl.BlockSpec((1, EMBED_DIM), bcast),
            pl.BlockSpec((1, EMBED_DIM), bcast),
            pl.BlockSpec((1, EMBED_DIM), bcast),
        ],
        out_specs=pl.BlockSpec((None, 1, EMBED_DIM), lambda b: (b, 0, 0)),
        compiler_params=pltpu.CompilerParams(dimension_semantics=("parallel",)),
    )(patches, scale, bias, sel, params["w"], params["b"],
      params["gamma"], params["beta"])
    return out.reshape(B, EMBED_DIM)


_features_jit = jax.jit(foreground_features)


def cosine_similarity(a, b, eps=1e-8):
    # tiny op -> plain jnp (no kernel launch), matches torch eps behavior
    dot = jnp.sum(a * b)
    na = jnp.maximum(jnp.sqrt(jnp.sum(a * a)), eps)
    nb = jnp.maximum(jnp.sqrt(jnp.sum(b * b)), eps)
    return dot / (na * nb)


# ----------------------------- module-level forward --------------------------
def init_params(key, embed_dim=EMBED_DIM):
    kw, kb = jax.random.split(key)
    return {
        "w": jax.random.normal(kw, (PDIM, embed_dim), jnp.float32) * 0.02,
        "b": jax.random.normal(kb, (1, embed_dim), jnp.float32) * 0.01,
        "gamma": jnp.ones((1, embed_dim), jnp.float32),
        "beta": jnp.zeros((1, embed_dim), jnp.float32),
    }


def forward_single(params, x, variant):
    if variant not in ("Crop-Feat", "Crop-Img"):
        raise ValueError("Invalid variant, only Crop-Feat and Crop-Img are supported.")
    # With carvekit skipped, Crop-Feat and Crop-Img see the same tensor.
    return _features_jit(params, x)


def forward(params, variant, *x):
    if len(x) == 1:
        return forward_single(params, x[0], variant)
    elif len(x) == 2:
        f1 = forward_single(params, x[0], variant)[0]
        f2 = forward_single(params, x[1], variant)[0]
        return cosine_similarity(f1, f2)
    else:
        raise ValueError("Invalid number of inputs, only 1 or 2 inputs are supported.")


# ----------------------------- demo / smoke test -----------------------------
if __name__ == "__main__":
    key = jax.random.PRNGKey(0)
    k_param, k1, k2 = jax.random.split(key, 3)
    params = init_params(k_param)

    B = 2

    def make_images(k, lo, hi):
        imgs = jax.random.uniform(k, (B, 3, IMG, IMG), jnp.float32,
                                  minval=0.1, maxval=1.0)
        yy = jnp.arange(IMG)[:, None]
        xx = jnp.arange(IMG)[None, :]
        fgm = ((yy >= lo) & (yy < hi) & (xx >= lo) & (xx < hi)).astype(jnp.float32)
        # zero background (what carvekit segmentation would have produced)
        return imgs * fgm[None, None, :, :]

    x1 = make_images(k1, 84, 252)
    x2 = make_images(k2, 56, 280)

    feats = forward(params, "Crop-Feat", x1)          # (B, C) feature vectors
    feats = jax.block_until_ready(feats)
    assert feats.shape == (B, EMBED_DIM)
    assert bool(jnp.all(jnp.isfinite(feats)))

    sim = forward(params, "Crop-Feat", x1, x2)        # scalar cosine similarity
    sim = jax.block_until_ready(sim)
    assert sim.shape == ()
    assert bool(jnp.isfinite(sim))

    print("KERNEL_OK")
</pallas_src>

<mosaic_0001>
module attributes {stable_mosaic.version = 11 : i64} {
  func.func @_fused_feature_kernel(%arg0: i32, %arg1: memref<1x576x588xf32, #tpu.memory_space<vmem>>, %arg2: memref<1x588xf32, #tpu.memory_space<vmem>>, %arg3: memref<1x588xf32, #tpu.memory_space<vmem>>, %arg4: memref<588x196xf32, #tpu.memory_space<vmem>>, %arg5: memref<588x128xf32, #tpu.memory_space<vmem>>, %arg6: memref<1x128xf32, #tpu.memory_space<vmem>>, %arg7: memref<1x128xf32, #tpu.memory_space<vmem>>, %arg8: memref<1x128xf32, #tpu.memory_space<vmem>>, %arg9: memref<1x1x128xf32, #tpu.memory_space<vmem>>) attributes {dimension_semantics = [#tpu.dimension_semantics<parallel>], iteration_bounds = array<i64: 2>, scalar_prefetch = 0 : i64, scratch_operands = 0 : i64, tpu.core_type = #tpu.core_type<tc>, window_params = [{transform_indices = @transform_0, window_bounds = array<i64: 1, 576, 588>}, {pipeline_mode = #tpu.pipeline_mode<synchronous>, transform_indices = @transform_1, window_bounds = array<i64: 1, 588>}, {pipeline_mode = #tpu.pipeline_mode<synchronous>, transform_indices = @transform_2, window_bounds = array<i64: 1, 588>}, {pipeline_mode = #tpu.pipeline_mode<synchronous>, transform_indices = @transform_3, window_bounds = array<i64: 588, 196>}, {pipeline_mode = #tpu.pipeline_mode<synchronous>, transform_indices = @transform_4, window_bounds = array<i64: 588, 128>}, {pipeline_mode = #tpu.pipeline_mode<synchronous>, transform_indices = @transform_5, window_bounds = array<i64: 1, 128>}, {pipeline_mode = #tpu.pipeline_mode<synchronous>, transform_indices = @transform_6, window_bounds = array<i64: 1, 128>}, {pipeline_mode = #tpu.pipeline_mode<synchronous>, transform_indices = @transform_7, window_bounds = array<i64: 1, 128>}, {transform_indices = @transform_8, window_bounds = array<i64: 1, 1, 128>}]} {
    %c0 = arith.constant 0 : index
    %c0_0 = arith.constant 0 : index
    %c0_1 = arith.constant 0 : index
    %0 = vector.load %arg1[%c0, %c0_0, %c0_1] : memref<1x576x588xf32, #tpu.memory_space<vmem>>, vector<1x576x588xf32>
    %1 = vector.shape_cast %0 : vector<1x576x588xf32> to vector<576x588xf32>
    %c0_2 = arith.constant 0 : index
    %c0_3 = arith.constant 0 : index
    %2 = vector.load %arg2[%c0_2, %c0_3] : memref<1x588xf32, #tpu.memory_space<vmem>>, vector<1x588xf32>
    %3 = vector.broadcast %2 : vector<1x588xf32> to vector<576x588xf32>
    %4 = arith.mulf %1, %3 : vector<576x588xf32>
    %c0_4 = arith.constant 0 : index
    %c0_5 = arith.constant 0 : index
    %5 = vector.load %arg3[%c0_4, %c0_5] : memref<1x588xf32, #tpu.memory_space<vmem>>, vector<1x588xf32>
    %6 = vector.broadcast %5 : vector<1x588xf32> to vector<576x588xf32>
    %7 = arith.addf %4, %6 : vector<576x588xf32>
    %c0_6 = arith.constant 0 : index
    %c0_7 = arith.constant 0 : index
    %8 = vector.load %arg4[%c0_6, %c0_7] : memref<588x196xf32, #tpu.memory_space<vmem>>, vector<588x196xf32>
    %cst = arith.constant dense<0.000000e+00> : vector<576x196xf32>
    %9 = tpu.matmul %7, %8, %cst {dimension_numbers = #tpu.dot_dimension_numbers<[1], [0], [0], [1], [0, 0, 1, 1], [], []>} : vector<576x588xf32>, vector<588x196xf32>, vector<576x196xf32> -> vector<576x196xf32>
    %10 = vector.shape_cast %9 : vector<576x196xf32> to vector<1x576x196xf32>
    %cst_8 = arith.constant dense<0x7F800000> : vector<1xf32>
    %11 = vector.multi_reduction <minimumf>, %10, %cst_8 [1, 2] : vector<1x576x196xf32> to vector<1xf32>
    %12 = vector.shape_cast %11 : vector<1xf32> to vector<1x1x1xf32>
    %13 = vector.extract %12[0, 0, 0] : f32 from vector<1x1x1xf32>
    %14 = vector.broadcast %13 : f32 to vector<576x196xf32>
    %15 = arith.cmpf oeq, %9, %14 : vector<576x196xf32>
    %cst_9 = arith.constant 0.000000e+00 : f32
    %cst_10 = arith.constant 1.000000e+00 : f32
    %16 = vector.broadcast %cst_9 : f32 to vector<576x196xf32>
    %17 = vector.broadcast %cst_10 : f32 to vector<576x196xf32>
    %18 = arith.select %15, %16, %17 : vector<576x196xi1>, vector<576x196xf32>
    %cst_11 = arith.constant dense<0.000000e+00> : vector<576xf32>
    %19 = vector.multi_reduction <add>, %18, %cst_11 [1] : vector<576x196xf32> to vector<576xf32>
    %20 = vector.shape_cast %19 : vector<576xf32> to vector<576x1xf32>
    %cst_12 = arith.constant 9.800000e+01 : f32
    %21 = vector.broadcast %cst_12 : f32 to vector<576x1xf32>
    %22 = arith.cmpf ogt, %20, %21 : vector<576x1xf32>
    %cst_13 = arith.constant 1.000000e+00 : f32
    %cst_14 = arith.constant 0.000000e+00 : f32
    %23 = vector.broadcast %cst_13 : f32 to vector<576x1xf32>
    %24 = vector.broadcast %cst_14 : f32 to vector<576x1xf32>
    %25 = arith.select %22, %23, %24 : vector<576x1xi1>, vector<576x1xf32>
    %26 = vector.shape_cast %25 : vector<576x1xf32> to vector<1x576x1xf32>
    %cst_15 = arith.constant dense<0.000000e+00> : vector<1xf32>
    %27 = vector.multi_reduction <add>, %26, %cst_15 [1, 2] : vector<1x576x1xf32> to vector<1xf32>
    %28 = vector.shape_cast %27 : vector<1xf32> to vector<1x1x1xf32>
    %29 = vector.extract %28[0, 0, 0] : f32 from vector<1x1x1xf32>
    %cst_16 = arith.constant 0.000000e+00 : f32
    %30 = arith.cmpf oeq, %29, %cst_16 : f32
    %cst_17 = arith.constant 1.000000e+00 : f32
    %31 = vector.broadcast %cst_17 : f32 to vector<576x1xf32>
    %32 = arith.select %30, %31, %25 : vector<576x1xf32>
    %c0_18 = arith.constant 0 : index
    %c0_19 = arith.constant 0 : index
    %33 = vector.load %arg5[%c0_18, %c0_19] : memref<588x128xf32, #tpu.memory_space<vmem>>, vector<588x128xf32>
    %cst_20 = arith.constant dense<0.000000e+00> : vector<576x128xf32>
    %34 = tpu.matmul %7, %33, %cst_20 {dimension_numbers = #tpu.dot_dimension_numbers<[1], [0], [0], [1], [0, 0, 1, 1], [], []>} : vector<576x588xf32>, vector<588x128xf32>, vector<576x128xf32> -> vector<576x128xf32>
    %c0_21 = arith.constant 0 : index
    %c0_22 = arith.constant 0 : index
    %35 = vector.load %arg6[%c0_21, %c0_22] : memref<1x128xf32, #tpu.memory_space<vmem>>, vector<1x128xf32>
    %36 = vector.broadcast %35 : vector<1x128xf32> to vector<576x128xf32>
    %37 = arith.addf %34, %36 : vector<576x128xf32>
    %cst_23 = arith.constant dense<0.000000e+00> : vector<576xf32>
    %38 = vector.multi_reduction <add>, %37, %cst_23 [1] : vector<576x128xf32> to vector<576xf32>
    %39 = vector.shape_cast %38 : vector<576xf32> to vector<576x1xf32>
    %cst_24 = arith.constant 1.280000e+02 : f32
    %40 = vector.broadcast %cst_24 : f32 to vector<576x1xf32>
    %41 = arith.divf %39, %40 : vector<576x1xf32>
    %42 = vector.broadcast %41 : vector<576x1xf32> to vector<576x128xf32>
    %43 = arith.subf %37, %42 : vector<576x128xf32>
    %44 = arith.mulf %43, %43 : vector<576x128xf32>
    %cst_25 = arith.constant dense<0.000000e+00> : vector<576xf32>
    %45 = vector.multi_reduction <add>, %44, %cst_25 [1] : vector<576x128xf32> to vector<576xf32>
    %46 = vector.shape_cast %45 : vector<576xf32> to vector<576x1xf32>
    %cst_26 = arith.constant 1.280000e+02 : f32
    %47 = vector.broadcast %cst_26 : f32 to vector<576x1xf32>
    %48 = arith.divf %46, %47 : vector<576x1xf32>
    %49 = vector.broadcast %41 : vector<576x1xf32> to vector<576x128xf32>
    %50 = arith.subf %37, %49 : vector<576x128xf32>
    %cst_27 = arith.constant 9.99999997E-7 : f32
    %51 = vector.broadcast %cst_27 : f32 to vector<576x1xf32>
    %52 = arith.addf %48, %51 : vector<576x1xf32>
    %53 = math.rsqrt %52 : vector<576x1xf32>
    %54 = vector.broadcast %53 : vector<576x1xf32> to vector<576x128xf32>
    %55 = arith.mulf %50, %54 : vector<576x128xf32>
    %c0_28 = arith.constant 0 : index
    %c0_29 = arith.constant 0 : index
    %56 = vector.load %arg7[%c0_28, %c0_29] : memref<1x128xf32, #tpu.memory_space<vmem>>, vector<1x128xf32>
    %57 = vector.broadcast %56 : vector<1x128xf32> to vector<576x128xf32>
    %58 = arith.mulf %55, %57 : vector<576x128xf32>
    %c0_30 = arith.constant 0 : index
    %c0_31 = arith.constant 0 : index
    %59 = vector.load %arg8[%c0_30, %c0_31] : memref<1x128xf32, #tpu.memory_space<vmem>>, vector<1x128xf32>
    %60 = vector.broadcast %59 : vector<1x128xf32> to vector<576x128xf32>
    %61 = arith.addf %58, %60 : vector<576x128xf32>
    %62 = vector.broadcast %32 : vector<576x1xf32> to vector<576x128xf32>
    %63 = arith.mulf %61, %62 : vector<576x128xf32>
    %cst_32 = arith.constant dense<0.000000e+00> : vector<128xf32>
    %64 = vector.multi_reduction <add>, %63, %cst_32 [0] : vector<576x128xf32> to vector<128xf32>
    %65 = vector.shape_cast %64 : vector<128xf32> to vector<1x128xf32>
    %66 = vector.shape_cast %32 : vector<576x1xf32> to vector<1x576x1xf32>
    %cst_33 = arith.constant dense<0.000000e+00> : vector<1xf32>
    %67 = vector.multi_reduction <add>, %66, %cst_33 [1, 2] : vector<1x576x1xf32> to vector<1xf32>
    %68 = vector.shape_cast %67 : vector<1xf32> to vector<1x1x1xf32>
    %69 = vector.extract %68[0, 0, 0] : f32 from vector<1x1x1xf32>
    %70 = vector.broadcast %69 : f32 to vector<1x128xf32>
    %71 = arith.divf %65, %70 : vector<1x128xf32>
    %c0_34 = arith.constant 0 : index
    %c0_35 = arith.constant 0 : index
    %c0_36 = arith.constant 0 : index
    %72 = vector.load %arg9[%c0_34, %c0_35, %c0_36] : memref<1x1x128xf32, #tpu.memory_space<vmem>>, vector<1x1x128xf32>
    %73 = vector.shape_cast %72 : vector<1x1x128xf32> to vector<1x128xf32>
    %74 = vector.shape_cast %71 : vector<1x128xf32> to vector<1x1x128xf32>
    tpu.vector_store %arg9[%c0_34, %c0_35, %c0_36], %74 {strides = array<i32>} : memref<1x1x128xf32, #tpu.memory_space<vmem>>, vector<1x1x128xf32>,
    return
  }
  func.func @transform_0(%arg0: i32) -> (i32, i32, i32) {
    %c0_i32 = arith.constant 0 : i32
    %c0_i32_0 = arith.constant 0 : i32
    %c0_i32_1 = arith.constant 0 : i32
    return %arg0, %c0_i32, %c0_i32_0 : i32, i32, i32
  }
  func.func @transform_1(%arg0: i32) -> (i32, i32) {
    %c0_i32 = arith.constant 0 : i32
    %c0_i32_0 = arith.constant 0 : i32
    %c0_i32_1 = arith.constant 0 : i32
    return %c0_i32, %c0_i32_0 : i32, i32
  }
  func.func @transform_2(%arg0: i32) -> (i32, i32) {
    %c0_i32 = arith.constant 0 : i32
    %c0_i32_0 = arith.constant 0 : i32
    %c0_i32_1 = arith.constant 0 : i32
    return %c0_i32, %c0_i32_0 : i32, i32
  }
  func.func @transform_3(%arg0: i32) -> (i32, i32) {
    %c0_i32 = arith.constant 0 : i32
    %c0_i32_0 = arith.constant 0 : i32
    %c0_i32_1 = arith.constant 0 : i32
    return %c0_i32, %c0_i32_0 : i32, i32
  }
  func.func @transform_4(%arg0: i32) -> (i32, i32) {
    %c0_i32 = arith.constant 0 : i32
    %c0_i32_0 = arith.constant 0 : i32
    %c0_i32_1 = arith.constant 0 : i32
    return %c0_i32, %c0_i32_0 : i32, i32
  }
  func.func @transform_5(%arg0: i32) -> (i32, i32) {
    %c0_i32 = arith.constant 0 : i32
    %c0_i32_0 = arith.constant 0 : i32
    %c0_i32_1 = arith.constant 0 : i32
    return %c0_i32, %c0_i32_0 : i32, i32
  }
  func.func @transform_6(%arg0: i32) -> (i32, i32) {
    %c0_i32 = arith.constant 0 : i32
    %c0_i32_0 = arith.constant 0 : i32
    %c0_i32_1 = arith.constant 0 : i32
    return %c0_i32, %c0_i32_0 : i32, i32
  }
  func.func @transform_7(%arg0: i32) -> (i32, i32) {
    %c0_i32 = arith.constant 0 : i32
    %c0_i32_0 = arith.constant 0 : i32
    %c0_i32_1 = arith.constant 0 : i32
    return %c0_i32, %c0_i32_0 : i32, i32
  }
  func.func @transform_8(%arg0: i32) -> (i32, i32, i32) {
    %c0_i32 = arith.constant 0 : i32
    %c0_i32_0 = arith.constant 0 : i32
    %c0_i32_1 = arith.constant 0 : i32
    return %arg0, %c0_i32, %c0_i32_0 : i32, i32, i32
  }
}

</mosaic_0001>

<bundles_post_ra>
// kernel: foreground_features.1
= control target key start
LH: loop header
LB: loop body
LE: loop exit
PB: predicated region body
PF: predicated region fallthrough
CT: control target
= control target key end

     0   :  { %13 = vsyncpa [#allocation3], 0  ;;  %s16054_s0 = inlined_call_operand.vmem [shape: f32[2,576,588], index: 0, kind: input, shape index: {}]   ;;  %s16055_s1 = inlined_call_operand.vmem [shape: f32[1,588], index: 1, kind: input, shape index: {}]   ;;  %s16056_s2 = inlined_call_operand.vmem [shape: f32[1,588], index: 2, kind: input, shape index: {}]   ;;  %s16057_s3 = inlined_call_operand.vmem [shape: f32[588,196], index: 3, kind: input, shape index: {}]   ;;  %s16058_s4 = inlined_call_operand.vmem [shape: f32[588,128], index: 4, kind: input, shape index: {}]   ;;  %s16059_s5 = inlined_call_operand.vmem [shape: f32[1,128], index: 5, kind: input, shape index: {}]   ;;  %s16060_s6 = inlined_call_operand.vmem [shape: f32[1,128], index: 6, kind: input, shape index: {}]   ;;  %s16061_s7 = inlined_call_operand.vmem [shape: f32[1,128], index: 7, kind: input, shape index: {}]   ;;  %s16062_s8 = inlined_call_operand.hbm [shape: f32[2,1,128], index: 8, kind: output, shape index: {}]  }
   0x1   :  { %15 = vsyncpa [#allocation3 + $0x1], 0  ;;  %s8622_s27 = smov 0   ;;  %s8624_s28 = smov 0  }
   0x2   :  { %s8626_s29 = smov 0   ;;  %s8628_s30 = smov 0  }
   0x3 LB: > { %s8643_s9 = sadd.s32 4294967295, %s8570_s30   ;;  %s7158_s10 = sadd.s32 4294967294, %s8570_s30   ;;  %s8570_s30 = sphi %s8628_s30, %s17548_s30   ;;  %s8566_s29 = sphi %s8626_s29, %s17547_s29   ;;  %s8562_s28 = sphi %s8624_s28, %s17546_s28   ;;  %s8558_s27 = sphi %s8622_s27, %s17545_s27  }
   0x4   : > { %s8647_s11 = sadd.s32 1, %s8570_s30   ;;  %s201_s12 = sadd.s32 1, %s8566_s29 }
   0x5   : > { %s198_s13 = ssub.s32 %s8570_s30, %s8647_s11  ;;  %p211_p0 = scmp.ne.s32.totalorder %s8566_s29, %s8562_s28 }
   0x6   : > { %p199_p1 = scmp.eq.s32.totalorder %s198_s13, 0  ;;  %p212_p2 = scmp.eq.s32.totalorder %s8643_s9, 1 }
   0x7   : > { %p217_p3 = scmp.ne.s32.totalorder %s8562_s28, %s8558_s27  ;;  %p218_p4 = scmp.eq.s32.totalorder %s7158_s10, 1 }
   0x8   : > { %s8658_s14 = scalar_select %p199_p1, %s8566_s29, %s201_s12  }
   0x9   : > { %p8660_p5 = por %p212_p2, %p211_p0  ;;  %p8664_p6 = por %p218_p4, %p217_p3 }
   0xa   : > { %p7161_p7 = scmp.ge.s32.totalorder %s8570_s30, 1  ;;  %p265_p8 = scmp.lt.s32.totalorder %s8570_s30, 3 }
   0xc   : > { %p266_p9 = pnand %p7161_p7, %p265_p8 }
   0xe   : > { %269 = sbr.rel (%p266_p9) target bundleno = 2217 (0x8a9), region = 52 }
  0x15   : > { %v1438_v0 = vld [vmem:[%s16057_s3 + $0x8] sm:$0xff]  ;;  %v1440_v1 = vld [vmem:[%s16057_s3 + $0x18] sm:$0xff]  ;;  %v1437_v2 = vld [vmem:[%s16057_s3] sm:$0xff]  ;;  %v16065_v12 = vmov 0.0   ;;  %p298_p10 = scmp.lt.s32.totalorder %s8643_s9, 1  ;;  %v665_v26 = vlaneseq  ;;  %vm1802_vm0 = vcmask 1043456  }
  0x16   : > { %v7526_v3 = vpack.c.bf16 %v1440_v1, %v1438_v0  ;;  %v1439_v4 = vld [vmem:[%s16057_s3 + $0x10] sm:$0xff]  ;;  %v1442_v5 = vld [vmem:[%s16057_s3 + $0x28] sm:$0xff]  ;;  %v1444_v6 = vld [vmem:[%s16057_s3 + $0x38] sm:$0xff]  ;;  %3161 = vmatprep.mubr.f32.mxu1 %v16065_v12  ;;  %vm8573_vm1 = vmmov 1   ;;  %vm1585_vm3 = vcmask 621568   ;;  %vm3300_vm4 = vcmask 556032  }
  0x17   : > { %v7528_v7 = vpack.c.bf16 %v1439_v4, %v1437_v2  ;;  %v7530_v8 = vpack.c.bf16 %v1444_v6, %v1442_v5  ;;  %v1441_v9 = vld [vmem:[%s16057_s3 + $0x20] sm:$0xff]  ;;  %v1443_v10 = vld [vmem:[%s16057_s3 + $0x30] sm:$0xff]  ;;  %v1446_v11 = vld [vmem:[%s16057_s3 + $0x48] sm:$0xff]  ;;  %s299_s10 = scalar_select %p298_p10, %s8643_s9, 1  ;;  %v8739_v33 = vshrl.u32 %v665_v26, 7 }
  0x18   : > { %7527 = vmatprep.subr.bf16.mxu0 %v7526_v3  ;;  %v1448_v13 = vld [vmem:[%s16057_s3 + $0x58] sm:$0xff]  ;;  %v7532_v14 = vpack.c.bf16 %v1443_v10, %v1441_v9  ;;  %v1445_v16 = vld [vmem:[%s16057_s3 + $0x40] sm:$0xff]  ;;  %v1447_v17 = vld [vmem:[%s16057_s3 + $0x50] sm:$0xff]  ;;  %s296_s12 = sand.u32 1, %s8562_s28  }
  0x19   : > { %7529 = vmatpush1.bf16.msra.mxu0 %v7528_v7  ;;  %v7534_v15 = vpack.c.bf16 %v1448_v13, %v1446_v11  ;;  %v1450_v18 = vld [vmem:[%s16057_s3 + $0x68] sm:$0xff]  ;;  %v1452_v19 = vld [vmem:[%s16057_s3 + $0x78] sm:$0xff]  ;;  %v7536_v20 = vpack.c.bf16 %v1447_v17, %v1445_v16  ;;  %v1449_v22 = vld [vmem:[%s16057_s3 + $0x60] sm:$0xff]  ;;  %s8308_s23 = smul.u32 2880, %s299_s10  ;;  %v671_v40 = vsub.s32 1, %v8739_v33  ;;  %v683_v26 = vsub.s32 4, %v8739_v33 }
  0x1a   : > { %7531 = vmatprep.subr.bf16.mxu0 %v7530_v8  ;;  %v7538_v21 = vpack.c.bf16 %v1452_v19, %v1450_v18  ;;  %v1451_v23 = vld [vmem:[%s16057_s3 + $0x70] sm:$0xff]  ;;  %v1454_v24 = vld [vmem:[%s16057_s3 + $0x88] sm:$0xff]  ;;  %v1456_v25 = vld [vmem:[%s16057_s3 + $0x98] sm:$0xff]  ;;  %s7091_s20 = scalar_lea.sflag [#allocation3], %s296_s12 }
  0x1b   : > { %v7540_v27 = vpack.c.bf16 %v1451_v23, %v1449_v22  ;;  %v7542_v28 = vpack.c.bf16 %v1456_v25, %v1454_v24  ;;  %v1453_v29 = vld [vmem:[%s16057_s3 + $0x80] sm:$0xff]  ;;  %v1455_v30 = vld [vmem:[%s16057_s3 + $0x90] sm:$0xff]  ;;  %v1458_v31 = vld [vmem:[%s16057_s3 + $0xa8] sm:$0xff]  ;;  %s8756_s21 = scalar_lea.vmem %s16054_s0, %s8308_s23 }
  0x1c   : > { %v1460_v32 = vld [vmem:[%s16057_s3 + $0xb8] sm:$0xff]  ;;  %v7544_v34 = vpack.c.bf16 %v1455_v30, %v1453_v29  ;;  %v1457_v36 = vld [vmem:[%s16057_s3 + $0xa0] sm:$0xff]  ;;  %v1459_v37 = vld [vmem:[%s16057_s3 + $0xb0] sm:$0xff] }
  0x1d   : > { %7533 = vmatpush1.bf16.msra.mxu0 %v7532_v14  ;;  %v7546_v35 = vpack.c.bf16 %v1460_v32, %v1458_v31  ;;  %v1462_v38 = vld [vmem:[%s16057_s3 + $0xc8] sm:$0xff]  ;;  %v1464_v39 = vld [vmem:[%s16057_s3 + $0xd8] sm:$0xff]  ;;  %v7548_v41 = vpack.c.bf16 %v1459_v37, %v1457_v36  ;;  %v1461_v42 = vld [vmem:[%s16057_s3 + $0xc0] sm:$0xff] }
  0x1e   : > { %7535 = vmatprep.subr.bf16.mxu0 %v7534_v15  ;;  %v7550_v43 = vpack.c.bf16 %v1464_v39, %v1462_v38  ;;  %v1463_v44 = vld [vmem:[%s16057_s3 + $0xd0] sm:$0xff]  ;;  %v304_v45 = vld [vmem:[%s8756_s21 + $0x8] sm:$0xff]  ;;  %v8769_v46 = vld [vmem:[%s16055_s1] sm:$0x1f] }
  0x1f   : > { %v1466_v47 = vld [vmem:[%s16057_s3 + $0xe8] sm:$0xff]  ;;  %v1468_v48 = vld [vmem:[%s16057_s3 + $0xf8] sm:$0xff]  ;;  %v8778_v49 = vrot.slane %v8769_v46, %v671_v40  ;;  %v8783_v50 = vld [vmem:[%s16056_s2] sm:$0x1f]  ;;  %v7552_v52 = vpack.c.bf16 %v1463_v44, %v1461_v42 }
  0x20   : > { %v8786_v51 = vrot.slane %v8783_v50, %v671_v40  ;;  %v1465_v53 = vld [vmem:[%s16057_s3 + $0xe0] sm:$0xff]  ;;  %v1467_v54 = vld [vmem:[%s16057_s3 + $0xf0] sm:$0xff]  ;;  %v1566_v56 = vld [vmem:[%s16057_s3 + $0x408] sm:$0xff]  ;;  %v7554_v57 = vpack.c.bf16 %v1468_v48, %v1466_v47  ;;  %v8910_v40 = vrot.slane %v8769_v46, %v683_v26 }
  0x21   : > { %7537 = vmatpush1.bf16.msra.mxu0 %v7536_v20  ;;  %v691_v55 = vmul.f32 %v8778_v49, %v304_v45  ;;  %v1568_v58 = vld [vmem:[%s16057_s3 + $0x418] sm:$0xff]  ;;  %v1565_v59 = vld [vmem:[%s16057_s3 + $0x400] sm:$0xff]  ;;  %v1567_v60 = vld [vmem:[%s16057_s3 + $0x410] sm:$0xff]  ;;  %v7556_v6 = vpack.c.bf16 %v1467_v54, %v1465_v53  ;;  %v16527_v53 = vmov 0 }
  0x22   : > { %7539 = vmatprep.subr.bf16.mxu0 %v7538_v21  ;;  %v1470_v61 = vld [vmem:[%s16057_s3 + $0x108] sm:$0xff]  ;;  %v1472_v62 = vld [vmem:[%s16057_s3 + $0x118] sm:$0xff]  ;;  %v8816_v0 = vpack.c.bf16 %v1568_v58, %v1566_v56  ;;  %v8818_v1 = vpack.c.bf16 %v1567_v60, %v1565_v59  ;;  %v1569_v4 = vld [vmem:[%s16057_s3 + $0x420] sm:$0xff]  ;;  %16524 = vst [vmem:[#allocation6_spill] sm:$0xff] %v8910_v40  ;;  %v8943_v58 = vrot.slane %v8783_v50, %v683_v26 }
  0x23   : > { %v8814_v63 = vadd.f32 %v8786_v51, %v691_v55  ;;  %v1570_v2 = vld [vmem:[%s16057_s3 + $0x428] sm:$0xff]  ;;  %v1572_v3 = vld [vmem:[%s16057_s3 + $0x438] sm:$0xff]  ;;  %v1571_v5 = vld [vmem:[%s16057_s3 + $0x430] sm:$0xff]  ;;  %v7558_v9 = vpack.c.bf16 %v1472_v62, %v1470_v61 }
  0x24   : > { %v8833_v7 = vpack.c.bf16 %v1572_v3, %v1570_v2  ;;  %v1574_v8 = vld [vmem:[%s16057_s3 + $0x448] sm:$0xff]  ;;  %v1469_v10 = vld [vmem:[%s16057_s3 + $0x100] sm:$0xff]  ;;  %v1471_v11 = vld [vmem:[%s16057_s3 + $0x110] sm:$0xff]  ;;  %7794 = vmatprep.subr.bf16.mxu1 %v8816_v0  ;;  %v8855_v16 = vpack.c.bf16 %v1571_v5, %v1569_v4  ;;  %16530 = vst [vmem:[#allocation10_spill] sm:$0xff] %v8943_v58 }
  0x25   : > { %7541 = vmatpush1.bf16.msra.mxu0 %v7540_v27  ;;  %1873 = vmatprep.mubr.f32.mxu0 %v8814_v63  ;;  %v1576_v13 = vld [vmem:[%s16057_s3 + $0x458] sm:$0xff]  ;;  %v1474_v14 = vld [vmem:[%s16057_s3 + $0x128] sm:$0xff]  ;;  %v1573_v18 = vld [vmem:[%s16057_s3 + $0x440] sm:$0xff]  ;;  %v7560_v20 = vpack.c.bf16 %v1471_v11, %v1469_v10 }
  0x26   : > { %7543 = vmatprep.subr.bf16.mxu0 %v7542_v28  ;;  %v1476_v15 = vld [vmem:[%s16057_s3 + $0x138] sm:$0xff]  ;;  %7799 = vmatpush1.bf16.msra.mxu1 %v8818_v1  ;;  %v8858_v17 = vpack.c.bf16 %v1576_v13, %v1574_v8  ;;  %v1575_v19 = vld [vmem:[%s16057_s3 + $0x450] sm:$0xff]  ;;  %v1578_v21 = vld [vmem:[%s16057_s3 + $0x468] sm:$0xff] }
  0x27   : > { %7795 = vmatprep.subr.bf16.mxu1 %v8833_v7  ;;  %v1580_v22 = vld [vmem:[%s16057_s3 + $0x478] sm:$0xff]  ;;  %v7562_v23 = vpack.c.bf16 %v1476_v15, %v1474_v14  ;;  %v1473_v24 = vld [vmem:[%s16057_s3 + $0x120] sm:$0xff]  ;;  %v1475_v25 = vld [vmem:[%s16057_s3 + $0x130] sm:$0xff]  ;;  %v8886_v29 = vpack.c.bf16 %v1575_v19, %v1573_v18  ;;  %v16063_v15 = vmov 0.0|0.0  }
  0x28   : > { %v1478_v27 = vld [vmem:[%s16057_s3 + $0x148] sm:$0xff]  ;;  %v1480_v28 = vld [vmem:[%s16057_s3 + $0x158] sm:$0xff]  ;;  %v8889_v30 = vpack.c.bf16 %v1580_v22, %v1578_v21  ;;  %v1577_v31 = vld [vmem:[%s16057_s3 + $0x460] sm:$0xff] }
  0x29   : > { %7545 = vmatpush1.bf16.msra.mxu0 %v7544_v34  ;;  %v1579_v32 = vld [vmem:[%s16057_s3 + $0x470] sm:$0xff]  ;;  %v7564_v34 = vpack.c.bf16 %v1475_v25, %v1473_v24  ;;  %v1584_v36 = vld [vmem:[%s16057_s3 + $0x498] sm:$0xf]  ;;  %v7566_v37 = vpack.c.bf16 %v1480_v28, %v1478_v27  ;;  %v1477_v38 = vld [vmem:[%s16057_s3 + $0x140] sm:$0xff] }
  0x2a   : > { %7547 = vmatprep.subr.bf16.mxu0 %v7546_v35  ;;  %7800 = vmatpush1.bf16.msra.mxu1 %v8855_v16  ;;  %16523 = vst [vmem:[#allocation5_spill] sm:$0xff] %v8889_v30  ;;  %v1582_v35 = vld [vmem:[%s16057_s3 + $0x488] sm:$0xff]  ;;  %v1479_v39 = vld [vmem:[%s16057_s3 + $0x150] sm:$0xff]  ;;  %v1484_v42 = vld [vmem:[%s16057_s3 + $0x178] sm:$0xff] }
  0x2b   : > { %7796 = vmatprep.subr.bf16.mxu1 %v8858_v17  ;;  %v552_v44 = vld [vmem:[%s8756_s21 + $0x7c8] sm:$0xff]  ;;  %v8923_v45 = vpack.c.bf16 %v1584_v36, %v1582_v35  ;;  %v1581_v47 = vld [vmem:[%s16057_s3 + $0x480] sm:$0xff]  ;;  %v1583_v48 = vld [vmem:[%s16057_s3 + $0x490] sm:$0xf] }
  0x2c   : > { %vm8931_vm2 = vmpackc.low %vm1802_vm0, %vm8573_vm1  ;;  %v1481_v55 = vld [vmem:[%s16057_s3 + $0x160] sm:$0xff]  ;;  %v1483_v56 = vld [vmem:[%s16057_s3 + $0x170] sm:$0xff]  ;;  %v8952_v61 = vpack.c.bf16 %v1583_v48, %v1581_v47 }
  0x2d   : > { %7549 = vmatpush1.bf16.msra.mxu0 %v7548_v41  ;;  %v1482_v41 = vld [vmem:[%s16057_s3 + $0x168] sm:$0xff]  ;;  %16526 = vst [vmem:[#allocation8_spill] sm:$0xff] %v8923_v45  ;;  %v16528_v53 = vsel %vm8931_vm2, 4294967295, %v16527_v53  ;;  %v1488_v60 = vld [vmem:[%s16057_s3 + $0x198] sm:$0xff]  ;;  %v557_v62 = vld [vmem:[%s8756_s21 + $0x7f0] sm:$0xff]  ;;  %v7572_v2 = vpack.c.bf16 %v1483_v56, %v1481_v55 }
  0x2e   : > { %7551 = vmatprep.subr.bf16.mxu0 %v7550_v43  ;;  %7801 = vmatpush1.bf16.msra.mxu1 %v8886_v29  ;;  %v8919_v43 = vpack.c.bf16 %v1579_v32, %v1577_v31  ;;  %16529 = vst [vmem:[#allocation9_spill] sm:$0xff] %v16528_v53  ;;  %v7570_v54 = vpack.c.bf16 %v1484_v42, %v1482_v41  ;;  %v1486_v59 = vld [vmem:[%s16057_s3 + $0x188] sm:$0xff]  ;;  %16531 = vst [vmem:[#allocation11_spill] sm:$0xff] %v8952_v61  ;;  %v1485_v3 = vld [vmem:[%s16057_s3 + $0x180] sm:$0xff]  ;;  %v667_v32 = vsub.s32 0, %v8739_v33 }
  0x2f   : > { %7797 = vmatprep.subr.bf16.mxu1 %v8889_v30  ;;  %v7574_v4 = vpack.c.bf16 %v1488_v60, %v1486_v59  ;;  %v1487_v5 = vld [vmem:[%s16057_s3 + $0x190] sm:$0xff]  ;;  %v944_v8 = vmul.f32 %v8910_v40, %v557_v62  ;;  %v4476_v10 = vld [vmem:[%s16058_s4 + $0x8] sm:$0xff]  ;;  %v1492_v13 = vld [vmem:[%s16057_s3 + $0x1b8] sm:$0xff] }
  0x30   : > { %16525 = vst [vmem:[#allocation7_spill] sm:$0xff] %v8919_v43  ;;  %v1490_v11 = vld [vmem:[%s16057_s3 + $0x1a8] sm:$0xff]  ;;  %v562_v14 = vld [vmem:[%s8756_s21 + $0x818] sm:$0xff]  ;;  %v7576_v18 = vpack.c.bf16 %v1487_v5, %v1485_v3  ;;  %v1491_v24 = vld [vmem:[%s16057_s3 + $0x1b0] sm:$0xff]  ;;  %v9040_v55 = vrot.slane %v8769_v46, %v667_v32 }
  0x31   : > { %7553 = vmatpush1.bf16.msra.mxu0 %v7552_v52  ;;  %v7568_v52 = vpack.c.bf16 %v1479_v39, %v1477_v38  ;;  %v4478_v21 = vld [vmem:[%s16058_s4 + $0x18] sm:$0xff]  ;;  %v7578_v22 = vpack.c.bf16 %v1492_v13, %v1490_v11  ;;  %v9000_v25 = vadd.f32 %v8943_v58, %v944_v8  ;;  %v949_v26 = vmul.f32 %v8910_v40, %v562_v14  ;;  %v1494_v27 = vld [vmem:[%s16057_s3 + $0x1c8] sm:$0xff]  ;;  %v567_v31 = vld [vmem:[%s8756_s21 + $0x840] sm:$0xff] }
  0x32   : > { %7555 = vmatprep.subr.bf16.mxu0 %v7554_v57  ;;  %v939_v57 = vmul.f32 %v8910_v40, %v552_v44  ;;  %7802 = vmatpush1.bf16.msra.mxu1 %v8919_v43  ;;  %v1496_v28 = vld [vmem:[%s16057_s3 + $0x1d8] sm:$0xff]  ;;  %v4479_v35 = vld [vmem:[%s16058_s4 + $0x20] sm:$0xff]  ;;  %v4480_v36 = vld [vmem:[%s16058_s4 + $0x28] sm:$0xff]  ;;  %v954_v44 = vmul.f32 %v8910_v40, %v567_v31  ;;  %v9073_v14 = vrot.slane %v8783_v50, %v667_v32 }
  0x33   : > { %7798 = vmatprep.subr.msk.bf16.mxu1 %vm8931_vm2, %v8923_v45  ;;  %16533 = vst [vmem:[#allocation13_spill] sm:$0xff] %v9000_v25  ;;  %v7582_v38 = vpack.c.bf16 %v1496_v28, %v1494_v27  ;;  %v1493_v39 = vld [vmem:[%s16057_s3 + $0x1c0] sm:$0xff]  ;;  %v1495_v41 = vld [vmem:[%s16057_s3 + $0x1d0] sm:$0xff]  ;;  %v9028_v42 = vadd.f32 %v8943_v58, %v949_v26  ;;  %v1498_v47 = vld [vmem:[%s16057_s3 + $0x1e8] sm:$0xff] }
  0x34   : > { %v1500_v48 = vld [vmem:[%s16057_s3 + $0x1f8] sm:$0xff]  ;;  %v4481_v56 = vld [vmem:[%s16058_s4 + $0x30] sm:$0xff]  ;;  %v7584_v59 = vpack.c.bf16 %v1495_v41, %v1493_v39  ;;  %v303_v60 = vld [vmem:[%s8756_s21] sm:$0xff] }
  0x35   : > { %7557 = vmatpush1.bf16.msra.mxu0 %v7556_v6  ;;  %v8965_v6 = vadd.f32 %v8943_v58, %v939_v57  ;;  %16534 = vst [vmem:[#allocation14_spill] sm:$0xff] %v9028_v42  ;;  %v4482_v57 = vld [vmem:[%s16058_s4 + $0x38] sm:$0xff]  ;;  %v7586_v62 = vpack.c.bf16 %v1500_v48, %v1498_v47  ;;  %v1497_v46 = vld [vmem:[%s16057_s3 + $0x1e0] sm:$0xff]  ;;  %v309_v3 = vld [vmem:[%s8756_s21 + $0x30] sm:$0xff]  ;;  %v690_v13 = vmul.f32 %v9040_v55, %v303_v60 }
  0x36   : > { %7559 = vmatprep.subr.bf16.mxu0 %v7558_v9  ;;  %v4475_v9 = vld [vmem:[%s16058_s4] sm:$0xff]  ;;  %7803 = vmatpush1.bf16.msk.msra.mxu1 %vm8931_vm2, %v8952_v61  ;;  %v1502_v8 = vld [vmem:[%s16057_s3 + $0x208] sm:$0xff]  ;;  %v7686_v11 = vpack.c.bf16 %v4482_v57, %v4481_v56  ;;  %v314_v26 = vld [vmem:[%s8756_s21 + $0x58] sm:$0xff] }
  0x37   : > { %16532 = vst [vmem:[#allocation12_spill] sm:$0xff] %v8965_v6  ;;  %7676 = vmatprep.subr.bf16.mxu1 %v16063_v15  ;;  %v7677_v19 = vpack.c.bf16 %v4476_v10, %v4475_v9  ;;  %v1504_v9 = vld [vmem:[%s16057_s3 + $0x218] sm:$0xff]  ;;  %v577_v10 = vld [vmem:[%s8756_s21 + $0x890] sm:$0xff]  ;;  %v1501_v50 = vld [vmem:[%s16057_s3 + $0x200] sm:$0xff]  ;;  %v701_v47 = vmul.f32 %v8778_v49, %v314_v26 }
  0x38   : > { %v964_v28 = vmul.f32 %v8910_v40, %v577_v10  ;;  %v1506_v31 = vld [vmem:[%s16057_s3 + $0x228] sm:$0xff]  ;;  %v1508_v32 = vld [vmem:[%s16057_s3 + $0x238] sm:$0xff]  ;;  %v313_v48 = vld [vmem:[%s8756_s21 + $0x50] sm:$0xff] }
  0x39   : > { %7561 = vmatpush1.bf16.msra.mxu0 %v7560_v20  ;;  %v4477_v20 = vld [vmem:[%s16058_s4 + $0x10] sm:$0xff]  ;;  %7214 = vmatmul.mubr.msk.f32.vlgmr.msra.gmra.mrb[0].mxu1 %vm1585_vm3, %v8965_v6  ;;  %v4486_v39 = vld [vmem:[%s16058_s4 + $0x58] sm:$0xff]  ;;  %v1505_v56 = vld [vmem:[%s16057_s3 + $0x220] sm:$0xff] }
  0x3a   : > { %7563 = vmatprep.subr.bf16.mxu0 %v7562_v23  ;;  %v1489_v23 = vld [vmem:[%s16057_s3 + $0x1a0] sm:$0xff]  ;;  %3167 = vmatprep.mubr.f32.mxu1 %v16065_v12  ;;  %v1507_v57 = vld [vmem:[%s16057_s3 + $0x230] sm:$0xff]  ;;  %v4488_v10 = vld [vmem:[%s16058_s4 + $0x68] sm:$0xff] }
  0x3b   : > { %7678 = vmatpush1.bf16.msra.mxu1 %v7677_v19  ;;  %v4484_v19 = vld [vmem:[%s16058_s4 + $0x48] sm:$0xff]  ;;  %v1543_v6 = vld [vmem:[%s16057_s3 + $0x350] sm:$0xff] }
  0x3c   : > { %7679 = vmatprep.subr.bf16.mxu1 %v16063_v15  ;;  %v1514_v26 = vld [vmem:[%s16057_s3 + $0x268] sm:$0xff]  ;;  %v389_v61 = vld [vmem:[%s8756_s21 + $0x2b0] sm:$0xff] }
  0x3d   : > { %7565 = vmatpush1.bf16.msra.mxu0 %v7564_v34  ;;  %v7680_v34 = vpack.c.bf16 %v4478_v21, %v4477_v20  ;;  %7215 = vmatmul.mubr.msk.f32.gmra.mrb[2].mxu1 %vm1585_vm3, %v9000_v25  ;;  %v696_v21 = vmul.f32 %v8778_v49, %v309_v3  ;;  %v404_v43 = vld [vmem:[%s8756_s21 + $0x328] sm:$0xff] }
  0x3e   : > { %7567 = vmatprep.subr.bf16.mxu0 %v7566_v37  ;;  %v7580_v37 = vpack.c.bf16 %v1491_v24, %v1489_v23  ;;  %3173 = vmatprep.mubr.f32.mxu1 %v16065_v12  ;;  %v7590_v23 = vpack.c.bf16 %v1504_v9, %v1502_v8  ;;  %v1503_v24 = vld [vmem:[%s16057_s3 + $0x210] sm:$0xff]  ;;  %v700_v8 = vmul.f32 %v9040_v55, %v313_v48  ;;  %v4487_v9 = vld [vmem:[%s16058_s4 + $0x60] sm:$0xff] }
  0x3f   : > { %7681 = vmatpush1.bf16.msra.mxu1 %v7680_v34  ;;  %v582_v34 = vld [vmem:[%s8756_s21 + $0x8b8] sm:$0xff]  ;;  %v7592_v41 = vpack.c.bf16 %v1503_v24, %v1501_v50 }
  0x40   : > { %7682 = vmatprep.subr.bf16.mxu1 %v16063_v15  ;;  %v969_v60 = vmul.f32 %v8910_v40, %v582_v34  ;;  %v9183_v34 = vadd.f32 %v9073_v14, %v700_v8 }
  0x41   : > { %7569 = vmatpush1.bf16.msra.mxu0 %v7568_v52  ;;  %v572_v52 = vld [vmem:[%s8756_s21 + $0x868] sm:$0xff]  ;;  %7216 = vmatmul.mubr.msk.f32.gmra.mrb[4].mxu1 %vm1585_vm3, %v9028_v42 }
  0x42   : > { %7571 = vmatprep.subr.bf16.mxu0 %v7570_v54  ;;  %v7683_v54 = vpack.c.bf16 %v4480_v36, %v4479_v35  ;;  %v959_v5 = vmul.f32 %v8910_v40, %v572_v52  ;;  %3179 = vmatprep.mubr.f32.mxu1 %v16065_v12  ;;  %v9106_v36 = vadd.f32 %v9073_v14, %v690_v13  ;;  %v319_v52 = vld [vmem:[%s8756_s21 + $0x80] sm:$0xff] }
  0x43   : > { %v706_v13 = vmul.f32 %v8778_v49, %v319_v52  ;;  %v9170_v50 = vadd.f32 %v8943_v58, %v969_v60  ;;  %v329_v52 = vld [vmem:[%s8756_s21 + $0xd0] sm:$0xff] }
  0x44   : > { %7684 = vmatpush1.bf16.msra.mxu1 %v7683_v54  ;;  %v9094_v27 = vadd.f32 %v8943_v58, %v959_v5  ;;  %v7594_v54 = vpack.c.bf16 %v1508_v32, %v1506_v31  ;;  %v592_v31 = vld [vmem:[%s8756_s21 + $0x908] sm:$0xff]  ;;  %v7695_v32 = vpack.c.bf16 %v4488_v10, %v4487_v9  ;;  %v1515_v60 = vld [vmem:[%s16057_s3 + $0x270] sm:$0xff] }
  0x45   : > { %7573 = vmatpush1.bf16.msra.mxu0 %v7572_v2  ;;  %v1499_v2 = vld [vmem:[%s16057_s3 + $0x1f0] sm:$0xff]  ;;  %7685 = vmatprep.subr.bf16.mxu1 %v16063_v15  ;;  %16538 = vst [vmem:[#allocation18_spill] sm:$0xff] %v9170_v50 }
  0x46   : > { %7575 = vmatprep.subr.bf16.mxu0 %v7574_v4  ;;  %v9060_v4 = vadd.f32 %v8943_v58, %v954_v44  ;;  %v7588_v20 = vpack.c.bf16 %v1499_v2, %v1497_v46  ;;  %16536 = vst [vmem:[#allocation16_spill] sm:$0xff] %v9094_v27  ;;  %v9117_v44 = vadd.f32 %v8786_v51, %v696_v21  ;;  %v1512_v46 = vld [vmem:[%s16057_s3 + $0x258] sm:$0xff]  ;;  %v587_v2 = vld [vmem:[%s8756_s21 + $0x8e0] sm:$0xff] }
  0x47   : > { %v974_v24 = vmul.f32 %v8910_v40, %v587_v2  ;;  %v1518_v2 = vld [vmem:[%s16057_s3 + $0x288] sm:$0xff] }
  0x48   : > { %16535 = vst [vmem:[#allocation15_spill] sm:$0xff] %v9060_v4  ;;  %7217 = vmatmul.mubr.msk.f32.gmra.mrb[6].mxu1 %vm1585_vm3, %v9060_v4 }
  0x49   : > { %7577 = vmatpush1.bf16.msra.mxu0 %v7576_v18  ;;  %v4483_v18 = vld [vmem:[%s16058_s4 + $0x40] sm:$0xff]  ;;  %3185 = vmatprep.mubr.f32.mxu1 %v16065_v12 }
  0x4a   : > { %7579 = vmatprep.subr.bf16.mxu0 %v7578_v22  ;;  %v308_v22 = vld [vmem:[%s8756_s21 + $0x28] sm:$0xff]  ;;  %7687 = vmatpush1.bf16.msra.mxu1 %v7686_v11  ;;  %v7689_v35 = vpack.c.bf16 %v4484_v19, %v4483_v18  ;;  %v9156_v11 = vadd.f32 %v8786_v51, %v701_v47  ;;  %v318_v18 = vld [vmem:[%s8756_s21 + $0x78] sm:$0xff]  ;;  %v7596_v19 = vpack.c.bf16 %v1507_v57, %v1505_v56  ;;  %v323_v47 = vld [vmem:[%s8756_s21 + $0xa0] sm:$0xff] }
  0x4b   : > { %7688 = vmatprep.subr.bf16.mxu1 %v16063_v15  ;;  %v1513_v57 = vld [vmem:[%s16057_s3 + $0x260] sm:$0xff]  ;;  %v710_v10 = vmul.f32 %v9040_v55, %v323_v47 }
  0x4c   : > { %7218 = vmatmul.mubr.msk.f32.gmra.mrb[8].mxu1 %vm1585_vm3, %v9094_v27 }
  0x4d   : > { %7581 = vmatpush1.bf16.msra.mxu0 %v7580_v37  ;;  %v695_v37 = vmul.f32 %v9040_v55, %v308_v22  ;;  %3191 = vmatprep.mubr.f32.mxu1 %v16065_v12  ;;  %v1509_v22 = vld [vmem:[%s16057_s3 + $0x240] sm:$0xff]  ;;  %v9261_v47 = vadd.f32 %v9073_v14, %v710_v10 }
  0x4e   : > { %7583 = vmatprep.subr.bf16.mxu0 %v7582_v38  ;;  %v4485_v38 = vld [vmem:[%s16058_s4 + $0x50] sm:$0xff]  ;;  %7690 = vmatpush1.bf16.msra.mxu1 %v7689_v35  ;;  %v705_v35 = vmul.f32 %v9040_v55, %v318_v18  ;;  %v4492_v18 = vld [vmem:[%s16058_s4 + $0x88] sm:$0xff] }
  0x4f   : > { %v7692_v3 = vpack.c.bf16 %v4486_v39, %v4485_v38  ;;  %v9144_v5 = vadd.f32 %v9073_v14, %v695_v37  ;;  %7691 = vmatprep.subr.bf16.mxu1 %v16063_v15  ;;  %v4489_v37 = vld [vmem:[%s16058_s4 + $0x70] sm:$0xff]  ;;  %v4490_v38 = vld [vmem:[%s16058_s4 + $0x78] sm:$0xff]  ;;  %v9195_v39 = vadd.f32 %v8786_v51, %v706_v13  ;;  %v4491_v13 = vld [vmem:[%s16058_s4 + $0x80] sm:$0xff] }
  0x50   : > { %v7698_v8 = vpack.c.bf16 %v4490_v38, %v4489_v37  ;;  %v9222_v9 = vadd.f32 %v9073_v14, %v705_v35  ;;  %v602_v35 = vld [vmem:[%s8756_s21 + $0x958] sm:$0xff]  ;;  %v7701_v37 = vpack.c.bf16 %v4492_v18, %v4491_v13  ;;  %v1522_v38 = vld [vmem:[%s16057_s3 + $0x2a8] sm:$0xff]  ;;  %v1521_v13 = vld [vmem:[%s16057_s3 + $0x2a0] sm:$0xff] }
  0x51   : > { %7585 = vmatpush1.bf16.msra.mxu0 %v7584_v59  ;;  %v9131_v59 = vadd.f32 %v8943_v58, %v964_v28  ;;  %v1516_v28 = vld [vmem:[%s16057_s3 + $0x278] sm:$0xff]  ;;  %v1523_v18 = vld [vmem:[%s16057_s3 + $0x2b0] sm:$0xff] }
  0x52   : > { %7587 = vmatprep.subr.bf16.mxu0 %v7586_v62  ;;  %v1510_v62 = vld [vmem:[%s16057_s3 + $0x248] sm:$0xff]  ;;  %7693 = vmatpush1.bf16.msra.mxu1 %v7692_v3  ;;  %v7602_v56 = vpack.c.bf16 %v1516_v28, %v1514_v26  ;;  %v1520_v3 = vld [vmem:[%s16057_s3 + $0x298] sm:$0xff] }
  0x53   : > { %16537 = vst [vmem:[#allocation17_spill] sm:$0xff] %v9131_v59  ;;  %v7598_v21 = vpack.c.bf16 %v1512_v46, %v1510_v62  ;;  %7219 = vmatmul.mubr.msk.f32.gmra.mrb[10].mxu1 %vm1585_vm3, %v9131_v59  ;;  %7694 = vmatprep.subr.bf16.mxu1 %v16063_v15  ;;  %v979_v62 = vmul.f32 %v8910_v40, %v592_v31  ;;  %v597_v46 = vld [vmem:[%s8756_s21 + $0x930] sm:$0xff]  ;;  %v1517_v31 = vld [vmem:[%s16057_s3 + $0x280] sm:$0xff] }
  0x54   : > { %3197 = vmatprep.mubr.f32.mxu1 %v16065_v12  ;;  %v984_v26 = vmul.f32 %v8910_v40, %v597_v46  ;;  %v7606_v28 = vpack.c.bf16 %v1520_v3, %v1518_v2  ;;  %v339_v2 = vld [vmem:[%s8756_s21 + $0x120] sm:$0xff] }
  0x55   : > { %7589 = vmatpush1.bf16.msra.mxu0 %v7588_v20  ;;  %v324_v20 = vld [vmem:[%s8756_s21 + $0xa8] sm:$0xff] }
  0x56   : > { %7591 = vmatprep.subr.bf16.mxu0 %v7590_v23  ;;  %v1511_v23 = vld [vmem:[%s16057_s3 + $0x250] sm:$0xff]  ;;  %7696 = vmatpush1.bf16.msra.mxu1 %v7695_v32  ;;  %v9281_v3 = vadd.f32 %v8943_v58, %v984_v26 }
  0x57   : > { %v7600_v48 = vpack.c.bf16 %v1511_v23, %v1509_v22  ;;  %7220 = vmatmul.mubr.msk.f32.gmra.mrb[12].mxu1 %vm1585_vm3, %v9170_v50  ;;  %7697 = vmatprep.subr.bf16.mxu1 %v16063_v15  ;;  %v7604_v22 = vpack.c.bf16 %v1515_v60, %v1513_v57  ;;  %v334_v23 = vld [vmem:[%s8756_s21 + $0xf8] sm:$0xff]  ;;  %v1519_v32 = vld [vmem:[%s16057_s3 + $0x290] sm:$0xff]  ;;  %v359_v50 = vld [vmem:[%s8756_s21 + $0x1c0] sm:$0xff] }
  0x58   : > { %1874 = vmatmul.mubr.f32.vlgmr.msra.gmra.mrb[0].mxu0 %v9106_v36  ;;  %3203 = vmatprep.mubr.f32.mxu1 %v16065_v12  ;;  %v721_v60 = vmul.f32 %v8778_v49, %v334_v23  ;;  %v7608_v46 = vpack.c.bf16 %v1519_v32, %v1517_v31  ;;  %16541 = vst [vmem:[#allocation21_spill] sm:$0xff] %v9281_v3  ;;  %v1528_v23 = vld [vmem:[%s16057_s3 + $0x2d8] sm:$0xff]  ;;  %v4495_v31 = vld [vmem:[%s16058_s4 + $0xa0] sm:$0xff]  ;;  %v4496_v32 = vld [vmem:[%s16058_s4 + $0xa8] sm:$0xff] }
  0x59   : > { %7593 = vmatpush1.bf16.msra.mxu0 %v7592_v41  ;;  %1879 = vmatprep.mubr.f32.mxu0 %v9117_v44  ;;  %v711_v41 = vmul.f32 %v8778_v49, %v324_v20  ;;  %v716_v20 = vmul.f32 %v8778_v49, %v329_v52  ;;  %v4493_v52 = vld [vmem:[%s16058_s4 + $0x90] sm:$0xff] }
  0x5a   : > { %7595 = vmatprep.subr.bf16.mxu0 %v7594_v54  ;;  %v9203_v54 = vadd.f32 %v8943_v58, %v974_v24  ;;  %v9242_v24 = vadd.f32 %v8943_v58, %v979_v62  ;;  %7699 = vmatpush1.bf16.msra.mxu1 %v7698_v8  ;;  %v333_v62 = vld [vmem:[%s8756_s21 + $0xf0] sm:$0xff]  ;;  %v989_v8 = vmul.f32 %v8910_v40, %v602_v35 }
  0x5b   : > { %7700 = vmatprep.subr.bf16.mxu1 %v16063_v15  ;;  %v9273_v57 = vadd.f32 %v8786_v51, %v716_v20  ;;  %v607_v20 = vld [vmem:[%s8756_s21 + $0x980] sm:$0xff]  ;;  %v9312_v35 = vadd.f32 %v8786_v51, %v721_v60 }
  0x5c   : > { %1880 = vmatmul.mubr.f32.gmra.mrb[2].mxu0 %v9144_v5  ;;  %16539 = vst [vmem:[#allocation19_spill] sm:$0xff] %v9203_v54  ;;  %7221 = vmatmul.mubr.msk.f32.gmra.mrb[14].mxu1 %vm1585_vm3, %v9203_v54  ;;  %16540 = vst [vmem:[#allocation20_spill] sm:$0xff] %v9242_v24  ;;  %v1525_v60 = vld [vmem:[%s16057_s3 + $0x2c0] sm:$0xff]  ;;  %v4502_v54 = vld [vmem:[%s16058_s4 + $0xd8] sm:$0xff] }
  0x5d   : > { %1885 = vmatprep.mubr.f32.mxu0 %v9156_v11  ;;  %7597 = vmatpush1.bf16.msra.mxu0 %v7596_v19  ;;  %v9234_v19 = vadd.f32 %v8786_v51, %v711_v41  ;;  %v1524_v41 = vld [vmem:[%s16057_s3 + $0x2b8] sm:$0xff] }
  0x5e   : > { %7599 = vmatprep.subr.bf16.mxu0 %v7598_v21  ;;  %v328_v21 = vld [vmem:[%s8756_s21 + $0xc8] sm:$0xff]  ;;  %3209 = vmatprep.mubr.f32.mxu1 %v16065_v12  ;;  %v7610_v10 = vpack.c.bf16 %v1524_v41, %v1522_v38  ;;  %v338_v38 = vld [vmem:[%s8756_s21 + $0x118] sm:$0xff]  ;;  %v7612_v41 = vpack.c.bf16 %v1523_v18, %v1521_v13 }
  0x5f   : > { %7702 = vmatpush1.bf16.msra.mxu1 %v7701_v37  ;;  %v726_v37 = vmul.f32 %v8778_v49, %v339_v2  ;;  %v612_v2 = vld [vmem:[%s8756_s21 + $0x9a8] sm:$0xff]  ;;  %v1532_v13 = vld [vmem:[%s16057_s3 + $0x2f8] sm:$0xff] }
  0x60   : > { %1886 = vmatmul.mubr.f32.gmra.mrb[4].mxu0 %v9183_v34  ;;  %7222 = vmatmul.mubr.msk.f32.gmra.mrb[16].mxu1 %vm1585_vm3, %v9242_v24  ;;  %v354_v24 = vld [vmem:[%s8756_s21 + $0x198] sm:$0xff] }
  0x61   : > { %1891 = vmatprep.mubr.f32.mxu0 %v9195_v39  ;;  %7601 = vmatpush1.bf16.msra.mxu0 %v7600_v48  ;;  %v715_v48 = vmul.f32 %v9040_v55, %v328_v21 }
  0x62   : > { %7603 = vmatprep.subr.bf16.mxu0 %v7602_v56  ;;  %v4494_v56 = vld [vmem:[%s16058_s4 + $0x98] sm:$0xff]  ;;  %3215 = vmatprep.mubr.f32.mxu1 %v16065_v12 }
  0x63   : > { %v7704_v21 = vpack.c.bf16 %v4494_v56, %v4493_v52  ;;  %v9300_v26 = vadd.f32 %v9073_v14, %v715_v48  ;;  %7703 = vmatprep.subr.bf16.mxu1 %v16063_v15  ;;  %v344_v48 = vld [vmem:[%s8756_s21 + $0x148] sm:$0xff]  ;;  %v9320_v52 = vadd.f32 %v8943_v58, %v989_v8  ;;  %v994_v56 = vmul.f32 %v8910_v40, %v607_v20 }
  0x64   : > { %1892 = vmatmul.mubr.f32.gmra.mrb[6].mxu0 %v9222_v9  ;;  %7223 = vmatmul.mubr.msk.f32.gmra.mrb[18].mxu1 %vm1585_vm3, %v9281_v3  ;;  %v7707_v8 = vpack.c.bf16 %v4496_v32, %v4495_v31  ;;  %v725_v20 = vmul.f32 %v9040_v55, %v338_v38  ;;  %v343_v31 = vld [vmem:[%s8756_s21 + $0x140] sm:$0xff]  ;;  %v349_v38 = vld [vmem:[%s8756_s21 + $0x170] sm:$0xff] }
  0x65   : > { %1897 = vmatprep.mubr.f32.mxu0 %v9234_v19  ;;  %7605 = vmatpush1.bf16.msra.mxu0 %v7604_v22  ;;  %v1526_v22 = vld [vmem:[%s16057_s3 + $0x2c8] sm:$0xff]  ;;  %16542 = vst [vmem:[#allocation22_spill] sm:$0xff] %v9320_v52 }
  0x66   : > { %7607 = vmatprep.subr.bf16.mxu0 %v7606_v28  ;;  %v720_v28 = vmul.f32 %v9040_v55, %v333_v62  ;;  %v7614_v62 = vpack.c.bf16 %v1528_v23, %v1526_v22  ;;  %3221 = vmatprep.mubr.f32.mxu1 %v16065_v12  ;;  %v4498_v22 = vld [vmem:[%s16058_s4 + $0xb8] sm:$0xff]  ;;  %v9351_v23 = vadd.f32 %v8786_v51, %v726_v37  ;;  %v1529_v37 = vld [vmem:[%s16057_s3 + $0x2e0] sm:$0xff] }
  0x67   : > { %7705 = vmatpush1.bf16.msra.mxu1 %v7704_v21  ;;  %v4497_v21 = vld [vmem:[%s16058_s4 + $0xb0] sm:$0xff]  ;;  %v999_v12 = vmul.f32 %v8910_v40, %v612_v2  ;;  %v16545_v2 = vmov 0.0|0.0  }
  0x68   : > { %1898 = vmatmul.mubr.f32.gmra.mrb[8].mxu0 %v9261_v47  ;;  %v9339_v18 = vadd.f32 %v9073_v14, %v720_v28  ;;  %7706 = vmatprep.subr.bf16.mxu1 %v16063_v15  ;;  %v731_v28 = vmul.f32 %v8778_v49, %v344_v48  ;;  %v9359_v15 = vadd.f32 %v8943_v58, %v994_v56  ;;  %v16544_v48 = vmov 0.0  }
  0x69   : > { %1903 = vmatprep.mubr.f32.mxu0 %v9273_v57  ;;  %7609 = vmatpush1.bf16.msra.mxu0 %v7608_v46  ;;  %v1527_v46 = vld [vmem:[%s16057_s3 + $0x2d0] sm:$0xff]  ;;  %v7710_v56 = vpack.c.bf16 %v4498_v22, %v4497_v21  ;;  %v348_v21 = vld [vmem:[%s8756_s21 + $0x168] sm:$0xff] }
  0x6a   : > { %7611 = vmatprep.subr.bf16.mxu0 %v7610_v10  ;;  %v1530_v10 = vld [vmem:[%s16057_s3 + $0x2e8] sm:$0xff]  ;;  %v7616_v32 = vpack.c.bf16 %v1527_v46, %v1525_v60  ;;  %7224 = vmatmul.mubr.msk.f32.gmra.mrb[20].mxu1 %vm1585_vm3, %v9320_v52  ;;  %16543 = vst [vmem:[#allocation23_spill] sm:$0xff] %v9359_v15  ;;  %v617_v60 = vld [vmem:[%s8756_s21 + $0x9d0] sm:$0xff]  ;;  %v730_v46 = vmul.f32 %v9040_v55, %v343_v31  ;;  %v1536_v52 = vld [vmem:[%s16057_s3 + $0x318] sm:$0xff] }
  0x6b   : > { %v7618_v3 = vpack.c.bf16 %v1532_v13, %v1530_v10  ;;  %3227 = vmatprep.mubr.f32.mxu1 %v16544_v48  ;;  %7708 = vmatpush1.bf16.msra.mxu1 %v7707_v8  ;;  %v4499_v10 = vld [vmem:[%s16058_s4 + $0xc0] sm:$0xff]  ;;  %v4500_v13 = vld [vmem:[%s16058_s4 + $0xc8] sm:$0xff]  ;;  %v9384_v8 = vadd.f32 %v8786_v51, %v731_v28  ;;  %v9398_v28 = vadd.f32 %v8943_v58, %v999_v12 }
  0x6c   : > { %1904 = vmatmul.mubr.f32.gmra.mrb[10].mxu0 %v9300_v26  ;;  %7709 = vmatprep.subr.bf16.mxu1 %v16545_v2  ;;  %v1534_v31 = vld [vmem:[%s16057_s3 + $0x308] sm:$0xff]  ;;  %v9411_v12 = vadd.f32 %v9073_v14, %v730_v46  ;;  %v741_v46 = vmul.f32 %v8778_v49, %v354_v24  ;;  %v4503_v24 = vld [vmem:[%s16058_s4 + $0xe0] sm:$0xff] }
  0x6d   : > { %1909 = vmatprep.mubr.f32.mxu0 %v9312_v35  ;;  %7613 = vmatpush1.bf16.msra.mxu0 %v7612_v41  ;;  %v1531_v41 = vld [vmem:[%s16057_s3 + $0x2f0] sm:$0xff]  ;;  %16546 = vst [vmem:[#allocation24_spill] sm:$0xff] %v9398_v28 }
  0x6e   : > { %7615 = vmatprep.subr.bf16.mxu0 %v7614_v62  ;;  %v9372_v62 = vadd.f32 %v9073_v14, %v725_v20  ;;  %v736_v20 = vmul.f32 %v8778_v49, %v349_v38  ;;  %v7620_v22 = vpack.c.bf16 %v1531_v41, %v1529_v37  ;;  %7225 = vmatmul.mubr.msk.f32.gmra.mrb[22].mxu1 %vm1585_vm3, %v9359_v15  ;;  %v1535_v37 = vld [vmem:[%s16057_s3 + $0x310] sm:$0xff]  ;;  %v622_v41 = vld [vmem:[%s8756_s21 + $0x9f8] sm:$0xff] }
  0x6f   : > { %v1004_v38 = vmul.f32 %v8910_v40, %v617_v60  ;;  %3233 = vmatprep.mubr.f32.mxu1 %v16544_v48  ;;  %7711 = vmatpush1.bf16.msra.mxu1 %v7710_v56  ;;  %v7713_v15 = vpack.c.bf16 %v4500_v13, %v4499_v10  ;;  %v4501_v60 = vld [vmem:[%s16058_s4 + $0xd0] sm:$0xff]  ;;  %v7622_v56 = vpack.c.bf16 %v1536_v52, %v1534_v31  ;;  %v627_v52 = vld [vmem:[%s8756_s21 + $0xa20] sm:$0xff] }
  0x70   : > { %1910 = vmatmul.mubr.f32.gmra.mrb[12].mxu0 %v9339_v18  ;;  %7712 = vmatprep.subr.bf16.mxu1 %v16545_v2  ;;  %v9423_v10 = vadd.f32 %v8786_v51, %v736_v20  ;;  %v353_v13 = vld [vmem:[%s8756_s21 + $0x190] sm:$0xff]  ;;  %v1009_v27 = vmul.f32 %v8910_v40, %v622_v41  ;;  %v7716_v20 = vpack.c.bf16 %v4502_v54, %v4501_v60  ;;  %v1540_v54 = vld [vmem:[%s16057_s3 + $0x338] sm:$0xff] }
  0x71   : > { %1915 = vmatprep.mubr.f32.mxu0 %v9351_v23  ;;  %7617 = vmatpush1.bf16.msra.mxu0 %v7616_v32  ;;  %v1533_v32 = vld [vmem:[%s16057_s3 + $0x300] sm:$0xff]  ;;  %v9431_v59 = vadd.f32 %v8943_v58, %v1004_v38  ;;  %v740_v31 = vmul.f32 %v9040_v55, %v353_v13  ;;  %v4504_v38 = vld [vmem:[%s16058_s4 + $0xe8] sm:$0xff]  ;;  %v358_v41 = vld [vmem:[%s8756_s21 + $0x1b8] sm:$0xff] }
  0x72   : > { %7619 = vmatprep.subr.bf16.mxu0 %v7618_v3  ;;  %v735_v3 = vmul.f32 %v9040_v55, %v348_v21  ;;  %v7624_v21 = vpack.c.bf16 %v1535_v37, %v1533_v32  ;;  %7226 = vmatmul.mubr.msk.f32.gmra.mrb[24].mxu1 %vm1585_vm3, %v9398_v28  ;;  %v9456_v32 = vadd.f32 %v8786_v51, %v741_v46  ;;  %v1539_v60 = vld [vmem:[%s16057_s3 + $0x330] sm:$0xff] }
  0x73   : > { %16547 = vst [vmem:[#allocation25_spill] sm:$0xff] %v9431_v59  ;;  %3239 = vmatprep.mubr.f32.mxu1 %v16544_v48  ;;  %7714 = vmatpush1.bf16.msra.mxu1 %v7713_v15  ;;  %v1538_v15 = vld [vmem:[%s16057_s3 + $0x328] sm:$0xff]  ;;  %v746_v37 = vmul.f32 %v8778_v49, %v359_v50  ;;  %v9470_v13 = vadd.f32 %v8943_v58, %v1009_v27 }
  0x74   : > { %1916 = vmatmul.mubr.f32.gmra.mrb[14].mxu0 %v9372_v62  ;;  %7715 = vmatprep.subr.bf16.mxu1 %v16545_v2  ;;  %v1014_v46 = vmul.f32 %v8910_v40, %v627_v52  ;;  %v7626_v50 = vpack.c.bf16 %v1540_v54, %v1538_v15  ;;  %v7719_v28 = vpack.c.bf16 %v4504_v38, %v4503_v24  ;;  %v4505_v52 = vld [vmem:[%s16058_s4 + $0xf0] sm:$0xff]  ;;  %v363_v38 = vld [vmem:[%s8756_s21 + $0x1e0] sm:$0xff] }
  0x75   : > { %1921 = vmatprep.mubr.f32.mxu0 %v9384_v8  ;;  %7621 = vmatpush1.bf16.msra.mxu0 %v7620_v22  ;;  %v9441_v22 = vadd.f32 %v9073_v14, %v735_v3  ;;  %v1537_v3 = vld [vmem:[%s16057_s3 + $0x320] sm:$0xff]  ;;  %16548 = vst [vmem:[#allocation26_spill] sm:$0xff] %v9470_v13  ;;  %v9477_v42 = vadd.f32 %v9073_v14, %v740_v31  ;;  %v369_v15 = vld [vmem:[%s8756_s21 + $0x210] sm:$0xff] }
  0x76   : > { %7623 = vmatprep.subr.bf16.mxu0 %v7622_v56  ;;  %v364_v56 = vld [vmem:[%s8756_s21 + $0x1e8] sm:$0xff]  ;;  %7227 = vmatmul.mubr.msk.f32.gmra.mrb[26].mxu1 %vm1585_vm3, %v9431_v59  ;;  %v7628_v4 = vpack.c.bf16 %v1539_v60, %v1537_v3  ;;  %v745_v27 = vmul.f32 %v9040_v55, %v358_v41  ;;  %v9489_v24 = vadd.f32 %v8786_v51, %v746_v37  ;;  %v637_v37 = vld [vmem:[%s8756_s21 + $0xa70] sm:$0xff]  ;;  %v383_v59 = vld [vmem:[%s8756_s21 + $0x280] sm:$0xff] }
  0x77   : > { %3245 = vmatprep.mubr.f32.mxu1 %v16544_v48  ;;  %7717 = vmatpush1.bf16.msra.mxu1 %v7716_v20  ;;  %v4506_v20 = vld [vmem:[%s16058_s4 + $0xf8] sm:$0xff]  ;;  %v751_v31 = vmul.f32 %v8778_v49, %v364_v56  ;;  %v9497_v54 = vadd.f32 %v8943_v58, %v1014_v46  ;;  %v750_v56 = vmul.f32 %v9040_v55, %v363_v38 }
  0x78   : > { %1922 = vmatmul.mubr.f32.gmra.mrb[16].mxu0 %v9411_v12  ;;  %7718 = vmatprep.subr.bf16.mxu1 %v16545_v2  ;;  %v7722_v3 = vpack.c.bf16 %v4506_v20, %v4505_v52  ;;  %v9504_v60 = vadd.f32 %v9073_v14, %v745_v27  ;;  %v1024_v27 = vmul.f32 %v8910_v40, %v637_v37  ;;  %v642_v52 = vld [vmem:[%s8756_s21 + $0xa98] sm:$0xff]  ;;  %v379_v37 = vld [vmem:[%s8756_s21 + $0x260] sm:$0xff] }
  0x79   : > { %1927 = vmatprep.mubr.f32.mxu0 %v9423_v10  ;;  %7625 = vmatpush1.bf16.msra.mxu0 %v7624_v21  ;;  %v632_v21 = vld [vmem:[%s8756_s21 + $0xa48] sm:$0xff]  ;;  %16549 = vst [vmem:[#allocation27_spill] sm:$0xff] %v9497_v54  ;;  %v9510_v46 = vadd.f32 %v8786_v51, %v751_v31  ;;  %v9525_v20 = vadd.f32 %v9073_v14, %v750_v56 }
  0x7a   : > { %7627 = vmatprep.subr.bf16.mxu0 %v7626_v50  ;;  %7228 = vmatmul.mubr.msk.f32.gmra.mrb[28].mxu1 %vm1585_vm3, %v9470_v13  ;;  %v1019_v41 = vmul.f32 %v8910_v40, %v632_v21  ;;  %v368_v50 = vld [vmem:[%s8756_s21 + $0x208] sm:$0xff]  ;;  %v1029_v56 = vmul.f32 %v8910_v40, %v642_v52 }
  0x7b   : > { %3251 = vmatprep.mubr.f32.mxu1 %v16544_v48  ;;  %7720 = vmatpush1.bf16.msra.mxu1 %v7719_v28  ;;  %v374_v28 = vld [vmem:[%s8756_s21 + $0x238] sm:$0xff]  ;;  %v755_v31 = vmul.f32 %v9040_v55, %v368_v50  ;;  %v647_v50 = vld [vmem:[%s8756_s21 + $0xac0] sm:$0xff]  ;;  %v384_v52 = vld [vmem:[%s8756_s21 + $0x288] sm:$0xff] }
  0x7c   : > { %1928 = vmatmul.mubr.f32.gmra.mrb[18].mxu0 %v9441_v22  ;;  %7721 = vmatprep.subr.bf16.mxu1 %v16545_v2  ;;  %v9518_v21 = vadd.f32 %v8943_v58, %v1019_v41  ;;  %v373_v41 = vld [vmem:[%s8756_s21 + $0x230] sm:$0xff]  ;;  %v9559_v13 = vadd.f32 %v8943_v58, %v1029_v56  ;;  %v1544_v56 = vld [vmem:[%s16057_s3 + $0x358] sm:$0xff] }
  0x7d   : > { %1933 = vmatprep.mubr.f32.mxu0 %v9456_v32  ;;  %7629 = vmatpush1.bf16.msra.mxu0 %v7628_v4  ;;  %v756_v4 = vmul.f32 %v8778_v49, %v369_v15  ;;  %v761_v15 = vmul.f32 %v8778_v49, %v374_v28  ;;  %v760_v28 = vmul.f32 %v9040_v55, %v373_v41  ;;  %v652_v41 = vld [vmem:[%s8756_s21 + $0xae8] sm:$0xff] }
  0x7e   : > { %7229 = vmatmul.mubr.msk.f32.gmra.mrb[30].mxu1 %vm1585_vm3, %v9497_v54  ;;  %16550 = vst [vmem:[#allocation28_spill] sm:$0xff] %v9518_v21  ;;  %v378_v54 = vld [vmem:[%s8756_s21 + $0x258] sm:$0xff]  ;;  %16552 = vst [vmem:[#allocation30_spill] sm:$0xff] %v9559_v13 }
  0x7f   : > { %3257 = vmatprep.mubr.f32.mxu1 %v16544_v48  ;;  %7723 = vmatpush1.bf16.msra.mxu1 %v7722_v3  ;;  %v9531_v38 = vadd.f32 %v8786_v51, %v756_v4  ;;  %v9539_v3 = vadd.f32 %v8943_v58, %v1024_v27  ;;  %v9546_v4 = vadd.f32 %v9073_v14, %v755_v31 }
  0x80   : > { %1934 = vmatmul.mubr.f32.gmra.mrb[20].mxu0 %v9477_v42  ;;  %7724 = vmatprep.subr.bf16.mxu1 %v16545_v2  ;;  %v766_v27 = vmul.f32 %v8778_v49, %v379_v37  ;;  %v1034_v31 = vmul.f32 %v8910_v40, %v647_v50  ;;  %v765_v37 = vmul.f32 %v9040_v55, %v378_v54  ;;  %v1541_v50 = vld [vmem:[%s16057_s3 + $0x340] sm:$0xff] }
  0x81   : > { %1939 = vmatprep.mubr.f32.mxu0 %v9489_v24  ;;  %16551 = vst [vmem:[#allocation29_spill] sm:$0xff] %v9539_v3  ;;  %v771_v54 = vmul.f32 %v8778_v49, %v384_v52  ;;  %v7632_v45 = vpack.c.bf16 %v1543_v6, %v1541_v50  ;;  %v776_v6 = vmul.f32 %v8778_v49, %v389_v61  ;;  %v394_v50 = vld [vmem:[%s8756_s21 + $0x2d8] sm:$0xff] }
  0x82   : > { %7230 = vmatmul.mubr.msk.f32.gmra.mrb[32].mxu1 %vm1585_vm3, %v9518_v21  ;;  %v9551_v21 = vadd.f32 %v8786_v51, %v761_v15  ;;  %v9566_v15 = vadd.f32 %v9073_v14, %v760_v28  ;;  %v9580_v28 = vadd.f32 %v8786_v51, %v766_v27  ;;  %v9591_v53 = vadd.f32 %v8943_v58, %v1034_v31 }
  0x83   : > { %3263 = vmatprep.mubr.f32.mxu1 %v16544_v48  ;;  %v1039_v27 = vmul.f32 %v8910_v40, %v652_v41  ;;  %v9598_v52 = vadd.f32 %v9073_v14, %v765_v37  ;;  %v9603_v31 = vadd.f32 %v8786_v51, %v771_v54  ;;  %v388_v41 = vld [vmem:[%s8756_s21 + $0x2a8] sm:$0xff]  ;;  %v662_v37 = vld [vmem:[%s8756_s21 + $0xb38] sm:$0xff] }
  0x84   : > { %1940 = vmatmul.mubr.f32.gmra.mrb[22].mxu0 %v9504_v60  ;;  %16553 = vst [vmem:[#allocation31_spill] sm:$0xff] %v9591_v53  ;;  %v775_v61 = vmul.f32 %v9040_v55, %v388_v41 }
  0x85   : > { %1945 = vmatprep.mubr.f32.mxu0 %v9510_v46 }
  0x86   : > { %7231 = vmatmul.mubr.msk.f32.gmra.mrb[34].mxu1 %vm1585_vm3, %v9539_v3  ;;  %v1542_v3 = vld [vmem:[%s16057_s3 + $0x348] sm:$0xff]  ;;  %v9637_v41 = vadd.f32 %v9073_v14, %v775_v61 }
  0x87   : > { %3269 = vmatprep.mubr.f32.mxu1 %v16544_v48  ;;  %v7630_v25 = vpack.c.bf16 %v1544_v56, %v1542_v3  ;;  %v657_v3 = vld [vmem:[%s8756_s21 + $0xb10] sm:$0xff]  ;;  %v770_v56 = vmul.f32 %v9040_v55, %v383_v59 }
  0x88   : > { %1946 = vmatmul.mubr.f32.gmra.mrb[24].mxu0 %v9525_v20  ;;  %v1044_v59 = vmul.f32 %v8910_v40, %v657_v3  ;;  %v393_v3 = vld [vmem:[%s8756_s21 + $0x2d0] sm:$0xff] }
  0x89   : > { %1951 = vmatprep.mubr.f32.mxu0 %v9531_v38  ;;  %7631 = vmatprep.subr.bf16.mxu0 %v7630_v25  ;;  %v9611_v25 = vadd.f32 %v8943_v58, %v1039_v27  ;;  %v9618_v54 = vadd.f32 %v9073_v14, %v770_v56  ;;  %v781_v27 = vmul.f32 %v8778_v49, %v394_v50 }
  0x8a   : > { %7232 = vmatmul.mubr.msk.f32.gmra.mrb[36].mxu1 %vm1585_vm3, %v9559_v13  ;;  %7633 = vmatpush1.bf16.msra.mxu0 %v7632_v45  ;;  %v9623_v45 = vadd.f32 %v8786_v51, %v776_v6  ;;  %v9631_v13 = vadd.f32 %v8943_v58, %v1044_v59  ;;  %v1049_v56 = vmul.f32 %v8910_v40, %v662_v37  ;;  %v409_v40 = vld [vmem:[%s8756_s21 + $0x350] sm:$0xff] }
  0x8b   : > { %3275 = vmatprep.mubr.f32.mxu1 %v16544_v48  ;;  %16554 = vst [vmem:[#allocation32_spill] sm:$0xff] %v9611_v25  ;;  %v780_v6 = vmul.f32 %v9040_v55, %v393_v3  ;;  %v9642_v50 = vadd.f32 %v8786_v51, %v781_v27  ;;  %v1548_v3 = vld [vmem:[%s16057_s3 + $0x378] sm:$0xff] }
  0x8c   : > { %1952 = vmatmul.mubr.f32.gmra.mrb[26].mxu0 %v9546_v4  ;;  %16555 = vst [vmem:[#allocation33_spill] sm:$0xff] %v9631_v13  ;;  %v9650_v37 = vadd.f32 %v8943_v58, %v1049_v56  ;;  %v1547_v58 = vld [vmem:[%s16057_s3 + $0x370] sm:$0xff] }
  0x8d   : > { %1957 = vmatprep.mubr.f32.mxu0 %v9551_v21  ;;  %v9655_v61 = vadd.f32 %v9073_v14, %v780_v6  ;;  %v403_v6 = vld [vmem:[%s8756_s21 + $0x320] sm:$0xff] }
  0x8e   : > { %7233 = vmatmul.mubr.msk.f32.gmra.mrb[38].mxu1 %vm1585_vm3, %v9591_v53  ;;  %v399_v53 = vld [vmem:[%s8756_s21 + $0x300] sm:$0xff]  ;;  %16556 = vst [vmem:[#allocation34_spill] sm:$0xff] %v9650_v37 }
  0x8f   : > { %3281 = vmatprep.mubr.f32.mxu1 %v16544_v48  ;;  %v786_v59 = vmul.f32 %v8778_v49, %v399_v53  ;;  %v1546_v53 = vld [vmem:[%s16057_s3 + $0x368] sm:$0xff] }
  0x90   : > { %1958 = vmatmul.mubr.f32.gmra.mrb[28].mxu0 %v9566_v15 }
  0x91   : > { %1963 = vmatprep.mubr.f32.mxu0 %v9580_v28  ;;  %v9666_v56 = vadd.f32 %v8786_v51, %v786_v59 }
  0x92   : > { %7234 = vmatmul.mubr.msk.f32.gmra.mrb[40].mxu1 %vm1585_vm3, %v9611_v25  ;;  %v398_v25 = vld [vmem:[%s8756_s21 + $0x2f8] sm:$0xff] }
  0x93   : > { %3287 = vmatprep.mubr.f32.mxu1 %v16544_v48  ;;  %v785_v27 = vmul.f32 %v9040_v55, %v398_v25  ;;  %v1545_v25 = vld [vmem:[%s16057_s3 + $0x360] sm:$0xff] }
  0x94   : > { %1964 = vmatmul.mubr.f32.gmra.mrb[30].mxu0 %v9598_v52  ;;  %v7636_v59 = vpack.c.bf16 %v1547_v58, %v1545_v25  ;;  %v408_v58 = vld [vmem:[%s8756_s21 + $0x348] sm:$0xff] }
  0x95   : > { %1969 = vmatprep.mubr.f32.mxu0 %v9603_v31 }
  0x96   : > { %7235 = vmatmul.mubr.msk.f32.gmra.mrb[42].mxu1 %vm1585_vm3, %v9631_v13  ;;  %v791_v13 = vmul.f32 %v8778_v49, %v404_v43  ;;  %v9682_v43 = vadd.f32 %v9073_v14, %v785_v27  ;;  %v795_v27 = vmul.f32 %v9040_v55, %v408_v58 }
  0x97   : > { %3293 = vmatprep.mubr.f32.mxu1 %v16544_v48  ;;  %v7634_v48 = vpack.c.bf16 %v1548_v3, %v1546_v53  ;;  %v790_v53 = vmul.f32 %v9040_v55, %v403_v6  ;;  %v413_v6 = vld [vmem:[%s8756_s21 + $0x370] sm:$0xff] }
  0x98   : > { %1970 = vmatmul.mubr.f32.gmra.mrb[32].mxu0 %v9618_v54  ;;  %v9687_v3 = vadd.f32 %v8786_v51, %v791_v13  ;;  %v800_v25 = vmul.f32 %v9040_v55, %v413_v6 }
  0x99   : > { %1975 = vmatprep.mubr.f32.mxu0 %v9623_v45  ;;  %7635 = vmatprep.subr.bf16.mxu0 %v7634_v48  ;;  %v9696_v48 = vadd.f32 %v9073_v14, %v790_v53  ;;  %v418_v53 = vld [vmem:[%s8756_s21 + $0x398] sm:$0xff] }
  0x9a   : > { %7236 = vmatmul.mubr.msk.f32.gmra.mrb[44].mxu1 %vm1585_vm3, %v9650_v37  ;;  %v796_v37 = vmul.f32 %v8778_v49, %v409_v40  ;;  %7637 = vmatpush1.bf16.msra.mxu0 %v7636_v59  ;;  %v805_v58 = vmul.f32 %v9040_v55, %v418_v53  ;;  %v428_v53 = vld [vmem:[%s8756_s21 + $0x3e8] sm:$0xff] }
  0x9b   : > { %4623 = vmatprep.mubr.f32.mxu1 %v8814_v63  ;;  %v414_v63 = vld [vmem:[%s8756_s21 + $0x378] sm:$0xff] }
  0x9c   : > { %1976 = vmatmul.mubr.f32.gmra.mrb[34].mxu0 %v9637_v41  ;;  %v9701_v40 = vadd.f32 %v8786_v51, %v796_v37  ;;  %v801_v13 = vmul.f32 %v8778_v49, %v414_v63 }
  0x9d   : > { %1981 = vmatprep.mubr.f32.mxu0 %v9642_v50 }
  0x9e   : > { %4624 = vmatmul.mubr.f32.vlgmr.msra.gmra.mrb[46].mxu1 %v9106_v36  ;;  %v419_v36 = vld [vmem:[%s8756_s21 + $0x3a0] sm:$0xff]  ;;  %v9715_v37 = vadd.f32 %v8786_v51, %v801_v13 }
  0x9f   : > { %4628 = vmatprep.mubr.f32.mxu1 %v9117_v44  ;;  %v9710_v44 = vadd.f32 %v9073_v14, %v795_v27  ;;  %v806_v59 = vmul.f32 %v8778_v49, %v419_v36  ;;  %v423_v13 = vld [vmem:[%s8756_s21 + $0x3c0] sm:$0xff]  ;;  %v1550_v36 = vld [vmem:[%s16057_s3 + $0x388] sm:$0xff] }
  0xa0   : > { %1982 = vmatmul.mubr.f32.gmra.mrb[36].mxu0 %v9655_v61  ;;  %v810_v6 = vmul.f32 %v9040_v55, %v423_v13  ;;  %v434_v13 = vld [vmem:[%s8756_s21 + $0x418] sm:$0xff] }
  0xa1   : > { %1987 = vmatprep.mubr.f32.mxu0 %v9666_v56  ;;  %v9729_v63 = vadd.f32 %v8786_v51, %v806_v59 }
  0xa2   : > { %4629 = vmatmul.mubr.f32.gmra.mrb[48].mxu1 %v9144_v5  ;;  %v424_v5 = vld [vmem:[%s8756_s21 + $0x3c8] sm:$0xff] }
  0xa3   : > { %4633 = vmatprep.mubr.f32.mxu1 %v9156_v11  ;;  %v9724_v11 = vadd.f32 %v9073_v14, %v800_v25  ;;  %v811_v27 = vmul.f32 %v8778_v49, %v424_v5  ;;  %v1552_v25 = vld [vmem:[%s16057_s3 + $0x398] sm:$0xff] }
  0xa4   : > { %1988 = vmatmul.mubr.f32.gmra.mrb[38].mxu0 %v9682_v43  ;;  %v7638_v5 = vpack.c.bf16 %v1552_v25, %v1550_v36  ;;  %v433_v25 = vld [vmem:[%s8756_s21 + $0x410] sm:$0xff] }
  0xa5   : > { %1993 = vmatprep.mubr.f32.mxu0 %v9687_v3 }
  0xa6   : > { %4634 = vmatmul.mubr.f32.gmra.mrb[50].mxu1 %v9183_v34  ;;  %v429_v34 = vld [vmem:[%s8756_s21 + $0x3f0] sm:$0xff]  ;;  %7639 = vmatprep.subr.bf16.mxu0 %v7638_v5 }
  0xa7   : > { %4638 = vmatprep.mubr.f32.mxu1 %v9195_v39  ;;  %v9738_v39 = vadd.f32 %v9073_v14, %v805_v58  ;;  %v816_v59 = vmul.f32 %v8778_v49, %v429_v34  ;;  %v1551_v58 = vld [vmem:[%s16057_s3 + $0x390] sm:$0xff]  ;;  %v815_v34 = vmul.f32 %v9040_v55, %v428_v53  ;;  %v438_v53 = vld [vmem:[%s8756_s21 + $0x438] sm:$0xff] }
  0xa8   : > { %1994 = vmatmul.mubr.f32.gmra.mrb[40].mxu0 %v9696_v48  ;;  %v825_v5 = vmul.f32 %v9040_v55, %v438_v53  ;;  %v1553_v53 = vld [vmem:[%s16057_s3 + $0x3a0] sm:$0xff] }
  0xa9   : > { %1999 = vmatprep.mubr.f32.mxu0 %v9701_v40  ;;  %v9769_v36 = vadd.f32 %v8786_v51, %v816_v59 }
  0xaa   : > { %4639 = vmatmul.mubr.f32.gmra.mrb[52].mxu1 %v9222_v9  ;;  %v1549_v9 = vld [vmem:[%s16057_s3 + $0x380] sm:$0xff] }
  0xab   : > { %4643 = vmatprep.mubr.f32.mxu1 %v9234_v19  ;;  %v9752_v19 = vadd.f32 %v8786_v51, %v811_v27  ;;  %v7640_v30 = vpack.c.bf16 %v1551_v58, %v1549_v9  ;;  %v9764_v27 = vadd.f32 %v9073_v14, %v810_v6  ;;  %v9778_v6 = vadd.f32 %v9073_v14, %v815_v34  ;;  %v443_v34 = vld [vmem:[%s8756_s21 + $0x460] sm:$0xff] }
  0xac   : > { %2000 = vmatmul.mubr.f32.gmra.mrb[42].mxu0 %v9710_v44  ;;  %v820_v9 = vmul.f32 %v9040_v55, %v433_v25  ;;  %v1554_v25 = vld [vmem:[%s16057_s3 + $0x3a8] sm:$0xff] }
  0xad   : > { %2005 = vmatprep.mubr.f32.mxu0 %v9715_v37  ;;  %7641 = vmatpush1.bf16.msra.mxu0 %v7640_v30 }
  0xae   : > { %4644 = vmatmul.mubr.f32.gmra.mrb[54].mxu1 %v9261_v47  ;;  %v821_v47 = vmul.f32 %v8778_v49, %v434_v13 }
  0xaf   : > { %4648 = vmatprep.mubr.f32.mxu1 %v9273_v57  ;;  %v439_v57 = vld [vmem:[%s8756_s21 + $0x440] sm:$0xff] }
  0xb0   : > { %2006 = vmatmul.mubr.f32.gmra.mrb[44].mxu0 %v9724_v11  ;;  %v9783_v59 = vadd.f32 %v8786_v51, %v821_v47  ;;  %v826_v30 = vmul.f32 %v8778_v49, %v439_v57  ;;  %v830_v47 = vmul.f32 %v9040_v55, %v443_v34  ;;  %v1556_v57 = vld [vmem:[%s16057_s3 + $0x3b8] sm:$0xff] }
  0xb1   : > { %2011 = vmatprep.mubr.f32.mxu0 %v9729_v63 }
  0xb2   : > { %4649 = vmatmul.mubr.f32.gmra.mrb[56].mxu1 %v9300_v26  ;;  %v444_v26 = vld [vmem:[%s8756_s21 + $0x468] sm:$0xff]  ;;  %v9797_v58 = vadd.f32 %v8786_v51, %v826_v30  ;;  %v7642_v30 = vpack.c.bf16 %v1556_v57, %v1554_v25  ;;  %v453_v57 = vld [vmem:[%s8756_s21 + $0x4b0] sm:$0xff] }
  0xb3   : > { %4653 = vmatprep.mubr.f32.mxu1 %v9312_v35  ;;  %v9792_v35 = vadd.f32 %v9073_v14, %v820_v9  ;;  %v831_v13 = vmul.f32 %v8778_v49, %v444_v26  ;;  %v448_v9 = vld [vmem:[%s8756_s21 + $0x488] sm:$0xff]  ;;  %v1555_v26 = vld [vmem:[%s16057_s3 + $0x3b0] sm:$0xff] }
  0xb4   : > { %2012 = vmatmul.mubr.f32.gmra.mrb[46].mxu0 %v9738_v39  ;;  %v7644_v34 = vpack.c.bf16 %v1555_v26, %v1553_v53  ;;  %7643 = vmatprep.subr.bf16.mxu0 %v7642_v30  ;;  %v458_v53 = vld [vmem:[%s8756_s21 + $0x4d8] sm:$0xff] }
  0xb5   : > { %2017 = vmatprep.mubr.f32.mxu0 %v9752_v19  ;;  %v845_v26 = vmul.f32 %v9040_v55, %v458_v53  ;;  %v1558_v53 = vld [vmem:[%s16057_s3 + $0x3c8] sm:$0xff] }
  0xb6   : > { %4654 = vmatmul.mubr.f32.gmra.mrb[58].mxu1 %v9339_v18  ;;  %v449_v18 = vld [vmem:[%s8756_s21 + $0x490] sm:$0xff]  ;;  %7645 = vmatpush1.bf16.msra.mxu0 %v7644_v34 }
  0xb7   : > { %4658 = vmatprep.mubr.f32.mxu1 %v9351_v23  ;;  %v9806_v23 = vadd.f32 %v9073_v14, %v825_v5  ;;  %v454_v5 = vld [vmem:[%s8756_s21 + $0x4b8] sm:$0xff] }
  0xb8   : > { %2018 = vmatmul.mubr.f32.gmra.mrb[48].mxu0 %v9764_v27 }
  0xb9   : > { %2023 = vmatprep.mubr.f32.mxu0 %v9769_v36 }
  0xba   : > { %4659 = vmatmul.mubr.f32.gmra.mrb[60].mxu1 %v9372_v62  ;;  %v9817_v62 = vadd.f32 %v8786_v51, %v831_v13  ;;  %v9832_v13 = vadd.f32 %v9073_v14, %v830_v47 }
  0xbb   : > { %4663 = vmatprep.mubr.f32.mxu1 %v9384_v8  ;;  %v836_v8 = vmul.f32 %v8778_v49, %v449_v18  ;;  %v835_v18 = vmul.f32 %v9040_v55, %v448_v9  ;;  %v840_v9 = vmul.f32 %v9040_v55, %v453_v57 }
  0xbc   : > { %2024 = vmatmul.mubr.f32.gmra.mrb[50].mxu0 %v9778_v6 }
  0xbd   : > { %2029 = vmatprep.mubr.f32.mxu0 %v9783_v59  ;;  %v9837_v25 = vadd.f32 %v8786_v51, %v836_v8  ;;  %v9846_v47 = vadd.f32 %v9073_v14, %v835_v18  ;;  %v463_v18 = vld [vmem:[%s8756_s21 + $0x500] sm:$0xff] }
  0xbe   : > { %4664 = vmatmul.mubr.f32.gmra.mrb[62].mxu1 %v9411_v12  ;;  %v841_v12 = vmul.f32 %v8778_v49, %v454_v5 }
  0xbf   : > { %4668 = vmatprep.mubr.f32.mxu1 %v9423_v10  ;;  %v459_v10 = vld [vmem:[%s8756_s21 + $0x4e0] sm:$0xff] }
  0xc0   : > { %2030 = vmatmul.mubr.f32.gmra.mrb[52].mxu0 %v9792_v35  ;;  %v9851_v8 = vadd.f32 %v8786_v51, %v841_v12  ;;  %v846_v30 = vmul.f32 %v8778_v49, %v459_v10  ;;  %v850_v12 = vmul.f32 %v9040_v55, %v463_v18 }
  0xc1   : > { %2035 = vmatprep.mubr.f32.mxu0 %v9797_v58 }
  0xc2   : > { %4669 = vmatmul.mubr.f32.gmra.mrb[64].mxu1 %v9441_v22  ;;  %v464_v22 = vld [vmem:[%s8756_s21 + $0x508] sm:$0xff]  ;;  %v9865_v5 = vadd.f32 %v8786_v51, %v846_v30 }
  0xc3   : > { %4673 = vmatprep.mubr.f32.mxu1 %v9456_v32  ;;  %v9860_v32 = vadd.f32 %v9073_v14, %v840_v9  ;;  %v851_v34 = vmul.f32 %v8778_v49, %v464_v22  ;;  %v468_v9 = vld [vmem:[%s8756_s21 + $0x528] sm:$0xff]  ;;  %v1560_v22 = vld [vmem:[%s16057_s3 + $0x3d8] sm:$0xff] }
  0xc4   : > { %2036 = vmatmul.mubr.f32.gmra.mrb[54].mxu0 %v9806_v23  ;;  %v855_v30 = vmul.f32 %v9040_v55, %v468_v9  ;;  %v7646_v18 = vpack.c.bf16 %v1560_v22, %v1558_v53  ;;  %v478_v22 = vld [vmem:[%s8756_s21 + $0x578] sm:$0xff] }
  0xc5   : > { %2041 = vmatprep.mubr.f32.mxu0 %v9817_v62  ;;  %v9879_v57 = vadd.f32 %v8786_v51, %v851_v34  ;;  %v473_v34 = vld [vmem:[%s8756_s21 + $0x550] sm:$0xff] }
  0xc6   : > { %4674 = vmatmul.mubr.f32.gmra.mrb[66].mxu1 %v9477_v42  ;;  %v469_v42 = vld [vmem:[%s8756_s21 + $0x530] sm:$0xff]  ;;  %7647 = vmatprep.subr.bf16.mxu0 %v7646_v18  ;;  %v483_v18 = vld [vmem:[%s8756_s21 + $0x5a0] sm:$0xff] }
  0xc7   : > { %4678 = vmatprep.mubr.f32.mxu1 %v9489_v24  ;;  %v9874_v24 = vadd.f32 %v9073_v14, %v845_v26  ;;  %v856_v10 = vmul.f32 %v8778_v49, %v469_v42  ;;  %v1559_v42 = vld [vmem:[%s16057_s3 + $0x3d0] sm:$0xff] }
  0xc8   : > { %2042 = vmatmul.mubr.f32.gmra.mrb[56].mxu0 %v9832_v13 }
  0xc9   : > { %2047 = vmatprep.mubr.f32.mxu0 %v9837_v25 }
  0xca   : > { %4679 = vmatmul.mubr.f32.gmra.mrb[68].mxu1 %v9504_v60  ;;  %v474_v60 = vld [vmem:[%s8756_s21 + $0x558] sm:$0xff] }
  0xcb   : > { %4683 = vmatprep.mubr.f32.mxu1 %v9510_v46  ;;  %v9888_v46 = vadd.f32 %v9073_v14, %v850_v12  ;;  %v861_v26 = vmul.f32 %v8778_v49, %v474_v60  ;;  %v479_v12 = vld [vmem:[%s8756_s21 + $0x580] sm:$0xff]  ;;  %v860_v60 = vmul.f32 %v9040_v55, %v473_v34 }
  0xcc   : > { %2048 = vmatmul.mubr.f32.gmra.mrb[58].mxu0 %v9846_v47 }
  0xcd   : > { %2053 = vmatprep.mubr.f32.mxu0 %v9851_v8  ;;  %v9919_v53 = vadd.f32 %v8786_v51, %v861_v26 }
  0xce   : > { %4684 = vmatmul.mubr.f32.gmra.mrb[70].mxu1 %v9525_v20  ;;  %v1557_v20 = vld [vmem:[%s16057_s3 + $0x3c0] sm:$0xff] }
  0xcf   : > { %4688 = vmatprep.mubr.f32.mxu1 %v9531_v38  ;;  %v9902_v38 = vadd.f32 %v8786_v51, %v856_v10  ;;  %v7648_v9 = vpack.c.bf16 %v1559_v42, %v1557_v20  ;;  %v9914_v10 = vadd.f32 %v9073_v14, %v855_v30  ;;  %v9928_v30 = vadd.f32 %v9073_v14, %v860_v60  ;;  %v488_v60 = vld [vmem:[%s8756_s21 + $0x5c8] sm:$0xff] }
  0xd0   : > { %2054 = vmatmul.mubr.f32.gmra.mrb[60].mxu0 %v9860_v32  ;;  %v865_v20 = vmul.f32 %v9040_v55, %v478_v22  ;;  %v870_v42 = vmul.f32 %v9040_v55, %v483_v18  ;;  %v1562_v22 = vld [vmem:[%s16057_s3 + $0x3e8] sm:$0xff]  ;;  %v1561_v18 = vld [vmem:[%s16057_s3 + $0x3e0] sm:$0xff] }
  0xd1   : > { %2059 = vmatprep.mubr.f32.mxu0 %v9865_v5  ;;  %7649 = vmatpush1.bf16.msra.mxu0 %v7648_v9 }
  0xd2   : > { %4689 = vmatmul.mubr.f32.gmra.mrb[72].mxu1 %v9546_v4  ;;  %v866_v4 = vmul.f32 %v8778_v49, %v479_v12 }
  0xd3   : > { %4693 = vmatprep.mubr.f32.mxu1 %v9551_v21  ;;  %v484_v21 = vld [vmem:[%s8756_s21 + $0x5a8] sm:$0xff] }
  0xd4   : > { %2060 = vmatmul.mubr.f32.gmra.mrb[62].mxu0 %v9874_v24  ;;  %v9933_v26 = vadd.f32 %v8786_v51, %v866_v4  ;;  %v871_v34 = vmul.f32 %v8778_v49, %v484_v21  ;;  %v875_v4 = vmul.f32 %v9040_v55, %v488_v60  ;;  %v1564_v21 = vld [vmem:[%s16057_s3 + $0x3f8] sm:$0xff] }
  0xd5   : > { %2065 = vmatprep.mubr.f32.mxu0 %v9879_v57 }
  0xd6   : > { %4694 = vmatmul.mubr.f32.gmra.mrb[74].mxu1 %v9566_v15  ;;  %v489_v15 = vld [vmem:[%s8756_s21 + $0x5d0] sm:$0xff]  ;;  %v9947_v12 = vadd.f32 %v8786_v51, %v871_v34  ;;  %v7650_v34 = vpack.c.bf16 %v1564_v21, %v1562_v22  ;;  %v498_v21 = vld [vmem:[%s8756_s21 + $0x618] sm:$0xff] }
  0xd7   : > { %4698 = vmatprep.mubr.f32.mxu1 %v9580_v28  ;;  %v9942_v28 = vadd.f32 %v9073_v14, %v865_v20  ;;  %v876_v9 = vmul.f32 %v8778_v49, %v489_v15  ;;  %v493_v20 = vld [vmem:[%s8756_s21 + $0x5f0] sm:$0xff] }
  0xd8   : > { %2066 = vmatmul.mubr.f32.gmra.mrb[64].mxu0 %v9888_v46  ;;  %v1563_v15 = vld [vmem:[%s16057_s3 + $0x3f0] sm:$0xff]  ;;  %7651 = vmatprep.subr.bf16.mxu0 %v7650_v34  ;;  %v503_v34 = vld [vmem:[%s8756_s21 + $0x640] sm:$0xff] }
  0xd9   : > { %2071 = vmatprep.mubr.f32.mxu0 %v9902_v38  ;;  %v7652_v60 = vpack.c.bf16 %v1563_v15, %v1561_v18  ;;  %v890_v18 = vmul.f32 %v9040_v55, %v503_v34 }
  0xda   : > { %4699 = vmatmul.mubr.f32.gmra.mrb[76].mxu1 %v9598_v52  ;;  %v494_v52 = vld [vmem:[%s8756_s21 + $0x5f8] sm:$0xff] }
  0xdb   : > { %4703 = vmatprep.mubr.f32.mxu1 %v9603_v31  ;;  %v9956_v31 = vadd.f32 %v9073_v14, %v870_v42  ;;  %v499_v42 = vld [vmem:[%s8756_s21 + $0x620] sm:$0xff]  ;;  %7653 = vmatpush1.bf16.msra.mxu0 %v7652_v60  ;;  %v508_v60 = vld [vmem:[%s8756_s21 + $0x668] sm:$0xff] }
  0xdc   : > { %2072 = vmatmul.mubr.f32.gmra.mrb[66].mxu0 %v9914_v10  ;;  %7655 = vmatprep.subr.bf16.mxu0 %v8816_v0  ;;  %v509_v0 = vld [vmem:[%s8756_s21 + $0x670] sm:$0xff] }
  0xdd   : > { %2077 = vmatprep.mubr.f32.mxu0 %v9919_v53 }
  0xde   : > { %4704 = vmatmul.mubr.f32.gmra.mrb[78].mxu1 %v9618_v54  ;;  %v9967_v54 = vadd.f32 %v8786_v51, %v876_v9  ;;  %v9982_v9 = vadd.f32 %v9073_v14, %v875_v4 }
  0xdf   : > { %4708 = vmatprep.mubr.f32.mxu1 %v9623_v45  ;;  %v881_v45 = vmul.f32 %v8778_v49, %v494_v52  ;;  %v880_v52 = vmul.f32 %v9040_v55, %v493_v20 }
  0xe0   : > { %2078 = vmatmul.mubr.f32.gmra.mrb[68].mxu0 %v9928_v30 }
  0xe1   : > { %2083 = vmatprep.mubr.f32.mxu0 %v9933_v26  ;;  %v9987_v22 = vadd.f32 %v8786_v51, %v881_v45  ;;  %v9997_v4 = vadd.f32 %v9073_v14, %v880_v52  ;;  %v885_v45 = vmul.f32 %v9040_v55, %v498_v21  ;;  %v895_v52 = vmul.f32 %v9040_v55, %v508_v60 }
  0xe2   : > { %4709 = vmatmul.mubr.f32.gmra.mrb[80].mxu1 %v9637_v41  ;;  %v886_v41 = vmul.f32 %v8778_v49, %v499_v42  ;;  %v896_v42 = vmul.f32 %v8778_v49, %v509_v0  ;;  %v518_v0 = vld [vmem:[%s8756_s21 + $0x6b8] sm:$0xff] }
  0xe3   : > { %4713 = vmatprep.mubr.f32.mxu1 %v9642_v50  ;;  %v504_v50 = vld [vmem:[%s8756_s21 + $0x648] sm:$0xff] }
  0xe4   : > { %2084 = vmatmul.mubr.f32.gmra.mrb[70].mxu0 %v9942_v28  ;;  %v10002_v20 = vadd.f32 %v8786_v51, %v886_v41  ;;  %v10030_v41 = vadd.f32 %v8786_v51, %v896_v42 }
  0xe5   : > { %2089 = vmatprep.mubr.f32.mxu0 %v9947_v12 }
  0xe6   : > { %4714 = vmatmul.mubr.f32.gmra.mrb[82].mxu1 %v9655_v61  ;;  %v891_v61 = vmul.f32 %v8778_v49, %v504_v50  ;;  %v513_v50 = vld [vmem:[%s8756_s21 + $0x690] sm:$0xff] }
  0xe7   : > { %4718 = vmatprep.mubr.f32.mxu1 %v9666_v56  ;;  %v10011_v56 = vadd.f32 %v9073_v14, %v885_v45  ;;  %v900_v45 = vmul.f32 %v9040_v55, %v513_v50 }
  0xe8   : > { %2090 = vmatmul.mubr.f32.gmra.mrb[72].mxu0 %v9956_v31  ;;  %v10016_v15 = vadd.f32 %v8786_v51, %v891_v61 }
  0xe9   : > { %2095 = vmatprep.mubr.f32.mxu0 %v9967_v54 }
  0xea   : > { %4719 = vmatmul.mubr.f32.gmra.mrb[84].mxu1 %v9682_v43  ;;  %v514_v43 = vld [vmem:[%s8756_s21 + $0x698] sm:$0xff] }
  0xeb   : > { %4723 = vmatprep.mubr.f32.mxu1 %v9687_v3  ;;  %v10025_v3 = vadd.f32 %v9073_v14, %v890_v18  ;;  %v901_v21 = vmul.f32 %v8778_v49, %v514_v43  ;;  %v905_v18 = vmul.f32 %v9040_v55, %v518_v0  ;;  %v523_v43 = vld [vmem:[%s8756_s21 + $0x6e0] sm:$0xff] }
  0xec   : > { %2096 = vmatmul.mubr.f32.gmra.mrb[74].mxu0 %v9982_v9 }
  0xed   : > { %2101 = vmatprep.mubr.f32.mxu0 %v9987_v22  ;;  %v10044_v61 = vadd.f32 %v8786_v51, %v901_v21 }
  0xee   : > { %4724 = vmatmul.mubr.f32.gmra.mrb[86].mxu1 %v9696_v48  ;;  %v519_v48 = vld [vmem:[%s8756_s21 + $0x6c0] sm:$0xff] }
  0xef   : > { %4728 = vmatprep.mubr.f32.mxu1 %v9701_v40  ;;  %v10039_v40 = vadd.f32 %v9073_v14, %v895_v52  ;;  %v906_v34 = vmul.f32 %v8778_v49, %v519_v48  ;;  %v910_v52 = vmul.f32 %v9040_v55, %v523_v43  ;;  %v528_v48 = vld [vmem:[%s8756_s21 + $0x708] sm:$0xff] }
  0xf0   : > { %2102 = vmatmul.mubr.f32.gmra.mrb[76].mxu0 %v9997_v4 }
  0xf1   : > { %2107 = vmatprep.mubr.f32.mxu0 %v10002_v20  ;;  %v10058_v42 = vadd.f32 %v8786_v51, %v906_v34 }
  0xf2   : > { %4729 = vmatmul.mubr.f32.gmra.mrb[88].mxu1 %v9710_v44  ;;  %v524_v44 = vld [vmem:[%s8756_s21 + $0x6e8] sm:$0xff] }
  0xf3   : > { %4733 = vmatprep.mubr.f32.mxu1 %v9715_v37  ;;  %v10053_v37 = vadd.f32 %v9073_v14, %v900_v45  ;;  %v911_v60 = vmul.f32 %v8778_v49, %v524_v44  ;;  %v915_v45 = vmul.f32 %v9040_v55, %v528_v48  ;;  %v533_v44 = vld [vmem:[%s8756_s21 + $0x730] sm:$0xff] }
  0xf4   : > { %2108 = vmatmul.mubr.f32.gmra.mrb[78].mxu0 %v10011_v56 }
  0xf5   : > { %2113 = vmatprep.mubr.f32.mxu0 %v10016_v15  ;;  %v10072_v21 = vadd.f32 %v8786_v51, %v911_v60 }
  0xf6   : > { %4734 = vmatmul.mubr.f32.gmra.mrb[90].mxu1 %v9724_v11  ;;  %v529_v11 = vld [vmem:[%s8756_s21 + $0x710] sm:$0xff] }
  0xf7   : > { %4738 = vmatprep.mubr.f32.mxu1 %v9729_v63  ;;  %v10067_v63 = vadd.f32 %v9073_v14, %v905_v18  ;;  %v916_v50 = vmul.f32 %v8778_v49, %v529_v11  ;;  %v920_v18 = vmul.f32 %v9040_v55, %v533_v44  ;;  %v538_v11 = vld [vmem:[%s8756_s21 + $0x758] sm:$0xff] }
  0xf8   : > { %2114 = vmatmul.mubr.f32.gmra.mrb[80].mxu0 %v10025_v3 }
  0xf9   : > { %2119 = vmatprep.mubr.f32.mxu0 %v10030_v41  ;;  %v10086_v34 = vadd.f32 %v8786_v51, %v916_v50 }
  0xfa   : > { %4739 = vmatmul.mubr.f32.gmra.mrb[92].mxu1 %v9738_v39  ;;  %v534_v39 = vld [vmem:[%s8756_s21 + $0x738] sm:$0xff] }
  0xfb   : > { %4743 = vmatprep.mubr.f32.mxu1 %v9752_v19  ;;  %v10081_v19 = vadd.f32 %v9073_v14, %v910_v52  ;;  %v921_v0 = vmul.f32 %v8778_v49, %v534_v39  ;;  %v925_v52 = vmul.f32 %v9040_v55, %v538_v11  ;;  %v543_v39 = vld [vmem:[%s8756_s21 + $0x780] sm:$0xff] }
  0xfc   : > { %2120 = vmatmul.mubr.f32.gmra.mrb[82].mxu0 %v10039_v40 }
  0xfd   : > { %2125 = vmatprep.mubr.f32.mxu0 %v10044_v61  ;;  %v10100_v60 = vadd.f32 %v8786_v51, %v921_v0 }
  0xfe   : > { %4744 = vmatmul.mubr.f32.gmra.mrb[94].mxu1 %v9764_v27  ;;  %v539_v27 = vld [vmem:[%s8756_s21 + $0x760] sm:$0xff] }
  0xff   : > { %4748 = vmatprep.mubr.f32.mxu1 %v9769_v36  ;;  %v10095_v36 = vadd.f32 %v9073_v14, %v915_v45  ;;  %v926_v43 = vmul.f32 %v8778_v49, %v539_v27  ;;  %v930_v45 = vmul.f32 %v9040_v55, %v543_v39  ;;  %v548_v27 = vld [vmem:[%s8756_s21 + $0x7a8] sm:$0xff]  ;;  %v4509_v39 = vld [vmem:[%s16058_s4 + $0x110] sm:$0xff] }
 0x100   : > { %2126 = vmatmul.mubr.f32.gmra.mrb[84].mxu0 %v10053_v37  ;;  %v935_v11 = vmul.f32 %v9040_v55, %v548_v27 }
 0x101   : > { %2131 = vmatprep.mubr.f32.mxu0 %v10058_v42  ;;  %v10114_v50 = vadd.f32 %v8786_v51, %v926_v43  ;;  %v10143_v43 = vadd.f32 %v9073_v14, %v930_v45 }
 0x102   : > { %4749 = vmatmul.mubr.f32.gmra.mrb[96].mxu1 %v9778_v6  ;;  %v544_v6 = vld [vmem:[%s8756_s21 + $0x788] sm:$0xff]  ;;  %v10163_v45 = vadd.f32 %v9073_v14, %v935_v11 }
 0x103   : > { %4753 = vmatprep.mubr.f32.mxu1 %v9783_v59  ;;  %v10109_v59 = vadd.f32 %v9073_v14, %v920_v18  ;;  %v931_v48 = vmul.f32 %v8778_v49, %v544_v6  ;;  %v4508_v18 = vld [vmem:[%s16058_s4 + $0x108] sm:$0xff] }
 0x104   : > { %2132 = vmatmul.mubr.f32.gmra.mrb[86].mxu0 %v10067_v63  ;;  %v4512_v11 = vld [vmem:[%s16058_s4 + $0x128] sm:$0xff] }
 0x105   : > { %2137 = vmatprep.mubr.f32.mxu0 %v10072_v21  ;;  %v10128_v0 = vadd.f32 %v8786_v51, %v931_v48  ;;  %v559_v48 = vld [vmem:[%s8756_s21 + $0x800] sm:$0xff] }
 0x106   : > { %4754 = vmatmul.mubr.f32.gmra.mrb[98].mxu1 %v9792_v35  ;;  %v549_v35 = vld [vmem:[%s8756_s21 + $0x7b0] sm:$0xff]  ;;  %v946_v27 = vmul.f32 %v8778_v49, %v559_v48  ;;  %v563_v48 = vld [vmem:[%s8756_s21 + $0x820] sm:$0xff] }
 0x107   : > { %4758 = vmatprep.mubr.f32.mxu1 %v9797_v58  ;;  %v10123_v58 = vadd.f32 %v9073_v14, %v925_v52  ;;  %v936_v44 = vmul.f32 %v8778_v49, %v549_v35  ;;  %v553_v52 = vld [vmem:[%s8756_s21 + $0x7d0] sm:$0xff]  ;;  %v4510_v35 = vld [vmem:[%s16058_s4 + $0x118] sm:$0xff] }
 0x108   : > { %2138 = vmatmul.mubr.f32.gmra.mrb[88].mxu0 %v10081_v19 }
 0x109   : > { %2143 = vmatprep.mubr.f32.mxu0 %v10086_v34 }
 0x10a   : > { %4759 = vmatmul.mubr.f32.gmra.mrb[100].mxu1 %v9806_v23  ;;  %v554_v23 = vld [vmem:[%s8756_s21 + $0x7d8] sm:$0xff] }
 0x10b   : > { %4763 = vmatprep.mubr.f32.mxu1 %v9817_v62  ;;  %v4507_v62 = vld [vmem:[%s16058_s4 + $0x100] sm:$0xff] }
 0x10c   : > { %2144 = vmatmul.mubr.f32.gmra.mrb[90].mxu0 %v10095_v36  ;;  %v7725_v6 = vpack.c.bf16 %v4508_v18, %v4507_v62  ;;  %v564_v62 = vld [vmem:[%s8756_s21 + $0x828] sm:$0xff]  ;;  %v4511_v18 = vld [vmem:[%s16058_s4 + $0x120] sm:$0xff] }
 0x10d   : > { %2149 = vmatprep.mubr.f32.mxu0 %v10100_v60 }
 0x10e   : > { %4764 = vmatmul.mubr.f32.gmra.mrb[102].mxu1 %v9832_v13  ;;  %v10148_v13 = vadd.f32 %v8786_v51, %v936_v44  ;;  %v940_v44 = vmul.f32 %v9040_v55, %v553_v52  ;;  %v951_v52 = vmul.f32 %v8778_v49, %v564_v62  ;;  %v568_v62 = vld [vmem:[%s8756_s21 + $0x848] sm:$0xff] }
 0x10f   : > { %4768 = vmatprep.mubr.f32.mxu1 %v9837_v25  ;;  %v941_v25 = vmul.f32 %v8778_v49, %v554_v23  ;;  %7726 = vmatpush1.bf16.msra.mxu1 %v7725_v6  ;;  %v558_v23 = vld [vmem:[%s8756_s21 + $0x7f8] sm:$0xff] }
 0x110   : > { %2150 = vmatmul.mubr.f32.gmra.mrb[92].mxu0 %v10109_v59  ;;  %7727 = vmatprep.subr.bf16.mxu1 %v16545_v2  ;;  %v10184_v6 = vadd.f32 %v9073_v14, %v940_v44  ;;  %v4514_v44 = vld [vmem:[%s16058_s4 + $0x138] sm:$0xff] }
 0x111   : > { %2155 = vmatprep.mubr.f32.mxu0 %v10114_v50 }
 0x112   : > { %4769 = vmatmul.mubr.f32.gmra.mrb[104].mxu1 %v9846_v47  ;;  %v7728_v47 = vpack.c.bf16 %v4510_v35, %v4509_v39  ;;  %v569_v39 = vld [vmem:[%s8756_s21 + $0x850] sm:$0xff] }
 0x113   : > { %4773 = vmatprep.mubr.f32.mxu1 %v9851_v8  ;;  %v10169_v8 = vadd.f32 %v8786_v51, %v941_v25  ;;  %v945_v25 = vmul.f32 %v9040_v55, %v558_v23  ;;  %v4513_v35 = vld [vmem:[%s16058_s4 + $0x130] sm:$0xff]  ;;  %v956_v23 = vmul.f32 %v8778_v49, %v569_v39 }
 0x114   : > { %2156 = vmatmul.mubr.f32.gmra.mrb[94].mxu0 %v10123_v58  ;;  %7729 = vmatpush1.bf16.msra.mxu1 %v7728_v47  ;;  %v573_v39 = vld [vmem:[%s8756_s21 + $0x870] sm:$0xff] }
 0x115   : > { %2161 = vmatprep.mubr.f32.mxu0 %v10128_v0  ;;  %7730 = vmatprep.subr.bf16.mxu1 %v16545_v2  ;;  %v10205_v47 = vadd.f32 %v9073_v14, %v945_v25  ;;  %v4516_v25 = vld [vmem:[%s16058_s4 + $0x148] sm:$0xff] }
 0x116   : > { %4774 = vmatmul.mubr.f32.gmra.mrb[106].mxu1 %v9860_v32  ;;  %v7731_v32 = vpack.c.bf16 %v4512_v11, %v4511_v18  ;;  %v574_v18 = vld [vmem:[%s8756_s21 + $0x878] sm:$0xff]  ;;  %v4515_v11 = vld [vmem:[%s16058_s4 + $0x140] sm:$0xff] }
 0x117   : > { %4778 = vmatprep.mubr.f32.mxu1 %v9865_v5  ;;  %v10190_v5 = vadd.f32 %v8786_v51, %v946_v27  ;;  %v950_v27 = vmul.f32 %v9040_v55, %v563_v48  ;;  %v961_v48 = vmul.f32 %v8778_v49, %v574_v18  ;;  %v578_v18 = vld [vmem:[%s8756_s21 + $0x898] sm:$0xff] }
 0x118   : > { %2162 = vmatmul.mubr.f32.gmra.mrb[96].mxu0 %v10143_v43  ;;  %7732 = vmatpush1.bf16.msra.mxu1 %v7731_v32 }
 0x119   : > { %2167 = vmatprep.mubr.f32.mxu0 %v10148_v13  ;;  %7733 = vmatprep.subr.bf16.mxu1 %v16545_v2  ;;  %v10226_v32 = vadd.f32 %v9073_v14, %v950_v27  ;;  %v4518_v27 = vld [vmem:[%s16058_s4 + $0x158] sm:$0xff] }
 0x11a   : > { %4779 = vmatmul.mubr.f32.gmra.mrb[108].mxu1 %v9874_v24  ;;  %v7734_v24 = vpack.c.bf16 %v4514_v44, %v4513_v35  ;;  %v579_v35 = vld [vmem:[%s8756_s21 + $0x8a0] sm:$0xff]  ;;  %v4517_v44 = vld [vmem:[%s16058_s4 + $0x150] sm:$0xff] }
 0x11b   : > { %4783 = vmatprep.mubr.f32.mxu1 %v9879_v57  ;;  %v10211_v57 = vadd.f32 %v8786_v51, %v951_v52  ;;  %v955_v52 = vmul.f32 %v9040_v55, %v568_v62  ;;  %v966_v62 = vmul.f32 %v8778_v49, %v579_v35  ;;  %v583_v35 = vld [vmem:[%s8756_s21 + $0x8c0] sm:$0xff] }
 0x11c   : > { %2168 = vmatmul.mubr.f32.gmra.mrb[98].mxu0 %v10163_v45  ;;  %7735 = vmatpush1.bf16.msra.mxu1 %v7734_v24 }
 0x11d   : > { %2173 = vmatprep.mubr.f32.mxu0 %v10169_v8  ;;  %7736 = vmatprep.subr.bf16.mxu1 %v16545_v2  ;;  %v10247_v24 = vadd.f32 %v9073_v14, %v955_v52  ;;  %v4520_v52 = vld [vmem:[%s16058_s4 + $0x168] sm:$0xff] }
 0x11e   : > { %4784 = vmatmul.mubr.f32.gmra.mrb[110].mxu1 %v9888_v46  ;;  %v7737_v46 = vpack.c.bf16 %v4516_v25, %v4515_v11  ;;  %v584_v11 = vld [vmem:[%s8756_s21 + $0x8c8] sm:$0xff]  ;;  %v4519_v25 = vld [vmem:[%s16058_s4 + $0x160] sm:$0xff] }
 0x11f   : > { %4788 = vmatprep.mubr.f32.mxu1 %v9902_v38  ;;  %v10232_v38 = vadd.f32 %v8786_v51, %v956_v23  ;;  %v960_v23 = vmul.f32 %v9040_v55, %v573_v39  ;;  %v971_v39 = vmul.f32 %v8778_v49, %v584_v11  ;;  %v588_v11 = vld [vmem:[%s8756_s21 + $0x8e8] sm:$0xff] }
 0x120   : > { %2174 = vmatmul.mubr.f32.gmra.mrb[100].mxu0 %v10184_v6  ;;  %7738 = vmatpush1.bf16.msra.mxu1 %v7737_v46 }
 0x121   : > { %2179 = vmatprep.mubr.f32.mxu0 %v10190_v5  ;;  %7739 = vmatprep.subr.bf16.mxu1 %v16545_v2  ;;  %v10268_v46 = vadd.f32 %v9073_v14, %v960_v23  ;;  %v4522_v23 = vld [vmem:[%s16058_s4 + $0x178] sm:$0xff] }
 0x122   : > { %4789 = vmatmul.mubr.f32.gmra.mrb[112].mxu1 %v9914_v10  ;;  %v7740_v10 = vpack.c.bf16 %v4518_v27, %v4517_v44  ;;  %v589_v44 = vld [vmem:[%s8756_s21 + $0x8f0] sm:$0xff] }
 0x123   : > { %4793 = vmatprep.mubr.f32.mxu1 %v9919_v53  ;;  %v10253_v53 = vadd.f32 %v8786_v51, %v961_v48  ;;  %v965_v48 = vmul.f32 %v9040_v55, %v578_v18  ;;  %v4521_v27 = vld [vmem:[%s16058_s4 + $0x170] sm:$0xff]  ;;  %v976_v18 = vmul.f32 %v8778_v49, %v589_v44 }
 0x124   : > { %2180 = vmatmul.mubr.f32.gmra.mrb[102].mxu0 %v10205_v47  ;;  %7741 = vmatpush1.bf16.msra.mxu1 %v7740_v10  ;;  %v593_v44 = vld [vmem:[%s8756_s21 + $0x910] sm:$0xff] }
 0x125   : > { %2185 = vmatprep.mubr.f32.mxu0 %v10211_v57  ;;  %7742 = vmatprep.subr.bf16.mxu1 %v16545_v2  ;;  %v10289_v10 = vadd.f32 %v9073_v14, %v965_v48  ;;  %v4524_v48 = vld [vmem:[%s16058_s4 + $0x188] sm:$0xff] }
 0x126   : > { %4794 = vmatmul.mubr.f32.gmra.mrb[114].mxu1 %v9928_v30  ;;  %v7743_v30 = vpack.c.bf16 %v4520_v52, %v4519_v25  ;;  %v594_v25 = vld [vmem:[%s8756_s21 + $0x918] sm:$0xff]  ;;  %v4523_v52 = vld [vmem:[%s16058_s4 + $0x180] sm:$0xff] }
 0x127   : > { %4798 = vmatprep.mubr.f32.mxu1 %v9933_v26  ;;  %v10274_v26 = vadd.f32 %v8786_v51, %v966_v62  ;;  %v970_v62 = vmul.f32 %v9040_v55, %v583_v35  ;;  %v981_v35 = vmul.f32 %v8778_v49, %v594_v25  ;;  %v598_v25 = vld [vmem:[%s8756_s21 + $0x938] sm:$0xff] }
 0x128   : > { %2186 = vmatmul.mubr.f32.gmra.mrb[104].mxu0 %v10226_v32  ;;  %7744 = vmatpush1.bf16.msra.mxu1 %v7743_v30 }
 0x129   : > { %2191 = vmatprep.mubr.f32.mxu0 %v10232_v38  ;;  %7745 = vmatprep.subr.bf16.mxu1 %v16545_v2  ;;  %v10310_v30 = vadd.f32 %v9073_v14, %v970_v62  ;;  %v4526_v62 = vld [vmem:[%s16058_s4 + $0x198] sm:$0xff] }
 0x12a   : > { %4799 = vmatmul.mubr.f32.gmra.mrb[116].mxu1 %v9942_v28  ;;  %v7746_v28 = vpack.c.bf16 %v4522_v23, %v4521_v27  ;;  %v599_v27 = vld [vmem:[%s8756_s21 + $0x940] sm:$0xff]  ;;  %v4525_v23 = vld [vmem:[%s16058_s4 + $0x190] sm:$0xff] }
 0x12b   : > { %4803 = vmatprep.mubr.f32.mxu1 %v9947_v12  ;;  %v10295_v12 = vadd.f32 %v8786_v51, %v971_v39  ;;  %v975_v39 = vmul.f32 %v9040_v55, %v588_v11  ;;  %v986_v11 = vmul.f32 %v8778_v49, %v599_v27  ;;  %v603_v27 = vld [vmem:[%s8756_s21 + $0x960] sm:$0xff] }
 0x12c   : > { %2192 = vmatmul.mubr.f32.gmra.mrb[106].mxu0 %v10247_v24  ;;  %7747 = vmatpush1.bf16.msra.mxu1 %v7746_v28 }
 0x12d   : > { %2197 = vmatprep.mubr.f32.mxu0 %v10253_v53  ;;  %7748 = vmatprep.subr.bf16.mxu1 %v16545_v2  ;;  %v10331_v28 = vadd.f32 %v9073_v14, %v975_v39  ;;  %v4528_v39 = vld [vmem:[%s16058_s4 + $0x1a8] sm:$0xff] }
 0x12e   : > { %4804 = vmatmul.mubr.f32.gmra.mrb[118].mxu1 %v9956_v31  ;;  %v7749_v31 = vpack.c.bf16 %v4524_v48, %v4523_v52  ;;  %v604_v52 = vld [vmem:[%s8756_s21 + $0x968] sm:$0xff]  ;;  %v4527_v48 = vld [vmem:[%s16058_s4 + $0x1a0] sm:$0xff] }
 0x12f   : > { %4808 = vmatprep.mubr.f32.mxu1 %v9967_v54  ;;  %v10316_v54 = vadd.f32 %v8786_v51, %v976_v18  ;;  %v980_v18 = vmul.f32 %v9040_v55, %v593_v44  ;;  %v991_v44 = vmul.f32 %v8778_v49, %v604_v52  ;;  %v608_v52 = vld [vmem:[%s8756_s21 + $0x988] sm:$0xff] }
 0x130   : > { %2198 = vmatmul.mubr.f32.gmra.mrb[108].mxu0 %v10268_v46  ;;  %7750 = vmatpush1.bf16.msra.mxu1 %v7749_v31 }
 0x131   : > { %2203 = vmatprep.mubr.f32.mxu0 %v10274_v26  ;;  %7751 = vmatprep.subr.bf16.mxu1 %v16545_v2  ;;  %v10352_v31 = vadd.f32 %v9073_v14, %v980_v18  ;;  %v4530_v18 = vld [vmem:[%s16058_s4 + $0x1b8] sm:$0xff] }
 0x132   : > { %4809 = vmatmul.mubr.f32.gmra.mrb[120].mxu1 %v9982_v9  ;;  %v7752_v9 = vpack.c.bf16 %v4526_v62, %v4525_v23  ;;  %v609_v23 = vld [vmem:[%s8756_s21 + $0x990] sm:$0xff] }
 0x133   : > { %4813 = vmatprep.mubr.f32.mxu1 %v9987_v22  ;;  %v10337_v22 = vadd.f32 %v8786_v51, %v981_v35  ;;  %v985_v35 = vmul.f32 %v9040_v55, %v598_v25  ;;  %v4529_v62 = vld [vmem:[%s16058_s4 + $0x1b0] sm:$0xff]  ;;  %v996_v25 = vmul.f32 %v8778_v49, %v609_v23 }
 0x134   : > { %2204 = vmatmul.mubr.f32.gmra.mrb[110].mxu0 %v10289_v10  ;;  %7753 = vmatpush1.bf16.msra.mxu1 %v7752_v9  ;;  %v613_v23 = vld [vmem:[%s8756_s21 + $0x9b0] sm:$0xff] }
 0x135   : > { %2209 = vmatprep.mubr.f32.mxu0 %v10295_v12  ;;  %7754 = vmatprep.subr.bf16.mxu1 %v16545_v2  ;;  %v10373_v9 = vadd.f32 %v9073_v14, %v985_v35  ;;  %v4532_v35 = vld [vmem:[%s16058_s4 + $0x1c8] sm:$0xff] }
 0x136   : > { %4814 = vmatmul.mubr.f32.gmra.mrb[122].mxu1 %v9997_v4  ;;  %v7755_v4 = vpack.c.bf16 %v4528_v39, %v4527_v48  ;;  %v614_v48 = vld [vmem:[%s8756_s21 + $0x9b8] sm:$0xff]  ;;  %v4531_v39 = vld [vmem:[%s16058_s4 + $0x1c0] sm:$0xff] }
 0x137   : > { %4818 = vmatprep.mubr.f32.mxu1 %v10002_v20  ;;  %v10358_v20 = vadd.f32 %v8786_v51, %v986_v11  ;;  %v990_v11 = vmul.f32 %v9040_v55, %v603_v27  ;;  %v1001_v27 = vmul.f32 %v8778_v49, %v614_v48  ;;  %v618_v48 = vld [vmem:[%s8756_s21 + $0x9d8] sm:$0xff] }
 0x138   : > { %2210 = vmatmul.mubr.f32.gmra.mrb[112].mxu0 %v10310_v30  ;;  %7756 = vmatpush1.bf16.msra.mxu1 %v7755_v4 }
 0x139   : > { %2215 = vmatprep.mubr.f32.mxu0 %v10316_v54  ;;  %7757 = vmatprep.subr.bf16.mxu1 %v16545_v2  ;;  %v10394_v4 = vadd.f32 %v9073_v14, %v990_v11  ;;  %v4534_v11 = vld [vmem:[%s16058_s4 + $0x1d8] sm:$0xff] }
 0x13a   : > { %4819 = vmatmul.mubr.f32.gmra.mrb[124].mxu1 %v10011_v56  ;;  %v7758_v56 = vpack.c.bf16 %v4530_v18, %v4529_v62  ;;  %v619_v62 = vld [vmem:[%s8756_s21 + $0x9e0] sm:$0xff]  ;;  %v4533_v18 = vld [vmem:[%s16058_s4 + $0x1d0] sm:$0xff] }
 0x13b   : > { %4823 = vmatprep.mubr.f32.mxu1 %v10016_v15  ;;  %v10379_v15 = vadd.f32 %v8786_v51, %v991_v44  ;;  %v995_v44 = vmul.f32 %v9040_v55, %v608_v52  ;;  %v1006_v52 = vmul.f32 %v8778_v49, %v619_v62  ;;  %v623_v62 = vld [vmem:[%s8756_s21 + $0xa00] sm:$0xff] }
 0x13c   : > { %2216 = vmatmul.mubr.f32.gmra.mrb[114].mxu0 %v10331_v28  ;;  %7759 = vmatpush1.bf16.msra.mxu1 %v7758_v56 }
 0x13d   : > { %2221 = vmatprep.mubr.f32.mxu0 %v10337_v22  ;;  %7760 = vmatprep.subr.bf16.mxu1 %v16545_v2  ;;  %v10415_v56 = vadd.f32 %v9073_v14, %v995_v44  ;;  %v4536_v44 = vld [vmem:[%s16058_s4 + $0x1e8] sm:$0xff] }
 0x13e   : > { %4824 = vmatmul.mubr.f32.gmra.mrb[126].mxu1 %v10025_v3  ;;  %v7761_v3 = vpack.c.bf16 %v4532_v35, %v4531_v39  ;;  %v624_v39 = vld [vmem:[%s8756_s21 + $0xa08] sm:$0xff]  ;;  %v4535_v35 = vld [vmem:[%s16058_s4 + $0x1e0] sm:$0xff] }
 0x13f   : > { %4828 = vmatprep.mubr.f32.mxu1 %v10030_v41  ;;  %v10400_v41 = vadd.f32 %v8786_v51, %v996_v25  ;;  %v1000_v25 = vmul.f32 %v9040_v55, %v613_v23  ;;  %v1011_v23 = vmul.f32 %v8778_v49, %v624_v39  ;;  %v628_v39 = vld [vmem:[%s8756_s21 + $0xa28] sm:$0xff] }
 0x140   : > { %2222 = vmatmul.mubr.f32.gmra.mrb[116].mxu0 %v10352_v31  ;;  %7762 = vmatpush1.bf16.msra.mxu1 %v7761_v3 }
 0x141   : > { %2227 = vmatprep.mubr.f32.mxu0 %v10358_v20  ;;  %7763 = vmatprep.subr.bf16.mxu1 %v16545_v2  ;;  %v10436_v3 = vadd.f32 %v9073_v14, %v1000_v25  ;;  %v4538_v25 = vld [vmem:[%s16058_s4 + $0x1f8] sm:$0xff] }
 0x142   : > { %4829 = vmatmul.mubr.f32.gmra.mrb[128].mxu1 %v10039_v40  ;;  %v7764_v40 = vpack.c.bf16 %v4534_v11, %v4533_v18  ;;  %v629_v18 = vld [vmem:[%s8756_s21 + $0xa30] sm:$0xff] }
 0x143   : > { %4833 = vmatprep.mubr.f32.mxu1 %v10044_v61  ;;  %v10421_v61 = vadd.f32 %v8786_v51, %v1001_v27  ;;  %v1005_v27 = vmul.f32 %v9040_v55, %v618_v48  ;;  %v4537_v11 = vld [vmem:[%s16058_s4 + $0x1f0] sm:$0xff]  ;;  %v1016_v48 = vmul.f32 %v8778_v49, %v629_v18 }
 0x144   : > { %2228 = vmatmul.mubr.f32.gmra.mrb[118].mxu0 %v10373_v9  ;;  %7765 = vmatpush1.bf16.msra.mxu1 %v7764_v40 }
 0x145   : > { %2233 = vmatprep.mubr.f32.mxu0 %v10379_v15  ;;  %7766 = vmatprep.subr.bf16.mxu1 %v16545_v2  ;;  %v10457_v40 = vadd.f32 %v9073_v14, %v1005_v27  ;;  %v10477_v27 = vadd.f32 %v8786_v51, %v1016_v48 }
 0x146   : > { %4834 = vmatmul.mubr.f32.gmra.mrb[130].mxu1 %v10053_v37  ;;  %v7767_v37 = vpack.c.bf16 %v4536_v44, %v4535_v35  ;;  %v634_v35 = vld [vmem:[%s8756_s21 + $0xa58] sm:$0xff]  ;;  %v1015_v44 = vmul.f32 %v9040_v55, %v628_v39  ;;  %v643_v39 = vld [vmem:[%s8756_s21 + $0xaa0] sm:$0xff] }
 0x147   : > { %4838 = vmatprep.mubr.f32.mxu1 %v10058_v42  ;;  %v10442_v42 = vadd.f32 %v8786_v51, %v1006_v52  ;;  %v1010_v52 = vmul.f32 %v9040_v55, %v623_v62 }
 0x148   : > { %2234 = vmatmul.mubr.f32.gmra.mrb[120].mxu0 %v10394_v4  ;;  %7768 = vmatpush1.bf16.msra.mxu1 %v7767_v37  ;;  %v1021_v37 = vmul.f32 %v8778_v49, %v634_v35  ;;  %v1030_v35 = vmul.f32 %v9040_v55, %v643_v39 }
 0x149   : > { %2239 = vmatprep.mubr.f32.mxu0 %v10400_v41  ;;  %7769 = vmatprep.subr.bf16.mxu1 %v16545_v2  ;;  %v10472_v2 = vadd.f32 %v9073_v14, %v1010_v52 }
 0x14a   : > { %4839 = vmatmul.mubr.f32.gmra.mrb[132].mxu1 %v10067_v63  ;;  %v7770_v63 = vpack.c.bf16 %v4538_v25, %v4537_v11  ;;  %v10491_v18 = vadd.f32 %v8786_v51, %v1021_v37  ;;  %v638_v25 = vld [vmem:[%s8756_s21 + $0xa78] sm:$0xff] }
 0x14b   : > { %4843 = vmatprep.mubr.f32.mxu1 %v10072_v21  ;;  %v10463_v21 = vadd.f32 %v8786_v51, %v1011_v23  ;;  %v639_v23 = vld [vmem:[%s8756_s21 + $0xa80] sm:$0xff]  ;;  %v1025_v52 = vmul.f32 %v9040_v55, %v638_v25  ;;  %v653_v25 = vld [vmem:[%s8756_s21 + $0xaf0] sm:$0xff] }
 0x14c   : > { %2240 = vmatmul.mubr.f32.gmra.mrb[122].mxu0 %v10415_v56  ;;  %7771 = vmatpush1.bf16.msra.mxu1 %v7770_v63  ;;  %v1026_v11 = vmul.f32 %v8778_v49, %v639_v23 }
 0x14d   : > { %2245 = vmatprep.mubr.f32.mxu0 %v10421_v61 }
 0x14e   : > { %4844 = vmatmul.mubr.f32.gmra.mrb[134].mxu1 %v10081_v19  ;;  %v633_v19 = vld [vmem:[%s8756_s21 + $0xa50] sm:$0xff]  ;;  %v10505_v63 = vadd.f32 %v8786_v51, %v1026_v11 }
 0x14f   : > { %4848 = vmatprep.mubr.f32.mxu1 %v10086_v34  ;;  %v10486_v34 = vadd.f32 %v9073_v14, %v1015_v44  ;;  %v1020_v62 = vmul.f32 %v9040_v55, %v633_v19  ;;  %v648_v19 = vld [vmem:[%s8756_s21 + $0xac8] sm:$0xff] }
 0x150   : > { %2246 = vmatmul.mubr.f32.gmra.mrb[124].mxu0 %v10436_v3  ;;  %v1035_v23 = vmul.f32 %v9040_v55, %v648_v19 }
 0x151   : > { %2251 = vmatprep.mubr.f32.mxu0 %v10442_v42 }
 0x152   : > { %4849 = vmatmul.mubr.f32.gmra.mrb[136].mxu1 %v10095_v36  ;;  %v644_v36 = vld [vmem:[%s8756_s21 + $0xaa8] sm:$0xff] }
 0x153   : > { %4853 = vmatprep.mubr.f32.mxu1 %v10100_v60  ;;  %v10500_v60 = vadd.f32 %v9073_v14, %v1020_v62  ;;  %v1031_v48 = vmul.f32 %v8778_v49, %v644_v36  ;;  %v10543_v36 = vadd.f32 %v9073_v14, %v1035_v23 }
 0x154   : > { %2252 = vmatmul.mubr.f32.gmra.mrb[126].mxu0 %v10457_v40 }
 0x155   : > { %2257 = vmatprep.mubr.f32.mxu0 %v10463_v21  ;;  %v10519_v44 = vadd.f32 %v8786_v51, %v1031_v48  ;;  %v675_v48 = vsub.s32 2, %v8739_v33 }
 0x156   : > { %4854 = vmatmul.mubr.f32.gmra.mrb[138].mxu1 %v10109_v59  ;;  %v649_v59 = vld [vmem:[%s8756_s21 + $0xad0] sm:$0xff] }
 0x157   : > { %4858 = vmatprep.mubr.f32.mxu1 %v10114_v50  ;;  %v10514_v50 = vadd.f32 %v9073_v14, %v1025_v52  ;;  %v1036_v37 = vmul.f32 %v8778_v49, %v649_v59  ;;  %v1040_v52 = vmul.f32 %v9040_v55, %v653_v25  ;;  %v311_v25 = vld [vmem:[%s8756_s21 + $0x40] sm:$0xff] }
 0x158   : > { %2258 = vmatmul.mubr.f32.gmra.mrb[128].mxu0 %v10472_v2 }
 0x159   : > { %2263 = vmatprep.mubr.f32.mxu0 %v10477_v27  ;;  %v10533_v62 = vadd.f32 %v8786_v51, %v1036_v37  ;;  %v306_v37 = vld [vmem:[%s8756_s21 + $0x18] sm:$0xff] }
 0x15a   : > { %4859 = vmatmul.mubr.f32.gmra.mrb[140].mxu1 %v10123_v58  ;;  %v654_v58 = vld [vmem:[%s8756_s21 + $0xaf8] sm:$0xff] }
 0x15b   : > { %4863 = vmatprep.mubr.f32.mxu1 %v10128_v0  ;;  %v10528_v0 = vadd.f32 %v9073_v14, %v1030_v35  ;;  %v1041_v11 = vmul.f32 %v8778_v49, %v654_v58 }
 0x15c   : > { %2264 = vmatmul.mubr.f32.gmra.mrb[130].mxu0 %v10486_v34 }
 0x15d   : > { %2269 = vmatprep.mubr.f32.mxu0 %v10491_v18  ;;  %v10549_v39 = vadd.f32 %v8786_v51, %v1041_v11  ;;  %v305_v11 = vld [vmem:[%s8756_s21 + $0x10] sm:$0xff] }
 0x15e   : > { %4864 = vmatmul.mubr.f32.gmra.mrb[142].mxu1 %v10143_v43  ;;  %v679_v43 = vsub.s32 3, %v8739_v33  ;;  %v10563_v33 = vadd.f32 %v9073_v14, %v1040_v52  ;;  %v310_v52 = vld [vmem:[%s8756_s21 + $0x38] sm:$0xff] }
 0x15f   : > { %4868 = vmatprep.mubr.f32.mxu1 %v10148_v13  ;;  %v659_v13 = vld [vmem:[%s8756_s21 + $0xb20] sm:$0xff] }
 0x160   : > { %2270 = vmatmul.mubr.f32.gmra.mrb[132].mxu0 %v10500_v60  ;;  %v1046_v59 = vmul.f32 %v8778_v49, %v659_v13 }
 0x161   : > { %2275 = vmatprep.mubr.f32.mxu0 %v10505_v63 }
 0x162   : > { %4869 = vmatmul.mubr.f32.gmra.mrb[144].mxu1 %v10163_v45  ;;  %v658_v45 = vld [vmem:[%s8756_s21 + $0xb18] sm:$0xff]  ;;  %v10570_v58 = vadd.f32 %v8786_v51, %v1046_v59 }
 0x163   : > { %4873 = vmatprep.mubr.f32.mxu1 %v10169_v8  ;;  %v8504_v8 = vld [vmem:[%s16055_s1] sm:$0x1f]  ;;  %v1045_v49 = vmul.f32 %v9040_v55, %v658_v45 }
 0x164   : > { %2276 = vmatmul.mubr.f32.gmra.mrb[134].mxu0 %v10514_v50  ;;  %v10556_v35 = vrot.slane %v8504_v8, %v679_v43  ;;  %v10566_v19 = vrot.slane %v8504_v8, %v675_v48  ;;  %v315_v8 = vld [vmem:[%s8756_s21 + $0x60] sm:$0xff] }
 0x165   : > { %2281 = vmatprep.mubr.f32.mxu0 %v10519_v44  ;;  %v10584_v51 = vadd.f32 %v9073_v14, %v1045_v49 }
 0x166   : > { %4874 = vmatmul.mubr.f32.gmra.mrb[146].mxu1 %v10184_v6  ;;  %v693_v6 = vmul.f32 %v10556_v35, %v306_v37  ;;  %v692_v55 = vmul.f32 %v10566_v19, %v305_v11  ;;  %v702_v37 = vmul.f32 %v10566_v19, %v315_v8  ;;  %v16559_v8 = vld [vmem:[#allocation8_spill] sm:$0xff] }
 0x167   : > { %4878 = vmatprep.mubr.f32.mxu1 %v10190_v5  ;;  %v8505_v5 = vld [vmem:[%s16056_s2] sm:$0x1f] }
 0x168   : > { %2282 = vmatmul.mubr.f32.gmra.mrb[136].mxu0 %v10528_v0  ;;  %v10576_v23 = vrot.slane %v8505_v5, %v679_v43  ;;  %v10587_v13 = vrot.slane %v8505_v5, %v675_v48  ;;  %v697_v48 = vmul.f32 %v10566_v19, %v310_v52 }
 0x169   : > { %2287 = vmatprep.mubr.f32.mxu0 %v10533_v62 }
 0x16a   : > { %4879 = vmatmul.mubr.f32.gmra.mrb[148].mxu1 %v10205_v47  ;;  %v10591_v43 = vadd.f32 %v10576_v23, %v693_v6  ;;  %v698_v47 = vmul.f32 %v10556_v35, %v311_v25  ;;  %v10600_v14 = vadd.f32 %v10587_v13, %v692_v55  ;;  %v320_v6 = vld [vmem:[%s8756_s21 + $0x88] sm:$0xff]  ;;  %v325_v25 = vld [vmem:[%s8756_s21 + $0xb0] sm:$0xff] }
 0x16b   : > { %4883 = vmatprep.mubr.f32.mxu1 %v10211_v57  ;;  %v316_v57 = vld [vmem:[%s8756_s21 + $0x68] sm:$0xff]  ;;  %v707_v5 = vmul.f32 %v10566_v19, %v320_v6  ;;  %v712_v55 = vmul.f32 %v10566_v19, %v325_v25 }
 0x16c   : > { %2288 = vmatmul.mubr.f32.gmra.mrb[138].mxu0 %v10543_v36  ;;  %v10605_v59 = vadd.f32 %v10576_v23, %v698_v47  ;;  %v703_v45 = vmul.f32 %v10556_v35, %v316_v57 }
 0x16d   : > { %2293 = vmatprep.mubr.f32.mxu0 %v10549_v39  ;;  %v10662_v52 = vadd.f32 %v10587_v13, %v712_v55 }
 0x16e   : > { %4884 = vmatmul.mubr.f32.gmra.mrb[150].mxu1 %v10226_v32  ;;  %v321_v32 = vld [vmem:[%s8756_s21 + $0x90] sm:$0xff]  ;;  %v10620_v49 = vadd.f32 %v10576_v23, %v703_v45 }
 0x16f   : > { %4888 = vmatprep.mubr.f32.mxu1 %v10232_v38  ;;  %v10614_v38 = vadd.f32 %v10587_v13, %v697_v48  ;;  %v16558_v45 = vld [vmem:[#allocation7_spill] sm:$0xff] }
 0x170   : > { %2294 = vmatmul.mubr.f32.gmra.mrb[140].mxu0 %v10563_v33 }
 0x171   : > { %2299 = vmatprep.mubr.f32.mxu0 %v10570_v58 }
 0x172   : > { %4889 = vmatmul.mubr.f32.gmra.mrb[152].mxu1 %v10247_v24  ;;  %v708_v24 = vmul.f32 %v10556_v35, %v321_v32 }
 0x173   : > { %4893 = vmatprep.mubr.f32.mxu1 %v10253_v53  ;;  %v326_v53 = vld [vmem:[%s8756_s21 + $0xb8] sm:$0xff] }
 0x174   : > { %2300 = vmatmul.mubr.f32.gmra.mrb[142].mxu0 %v10584_v51  ;;  %v10635_v11 = vadd.f32 %v10576_v23, %v708_v24 }
 0x175   : > { %2370 = vmatprep.mubr.f32.mxu0 %v10591_v43 }
 0x176   : > { %4894 = vmatmul.mubr.f32.gmra.mrb[154].mxu1 %v10268_v46  ;;  %v713_v46 = vmul.f32 %v10556_v35, %v326_v53  ;;  %v340_v53 = vld [vmem:[%s8756_s21 + $0x128] sm:$0xff] }
 0x177   : > { %4898 = vmatprep.mubr.f32.mxu1 %v10274_v26  ;;  %v10646_v26 = vadd.f32 %v10587_v13, %v707_v5  ;;  %v16561_v5 = vld [vmem:[#allocation11_spill] sm:$0xff]  ;;  %v727_v25 = vmul.f32 %v10566_v19, %v340_v53  ;;  %v360_v53 = vld [vmem:[%s8756_s21 + $0x1c8] sm:$0xff] }
 0x178   : > { %2371 = vmatmul.mubr.f32.vlgmr.msra.gmra.mrb[0].mxu0 %v10600_v14  ;;  %v10651_v47 = vadd.f32 %v10576_v23, %v713_v46 }
 0x179   : > { %7657 = vmatpush1.bf16.msra.mxu0 %v8818_v1  ;;  %2376 = vmatprep.mubr.f32.mxu0 %v10605_v59  ;;  %v10630_v1 = vadd.f32 %v10587_v13, %v702_v37 }
 0x17a   : > { %7659 = vmatprep.subr.bf16.mxu0 %v8833_v7  ;;  %v331_v7 = vld [vmem:[%s8756_s21 + $0xe0] sm:$0xff]  ;;  %4899 = vmatmul.mubr.f32.gmra.mrb[156].mxu1 %v10289_v10  ;;  %v330_v10 = vld [vmem:[%s8756_s21 + $0xd8] sm:$0xff] }
 0x17b   : > { %4903 = vmatprep.mubr.f32.mxu1 %v10295_v12  ;;  %v16557_v12 = vld [vmem:[#allocation5_spill] sm:$0xff]  ;;  %v717_v57 = vmul.f32 %v10566_v19, %v330_v10 }
 0x17c   : > { %2377 = vmatmul.mubr.f32.gmra.mrb[2].mxu0 %v10614_v38 }
 0x17d   : > { %2382 = vmatprep.mubr.f32.mxu0 %v10620_v49  ;;  %7661 = vmatpush1.bf16.msra.mxu0 %v8855_v16  ;;  %v718_v16 = vmul.f32 %v10556_v35, %v331_v7  ;;  %v10680_v37 = vadd.f32 %v10587_v13, %v717_v57  ;;  %v350_v57 = vld [vmem:[%s8756_s21 + $0x178] sm:$0xff] }
 0x17e   : > { %7663 = vmatprep.subr.bf16.mxu0 %v8858_v17  ;;  %v336_v17 = vld [vmem:[%s8756_s21 + $0x108] sm:$0xff]  ;;  %4904 = vmatmul.mubr.f32.gmra.mrb[158].mxu1 %v10310_v30  ;;  %v335_v30 = vld [vmem:[%s8756_s21 + $0x100] sm:$0xff] }
 0x17f   : > { %4908 = vmatprep.mubr.f32.mxu1 %v10316_v54  ;;  %v10667_v48 = vadd.f32 %v10576_v23, %v718_v16  ;;  %v341_v54 = vld [vmem:[%s8756_s21 + $0x130] sm:$0xff]  ;;  %v722_v24 = vmul.f32 %v10566_v19, %v335_v30 }
 0x180   : > { %2383 = vmatmul.mubr.f32.gmra.mrb[4].mxu0 %v10630_v1  ;;  %v345_v16 = vld [vmem:[%s8756_s21 + $0x150] sm:$0xff] }
 0x181   : > { %2388 = vmatprep.mubr.f32.mxu0 %v10635_v11  ;;  %7665 = vmatpush1.bf16.msra.mxu0 %v8886_v29  ;;  %v723_v29 = vmul.f32 %v10556_v35, %v336_v17  ;;  %v10697_v46 = vadd.f32 %v10587_v13, %v722_v24  ;;  %v732_v10 = vmul.f32 %v10566_v19, %v345_v16 }
 0x182   : > { %7667 = vmatprep.subr.bf16.mxu0 %v16557_v12  ;;  %4909 = vmatmul.mubr.f32.gmra.mrb[160].mxu1 %v10331_v28  ;;  %v728_v28 = vmul.f32 %v10556_v35, %v341_v54  ;;  %v355_v54 = vld [vmem:[%s8756_s21 + $0x1a0] sm:$0xff] }
 0x183   : > { %4913 = vmatprep.mubr.f32.mxu1 %v10337_v22  ;;  %v10685_v6 = vadd.f32 %v10576_v23, %v723_v29  ;;  %v346_v22 = vld [vmem:[%s8756_s21 + $0x158] sm:$0xff]  ;;  %v737_v29 = vmul.f32 %v10566_v19, %v350_v57 }
 0x184   : > { %2389 = vmatmul.mubr.f32.gmra.mrb[6].mxu0 %v10646_v26  ;;  %v10702_v7 = vadd.f32 %v10576_v23, %v728_v28  ;;  %v733_v55 = vmul.f32 %v10556_v35, %v346_v22 }
 0x185   : > { %2394 = vmatprep.mubr.f32.mxu0 %v10651_v47  ;;  %7669 = vmatpush1.bf16.msra.mxu0 %v16558_v45 }
 0x186   : > { %7672 = vmatprep.subr.msk.bf16.mxu0 %vm8931_vm2, %v16559_v8  ;;  %4914 = vmatmul.mubr.f32.gmra.mrb[162].mxu1 %v10352_v31  ;;  %v351_v31 = vld [vmem:[%s8756_s21 + $0x180] sm:$0xff]  ;;  %v10716_v17 = vadd.f32 %v10576_v23, %v733_v55  ;;  %v742_v8 = vmul.f32 %v10566_v19, %v355_v54  ;;  %v365_v55 = vld [vmem:[%s8756_s21 + $0x1f0] sm:$0xff] }
 0x187   : > { %4918 = vmatprep.mubr.f32.mxu1 %v10358_v20  ;;  %v10711_v20 = vadd.f32 %v10587_v13, %v727_v25  ;;  %v738_v12 = vmul.f32 %v10556_v35, %v351_v31  ;;  %v752_v16 = vmul.f32 %v10566_v19, %v365_v55 }
 0x188   : > { %2395 = vmatmul.mubr.f32.gmra.mrb[8].mxu0 %v10662_v52 }
 0x189   : > { %2400 = vmatprep.mubr.f32.mxu0 %v10667_v48  ;;  %7675 = vmatpush1.bf16.msk.msra.mxu0 %vm8931_vm2, %v16561_v5  ;;  %v10730_v30 = vadd.f32 %v10576_v23, %v738_v12  ;;  %v747_v5 = vmul.f32 %v10566_v19, %v360_v53  ;;  %v370_v12 = vld [vmem:[%s8756_s21 + $0x218] sm:$0xff] }
 0x18a   : > { %4919 = vmatmul.mubr.f32.gmra.mrb[164].mxu1 %v10373_v9  ;;  %v356_v9 = vld [vmem:[%s8756_s21 + $0x1a8] sm:$0xff]  ;;  %v757_v57 = vmul.f32 %v10566_v19, %v370_v12 }
 0x18b   : > { %4923 = vmatprep.mubr.f32.mxu1 %v10379_v15  ;;  %v10725_v15 = vadd.f32 %v10587_v13, %v732_v10  ;;  %v743_v45 = vmul.f32 %v10556_v35, %v356_v9 }
 0x18c   : > { %2401 = vmatmul.mubr.f32.gmra.mrb[10].mxu0 %v10680_v37 }
 0x18d   : > { %2406 = vmatprep.mubr.f32.mxu0 %v10685_v6  ;;  %v10744_v24 = vadd.f32 %v10576_v23, %v743_v45  ;;  %v375_v45 = vld [vmem:[%s8756_s21 + $0x240] sm:$0xff] }
 0x18e   : > { %4924 = vmatmul.mubr.f32.gmra.mrb[166].mxu1 %v10394_v4  ;;  %v361_v4 = vld [vmem:[%s8756_s21 + $0x1d0] sm:$0xff]  ;;  %v762_v54 = vmul.f32 %v10566_v19, %v375_v45 }
 0x18f   : > { %4928 = vmatprep.mubr.f32.mxu1 %v10400_v41  ;;  %v10739_v41 = vadd.f32 %v10587_v13, %v737_v29  ;;  %v748_v28 = vmul.f32 %v10556_v35, %v361_v4 }
 0x190   : > { %2407 = vmatmul.mubr.f32.gmra.mrb[12].mxu0 %v10697_v46 }
 0x191   : > { %2412 = vmatprep.mubr.f32.mxu0 %v10702_v7  ;;  %v10758_v22 = vadd.f32 %v10576_v23, %v748_v28  ;;  %v380_v28 = vld [vmem:[%s8756_s21 + $0x268] sm:$0xff] }
 0x192   : > { %4929 = vmatmul.mubr.f32.gmra.mrb[168].mxu1 %v10415_v56  ;;  %v366_v56 = vld [vmem:[%s8756_s21 + $0x1f8] sm:$0xff]  ;;  %v767_v53 = vmul.f32 %v10566_v19, %v380_v28 }
 0x193   : > { %4933 = vmatprep.mubr.f32.mxu1 %v10421_v61  ;;  %v10753_v61 = vadd.f32 %v10587_v13, %v742_v8  ;;  %v753_v25 = vmul.f32 %v10556_v35, %v366_v56 }
 0x194   : > { %2413 = vmatmul.mubr.f32.gmra.mrb[14].mxu0 %v10711_v20 }
 0x195   : > { %2418 = vmatprep.mubr.f32.mxu0 %v10716_v17  ;;  %v10772_v31 = vadd.f32 %v10576_v23, %v753_v25  ;;  %v385_v25 = vld [vmem:[%s8756_s21 + $0x290] sm:$0xff] }
 0x196   : > { %4934 = vmatmul.mubr.f32.gmra.mrb[170].mxu1 %v10436_v3  ;;  %v371_v3 = vld [vmem:[%s8756_s21 + $0x220] sm:$0xff]  ;;  %v772_v55 = vmul.f32 %v10566_v19, %v385_v25 }
 0x197   : > { %4938 = vmatprep.mubr.f32.mxu1 %v10442_v42  ;;  %v10767_v42 = vadd.f32 %v10587_v13, %v747_v5  ;;  %v758_v10 = vmul.f32 %v10556_v35, %v371_v3 }
 0x198   : > { %2419 = vmatmul.mubr.f32.gmra.mrb[16].mxu0 %v10725_v15 }
 0x199   : > { %2424 = vmatprep.mubr.f32.mxu0 %v10730_v30  ;;  %v10786_v9 = vadd.f32 %v10576_v23, %v758_v10  ;;  %v390_v10 = vld [vmem:[%s8756_s21 + $0x2b8] sm:$0xff] }
 0x19a   : > { %4939 = vmatmul.mubr.f32.gmra.mrb[172].mxu1 %v10457_v40  ;;  %v376_v40 = vld [vmem:[%s8756_s21 + $0x248] sm:$0xff]  ;;  %v777_v12 = vmul.f32 %v10566_v19, %v390_v10 }
 0x19b   : > { %4943 = vmatprep.mubr.f32.mxu1 %v10463_v21  ;;  %v10781_v21 = vadd.f32 %v10587_v13, %v752_v16  ;;  %v763_v29 = vmul.f32 %v10556_v35, %v376_v40 }
 0x19c   : > { %2425 = vmatmul.mubr.f32.gmra.mrb[18].mxu0 %v10739_v41 }
 0x19d   : > { %2430 = vmatprep.mubr.f32.mxu0 %v10744_v24  ;;  %v10800_v4 = vadd.f32 %v10576_v23, %v763_v29  ;;  %v395_v29 = vld [vmem:[%s8756_s21 + $0x2e0] sm:$0xff] }
 0x19e   : > { %4944 = vmatmul.mubr.f32.gmra.mrb[174].mxu1 %v10472_v2  ;;  %v381_v2 = vld [vmem:[%s8756_s21 + $0x270] sm:$0xff]  ;;  %v782_v45 = vmul.f32 %v10566_v19, %v395_v29 }
 0x19f   : > { %4948 = vmatprep.mubr.f32.mxu1 %v10477_v27  ;;  %v10795_v27 = vadd.f32 %v10587_v13, %v757_v57  ;;  %v768_v8 = vmul.f32 %v10556_v35, %v381_v2 }
 0x1a0   : > { %2431 = vmatmul.mubr.f32.gmra.mrb[20].mxu0 %v10753_v61 }
 0x1a1   : > { %2436 = vmatprep.mubr.f32.mxu0 %v10758_v22  ;;  %v10814_v56 = vadd.f32 %v10576_v23, %v768_v8  ;;  %v400_v8 = vld [vmem:[%s8756_s21 + $0x308] sm:$0xff] }
 0x1a2   : > { %4949 = vmatmul.mubr.f32.gmra.mrb[176].mxu1 %v10486_v34  ;;  %v386_v34 = vld [vmem:[%s8756_s21 + $0x298] sm:$0xff]  ;;  %v787_v28 = vmul.f32 %v10566_v19, %v400_v8 }
 0x1a3   : > { %4953 = vmatprep.mubr.f32.mxu1 %v10491_v18  ;;  %v10809_v18 = vadd.f32 %v10587_v13, %v762_v54  ;;  %v773_v5 = vmul.f32 %v10556_v35, %v386_v34 }
 0x1a4   : > { %2437 = vmatmul.mubr.f32.gmra.mrb[22].mxu0 %v10767_v42 }
 0x1a5   : > { %2442 = vmatprep.mubr.f32.mxu0 %v10772_v31  ;;  %v10828_v3 = vadd.f32 %v10576_v23, %v773_v5  ;;  %v405_v5 = vld [vmem:[%s8756_s21 + $0x330] sm:$0xff] }
 0x1a6   : > { %4954 = vmatmul.mubr.f32.gmra.mrb[178].mxu1 %v10500_v60  ;;  %v391_v60 = vld [vmem:[%s8756_s21 + $0x2c0] sm:$0xff]  ;;  %v792_v25 = vmul.f32 %v10566_v19, %v405_v5 }
 0x1a7   : > { %4958 = vmatprep.mubr.f32.mxu1 %v10505_v63  ;;  %v10823_v63 = vadd.f32 %v10587_v13, %v767_v53  ;;  %v778_v16 = vmul.f32 %v10556_v35, %v391_v60 }
 0x1a8   : > { %2443 = vmatmul.mubr.f32.gmra.mrb[24].mxu0 %v10781_v21 }
 0x1a9   : > { %2448 = vmatprep.mubr.f32.mxu0 %v10786_v9  ;;  %v10842_v40 = vadd.f32 %v10576_v23, %v778_v16  ;;  %v410_v16 = vld [vmem:[%s8756_s21 + $0x358] sm:$0xff] }
 0x1aa   : > { %4959 = vmatmul.mubr.f32.gmra.mrb[180].mxu1 %v10514_v50  ;;  %v396_v50 = vld [vmem:[%s8756_s21 + $0x2e8] sm:$0xff]  ;;  %v797_v10 = vmul.f32 %v10566_v19, %v410_v16 }
 0x1ab   : > { %4963 = vmatprep.mubr.f32.mxu1 %v10519_v44  ;;  %v10837_v44 = vadd.f32 %v10587_v13, %v772_v55  ;;  %v783_v57 = vmul.f32 %v10556_v35, %v396_v50 }
 0x1ac   : > { %2449 = vmatmul.mubr.f32.gmra.mrb[26].mxu0 %v10795_v27 }
 0x1ad   : > { %2454 = vmatprep.mubr.f32.mxu0 %v10800_v4  ;;  %v10856_v2 = vadd.f32 %v10576_v23, %v783_v57  ;;  %v415_v57 = vld [vmem:[%s8756_s21 + $0x380] sm:$0xff] }
 0x1ae   : > { %4964 = vmatmul.mubr.f32.gmra.mrb[182].mxu1 %v10528_v0  ;;  %v401_v0 = vld [vmem:[%s8756_s21 + $0x310] sm:$0xff]  ;;  %v802_v29 = vmul.f32 %v10566_v19, %v415_v57 }
 0x1af   : > { %4968 = vmatprep.mubr.f32.mxu1 %v10533_v62  ;;  %v10851_v62 = vadd.f32 %v10587_v13, %v777_v12  ;;  %v788_v54 = vmul.f32 %v10556_v35, %v401_v0 }
 0x1b0   : > { %2455 = vmatmul.mubr.f32.gmra.mrb[28].mxu0 %v10809_v18 }
 0x1b1   : > { %2460 = vmatprep.mubr.f32.mxu0 %v10814_v56  ;;  %v10870_v34 = vadd.f32 %v10576_v23, %v788_v54  ;;  %v420_v54 = vld [vmem:[%s8756_s21 + $0x3a8] sm:$0xff] }
 0x1b2   : > { %4969 = vmatmul.mubr.f32.gmra.mrb[184].mxu1 %v10543_v36  ;;  %v406_v36 = vld [vmem:[%s8756_s21 + $0x338] sm:$0xff]  ;;  %v807_v8 = vmul.f32 %v10566_v19, %v420_v54 }
 0x1b3   : > { %4973 = vmatprep.mubr.f32.mxu1 %v10549_v39  ;;  %v10865_v39 = vadd.f32 %v10587_v13, %v782_v45  ;;  %v793_v53 = vmul.f32 %v10556_v35, %v406_v36 }
 0x1b4   : > { %2461 = vmatmul.mubr.f32.gmra.mrb[30].mxu0 %v10823_v63 }
 0x1b5   : > { %2466 = vmatprep.mubr.f32.mxu0 %v10828_v3  ;;  %v10884_v60 = vadd.f32 %v10576_v23, %v793_v53  ;;  %v425_v53 = vld [vmem:[%s8756_s21 + $0x3d0] sm:$0xff] }
 0x1b6   : > { %4974 = vmatmul.mubr.f32.gmra.mrb[186].mxu1 %v10563_v33  ;;  %v411_v33 = vld [vmem:[%s8756_s21 + $0x360] sm:$0xff]  ;;  %v812_v5 = vmul.f32 %v10566_v19, %v425_v53 }
 0x1b7   : > { %4978 = vmatprep.mubr.f32.mxu1 %v10570_v58  ;;  %v10879_v58 = vadd.f32 %v10587_v13, %v787_v28  ;;  %v798_v55 = vmul.f32 %v10556_v35, %v411_v33 }
 0x1b8   : > { %2467 = vmatmul.mubr.f32.gmra.mrb[32].mxu0 %v10837_v44 }
 0x1b9   : > { %2472 = vmatprep.mubr.f32.mxu0 %v10842_v40  ;;  %v10898_v50 = vadd.f32 %v10576_v23, %v798_v55  ;;  %v430_v55 = vld [vmem:[%s8756_s21 + $0x3f8] sm:$0xff] }
 0x1ba   : > { %4979 = vmatmul.mubr.f32.gmra.mrb[188].mxu1 %v10584_v51  ;;  %v416_v51 = vld [vmem:[%s8756_s21 + $0x388] sm:$0xff]  ;;  %v817_v16 = vmul.f32 %v10566_v19, %v430_v55 }
 0x1bb   : > { %5048 = vmatprep.mubr.f32.mxu1 %v10591_v43  ;;  %v10893_v43 = vadd.f32 %v10587_v13, %v792_v25  ;;  %v803_v12 = vmul.f32 %v10556_v35, %v416_v51 }
 0x1bc   : > { %2473 = vmatmul.mubr.f32.gmra.mrb[34].mxu0 %v10851_v62 }
 0x1bd   : > { %2478 = vmatprep.mubr.f32.mxu0 %v10856_v2  ;;  %v10912_v0 = vadd.f32 %v10576_v23, %v803_v12  ;;  %v435_v12 = vld [vmem:[%s8756_s21 + $0x420] sm:$0xff] }
 0x1be   : > { %5049 = vmatmul.mubr.f32.vlgmr.msra.gmra.mrb[46].mxu1 %v10600_v14  ;;  %v421_v14 = vld [vmem:[%s8756_s21 + $0x3b0] sm:$0xff]  ;;  %v822_v57 = vmul.f32 %v10566_v19, %v435_v12 }
 0x1bf   : > { %5053 = vmatprep.mubr.f32.mxu1 %v10605_v59  ;;  %v10907_v59 = vadd.f32 %v10587_v13, %v797_v10  ;;  %v808_v45 = vmul.f32 %v10556_v35, %v421_v14 }
 0x1c0   : > { %2479 = vmatmul.mubr.f32.gmra.mrb[36].mxu0 %v10865_v39 }
 0x1c1   : > { %2484 = vmatprep.mubr.f32.mxu0 %v10870_v34  ;;  %v10926_v36 = vadd.f32 %v10576_v23, %v808_v45  ;;  %v440_v45 = vld [vmem:[%s8756_s21 + $0x448] sm:$0xff] }
 0x1c2   : > { %5054 = vmatmul.mubr.f32.gmra.mrb[48].mxu1 %v10614_v38  ;;  %v426_v38 = vld [vmem:[%s8756_s21 + $0x3d8] sm:$0xff]  ;;  %v827_v54 = vmul.f32 %v10566_v19, %v440_v45 }
 0x1c3   : > { %5058 = vmatprep.mubr.f32.mxu1 %v10620_v49  ;;  %v10921_v49 = vadd.f32 %v10587_v13, %v802_v29  ;;  %v813_v28 = vmul.f32 %v10556_v35, %v426_v38 }
 0x1c4   : > { %2485 = vmatmul.mubr.f32.gmra.mrb[38].mxu0 %v10879_v58 }
 0x1c5   : > { %2490 = vmatprep.mubr.f32.mxu0 %v10884_v60  ;;  %v10940_v33 = vadd.f32 %v10576_v23, %v813_v28  ;;  %v445_v28 = vld [vmem:[%s8756_s21 + $0x470] sm:$0xff] }
 0x1c6   : > { %5059 = vmatmul.mubr.f32.gmra.mrb[50].mxu1 %v10630_v1  ;;  %v431_v1 = vld [vmem:[%s8756_s21 + $0x400] sm:$0xff]  ;;  %v832_v53 = vmul.f32 %v10566_v19, %v445_v28 }
 0x1c7   : > { %5063 = vmatprep.mubr.f32.mxu1 %v10635_v11  ;;  %v10935_v11 = vadd.f32 %v10587_v13, %v807_v8  ;;  %v818_v25 = vmul.f32 %v10556_v35, %v431_v1 }
 0x1c8   : > { %2491 = vmatmul.mubr.f32.gmra.mrb[40].mxu0 %v10893_v43 }
 0x1c9   : > { %2496 = vmatprep.mubr.f32.mxu0 %v10898_v50  ;;  %v10954_v51 = vadd.f32 %v10576_v23, %v818_v25  ;;  %v450_v25 = vld [vmem:[%s8756_s21 + $0x498] sm:$0xff] }
 0x1ca   : > { %5064 = vmatmul.mubr.f32.gmra.mrb[52].mxu1 %v10646_v26  ;;  %v436_v26 = vld [vmem:[%s8756_s21 + $0x428] sm:$0xff]  ;;  %v837_v55 = vmul.f32 %v10566_v19, %v450_v25 }
 0x1cb   : > { %5068 = vmatprep.mubr.f32.mxu1 %v10651_v47  ;;  %v10949_v47 = vadd.f32 %v10587_v13, %v812_v5  ;;  %v823_v10 = vmul.f32 %v10556_v35, %v436_v26 }
 0x1cc   : > { %2497 = vmatmul.mubr.f32.gmra.mrb[42].mxu0 %v10907_v59 }
 0x1cd   : > { %2502 = vmatprep.mubr.f32.mxu0 %v10912_v0  ;;  %v10968_v14 = vadd.f32 %v10576_v23, %v823_v10  ;;  %v455_v10 = vld [vmem:[%s8756_s21 + $0x4c0] sm:$0xff] }
 0x1ce   : > { %5069 = vmatmul.mubr.f32.gmra.mrb[54].mxu1 %v10662_v52  ;;  %v441_v52 = vld [vmem:[%s8756_s21 + $0x450] sm:$0xff]  ;;  %v842_v12 = vmul.f32 %v10566_v19, %v455_v10 }
 0x1cf   : > { %5073 = vmatprep.mubr.f32.mxu1 %v10667_v48  ;;  %v10963_v48 = vadd.f32 %v10587_v13, %v817_v16  ;;  %v828_v29 = vmul.f32 %v10556_v35, %v441_v52 }
 0x1d0   : > { %2503 = vmatmul.mubr.f32.gmra.mrb[44].mxu0 %v10921_v49 }
 0x1d1   : > { %2508 = vmatprep.mubr.f32.mxu0 %v10926_v36  ;;  %v10982_v38 = vadd.f32 %v10576_v23, %v828_v29  ;;  %v460_v29 = vld [vmem:[%s8756_s21 + $0x4e8] sm:$0xff] }
 0x1d2   : > { %5074 = vmatmul.mubr.f32.gmra.mrb[56].mxu1 %v10680_v37  ;;  %v446_v37 = vld [vmem:[%s8756_s21 + $0x478] sm:$0xff]  ;;  %v847_v45 = vmul.f32 %v10566_v19, %v460_v29 }
 0x1d3   : > { %5078 = vmatprep.mubr.f32.mxu1 %v10685_v6  ;;  %v10977_v6 = vadd.f32 %v10587_v13, %v822_v57  ;;  %v833_v8 = vmul.f32 %v10556_v35, %v446_v37 }
 0x1d4   : > { %2509 = vmatmul.mubr.f32.gmra.mrb[46].mxu0 %v10935_v11 }
 0x1d5   : > { %2514 = vmatprep.mubr.f32.mxu0 %v10940_v33  ;;  %v10996_v1 = vadd.f32 %v10576_v23, %v833_v8  ;;  %v465_v8 = vld [vmem:[%s8756_s21 + $0x510] sm:$0xff] }
 0x1d6   : > { %5079 = vmatmul.mubr.f32.gmra.mrb[58].mxu1 %v10697_v46  ;;  %v451_v46 = vld [vmem:[%s8756_s21 + $0x4a0] sm:$0xff]  ;;  %v852_v28 = vmul.f32 %v10566_v19, %v465_v8 }
 0x1d7   : > { %5083 = vmatprep.mubr.f32.mxu1 %v10702_v7  ;;  %v10991_v7 = vadd.f32 %v10587_v13, %v827_v54  ;;  %v838_v5 = vmul.f32 %v10556_v35, %v451_v46 }
 0x1d8   : > { %2515 = vmatmul.mubr.f32.gmra.mrb[48].mxu0 %v10949_v47 }
 0x1d9   : > { %2520 = vmatprep.mubr.f32.mxu0 %v10954_v51  ;;  %v11010_v26 = vadd.f32 %v10576_v23, %v838_v5  ;;  %v470_v5 = vld [vmem:[%s8756_s21 + $0x538] sm:$0xff] }
 0x1da   : > { %5084 = vmatmul.mubr.f32.gmra.mrb[60].mxu1 %v10711_v20  ;;  %v456_v20 = vld [vmem:[%s8756_s21 + $0x4c8] sm:$0xff]  ;;  %v857_v25 = vmul.f32 %v10566_v19, %v470_v5 }
 0x1db   : > { %5088 = vmatprep.mubr.f32.mxu1 %v10716_v17  ;;  %v11005_v17 = vadd.f32 %v10587_v13, %v832_v53  ;;  %v843_v16 = vmul.f32 %v10556_v35, %v456_v20 }
 0x1dc   : > { %2521 = vmatmul.mubr.f32.gmra.mrb[50].mxu0 %v10963_v48 }
 0x1dd   : > { %2526 = vmatprep.mubr.f32.mxu0 %v10968_v14  ;;  %v11024_v52 = vadd.f32 %v10576_v23, %v843_v16  ;;  %v475_v16 = vld [vmem:[%s8756_s21 + $0x560] sm:$0xff] }
 0x1de   : > { %5089 = vmatmul.mubr.f32.gmra.mrb[62].mxu1 %v10725_v15  ;;  %v461_v15 = vld [vmem:[%s8756_s21 + $0x4f0] sm:$0xff]  ;;  %v862_v10 = vmul.f32 %v10566_v19, %v475_v16 }
 0x1df   : > { %5093 = vmatprep.mubr.f32.mxu1 %v10730_v30  ;;  %v11019_v30 = vadd.f32 %v10587_v13, %v837_v55  ;;  %v848_v57 = vmul.f32 %v10556_v35, %v461_v15 }
 0x1e0   : > { %2527 = vmatmul.mubr.f32.gmra.mrb[52].mxu0 %v10977_v6 }
 0x1e1   : > { %2532 = vmatprep.mubr.f32.mxu0 %v10982_v38  ;;  %v11038_v37 = vadd.f32 %v10576_v23, %v848_v57  ;;  %v480_v57 = vld [vmem:[%s8756_s21 + $0x588] sm:$0xff] }
 0x1e2   : > { %5094 = vmatmul.mubr.f32.gmra.mrb[64].mxu1 %v10739_v41  ;;  %v466_v41 = vld [vmem:[%s8756_s21 + $0x518] sm:$0xff]  ;;  %v867_v29 = vmul.f32 %v10566_v19, %v480_v57 }
 0x1e3   : > { %5098 = vmatprep.mubr.f32.mxu1 %v10744_v24  ;;  %v11033_v24 = vadd.f32 %v10587_v13, %v842_v12  ;;  %v853_v54 = vmul.f32 %v10556_v35, %v466_v41 }
 0x1e4   : > { %2533 = vmatmul.mubr.f32.gmra.mrb[54].mxu0 %v10991_v7 }
 0x1e5   : > { %2538 = vmatprep.mubr.f32.mxu0 %v10996_v1  ;;  %v11052_v46 = vadd.f32 %v10576_v23, %v853_v54  ;;  %v485_v54 = vld [vmem:[%s8756_s21 + $0x5b0] sm:$0xff] }
 0x1e6   : > { %5099 = vmatmul.mubr.f32.gmra.mrb[66].mxu1 %v10753_v61  ;;  %v471_v61 = vld [vmem:[%s8756_s21 + $0x540] sm:$0xff]  ;;  %v872_v8 = vmul.f32 %v10566_v19, %v485_v54 }
 0x1e7   : > { %5103 = vmatprep.mubr.f32.mxu1 %v10758_v22  ;;  %v11047_v22 = vadd.f32 %v10587_v13, %v847_v45  ;;  %v858_v53 = vmul.f32 %v10556_v35, %v471_v61 }
 0x1e8   : > { %2539 = vmatmul.mubr.f32.gmra.mrb[56].mxu0 %v11005_v17 }
 0x1e9   : > { %2544 = vmatprep.mubr.f32.mxu0 %v11010_v26  ;;  %v11066_v20 = vadd.f32 %v10576_v23, %v858_v53  ;;  %v490_v53 = vld [vmem:[%s8756_s21 + $0x5d8] sm:$0xff] }
 0x1ea   : > { %5104 = vmatmul.mubr.f32.gmra.mrb[68].mxu1 %v10767_v42  ;;  %v476_v42 = vld [vmem:[%s8756_s21 + $0x568] sm:$0xff]  ;;  %v877_v5 = vmul.f32 %v10566_v19, %v490_v53 }
 0x1eb   : > { %5108 = vmatprep.mubr.f32.mxu1 %v10772_v31  ;;  %v11061_v31 = vadd.f32 %v10587_v13, %v852_v28  ;;  %v863_v55 = vmul.f32 %v10556_v35, %v476_v42 }
 0x1ec   : > { %2545 = vmatmul.mubr.f32.gmra.mrb[58].mxu0 %v11019_v30 }
 0x1ed   : > { %2550 = vmatprep.mubr.f32.mxu0 %v11024_v52  ;;  %v11080_v15 = vadd.f32 %v10576_v23, %v863_v55  ;;  %v495_v55 = vld [vmem:[%s8756_s21 + $0x600] sm:$0xff] }
 0x1ee   : > { %5109 = vmatmul.mubr.f32.gmra.mrb[70].mxu1 %v10781_v21  ;;  %v481_v21 = vld [vmem:[%s8756_s21 + $0x590] sm:$0xff]  ;;  %v882_v16 = vmul.f32 %v10566_v19, %v495_v55 }
 0x1ef   : > { %5113 = vmatprep.mubr.f32.mxu1 %v10786_v9  ;;  %v11075_v9 = vadd.f32 %v10587_v13, %v857_v25  ;;  %v868_v12 = vmul.f32 %v10556_v35, %v481_v21 }
 0x1f0   : > { %2551 = vmatmul.mubr.f32.gmra.mrb[60].mxu0 %v11033_v24 }
 0x1f1   : > { %2556 = vmatprep.mubr.f32.mxu0 %v11038_v37  ;;  %v11094_v41 = vadd.f32 %v10576_v23, %v868_v12  ;;  %v500_v12 = vld [vmem:[%s8756_s21 + $0x628] sm:$0xff] }
 0x1f2   : > { %5114 = vmatmul.mubr.f32.gmra.mrb[72].mxu1 %v10795_v27  ;;  %v486_v27 = vld [vmem:[%s8756_s21 + $0x5b8] sm:$0xff]  ;;  %v887_v57 = vmul.f32 %v10566_v19, %v500_v12 }
 0x1f3   : > { %5118 = vmatprep.mubr.f32.mxu1 %v10800_v4  ;;  %v11089_v4 = vadd.f32 %v10587_v13, %v862_v10  ;;  %v873_v45 = vmul.f32 %v10556_v35, %v486_v27 }
 0x1f4   : > { %2557 = vmatmul.mubr.f32.gmra.mrb[62].mxu0 %v11047_v22 }
 0x1f5   : > { %2562 = vmatprep.mubr.f32.mxu0 %v11052_v46  ;;  %v11108_v61 = vadd.f32 %v10576_v23, %v873_v45  ;;  %v505_v45 = vld [vmem:[%s8756_s21 + $0x650] sm:$0xff] }
 0x1f6   : > { %5119 = vmatmul.mubr.f32.gmra.mrb[74].mxu1 %v10809_v18  ;;  %v491_v18 = vld [vmem:[%s8756_s21 + $0x5e0] sm:$0xff]  ;;  %v892_v54 = vmul.f32 %v10566_v19, %v505_v45 }
 0x1f7   : > { %5123 = vmatprep.mubr.f32.mxu1 %v10814_v56  ;;  %v11103_v56 = vadd.f32 %v10587_v13, %v867_v29  ;;  %v878_v28 = vmul.f32 %v10556_v35, %v491_v18 }
 0x1f8   : > { %2563 = vmatmul.mubr.f32.gmra.mrb[64].mxu0 %v11061_v31 }
 0x1f9   : > { %2568 = vmatprep.mubr.f32.mxu0 %v11066_v20  ;;  %v11122_v42 = vadd.f32 %v10576_v23, %v878_v28  ;;  %v510_v28 = vld [vmem:[%s8756_s21 + $0x678] sm:$0xff] }
 0x1fa   : > { %5124 = vmatmul.mubr.f32.gmra.mrb[76].mxu1 %v10823_v63  ;;  %v496_v63 = vld [vmem:[%s8756_s21 + $0x608] sm:$0xff]  ;;  %v897_v53 = vmul.f32 %v10566_v19, %v510_v28 }
 0x1fb   : > { %5128 = vmatprep.mubr.f32.mxu1 %v10828_v3  ;;  %v11117_v3 = vadd.f32 %v10587_v13, %v872_v8  ;;  %v883_v25 = vmul.f32 %v10556_v35, %v496_v63 }
 0x1fc   : > { %2569 = vmatmul.mubr.f32.gmra.mrb[66].mxu0 %v11075_v9 }
 0x1fd   : > { %2574 = vmatprep.mubr.f32.mxu0 %v11080_v15  ;;  %v11136_v21 = vadd.f32 %v10576_v23, %v883_v25  ;;  %v515_v25 = vld [vmem:[%s8756_s21 + $0x6a0] sm:$0xff] }
 0x1fe   : > { %5129 = vmatmul.mubr.f32.gmra.mrb[78].mxu1 %v10837_v44  ;;  %v501_v44 = vld [vmem:[%s8756_s21 + $0x630] sm:$0xff]  ;;  %v902_v55 = vmul.f32 %v10566_v19, %v515_v25 }
 0x1ff   : > { %5133 = vmatprep.mubr.f32.mxu1 %v10842_v40  ;;  %v11131_v40 = vadd.f32 %v10587_v13, %v877_v5  ;;  %v888_v10 = vmul.f32 %v10556_v35, %v501_v44 }
 0x200   : > { %2575 = vmatmul.mubr.f32.gmra.mrb[68].mxu0 %v11089_v4 }
 0x201   : > { %2580 = vmatprep.mubr.f32.mxu0 %v11094_v41  ;;  %v11150_v27 = vadd.f32 %v10576_v23, %v888_v10  ;;  %v520_v10 = vld [vmem:[%s8756_s21 + $0x6c8] sm:$0xff] }
 0x202   : > { %5134 = vmatmul.mubr.f32.gmra.mrb[80].mxu1 %v10851_v62  ;;  %v506_v62 = vld [vmem:[%s8756_s21 + $0x658] sm:$0xff]  ;;  %v907_v12 = vmul.f32 %v10566_v19, %v520_v10 }
 0x203   : > { %5138 = vmatprep.mubr.f32.mxu1 %v10856_v2  ;;  %v11145_v2 = vadd.f32 %v10587_v13, %v882_v16  ;;  %v893_v29 = vmul.f32 %v10556_v35, %v506_v62 }
 0x204   : > { %2581 = vmatmul.mubr.f32.gmra.mrb[70].mxu0 %v11103_v56 }
 0x205   : > { %2586 = vmatprep.mubr.f32.mxu0 %v11108_v61  ;;  %v11164_v18 = vadd.f32 %v10576_v23, %v893_v29  ;;  %v525_v29 = vld [vmem:[%s8756_s21 + $0x6f0] sm:$0xff] }
 0x206   : > { %5139 = vmatmul.mubr.f32.gmra.mrb[82].mxu1 %v10865_v39  ;;  %v511_v39 = vld [vmem:[%s8756_s21 + $0x680] sm:$0xff]  ;;  %v912_v45 = vmul.f32 %v10566_v19, %v525_v29 }
 0x207   : > { %5143 = vmatprep.mubr.f32.mxu1 %v10870_v34  ;;  %v11159_v34 = vadd.f32 %v10587_v13, %v887_v57  ;;  %v898_v8 = vmul.f32 %v10556_v35, %v511_v39 }
 0x208   : > { %2587 = vmatmul.mubr.f32.gmra.mrb[72].mxu0 %v11117_v3 }
 0x209   : > { %2592 = vmatprep.mubr.f32.mxu0 %v11122_v42  ;;  %v11178_v63 = vadd.f32 %v10576_v23, %v898_v8  ;;  %v530_v8 = vld [vmem:[%s8756_s21 + $0x718] sm:$0xff] }
 0x20a   : > { %5144 = vmatmul.mubr.f32.gmra.mrb[84].mxu1 %v10879_v58  ;;  %v516_v58 = vld [vmem:[%s8756_s21 + $0x6a8] sm:$0xff]  ;;  %v917_v28 = vmul.f32 %v10566_v19, %v530_v8 }
 0x20b   : > { %5148 = vmatprep.mubr.f32.mxu1 %v10884_v60  ;;  %v11173_v60 = vadd.f32 %v10587_v13, %v892_v54  ;;  %v903_v5 = vmul.f32 %v10556_v35, %v516_v58 }
 0x20c   : > { %2593 = vmatmul.mubr.f32.gmra.mrb[74].mxu0 %v11131_v40 }
 0x20d   : > { %2598 = vmatprep.mubr.f32.mxu0 %v11136_v21  ;;  %v11192_v44 = vadd.f32 %v10576_v23, %v903_v5  ;;  %v535_v5 = vld [vmem:[%s8756_s21 + $0x740] sm:$0xff] }
 0x20e   : > { %5149 = vmatmul.mubr.f32.gmra.mrb[86].mxu1 %v10893_v43  ;;  %v521_v43 = vld [vmem:[%s8756_s21 + $0x6d0] sm:$0xff]  ;;  %v922_v25 = vmul.f32 %v10566_v19, %v535_v5 }
 0x20f   : > { %5153 = vmatprep.mubr.f32.mxu1 %v10898_v50  ;;  %v11187_v50 = vadd.f32 %v10587_v13, %v897_v53  ;;  %v908_v16 = vmul.f32 %v10556_v35, %v521_v43 }
 0x210   : > { %2599 = vmatmul.mubr.f32.gmra.mrb[76].mxu0 %v11145_v2 }
 0x211   : > { %2604 = vmatprep.mubr.f32.mxu0 %v11150_v27  ;;  %v11206_v62 = vadd.f32 %v10576_v23, %v908_v16  ;;  %v540_v16 = vld [vmem:[%s8756_s21 + $0x768] sm:$0xff] }
 0x212   : > { %5154 = vmatmul.mubr.f32.gmra.mrb[88].mxu1 %v10907_v59  ;;  %v526_v59 = vld [vmem:[%s8756_s21 + $0x6f8] sm:$0xff]  ;;  %v927_v10 = vmul.f32 %v10566_v19, %v540_v16 }
 0x213   : > { %5158 = vmatprep.mubr.f32.mxu1 %v10912_v0  ;;  %v11201_v0 = vadd.f32 %v10587_v13, %v902_v55  ;;  %v913_v57 = vmul.f32 %v10556_v35, %v526_v59 }
 0x214   : > { %2605 = vmatmul.mubr.f32.gmra.mrb[78].mxu0 %v11159_v34 }
 0x215   : > { %2610 = vmatprep.mubr.f32.mxu0 %v11164_v18  ;;  %v11220_v39 = vadd.f32 %v10576_v23, %v913_v57  ;;  %v545_v57 = vld [vmem:[%s8756_s21 + $0x790] sm:$0xff] }
 0x216   : > { %5159 = vmatmul.mubr.f32.gmra.mrb[90].mxu1 %v10921_v49  ;;  %v531_v49 = vld [vmem:[%s8756_s21 + $0x720] sm:$0xff]  ;;  %v932_v29 = vmul.f32 %v10566_v19, %v545_v57 }
 0x217   : > { %5163 = vmatprep.mubr.f32.mxu1 %v10926_v36  ;;  %v11215_v36 = vadd.f32 %v10587_v13, %v907_v12  ;;  %v918_v54 = vmul.f32 %v10556_v35, %v531_v49 }
 0x218   : > { %2611 = vmatmul.mubr.f32.gmra.mrb[80].mxu0 %v11173_v60 }
 0x219   : > { %2616 = vmatprep.mubr.f32.mxu0 %v11178_v63  ;;  %v11234_v58 = vadd.f32 %v10576_v23, %v918_v54  ;;  %v550_v54 = vld [vmem:[%s8756_s21 + $0x7b8] sm:$0xff] }
 0x21a   : > { %5164 = vmatmul.mubr.f32.gmra.mrb[92].mxu1 %v10935_v11  ;;  %v536_v11 = vld [vmem:[%s8756_s21 + $0x748] sm:$0xff]  ;;  %v937_v8 = vmul.f32 %v10566_v19, %v550_v54 }
 0x21b   : > { %5168 = vmatprep.mubr.f32.mxu1 %v10940_v33  ;;  %v11229_v33 = vadd.f32 %v10587_v13, %v912_v45  ;;  %v923_v53 = vmul.f32 %v10556_v35, %v536_v11 }
 0x21c   : > { %2617 = vmatmul.mubr.f32.gmra.mrb[82].mxu0 %v11187_v50 }
 0x21d   : > { %2622 = vmatprep.mubr.f32.mxu0 %v11192_v44  ;;  %v11248_v43 = vadd.f32 %v10576_v23, %v923_v53  ;;  %v555_v53 = vld [vmem:[%s8756_s21 + $0x7e0] sm:$0xff] }
 0x21e   : > { %5169 = vmatmul.mubr.f32.gmra.mrb[94].mxu1 %v10949_v47  ;;  %v541_v47 = vld [vmem:[%s8756_s21 + $0x770] sm:$0xff]  ;;  %v942_v5 = vmul.f32 %v10566_v19, %v555_v53 }
 0x21f   : > { %5173 = vmatprep.mubr.f32.mxu1 %v10954_v51  ;;  %v11243_v51 = vadd.f32 %v10587_v13, %v917_v28  ;;  %v928_v55 = vmul.f32 %v10556_v35, %v541_v47 }
 0x220   : > { %2623 = vmatmul.mubr.f32.gmra.mrb[84].mxu0 %v11201_v0 }
 0x221   : > { %2628 = vmatprep.mubr.f32.mxu0 %v11206_v62  ;;  %v11262_v59 = vadd.f32 %v10576_v23, %v928_v55  ;;  %v560_v55 = vld [vmem:[%s8756_s21 + $0x808] sm:$0xff] }
 0x222   : > { %5174 = vmatmul.mubr.f32.gmra.mrb[96].mxu1 %v10963_v48  ;;  %v546_v48 = vld [vmem:[%s8756_s21 + $0x798] sm:$0xff]  ;;  %v947_v16 = vmul.f32 %v10566_v19, %v560_v55 }
 0x223   : > { %5178 = vmatprep.mubr.f32.mxu1 %v10968_v14  ;;  %v11257_v14 = vadd.f32 %v10587_v13, %v922_v25  ;;  %v933_v12 = vmul.f32 %v10556_v35, %v546_v48 }
 0x224   : > { %2629 = vmatmul.mubr.f32.gmra.mrb[86].mxu0 %v11215_v36 }
 0x225   : > { %2634 = vmatprep.mubr.f32.mxu0 %v11220_v39  ;;  %v11276_v49 = vadd.f32 %v10576_v23, %v933_v12  ;;  %v565_v12 = vld [vmem:[%s8756_s21 + $0x830] sm:$0xff] }
 0x226   : > { %5179 = vmatmul.mubr.f32.gmra.mrb[98].mxu1 %v10977_v6  ;;  %v551_v6 = vld [vmem:[%s8756_s21 + $0x7c0] sm:$0xff]  ;;  %v952_v57 = vmul.f32 %v10566_v19, %v565_v12 }
 0x227   : > { %5183 = vmatprep.mubr.f32.mxu1 %v10982_v38  ;;  %v11271_v38 = vadd.f32 %v10587_v13, %v927_v10  ;;  %v938_v45 = vmul.f32 %v10556_v35, %v551_v6 }
 0x228   : > { %2635 = vmatmul.mubr.f32.gmra.mrb[88].mxu0 %v11229_v33 }
 0x229   : > { %2640 = vmatprep.mubr.f32.mxu0 %v11234_v58  ;;  %v11290_v11 = vadd.f32 %v10576_v23, %v938_v45  ;;  %v570_v45 = vld [vmem:[%s8756_s21 + $0x858] sm:$0xff] }
 0x22a   : > { %5184 = vmatmul.mubr.f32.gmra.mrb[100].mxu1 %v10991_v7  ;;  %v556_v7 = vld [vmem:[%s8756_s21 + $0x7e8] sm:$0xff]  ;;  %v957_v54 = vmul.f32 %v10566_v19, %v570_v45 }
 0x22b   : > { %5188 = vmatprep.mubr.f32.mxu1 %v10996_v1  ;;  %v11285_v1 = vadd.f32 %v10587_v13, %v932_v29  ;;  %v943_v28 = vmul.f32 %v10556_v35, %v556_v7 }
 0x22c   : > { %2641 = vmatmul.mubr.f32.gmra.mrb[90].mxu0 %v11243_v51 }
 0x22d   : > { %2646 = vmatprep.mubr.f32.mxu0 %v11248_v43  ;;  %v11304_v47 = vadd.f32 %v10576_v23, %v943_v28  ;;  %v575_v28 = vld [vmem:[%s8756_s21 + $0x880] sm:$0xff] }
 0x22e   : > { %5189 = vmatmul.mubr.f32.gmra.mrb[102].mxu1 %v11005_v17  ;;  %v561_v17 = vld [vmem:[%s8756_s21 + $0x810] sm:$0xff]  ;;  %v962_v53 = vmul.f32 %v10566_v19, %v575_v28 }
 0x22f   : > { %5193 = vmatprep.mubr.f32.mxu1 %v11010_v26  ;;  %v11299_v26 = vadd.f32 %v10587_v13, %v937_v8  ;;  %v948_v25 = vmul.f32 %v10556_v35, %v561_v17 }
 0x230   : > { %2647 = vmatmul.mubr.f32.gmra.mrb[92].mxu0 %v11257_v14 }
 0x231   : > { %2652 = vmatprep.mubr.f32.mxu0 %v11262_v59  ;;  %v11318_v48 = vadd.f32 %v10576_v23, %v948_v25  ;;  %v580_v25 = vld [vmem:[%s8756_s21 + $0x8a8] sm:$0xff] }
 0x232   : > { %5194 = vmatmul.mubr.f32.gmra.mrb[104].mxu1 %v11019_v30  ;;  %v566_v30 = vld [vmem:[%s8756_s21 + $0x838] sm:$0xff]  ;;  %v967_v55 = vmul.f32 %v10566_v19, %v580_v25 }
 0x233   : > { %5198 = vmatprep.mubr.f32.mxu1 %v11024_v52  ;;  %v11313_v52 = vadd.f32 %v10587_v13, %v942_v5  ;;  %v953_v10 = vmul.f32 %v10556_v35, %v566_v30 }
 0x234   : > { %2653 = vmatmul.mubr.f32.gmra.mrb[94].mxu0 %v11271_v38 }
 0x235   : > { %2658 = vmatprep.mubr.f32.mxu0 %v11276_v49  ;;  %v11332_v6 = vadd.f32 %v10576_v23, %v953_v10  ;;  %v585_v10 = vld [vmem:[%s8756_s21 + $0x8d0] sm:$0xff] }
 0x236   : > { %5199 = vmatmul.mubr.f32.gmra.mrb[106].mxu1 %v11033_v24  ;;  %v571_v24 = vld [vmem:[%s8756_s21 + $0x860] sm:$0xff]  ;;  %v972_v12 = vmul.f32 %v10566_v19, %v585_v10  ;;  %v4540_v10 = vld [vmem:[%s16058_s4 + $0x208] sm:$0xff] }
 0x237   : > { %5203 = vmatprep.mubr.f32.mxu1 %v11038_v37  ;;  %v11327_v37 = vadd.f32 %v10587_v13, %v947_v16  ;;  %v958_v29 = vmul.f32 %v10556_v35, %v571_v24 }
 0x238   : > { %2659 = vmatmul.mubr.f32.gmra.mrb[96].mxu0 %v11285_v1 }
 0x239   : > { %2664 = vmatprep.mubr.f32.mxu0 %v11290_v11  ;;  %v11346_v7 = vadd.f32 %v10576_v23, %v958_v29  ;;  %v590_v29 = vld [vmem:[%s8756_s21 + $0x8f8] sm:$0xff] }
 0x23a   : > { %5204 = vmatmul.mubr.f32.gmra.mrb[108].mxu1 %v11047_v22  ;;  %v576_v22 = vld [vmem:[%s8756_s21 + $0x888] sm:$0xff]  ;;  %v977_v45 = vmul.f32 %v10566_v19, %v590_v29 }
 0x23b   : > { %5208 = vmatprep.mubr.f32.mxu1 %v11052_v46  ;;  %v11341_v46 = vadd.f32 %v10587_v13, %v952_v57  ;;  %v963_v8 = vmul.f32 %v10556_v35, %v576_v22 }
 0x23c   : > { %2665 = vmatmul.mubr.f32.gmra.mrb[98].mxu0 %v11299_v26 }
 0x23d   : > { %2670 = vmatprep.mubr.f32.mxu0 %v11304_v47  ;;  %v11360_v17 = vadd.f32 %v10576_v23, %v963_v8  ;;  %v595_v8 = vld [vmem:[%s8756_s21 + $0x920] sm:$0xff] }
 0x23e   : > { %5209 = vmatmul.mubr.f32.gmra.mrb[110].mxu1 %v11061_v31  ;;  %v581_v31 = vld [vmem:[%s8756_s21 + $0x8b0] sm:$0xff]  ;;  %v982_v28 = vmul.f32 %v10566_v19, %v595_v8 }
 0x23f   : > { %5213 = vmatprep.mubr.f32.mxu1 %v11066_v20  ;;  %v11355_v20 = vadd.f32 %v10587_v13, %v957_v54  ;;  %v968_v5 = vmul.f32 %v10556_v35, %v581_v31 }
 0x240   : > { %2671 = vmatmul.mubr.f32.gmra.mrb[100].mxu0 %v11313_v52 }
 0x241   : > { %2676 = vmatprep.mubr.f32.mxu0 %v11318_v48  ;;  %v11374_v30 = vadd.f32 %v10576_v23, %v968_v5  ;;  %v600_v5 = vld [vmem:[%s8756_s21 + $0x948] sm:$0xff] }
 0x242   : > { %5214 = vmatmul.mubr.f32.gmra.mrb[112].mxu1 %v11075_v9  ;;  %v586_v9 = vld [vmem:[%s8756_s21 + $0x8d8] sm:$0xff]  ;;  %v987_v25 = vmul.f32 %v10566_v19, %v600_v5  ;;  %v615_v5 = vld [vmem:[%s8756_s21 + $0x9c0] sm:$0xff] }
 0x243   : > { %5218 = vmatprep.mubr.f32.mxu1 %v11080_v15  ;;  %v11369_v15 = vadd.f32 %v10587_v13, %v962_v53  ;;  %v973_v16 = vmul.f32 %v10556_v35, %v586_v9 }
 0x244   : > { %2677 = vmatmul.mubr.f32.gmra.mrb[102].mxu0 %v11327_v37 }
 0x245   : > { %2682 = vmatprep.mubr.f32.mxu0 %v11332_v6  ;;  %v11388_v24 = vadd.f32 %v10576_v23, %v973_v16  ;;  %v605_v16 = vld [vmem:[%s8756_s21 + $0x970] sm:$0xff] }
 0x246   : > { %5219 = vmatmul.mubr.f32.gmra.mrb[114].mxu1 %v11089_v4  ;;  %v591_v4 = vld [vmem:[%s8756_s21 + $0x900] sm:$0xff] }
 0x247   : > { %5223 = vmatprep.mubr.f32.mxu1 %v11094_v41  ;;  %v11383_v41 = vadd.f32 %v10587_v13, %v967_v55  ;;  %v978_v57 = vmul.f32 %v10556_v35, %v591_v4 }
 0x248   : > { %2683 = vmatmul.mubr.f32.gmra.mrb[104].mxu0 %v11341_v46 }
 0x249   : > { %2688 = vmatprep.mubr.f32.mxu0 %v11346_v7  ;;  %v11402_v22 = vadd.f32 %v10576_v23, %v978_v57  ;;  %v992_v57 = vmul.f32 %v10566_v19, %v605_v16 }
 0x24a   : > { %5224 = vmatmul.mubr.f32.gmra.mrb[116].mxu1 %v11103_v56  ;;  %v596_v56 = vld [vmem:[%s8756_s21 + $0x928] sm:$0xff] }
 0x24b   : > { %5228 = vmatprep.mubr.f32.mxu1 %v11108_v61  ;;  %v11397_v61 = vadd.f32 %v10587_v13, %v972_v12  ;;  %v983_v54 = vmul.f32 %v10556_v35, %v596_v56  ;;  %v11445_v12 = vadd.f32 %v10587_v13, %v987_v25  ;;  %v610_v56 = vld [vmem:[%s8756_s21 + $0x998] sm:$0xff]  ;;  %v4544_v25 = vld [vmem:[%s16058_s4 + $0x228] sm:$0xff] }
 0x24c   : > { %2689 = vmatmul.mubr.f32.gmra.mrb[106].mxu0 %v11355_v20 }
 0x24d   : > { %2694 = vmatprep.mubr.f32.mxu0 %v11360_v17  ;;  %v11416_v31 = vadd.f32 %v10576_v23, %v983_v54  ;;  %v4542_v54 = vld [vmem:[%s16058_s4 + $0x218] sm:$0xff] }
 0x24e   : > { %5229 = vmatmul.mubr.f32.gmra.mrb[118].mxu1 %v11117_v3  ;;  %v601_v3 = vld [vmem:[%s8756_s21 + $0x950] sm:$0xff] }
 0x24f   : > { %5233 = vmatprep.mubr.f32.mxu1 %v11122_v42  ;;  %v11411_v42 = vadd.f32 %v10587_v13, %v977_v45  ;;  %v988_v53 = vmul.f32 %v10556_v35, %v601_v3  ;;  %v4541_v45 = vld [vmem:[%s16058_s4 + $0x210] sm:$0xff]  ;;  %v11465_v3 = vadd.f32 %v10587_v13, %v992_v57  ;;  %v4546_v57 = vld [vmem:[%s16058_s4 + $0x238] sm:$0xff] }
 0x250   : > { %2695 = vmatmul.mubr.f32.gmra.mrb[108].mxu0 %v11369_v15  ;;  %v7776_v8 = vpack.c.bf16 %v4542_v54, %v4541_v45  ;;  %v625_v54 = vld [vmem:[%s8756_s21 + $0xa10] sm:$0xff] }
 0x251   : > { %2700 = vmatprep.mubr.f32.mxu0 %v11374_v30  ;;  %v11430_v9 = vadd.f32 %v10576_v23, %v988_v53 }
 0x252   : > { %5234 = vmatmul.mubr.f32.gmra.mrb[120].mxu1 %v11131_v40  ;;  %v606_v40 = vld [vmem:[%s8756_s21 + $0x978] sm:$0xff] }
 0x253   : > { %5238 = vmatprep.mubr.f32.mxu1 %v11136_v21  ;;  %v11425_v21 = vadd.f32 %v10587_v13, %v982_v28  ;;  %v993_v55 = vmul.f32 %v10556_v35, %v606_v40  ;;  %v997_v28 = vmul.f32 %v10566_v19, %v610_v56  ;;  %v4543_v40 = vld [vmem:[%s16058_s4 + $0x220] sm:$0xff] }
 0x254   : > { %2701 = vmatmul.mubr.f32.gmra.mrb[110].mxu0 %v11383_v41 }
 0x255   : > { %2706 = vmatprep.mubr.f32.mxu0 %v11388_v24  ;;  %v11485_v16 = vadd.f32 %v10587_v13, %v997_v28  ;;  %v4548_v28 = vld [vmem:[%s16058_s4 + $0x248] sm:$0xf] }
 0x256   : > { %5239 = vmatmul.mubr.f32.gmra.mrb[122].mxu1 %v11145_v2  ;;  %v611_v2 = vld [vmem:[%s8756_s21 + $0x9a0] sm:$0xff] }
 0x257   : > { %5243 = vmatprep.mubr.f32.mxu1 %v11150_v27  ;;  %v4539_v27 = vld [vmem:[%s16058_s4 + $0x200] sm:$0xff]  ;;  %v998_v29 = vmul.f32 %v10556_v35, %v611_v2  ;;  %v1002_v2 = vmul.f32 %v10566_v19, %v615_v5 }
 0x258   : > { %2707 = vmatmul.mubr.f32.gmra.mrb[112].mxu0 %v11397_v61  ;;  %v7772_v4 = vpack.c.bf16 %v4540_v10, %v4539_v27  ;;  %v620_v10 = vld [vmem:[%s8756_s21 + $0x9e8] sm:$0xff] }
 0x259   : > { %2712 = vmatprep.mubr.f32.mxu0 %v11402_v22  ;;  %v11505_v56 = vadd.f32 %v10587_v13, %v1002_v2 }
 0x25a   : > { %5244 = vmatmul.mubr.f32.gmra.mrb[124].mxu1 %v11159_v34  ;;  %v11450_v34 = vadd.f32 %v10576_v23, %v993_v55  ;;  %7773 = vmatprep.subr.bf16.mxu1 %v7772_v4  ;;  %v7780_v55 = vpack.c.bf16 %v4544_v25, %v4543_v40  ;;  %v630_v25 = vld [vmem:[%s8756_s21 + $0xa38] sm:$0xff] }
 0x25b   : > { %5248 = vmatprep.mubr.f32.mxu1 %v11164_v18  ;;  %v616_v18 = vld [vmem:[%s8756_s21 + $0x9c8] sm:$0xff]  ;;  %7775 = vmatpush3.bf16.msra.mxu1 %v7772_v4  ;;  %v4545_v4 = vld [vmem:[%s16058_s4 + $0x230] sm:$0xff]  ;;  %v1017_v2 = vmul.f32 %v10566_v19, %v630_v25 }
 0x25c   : > { %2713 = vmatmul.mubr.f32.gmra.mrb[114].mxu0 %v11411_v42  ;;  %v1003_v53 = vmul.f32 %v10556_v35, %v616_v18  ;;  %7777 = vmatprep.subr.bf16.mxu1 %v7776_v8  ;;  %v1007_v18 = vmul.f32 %v10566_v19, %v620_v10  ;;  %v641_v10 = vld [vmem:[%s8756_s21 + $0xa90] sm:$0xff] }
 0x25d   : > { %2718 = vmatprep.mubr.f32.mxu0 %v11416_v31  ;;  %v11557_v32 = vadd.f32 %v10587_v13, %v1017_v2  ;;  %v655_v2 = vld [vmem:[%s8756_s21 + $0xb00] sm:$0xff] }
 0x25e   : > { %5249 = vmatmul.mubr.f32.gmra.mrb[126].mxu1 %v11173_v60  ;;  %v11470_v60 = vadd.f32 %v10576_v23, %v998_v29  ;;  %v7784_v29 = vpack.c.bf16 %v4546_v57, %v4545_v4  ;;  %v11525_v5 = vadd.f32 %v10587_v13, %v1007_v18  ;;  %v1028_v57 = vmul.f32 %v10556_v35, %v641_v10 }
 0x25f   : > { %5253 = vmatprep.mubr.f32.mxu1 %v11178_v63  ;;  %v621_v63 = vld [vmem:[%s8756_s21 + $0x9f0] sm:$0xff]  ;;  %7779 = vmatpush3.bf16.msra.mxu1 %v7776_v8  ;;  %v4547_v8 = vld [vmem:[%s16058_s4 + $0x240] sm:$0xff] }
 0x260   : > { %2719 = vmatmul.mubr.f32.gmra.mrb[116].mxu0 %v11425_v21  ;;  %v1008_v27 = vmul.f32 %v10556_v35, %v621_v63  ;;  %7781 = vmatprep.subr.bf16.mxu1 %v7780_v55  ;;  %v1012_v63 = vmul.f32 %v10566_v19, %v625_v54 }
 0x261   : > { %2724 = vmatprep.mubr.f32.mxu0 %v11430_v9 }
 0x262   : > { %5254 = vmatmul.mubr.f32.gmra.mrb[128].mxu1 %v11187_v50  ;;  %v11490_v50 = vadd.f32 %v10576_v23, %v1003_v53  ;;  %v7788_v53 = vpack.c.bf16 %v4548_v28, %v4547_v8 }
 0x263   : > { %5258 = vmatprep.mubr.f32.mxu1 %v11192_v44  ;;  %v626_v44 = vld [vmem:[%s8756_s21 + $0xa18] sm:$0xff]  ;;  %7783 = vmatpush3.bf16.msra.mxu1 %v7780_v55  ;;  %v11543_v55 = vadd.f32 %v10587_v13, %v1012_v63 }
 0x264   : > { %2725 = vmatmul.mubr.f32.gmra.mrb[118].mxu0 %v11445_v12  ;;  %v1013_v45 = vmul.f32 %v10556_v35, %v626_v44  ;;  %7785 = vmatprep.subr.bf16.mxu1 %v7784_v29  ;;  %v650_v63 = vld [vmem:[%s8756_s21 + $0xad8] sm:$0xff] }
 0x265   : > { %2730 = vmatprep.mubr.f32.mxu0 %v11450_v34 }
 0x266   : > { %5259 = vmatmul.mubr.f32.gmra.mrb[130].mxu1 %v11201_v0  ;;  %v11510_v0 = vadd.f32 %v10576_v23, %v1008_v27 }
 0x267   : > { %5263 = vmatprep.mubr.f32.mxu1 %v11206_v62  ;;  %v631_v62 = vld [vmem:[%s8756_s21 + $0xa40] sm:$0xff]  ;;  %7787 = vmatpush3.bf16.msra.mxu1 %v7784_v29  ;;  %v640_v29 = vld [vmem:[%s8756_s21 + $0xa88] sm:$0xff] }
 0x268   : > { %2731 = vmatmul.mubr.f32.gmra.mrb[120].mxu0 %v11465_v3  ;;  %v1018_v40 = vmul.f32 %v10556_v35, %v631_v62  ;;  %7790 = vmatprep.subr.msk.bf16.mxu1 %vm8931_vm2, %v7788_v53  ;;  %v1027_v18 = vmul.f32 %v10566_v19, %v640_v29  ;;  %v645_v62 = vld [vmem:[%s8756_s21 + $0xab0] sm:$0xff] }
 0x269   : > { %2736 = vmatprep.mubr.f32.mxu0 %v11470_v60  ;;  %v1032_v8 = vmul.f32 %v10566_v19, %v645_v62  ;;  %v16562_v62 = vld [vmem:[#allocation6_spill] sm:$0xff] }
 0x26a   : > { %5264 = vmatmul.mubr.f32.gmra.mrb[132].mxu1 %v11215_v36  ;;  %v11530_v36 = vadd.f32 %v10576_v23, %v1013_v45  ;;  %v11548_v27 = vadd.f32 %v10576_v23, %v1018_v40  ;;  %v11576_v45 = vadd.f32 %v10576_v23, %v1028_v57  ;;  %v1037_v40 = vmul.f32 %v10566_v19, %v650_v63 }
 0x26b   : > { %5268 = vmatprep.mubr.f32.mxu1 %v11220_v39  ;;  %v636_v39 = vld [vmem:[%s8756_s21 + $0xa68] sm:$0xff]  ;;  %7793 = vmatpush3.bf16.msk.msra.mxu1 %vm8931_vm2, %v7788_v53 }
 0x26c   : > { %2737 = vmatmul.mubr.f32.gmra.mrb[122].mxu0 %v11485_v16 }
 0x26d   : > { %2742 = vmatprep.mubr.f32.mxu0 %v11490_v50 }
 0x26e   : > { %5269 = vmatmul.mubr.f32.gmra.mrb[134].mxu1 %v11229_v33  ;;  %v1023_v33 = vmul.f32 %v10556_v35, %v636_v39 }
 0x26f   : > { %5273 = vmatprep.mubr.f32.mxu1 %v11234_v58  ;;  %v635_v58 = vld [vmem:[%s8756_s21 + $0xa60] sm:$0xff] }
 0x270   : > { %2743 = vmatmul.mubr.f32.gmra.mrb[124].mxu0 %v11505_v56  ;;  %v1022_v44 = vmul.f32 %v10566_v19, %v635_v58  ;;  %v11562_v4 = vadd.f32 %v10576_v23, %v1023_v33  ;;  %v661_v33 = vld [vmem:[%s8756_s21 + $0xb30] sm:$0xff] }
 0x271   : > { %2748 = vmatprep.mubr.f32.mxu0 %v11510_v0  ;;  %v1048_v10 = vmul.f32 %v10556_v35, %v661_v33 }
 0x272   : > { %5274 = vmatmul.mubr.f32.gmra.mrb[136].mxu1 %v11243_v51  ;;  %v646_v51 = vld [vmem:[%s8756_s21 + $0xab8] sm:$0xff] }
 0x273   : > { %5278 = vmatprep.mubr.f32.mxu1 %v11248_v43  ;;  %v11571_v43 = vadd.f32 %v10587_v13, %v1022_v44  ;;  %v1033_v54 = vmul.f32 %v10556_v35, %v646_v51  ;;  %v660_v44 = vld [vmem:[%s8756_s21 + $0xb28] sm:$0xff] }
 0x274   : > { %2749 = vmatmul.mubr.f32.gmra.mrb[126].mxu0 %v11525_v5  ;;  %v1047_v29 = vmul.f32 %v10566_v19, %v660_v44 }
 0x275   : > { %2754 = vmatprep.mubr.f32.mxu0 %v11530_v36  ;;  %v11590_v28 = vadd.f32 %v10576_v23, %v1033_v54 }
 0x276   : > { %5279 = vmatmul.mubr.f32.gmra.mrb[138].mxu1 %v11257_v14  ;;  %v651_v14 = vld [vmem:[%s8756_s21 + $0xae0] sm:$0xff] }
 0x277   : > { %5283 = vmatprep.mubr.f32.mxu1 %v11262_v59  ;;  %v11585_v59 = vadd.f32 %v10587_v13, %v1027_v18  ;;  %v1038_v53 = vmul.f32 %v10556_v35, %v651_v14 }
 0x278   : > { %2755 = vmatmul.mubr.f32.gmra.mrb[128].mxu0 %v11543_v55 }
 0x279   : > { %2760 = vmatprep.mubr.f32.mxu0 %v11548_v27  ;;  %v11604_v25 = vadd.f32 %v10576_v23, %v1038_v53 }
 0x27a   : > { %5284 = vmatmul.mubr.f32.gmra.mrb[140].mxu1 %v11271_v38  ;;  %v656_v38 = vld [vmem:[%s8756_s21 + $0xb08] sm:$0xff] }
 0x27b   : > { %5288 = vmatprep.mubr.f32.mxu1 %v11276_v49  ;;  %v11599_v49 = vadd.f32 %v10587_v13, %v1032_v8  ;;  %v1043_v39 = vmul.f32 %v10556_v35, %v656_v38  ;;  %v11637_v35 = vadd.f32 %v10576_v23, %v1048_v10  ;;  %v312_v8 = vld [vmem:[%s8756_s21 + $0x48] sm:$0xff] }
 0x27c   : > { %2761 = vmatmul.mubr.f32.gmra.mrb[130].mxu0 %v11557_v32  ;;  %v699_v38 = vmul.f32 %v16562_v62, %v312_v8 }
 0x27d   : > { %2766 = vmatprep.mubr.f32.mxu0 %v11562_v4  ;;  %v11618_v58 = vadd.f32 %v10576_v23, %v1043_v39  ;;  %v16564_v39 = vmov 0.0  }
 0x27e   : > { %5289 = vmatmul.mubr.f32.gmra.mrb[142].mxu1 %v11285_v1  ;;  %v11613_v1 = vadd.f32 %v10587_v13, %v1037_v40 }
 0x27f   : > { %5293 = vmatprep.mubr.f32.mxu1 %v11290_v11  ;;  %v1042_v11 = vmul.f32 %v10566_v19, %v655_v2  ;;  %v11650_v19 = vadd.f32 %v10587_v13, %v1047_v29  ;;  %v317_v2 = vld [vmem:[%s8756_s21 + $0x70] sm:$0xff] }
 0x280   : > { %2767 = vmatmul.mubr.f32.gmra.mrb[132].mxu0 %v11571_v43  ;;  %v704_v10 = vmul.f32 %v16562_v62, %v317_v2 }
 0x281   : > { %2772 = vmatprep.mubr.f32.mxu0 %v11576_v45  ;;  %v11630_v57 = vadd.f32 %v10587_v13, %v1042_v11  ;;  %v16563_v13 = vld [vmem:[#allocation10_spill] sm:$0xff] }
 0x282   : > { %5294 = vmatmul.mubr.f32.gmra.mrb[144].mxu1 %v11299_v26  ;;  %v11623_v26 = vpop.f32.mrb[0].mxu1  ;;  %v11685_v11 = vadd.f32 %v16563_v13, %v699_v38 }
 0x283   : > { %5298 = vmatprep.mubr.f32.mxu1 %v11304_v47  ;;  %v11626_v47 = vpop.f32.mrb[1].mxu1 }
 0x284   : > { %2773 = vmatmul.mubr.f32.gmra.mrb[134].mxu0 %v11585_v59  ;;  %v11633_v51 = vpop.f32.mrb[2].mxu1 }
 0x285   : > { %2778 = vmatprep.mubr.f32.mxu0 %v11590_v28  ;;  %v11640_v18 = vpop.f32.mrb[3].mxu1 }
 0x286   : > { %5299 = vmatmul.mubr.f32.gmra.mrb[146].mxu1 %v11313_v52  ;;  %v307_v52 = vld [vmem:[%s8756_s21 + $0x20] sm:$0xff] }
 0x287   : > { %5303 = vmatprep.mubr.f32.mxu1 %v11318_v48  ;;  %v11643_v48 = vpop.f32.mrb[4].mxu1  ;;  %v694_v23 = vmul.f32 %v16562_v62, %v307_v52 }
 0x288   : > { %2779 = vmatmul.mubr.f32.gmra.mrb[136].mxu0 %v11599_v49  ;;  %v11646_v54 = vpop.f32.mrb[5].mxu1 }
 0x289   : > { %2784 = vmatprep.mubr.f32.mxu0 %v11604_v25  ;;  %v11653_v14 = vpop.f32.mrb[6].mxu1  ;;  %v11667_v63 = vadd.f32 %v16563_v13, %v694_v23  ;;  %v11703_v23 = vadd.f32 %v16563_v13, %v704_v10 }
 0x28a   : > { %5304 = vmatmul.mubr.f32.gmra.mrb[148].mxu1 %v11327_v37  ;;  %v11657_v37 = vpop.f32.mrb[7].mxu1 }
 0x28b   : > { %5308 = vmatprep.mubr.f32.mxu1 %v11332_v6  ;;  %v11660_v6 = vpop.f32.mrb[8].mxu1 }
 0x28c   : > { %2785 = vmatmul.mubr.f32.gmra.mrb[138].mxu0 %v11613_v1  ;;  %v11663_v53 = vpop.f32.mrb[9].mxu1 }
 0x28d   : > { %2790 = vmatprep.mubr.f32.mxu0 %v11618_v58  ;;  %v11670_v40 = vpop.f32.mrb[10].mxu1 }
 0x28e   : > { %5309 = vmatmul.mubr.f32.gmra.mrb[150].mxu1 %v11341_v46  ;;  %v11674_v46 = vpop.f32.mrb[11].mxu1 }
 0x28f   : > { %5313 = vmatprep.mubr.f32.mxu1 %v11346_v7  ;;  %v11677_v7 = vpop.f32.mrb[12].mxu1 }
 0x290   : > { %2791 = vmatmul.mubr.f32.gmra.mrb[140].mxu0 %v11630_v57  ;;  %v11680_v33 = vpop.f32.mrb[13].mxu1 }
 0x291   : > { %2796 = vmatprep.mubr.f32.mxu0 %v11637_v35  ;;  %v11688_v44 = vpop.f32.mrb[14].mxu1 }
 0x292   : > { %5314 = vmatmul.mubr.f32.gmra.mrb[152].mxu1 %v11355_v20  ;;  %v322_v20 = vld [vmem:[%s8756_s21 + $0x98] sm:$0xff]  ;;  %v11692_v29 = vpop.f32.mrb[15].mxu1 }
 0x293   : > { %5318 = vmatprep.mubr.f32.mxu1 %v11360_v17  ;;  %v11695_v17 = vpop.f32.mrb[16].mxu1  ;;  %v709_v8 = vmul.f32 %v16562_v62, %v322_v20 }
 0x294   : > { %2797 = vmatmul.mubr.f32.gmra.mrb[142].mxu0 %v11650_v19  ;;  %v11698_v52 = vpop.f32.mrb[17].mxu1 }
 0x295   : > { %2867 = vmatprep.mubr.f32.mxu0 %v16564_v39  ;;  %16565 = vst [vmem:[#allocation5_spill] sm:$0xff] %v11698_v52  ;;  %v11706_v38 = vpop.f32.mrb[18].mxu1  ;;  %v11721_v10 = vadd.f32 %v16563_v13, %v709_v8 }
 0x296   : > { %5319 = vmatmul.mubr.f32.gmra.mrb[154].mxu1 %v11369_v15  ;;  %16566 = vst [vmem:[#allocation7_spill] sm:$0xff] %v11706_v38  ;;  %v327_v15 = vld [vmem:[%s8756_s21 + $0xc0] sm:$0xff]  ;;  %v11710_v2 = vpop.f32.mrb[19].mxu1 }
 0x297   : > { %5323 = vmatprep.mubr.f32.mxu1 %v11374_v30  ;;  %16567 = vst [vmem:[#allocation8_spill] sm:$0xff] %v11710_v2  ;;  %v11713_v30 = vpop.f32.mrb[20].mxu1  ;;  %v714_v20 = vmul.f32 %v16562_v62, %v327_v15 }
 0x298   : > { %7165 = vmatmul.mubr.msk.f32.vlgmr.msra.gmra.mrb[0].mxu0 %vm1585_vm3, %v11667_v63  ;;  %v11716_v52 = vpop.f32.mrb[21].mxu1 }
 0x299   : > { %2873 = vmatprep.mubr.f32.mxu0 %v16564_v39  ;;  %16568 = vst [vmem:[#allocation9_spill] sm:$0xff] %v11716_v52  ;;  %v11724_v38 = vpop.f32.mrb[22].mxu1  ;;  %v11739_v8 = vadd.f32 %v16563_v13, %v714_v20 }
 0x29a   : > { %5324 = vmatmul.mubr.f32.gmra.mrb[156].mxu1 %v11383_v41  ;;  %16569 = vst [vmem:[#allocation11_spill] sm:$0xff] %v11724_v38  ;;  %v332_v41 = vld [vmem:[%s8756_s21 + $0xe8] sm:$0xff]  ;;  %v11728_v2 = vpop.f32.mrb[23].mxu1 }
 0x29b   : > { %5328 = vmatprep.mubr.f32.mxu1 %v11388_v24  ;;  %16570 = vst [vmem:[#allocation6_spill] sm:$0xff] %v11728_v2  ;;  %v11731_v24 = vpop.f32.mrb[24].mxu1  ;;  %v719_v15 = vmul.f32 %v16562_v62, %v332_v41 }
 0x29c   : > { %7166 = vmatmul.mubr.msk.f32.gmra.mrb[2].mxu0 %vm1585_vm3, %v11685_v11  ;;  %v11734_v52 = vpop.f32.mrb[25].mxu1 }
 0x29d   : > { %2879 = vmatprep.mubr.f32.mxu0 %v16564_v39  ;;  %16571 = vst [vmem:[#allocation10_spill] sm:$0xff] %v11734_v52  ;;  %v11742_v38 = vpop.f32.mrb[26].mxu1  ;;  %v11757_v20 = vadd.f32 %v16563_v13, %v719_v15 }
 0x29e   : > { %5329 = vmatmul.mubr.f32.gmra.mrb[158].mxu1 %v11397_v61  ;;  %16572 = vst [vmem:[#allocation35_spill] sm:$0xff] %v11742_v38  ;;  %v337_v61 = vld [vmem:[%s8756_s21 + $0x110] sm:$0xff]  ;;  %v11746_v2 = vpop.f32.mrb[27].mxu1 }
 0x29f   : > { %5333 = vmatprep.mubr.f32.mxu1 %v11402_v22  ;;  %16573 = vst [vmem:[#allocation36_spill] sm:$0xff] %v11746_v2  ;;  %v11749_v22 = vpop.f32.mrb[28].mxu1  ;;  %v724_v41 = vmul.f32 %v16562_v62, %v337_v61 }
 0x2a0   : > { %7167 = vmatmul.mubr.msk.f32.gmra.mrb[4].mxu0 %vm1585_vm3, %v11703_v23  ;;  %v11752_v52 = vpop.f32.mrb[29].mxu1 }
 0x2a1   : > { %2885 = vmatprep.mubr.f32.mxu0 %v16564_v39  ;;  %16574 = vst [vmem:[#allocation37_spill] sm:$0xff] %v11752_v52  ;;  %v11760_v38 = vpop.f32.mrb[30].mxu1  ;;  %v11775_v15 = vadd.f32 %v16563_v13, %v724_v41 }
 0x2a2   : > { %5334 = vmatmul.mubr.f32.gmra.mrb[160].mxu1 %v11411_v42  ;;  %16575 = vst [vmem:[#allocation38_spill] sm:$0xff] %v11760_v38  ;;  %v342_v42 = vld [vmem:[%s8756_s21 + $0x138] sm:$0xff]  ;;  %v11764_v2 = vpop.f32.mrb[31].mxu1 }
 0x2a3   : > { %5338 = vmatprep.mubr.f32.mxu1 %v11416_v31  ;;  %16576 = vst [vmem:[#allocation39_spill] sm:$0xff] %v11764_v2  ;;  %v11767_v31 = vpop.f32.mrb[32].mxu1  ;;  %v729_v61 = vmul.f32 %v16562_v62, %v342_v42 }
 0x2a4   : > { %7168 = vmatmul.mubr.msk.f32.gmra.mrb[6].mxu0 %vm1585_vm3, %v11721_v10  ;;  %v11770_v52 = vpop.f32.mrb[33].mxu1 }
 0x2a5   : > { %2891 = vmatprep.mubr.f32.mxu0 %v16564_v39  ;;  %16577 = vst [vmem:[#allocation40_spill] sm:$0xff] %v11770_v52  ;;  %v11778_v38 = vpop.f32.mrb[34].mxu1  ;;  %v11793_v41 = vadd.f32 %v16563_v13, %v729_v61 }
 0x2a6   : > { %5339 = vmatmul.mubr.f32.gmra.mrb[162].mxu1 %v11425_v21  ;;  %16578 = vst [vmem:[#allocation41_spill] sm:$0xff] %v11778_v38  ;;  %v347_v21 = vld [vmem:[%s8756_s21 + $0x160] sm:$0xff]  ;;  %v11782_v2 = vpop.f32.mrb[35].mxu1 }
 0x2a7   : > { %5343 = vmatprep.mubr.f32.mxu1 %v11430_v9  ;;  %16579 = vst [vmem:[#allocation42_spill] sm:$0xff] %v11782_v2  ;;  %v11785_v9 = vpop.f32.mrb[36].mxu1  ;;  %v734_v42 = vmul.f32 %v16562_v62, %v347_v21 }
 0x2a8   : > { %7169 = vmatmul.mubr.msk.f32.gmra.mrb[8].mxu0 %vm1585_vm3, %v11739_v8  ;;  %v11788_v52 = vpop.f32.mrb[37].mxu1 }
 0x2a9   : > { %2897 = vmatprep.mubr.f32.mxu0 %v16564_v39  ;;  %16580 = vst [vmem:[#allocation43_spill] sm:$0xff] %v11788_v52  ;;  %v11796_v38 = vpop.f32.mrb[38].mxu1  ;;  %v11811_v61 = vadd.f32 %v16563_v13, %v734_v42 }
 0x2aa   : > { %5344 = vmatmul.mubr.f32.gmra.mrb[164].mxu1 %v11445_v12  ;;  %16581 = vst [vmem:[#allocation44_spill] sm:$0xff] %v11796_v38  ;;  %v352_v12 = vld [vmem:[%s8756_s21 + $0x188] sm:$0xff]  ;;  %v11800_v2 = vpop.f32.mrb[39].mxu1 }
 0x2ab   : > { %5348 = vmatprep.mubr.f32.mxu1 %v11450_v34  ;;  %16582 = vst [vmem:[#allocation45_spill] sm:$0xff] %v11800_v2  ;;  %v11803_v34 = vpop.f32.mrb[40].mxu1  ;;  %v739_v21 = vmul.f32 %v16562_v62, %v352_v12 }
 0x2ac   : > { %7170 = vmatmul.mubr.msk.f32.gmra.mrb[10].mxu0 %vm1585_vm3, %v11757_v20  ;;  %v11806_v52 = vpop.f32.mrb[41].mxu1 }
 0x2ad   : > { %2903 = vmatprep.mubr.f32.mxu0 %v16564_v39  ;;  %16583 = vst [vmem:[#allocation46_spill] sm:$0xff] %v11806_v52  ;;  %v11814_v38 = vpop.f32.mrb[42].mxu1  ;;  %v11829_v42 = vadd.f32 %v16563_v13, %v739_v21 }
 0x2ae   : > { %5349 = vmatmul.mubr.f32.gmra.mrb[166].mxu1 %v11465_v3  ;;  %16584 = vst [vmem:[#allocation47_spill] sm:$0xff] %v11814_v38  ;;  %v357_v3 = vld [vmem:[%s8756_s21 + $0x1b0] sm:$0xff]  ;;  %v11818_v2 = vpop.f32.mrb[43].mxu1 }
 0x2af   : > { %5353 = vmatprep.mubr.f32.mxu1 %v11470_v60  ;;  %16585 = vst [vmem:[#allocation48_spill] sm:$0xff] %v11818_v2  ;;  %v11821_v60 = vpop.f32.mrb[44].mxu1  ;;  %v744_v12 = vmul.f32 %v16562_v62, %v357_v3 }
 0x2b0   : > { %7171 = vmatmul.mubr.msk.f32.gmra.mrb[12].mxu0 %vm1585_vm3, %v11775_v15  ;;  %v11824_v52 = vpop.f32.mrb[45].mxu1 }
 0x2b1   : > { %2909 = vmatprep.mubr.f32.mxu0 %v16564_v39  ;;  %16586 = vst [vmem:[#allocation49_spill] sm:$0xff] %v11824_v52  ;;  %v11832_v38 = vpop.f32.mrb[46].mxu1  ;;  %v11843_v21 = vadd.f32 %v16563_v13, %v744_v12 }
 0x2b2   : > { %5354 = vmatmul.mubr.f32.gmra.mrb[168].mxu1 %v11485_v16  ;;  %16587 = vst [vmem:[#allocation50_spill] sm:$0xff] %v11832_v38  ;;  %v362_v16 = vld [vmem:[%s8756_s21 + $0x1d8] sm:$0xff]  ;;  %v5052_v2 = vpop.f32.mrb[47].mxu1 }
 0x2b3   : > { %5358 = vmatprep.mubr.f32.mxu1 %v11490_v50  ;;  %v11837_v50 = vpop.f32.mrb[48].mxu1  ;;  %v749_v3 = vmul.f32 %v16562_v62, %v362_v16  ;;  %v367_v2 = vld [vmem:[%s8756_s21 + $0x200] sm:$0xff] }
 0x2b4   : > { %7172 = vmatmul.mubr.msk.f32.gmra.mrb[14].mxu0 %vm1585_vm3, %v11793_v41  ;;  %16588 = vst [vmem:[#allocation51_spill] sm:$0xff] %v11837_v50  ;;  %v5057_v52 = vpop.f32.mrb[49].mxu1  ;;  %v754_v12 = vmul.f32 %v16562_v62, %v367_v2 }
 0x2b5   : > { %2915 = vmatprep.mubr.f32.mxu0 %v16564_v39  ;;  %v11846_v38 = vpop.f32.mrb[50].mxu1  ;;  %v11857_v52 = vadd.f32 %v16563_v13, %v749_v3 }
 0x2b6   : > { %5359 = vmatmul.mubr.f32.gmra.mrb[170].mxu1 %v11505_v56  ;;  %16589 = vst [vmem:[#allocation52_spill] sm:$0xff] %v11846_v38  ;;  %v5062_v56 = vpop.f32.mrb[51].mxu1  ;;  %v11871_v3 = vadd.f32 %v16563_v13, %v754_v12 }
 0x2b7   : > { %5363 = vmatprep.mubr.f32.mxu1 %v11510_v0  ;;  %v11851_v50 = vpop.f32.mrb[52].mxu1  ;;  %v372_v56 = vld [vmem:[%s8756_s21 + $0x228] sm:$0xff] }
 0x2b8   : > { %7173 = vmatmul.mubr.msk.f32.gmra.mrb[16].mxu0 %vm1585_vm3, %v11811_v61  ;;  %v5067_v0 = vpop.f32.mrb[53].mxu1  ;;  %v759_v2 = vmul.f32 %v16562_v62, %v372_v56 }
 0x2b9   : > { %2921 = vmatprep.mubr.f32.mxu0 %v16564_v39  ;;  %v11860_v16 = vpop.f32.mrb[54].mxu1 }
 0x2ba   : > { %5364 = vmatmul.mubr.f32.gmra.mrb[172].mxu1 %v11525_v5  ;;  %16590 = vst [vmem:[#allocation53_spill] sm:$0xff] %v11860_v16  ;;  %v5072_v5 = vpop.f32.mrb[55].mxu1  ;;  %v11885_v12 = vadd.f32 %v16563_v13, %v759_v2 }
 0x2bb   : > { %5368 = vmatprep.mubr.f32.mxu1 %v11530_v36  ;;  %v11865_v38 = vpop.f32.mrb[56].mxu1  ;;  %v377_v5 = vld [vmem:[%s8756_s21 + $0x250] sm:$0xff] }
 0x2bc   : > { %7174 = vmatmul.mubr.msk.f32.gmra.mrb[18].mxu0 %vm1585_vm3, %v11829_v42  ;;  %v5077_v36 = vpop.f32.mrb[57].mxu1  ;;  %v764_v56 = vmul.f32 %v16562_v62, %v377_v5 }
 0x2bd   : > { %2927 = vmatprep.mubr.f32.mxu0 %v16564_v39  ;;  %v11874_v0 = vpop.f32.mrb[58].mxu1 }
 0x2be   : > { %5369 = vmatmul.mubr.f32.gmra.mrb[174].mxu1 %v11543_v55  ;;  %16591 = vst [vmem:[#allocation54_spill] sm:$0xff] %v11874_v0  ;;  %v5082_v55 = vpop.f32.mrb[59].mxu1  ;;  %v11899_v2 = vadd.f32 %v16563_v13, %v764_v56 }
 0x2bf   : > { %5373 = vmatprep.mubr.f32.mxu1 %v11548_v27  ;;  %v11879_v16 = vpop.f32.mrb[60].mxu1  ;;  %v382_v55 = vld [vmem:[%s8756_s21 + $0x278] sm:$0xff] }
 0x2c0   : > { %7175 = vmatmul.mubr.msk.f32.gmra.mrb[20].mxu0 %vm1585_vm3, %v11843_v21  ;;  %v5087_v27 = vpop.f32.mrb[61].mxu1  ;;  %v769_v5 = vmul.f32 %v16562_v62, %v382_v55 }
 0x2c1   : > { %2933 = vmatprep.mubr.f32.mxu0 %v16564_v39  ;;  %v11888_v36 = vpop.f32.mrb[62].mxu1 }
 0x2c2   : > { %5374 = vmatmul.mubr.f32.gmra.mrb[176].mxu1 %v11557_v32  ;;  %16592 = vst [vmem:[#allocation55_spill] sm:$0xff] %v11888_v36  ;;  %v5092_v32 = vpop.f32.mrb[63].mxu1  ;;  %v11913_v56 = vadd.f32 %v16563_v13, %v769_v5 }
 0x2c3   : > { %5378 = vmatprep.mubr.f32.mxu1 %v11562_v4  ;;  %v11893_v0 = vpop.f32.mrb[64].mxu1  ;;  %v387_v32 = vld [vmem:[%s8756_s21 + $0x2a0] sm:$0xff] }
 0x2c4   : > { %7176 = vmatmul.mubr.msk.f32.gmra.mrb[22].mxu0 %vm1585_vm3, %v11857_v52  ;;  %v5097_v4 = vpop.f32.mrb[65].mxu1  ;;  %v774_v55 = vmul.f32 %v16562_v62, %v387_v32 }
 0x2c5   : > { %2939 = vmatprep.mubr.f32.mxu0 %v16564_v39  ;;  %v11902_v27 = vpop.f32.mrb[66].mxu1 }
 0x2c6   : > { %5379 = vmatmul.mubr.f32.gmra.mrb[178].mxu1 %v11571_v43  ;;  %16593 = vst [vmem:[#allocation56_spill] sm:$0xff] %v11902_v27  ;;  %v5102_v43 = vpop.f32.mrb[67].mxu1  ;;  %v11927_v5 = vadd.f32 %v16563_v13, %v774_v55 }
 0x2c7   : > { %5383 = vmatprep.mubr.f32.mxu1 %v11576_v45  ;;  %v11907_v36 = vpop.f32.mrb[68].mxu1  ;;  %v392_v43 = vld [vmem:[%s8756_s21 + $0x2c8] sm:$0xff] }
 0x2c8   : > { %7177 = vmatmul.mubr.msk.f32.gmra.mrb[24].mxu0 %vm1585_vm3, %v11871_v3  ;;  %v5107_v45 = vpop.f32.mrb[69].mxu1  ;;  %v779_v32 = vmul.f32 %v16562_v62, %v392_v43 }
 0x2c9   : > { %2945 = vmatprep.mubr.f32.mxu0 %v16564_v39  ;;  %v11916_v4 = vpop.f32.mrb[70].mxu1 }
 0x2ca   : > { %5384 = vmatmul.mubr.f32.gmra.mrb[180].mxu1 %v11585_v59  ;;  %16594 = vst [vmem:[#allocation57_spill] sm:$0xff] %v11916_v4  ;;  %v5112_v59 = vpop.f32.mrb[71].mxu1  ;;  %v11941_v55 = vadd.f32 %v16563_v13, %v779_v32 }
 0x2cb   : > { %5388 = vmatprep.mubr.f32.mxu1 %v11590_v28  ;;  %v11921_v27 = vpop.f32.mrb[72].mxu1  ;;  %v397_v59 = vld [vmem:[%s8756_s21 + $0x2f0] sm:$0xff] }
 0x2cc   : > { %7178 = vmatmul.mubr.msk.f32.gmra.mrb[26].mxu0 %vm1585_vm3, %v11885_v12  ;;  %v5117_v28 = vpop.f32.mrb[73].mxu1  ;;  %v784_v43 = vmul.f32 %v16562_v62, %v397_v59 }
 0x2cd   : > { %2951 = vmatprep.mubr.f32.mxu0 %v16564_v39  ;;  %v11930_v45 = vpop.f32.mrb[74].mxu1 }
 0x2ce   : > { %5389 = vmatmul.mubr.f32.gmra.mrb[182].mxu1 %v11599_v49  ;;  %16595 = vst [vmem:[#allocation58_spill] sm:$0xff] %v11930_v45  ;;  %v5122_v49 = vpop.f32.mrb[75].mxu1  ;;  %v11955_v32 = vadd.f32 %v16563_v13, %v784_v43 }
 0x2cf   : > { %5393 = vmatprep.mubr.f32.mxu1 %v11604_v25  ;;  %v11935_v4 = vpop.f32.mrb[76].mxu1  ;;  %v402_v49 = vld [vmem:[%s8756_s21 + $0x318] sm:$0xff] }
 0x2d0   : > { %7179 = vmatmul.mubr.msk.f32.gmra.mrb[28].mxu0 %vm1585_vm3, %v11899_v2  ;;  %v5127_v25 = vpop.f32.mrb[77].mxu1  ;;  %v789_v59 = vmul.f32 %v16562_v62, %v402_v49  ;;  %v412_v49 = vld [vmem:[%s8756_s21 + $0x368] sm:$0xff] }
 0x2d1   : > { %2957 = vmatprep.mubr.f32.mxu0 %v16564_v39  ;;  %v11944_v28 = vpop.f32.mrb[78].mxu1  ;;  %v407_v25 = vld [vmem:[%s8756_s21 + $0x340] sm:$0xff] }
 0x2d2   : > { %5394 = vmatmul.mubr.f32.gmra.mrb[184].mxu1 %v11613_v1  ;;  %v5132_v1 = vpop.f32.mrb[79].mxu1  ;;  %v794_v43 = vmul.f32 %v16562_v62, %v407_v25  ;;  %v417_v25 = vld [vmem:[%s8756_s21 + $0x390] sm:$0xff] }
 0x2d3   : > { %5398 = vmatprep.mubr.f32.mxu1 %v11618_v58 }
 0x2d4   : > { %7180 = vmatmul.mubr.msk.f32.gmra.mrb[30].mxu0 %vm1585_vm3, %v11913_v56 }
 0x2d5   : > { %2963 = vmatprep.mubr.f32.mxu0 %v16564_v39  ;;  %v11949_v45 = vpop.f32.mrb[80].mxu1 }
 0x2d6   : > { %5399 = vmatmul.mubr.f32.gmra.mrb[186].mxu1 %v11630_v57  ;;  %v5137_v58 = vpop.f32.mrb[81].mxu1 }
 0x2d7   : > { %5403 = vmatprep.mubr.f32.mxu1 %v11637_v35  ;;  %v11968_v35 = vadd.f32 %v16563_v13, %v789_v59  ;;  %v799_v59 = vmul.f32 %v16562_v62, %v412_v49  ;;  %v422_v49 = vld [vmem:[%s8756_s21 + $0x3b8] sm:$0xff] }
 0x2d8   : > { %7181 = vmatmul.mubr.msk.f32.gmra.mrb[32].mxu0 %vm1585_vm3, %v11927_v5 }
 0x2d9   : > { %2969 = vmatprep.mubr.f32.mxu0 %v16564_v39  ;;  %v11960_v1 = vpop.f32.mrb[82].mxu1 }
 0x2da   : > { %5404 = vmatmul.mubr.f32.gmra.mrb[188].mxu1 %v11650_v19  ;;  %v5142_v57 = vpop.f32.mrb[83].mxu1 }
 0x2db   : > { %7418 = vmatprep.mubr.msk.f32.mxu1 %vm1585_vm3, %v11667_v63  ;;  %v11982_v63 = vadd.f32 %v16563_v13, %v794_v43  ;;  %v804_v43 = vmul.f32 %v16562_v62, %v417_v25  ;;  %v427_v25 = vld [vmem:[%s8756_s21 + $0x3e0] sm:$0xff] }
 0x2dc   : > { %7182 = vmatmul.mubr.msk.f32.gmra.mrb[34].mxu0 %vm1585_vm3, %v11941_v55 }
 0x2dd   : > { %2975 = vmatprep.mubr.f32.mxu0 %v16564_v39  ;;  %v11973_v58 = vpop.f32.mrb[84].mxu1 }
 0x2de   : > { %7419 = vmatmul.mubr.msk.f32.vlgmr.msra.gmra.mrb[190].mxu1 %vm1585_vm3, %v11685_v11  ;;  %v5147_v19 = vpop.f32.mrb[85].mxu1 }
 0x2df   : > { %7421 = vmatprep.mubr.msk.f32.mxu1 %vm1585_vm3, %v11703_v23  ;;  %v11996_v23 = vadd.f32 %v16563_v13, %v799_v59  ;;  %v809_v59 = vmul.f32 %v16562_v62, %v422_v49  ;;  %v432_v49 = vld [vmem:[%s8756_s21 + $0x408] sm:$0xff] }
 0x2e0   : > { %7183 = vmatmul.mubr.msk.f32.gmra.mrb[36].mxu0 %vm1585_vm3, %v11955_v32 }
 0x2e1   : > { %2981 = vmatprep.mubr.f32.mxu0 %v16564_v39  ;;  %v11987_v57 = vpop.f32.mrb[86].mxu1 }
 0x2e2   : > { %7422 = vmatmul.mubr.msk.f32.gmra.mrb[192].mxu1 %vm1585_vm3, %v11721_v10  ;;  %v5152_v11 = vpop.f32.mrb[87].mxu1 }
 0x2e3   : > { %7424 = vmatprep.mubr.msk.f32.mxu1 %vm1585_vm3, %v11739_v8  ;;  %v12010_v8 = vadd.f32 %v16563_v13, %v804_v43  ;;  %v814_v43 = vmul.f32 %v16562_v62, %v427_v25  ;;  %v437_v25 = vld [vmem:[%s8756_s21 + $0x430] sm:$0xff] }
 0x2e4   : > { %7184 = vmatmul.mubr.msk.f32.gmra.mrb[38].mxu0 %vm1585_vm3, %v11968_v35 }
 0x2e5   : > { %2987 = vmatprep.mubr.f32.mxu0 %v16564_v39  ;;  %v12001_v19 = vpop.f32.mrb[88].mxu1 }
 0x2e6   : > { %7425 = vmatmul.mubr.msk.f32.gmra.mrb[194].mxu1 %vm1585_vm3, %v11757_v20  ;;  %v5157_v10 = vpop.f32.mrb[89].mxu1 }
 0x2e7   : > { %7427 = vmatprep.mubr.msk.f32.mxu1 %vm1585_vm3, %v11775_v15  ;;  %v12024_v15 = vadd.f32 %v16563_v13, %v809_v59  ;;  %v819_v59 = vmul.f32 %v16562_v62, %v432_v49  ;;  %v442_v49 = vld [vmem:[%s8756_s21 + $0x458] sm:$0xff] }
 0x2e8   : > { %7185 = vmatmul.mubr.msk.f32.gmra.mrb[40].mxu0 %vm1585_vm3, %v11982_v63 }
 0x2e9   : > { %2993 = vmatprep.mubr.f32.mxu0 %v16564_v39  ;;  %v12015_v11 = vpop.f32.mrb[90].mxu1 }
 0x2ea   : > { %7428 = vmatmul.mubr.msk.f32.gmra.mrb[196].mxu1 %vm1585_vm3, %v11793_v41  ;;  %v5162_v20 = vpop.f32.mrb[91].mxu1 }
 0x2eb   : > { %7430 = vmatprep.mubr.msk.f32.mxu1 %vm1585_vm3, %v11811_v61  ;;  %v1201_v61 = vadd.f32 %v16563_v13, %v814_v43  ;;  %v824_v43 = vmul.f32 %v16562_v62, %v437_v25  ;;  %v447_v25 = vld [vmem:[%s8756_s21 + $0x480] sm:$0xff] }
 0x2ec   : > { %7186 = vmatmul.mubr.msk.f32.gmra.mrb[42].mxu0 %vm1585_vm3, %v11996_v23 }
 0x2ed   : > { %2999 = vmatprep.mubr.f32.mxu0 %v16564_v39  ;;  %v12029_v10 = vpop.f32.mrb[92].mxu1 }
 0x2ee   : > { %7431 = vmatmul.mubr.msk.f32.gmra.mrb[198].mxu1 %vm1585_vm3, %v11829_v42  ;;  %v5167_v41 = vpop.f32.mrb[93].mxu1 }
 0x2ef   : > { %7433 = vmatprep.mubr.msk.f32.mxu1 %vm1585_vm3, %v11843_v21  ;;  %v12049_v21 = vadd.f32 %v16563_v13, %v819_v59  ;;  %v829_v59 = vmul.f32 %v16562_v62, %v442_v49  ;;  %v452_v49 = vld [vmem:[%s8756_s21 + $0x4a8] sm:$0xff] }
 0x2f0   : > { %7187 = vmatmul.mubr.msk.f32.gmra.mrb[44].mxu0 %vm1585_vm3, %v12010_v8 }
 0x2f1   : > { %3005 = vmatprep.mubr.f32.mxu0 %v16564_v39  ;;  %v12041_v20 = vpop.f32.mrb[94].mxu1 }
 0x2f2   : > { %16596 = vst [vmem:[#allocation59_spill] sm:$0xff] %v12041_v20  ;;  %7434 = vmatmul.mubr.msk.f32.gmra.mrb[200].mxu1 %vm1585_vm3, %v11857_v52  ;;  %v5172_v42 = vpop.f32.mrb[95].mxu1 }
 0x2f3   : > { %7436 = vmatprep.mubr.msk.f32.mxu1 %vm1585_vm3, %v11871_v3  ;;  %v1211_v3 = vadd.f32 %v16563_v13, %v824_v43  ;;  %v834_v43 = vmul.f32 %v16562_v62, %v447_v25  ;;  %v457_v25 = vld [vmem:[%s8756_s21 + $0x4d0] sm:$0xff] }
 0x2f4   : > { %7188 = vmatmul.mubr.msk.f32.gmra.mrb[46].mxu0 %vm1585_vm3, %v12024_v15 }
 0x2f5   : > { %3011 = vmatprep.mubr.f32.mxu0 %v16564_v39  ;;  %v12054_v41 = vpop.f32.mrb[96].mxu1 }
 0x2f6   : > { %16597 = vst [vmem:[#allocation60_spill] sm:$0xff] %v12054_v41  ;;  %7437 = vmatmul.mubr.msk.f32.gmra.mrb[202].mxu1 %vm1585_vm3, %v11885_v12  ;;  %v5177_v52 = vpop.f32.mrb[97].mxu1  ;;  %v16657_v41 = vld [vmem:[#allocation15_spill] sm:$0xff] }
 0x2f7   : > { %7439 = vmatprep.mubr.msk.f32.mxu1 %vm1585_vm3, %v11899_v2  ;;  %v1216_v2 = vadd.f32 %v16563_v13, %v829_v59  ;;  %v839_v59 = vmul.f32 %v16562_v62, %v452_v49  ;;  %v462_v49 = vld [vmem:[%s8756_s21 + $0x4f8] sm:$0xff] }
 0x2f8   : > { %7189 = vmatmul.mubr.msk.f32.gmra.mrb[48].mxu0 %vm1585_vm3, %v1201_v61 }
 0x2f9   : > { %3017 = vmatprep.mubr.f32.mxu0 %v16564_v39  ;;  %v12066_v42 = vpop.f32.mrb[98].mxu1 }
 0x2fa   : > { %16598 = vst [vmem:[#allocation61_spill] sm:$0xff] %v12066_v42  ;;  %7440 = vmatmul.mubr.msk.f32.gmra.mrb[204].mxu1 %vm1585_vm3, %v11913_v56  ;;  %v5182_v12 = vpop.f32.mrb[99].mxu1  ;;  %v542_v42 = vld [vmem:[%s8756_s21 + $0x778] sm:$0xff] }
 0x2fb   : > { %7442 = vmatprep.mubr.msk.f32.mxu1 %vm1585_vm3, %v11927_v5  ;;  %v1221_v5 = vadd.f32 %v16563_v13, %v834_v43  ;;  %v844_v43 = vmul.f32 %v16562_v62, %v457_v25  ;;  %v467_v25 = vld [vmem:[%s8756_s21 + $0x520] sm:$0xff] }
 0x2fc   : > { %7190 = vmatmul.mubr.msk.f32.gmra.mrb[50].mxu0 %vm1585_vm3, %v12049_v21 }
 0x2fd   : > { %3023 = vmatprep.mubr.f32.mxu0 %v16564_v39  ;;  %v12077_v52 = vpop.f32.mrb[100].mxu1 }
 0x2fe   : > { %16599 = vst [vmem:[#allocation62_spill] sm:$0xff] %v12077_v52  ;;  %7443 = vmatmul.mubr.msk.f32.gmra.mrb[206].mxu1 %vm1585_vm3, %v11941_v55  ;;  %v5187_v56 = vpop.f32.mrb[101].mxu1 }
 0x2ff   : > { %7445 = vmatprep.mubr.msk.f32.mxu1 %vm1585_vm3, %v11955_v32  ;;  %v1226_v32 = vadd.f32 %v16563_v13, %v839_v59  ;;  %v849_v59 = vmul.f32 %v16562_v62, %v462_v49  ;;  %v854_v49 = vmul.f32 %v16562_v62, %v467_v25 }
 0x300   : > { %7191 = vmatmul.mubr.msk.f32.gmra.mrb[52].mxu0 %vm1585_vm3, %v1211_v3 }
 0x301   : > { %3029 = vmatprep.mubr.f32.mxu0 %v16564_v39  ;;  %v12088_v12 = vpop.f32.mrb[102].mxu1 }
 0x302   : > { %16600 = vst [vmem:[#allocation63_spill] sm:$0xff] %v12088_v12  ;;  %7446 = vmatmul.mubr.msk.f32.gmra.mrb[208].mxu1 %vm1585_vm3, %v11968_v35  ;;  %v5192_v55 = vpop.f32.mrb[103].mxu1 }
 0x303   : > { %7448 = vmatprep.mubr.msk.f32.mxu1 %vm1585_vm3, %v11982_v63  ;;  %v1231_v63 = vadd.f32 %v16563_v13, %v844_v43  ;;  %v1236_v43 = vadd.f32 %v16563_v13, %v849_v59 }
 0x304   : > { %7192 = vmatmul.mubr.msk.f32.gmra.mrb[54].mxu0 %vm1585_vm3, %v1216_v2 }
 0x305   : > { %3035 = vmatprep.mubr.f32.mxu0 %v16564_v39  ;;  %v12099_v56 = vpop.f32.mrb[104].mxu1 }
 0x306   : > { %16601 = vst [vmem:[#allocation64_spill] sm:$0xff] %v12099_v56  ;;  %7449 = vmatmul.mubr.msk.f32.gmra.mrb[210].mxu1 %vm1585_vm3, %v11996_v23  ;;  %v5197_v35 = vpop.f32.mrb[105].mxu1 }
 0x307   : > { %7451 = vmatprep.mubr.msk.f32.mxu1 %vm1585_vm3, %v12010_v8 }
 0x308   : > { %7193 = vmatmul.mubr.msk.f32.gmra.mrb[56].mxu0 %vm1585_vm3, %v1221_v5 }
 0x309   : > { %3041 = vmatprep.mubr.f32.mxu0 %v16564_v39  ;;  %v12110_v55 = vpop.f32.mrb[106].mxu1 }
 0x30a   : > { %16602 = vst [vmem:[#allocation65_spill] sm:$0xff] %v12110_v55  ;;  %7452 = vmatmul.mubr.msk.f32.gmra.mrb[212].mxu1 %vm1585_vm3, %v12024_v15  ;;  %v5202_v23 = vpop.f32.mrb[107].mxu1  ;;  %v472_v15 = vld [vmem:[%s8756_s21 + $0x548] sm:$0xff] }
 0x30b   : > { %7454 = vmatprep.mubr.msk.f32.mxu1 %vm1585_vm3, %v1201_v61 }
 0x30c   : > { %7194 = vmatmul.mubr.msk.f32.gmra.mrb[58].mxu0 %vm1585_vm3, %v1226_v32 }
 0x30d   : > { %3047 = vmatprep.mubr.f32.mxu0 %v16564_v39  ;;  %v12126_v23 = vpop.f32.mrb[108].mxu1 }
 0x30e   : > { %16605 = vst [vmem:[#allocation68_spill] sm:$0xff] %v12126_v23  ;;  %7455 = vmatmul.mubr.msk.f32.gmra.mrb[214].mxu1 %vm1585_vm3, %v12049_v21  ;;  %v477_v21 = vld [vmem:[%s8756_s21 + $0x570] sm:$0xff]  ;;  %v16633_v23 = vld [vmem:[#allocation8_spill] sm:$0xff] }
 0x30f   : > { %v2666_v35 = vpop.f32.mrb[98].mxu0  ;;  %7457 = vmatprep.mubr.msk.f32.mxu1 %vm1585_vm3, %v1211_v3 }
 0x310   : > { %v12116_v8 = vadd.f32 %v11623_v26, %v2666_v35  ;;  %v2668_v12 = vpop.f32.mrb[99].mxu0  ;;  %7195 = vmatmul.mubr.msk.f32.gmra.mrb[60].mxu0 %vm1585_vm3, %v1231_v63  ;;  %v5207_v26 = vpop.f32.mrb[109].mxu1 }
 0x311   : > { %v12122_v55 = vadd.f32 %v11626_v47, %v2668_v12  ;;  %3053 = vmatprep.mubr.f32.mxu0 %v16564_v39  ;;  %v1241_v47 = vadd.f32 %v16563_v13, %v854_v49  ;;  %v859_v12 = vmul.f32 %v16562_v62, %v472_v15  ;;  %v12142_v26 = vpop.f32.mrb[110].mxu1  ;;  %v864_v15 = vmul.f32 %v16562_v62, %v477_v21 }
 0x312   : > { %16603 = vst [vmem:[#allocation66_spill] sm:$0xff] %v12116_v8  ;;  %16608 = vst [vmem:[#allocation71_spill] sm:$0xff] %v12142_v26  ;;  %7458 = vmatmul.mubr.msk.f32.gmra.mrb[216].mxu1 %vm1585_vm3, %v1216_v2  ;;  %v482_v2 = vld [vmem:[%s8756_s21 + $0x598] sm:$0xff] }
 0x313   : > { %16604 = vst [vmem:[#allocation67_spill] sm:$0xff] %v12122_v55  ;;  %v2672_v61 = vpop.f32.mrb[100].mxu0  ;;  %7460 = vmatprep.mubr.msk.f32.mxu1 %vm1585_vm3, %v1221_v5  ;;  %v869_v21 = vmul.f32 %v16562_v62, %v482_v2 }
 0x314   : > { %v12132_v59 = vadd.f32 %v11633_v51, %v2672_v61  ;;  %v2674_v25 = vpop.f32.mrb[101].mxu0  ;;  %7196 = vmatmul.mubr.msk.f32.gmra.mrb[62].mxu0 %vm1585_vm3, %v1236_v43  ;;  %v5212_v51 = vpop.f32.mrb[111].mxu1 }
 0x315   : > { %v12138_v35 = vadd.f32 %v11640_v18, %v2674_v25  ;;  %3059 = vmatprep.mubr.f32.mxu0 %v16564_v39  ;;  %v1246_v18 = vadd.f32 %v16563_v13, %v859_v12  ;;  %v12157_v51 = vpop.f32.mrb[112].mxu1 }
 0x316   : > { %16606 = vst [vmem:[#allocation69_spill] sm:$0xff] %v12132_v59  ;;  %16611 = vst [vmem:[#allocation74_spill] sm:$0xff] %v12157_v51  ;;  %7461 = vmatmul.mubr.msk.f32.gmra.mrb[218].mxu1 %vm1585_vm3, %v1226_v32  ;;  %v487_v32 = vld [vmem:[%s8756_s21 + $0x5c0] sm:$0xff]  ;;  %v532_v51 = vld [vmem:[%s8756_s21 + $0x728] sm:$0xff] }
 0x317   : > { %16607 = vst [vmem:[#allocation70_spill] sm:$0xff] %v12138_v35  ;;  %v2678_v3 = vpop.f32.mrb[102].mxu0  ;;  %7463 = vmatprep.mubr.msk.f32.mxu1 %vm1585_vm3, %v1231_v63 }
 0x318   : > { %v12147_v61 = vadd.f32 %v11643_v48, %v2678_v3  ;;  %v2680_v49 = vpop.f32.mrb[103].mxu0  ;;  %7197 = vmatmul.mubr.msk.f32.gmra.mrb[64].mxu0 %vm1585_vm3, %v1241_v47  ;;  %v5217_v48 = vpop.f32.mrb[113].mxu1 }
 0x319   : > { %v12153_v25 = vadd.f32 %v11646_v54, %v2680_v49  ;;  %3065 = vmatprep.mubr.f32.mxu0 %v16564_v39  ;;  %v1251_v54 = vadd.f32 %v16563_v13, %v864_v15  ;;  %v12172_v48 = vpop.f32.mrb[114].mxu1 }
 0x31a   : > { %16609 = vst [vmem:[#allocation72_spill] sm:$0xff] %v12147_v61  ;;  %16614 = vst [vmem:[#allocation77_spill] sm:$0xff] %v12172_v48  ;;  %7464 = vmatmul.mubr.msk.f32.gmra.mrb[220].mxu1 %vm1585_vm3, %v1236_v43  ;;  %v492_v43 = vld [vmem:[%s8756_s21 + $0x5e8] sm:$0xff] }
 0x31b   : > { %16610 = vst [vmem:[#allocation73_spill] sm:$0xff] %v12153_v25  ;;  %v2684_v5 = vpop.f32.mrb[104].mxu0  ;;  %7466 = vmatprep.mubr.msk.f32.mxu1 %vm1585_vm3, %v1241_v47  ;;  %v497_v47 = vld [vmem:[%s8756_s21 + $0x610] sm:$0xff] }
 0x31c   : > { %v12162_v3 = vadd.f32 %v11653_v14, %v2684_v5  ;;  %v2686_v12 = vpop.f32.mrb[105].mxu0  ;;  %7198 = vmatmul.mubr.msk.f32.gmra.mrb[66].mxu0 %vm1585_vm3, %v1246_v18  ;;  %v5222_v14 = vpop.f32.mrb[115].mxu1  ;;  %v874_v5 = vmul.f32 %v16562_v62, %v487_v32 }
 0x31d   : > { %v12168_v49 = vadd.f32 %v11657_v37, %v2686_v12  ;;  %3071 = vmatprep.mubr.f32.mxu0 %v16564_v39  ;;  %v1256_v37 = vadd.f32 %v16563_v13, %v869_v21  ;;  %v12187_v14 = vpop.f32.mrb[116].mxu1 }
 0x31e   : > { %16612 = vst [vmem:[#allocation75_spill] sm:$0xff] %v12162_v3  ;;  %16617 = vst [vmem:[#allocation80_spill] sm:$0xff] %v12187_v14  ;;  %7467 = vmatmul.mubr.msk.f32.gmra.mrb[222].mxu1 %vm1585_vm3, %v1246_v18  ;;  %v884_v18 = vmul.f32 %v16562_v62, %v497_v47  ;;  %v522_v14 = vld [vmem:[%s8756_s21 + $0x6d8] sm:$0xff] }
 0x31f   : > { %16613 = vst [vmem:[#allocation76_spill] sm:$0xff] %v12168_v49  ;;  %v2690_v63 = vpop.f32.mrb[106].mxu0  ;;  %7469 = vmatprep.mubr.msk.f32.mxu1 %vm1585_vm3, %v1251_v54 }
 0x320   : > { %v12177_v15 = vadd.f32 %v11660_v6, %v2690_v63  ;;  %v2692_v2 = vpop.f32.mrb[107].mxu0  ;;  %7199 = vmatmul.mubr.msk.f32.gmra.mrb[68].mxu0 %vm1585_vm3, %v1251_v54  ;;  %v5227_v6 = vpop.f32.mrb[117].mxu1 }
 0x321   : > { %v12183_v12 = vadd.f32 %v11663_v53, %v2692_v2  ;;  %3077 = vmatprep.mubr.f32.mxu0 %v16564_v39  ;;  %v1261_v53 = vadd.f32 %v16563_v13, %v874_v5  ;;  %v879_v2 = vmul.f32 %v16562_v62, %v492_v43  ;;  %v502_v6 = vld [vmem:[%s8756_s21 + $0x638] sm:$0xff]  ;;  %v12204_v54 = vpop.f32.mrb[118].mxu1 }
 0x322   : > { %16615 = vst [vmem:[#allocation78_spill] sm:$0xff] %v12177_v15  ;;  %16620 = vst [vmem:[#allocation83_spill] sm:$0xff] %v12204_v54  ;;  %7470 = vmatmul.mubr.msk.f32.gmra.mrb[224].mxu1 %vm1585_vm3, %v1256_v37  ;;  %v889_v47 = vmul.f32 %v16562_v62, %v502_v6  ;;  %v512_v54 = vld [vmem:[%s8756_s21 + $0x688] sm:$0xff] }
 0x323   : > { %16616 = vst [vmem:[#allocation79_spill] sm:$0xff] %v12183_v12  ;;  %v2696_v63 = vpop.f32.mrb[108].mxu0  ;;  %7472 = vmatprep.mubr.msk.f32.mxu1 %vm1585_vm3, %v1261_v53  ;;  %v1266_v43 = vadd.f32 %v16563_v13, %v879_v2 }
 0x324   : > { %v12193_v21 = vadd.f32 %v11670_v40, %v2696_v63  ;;  %v2698_v32 = vpop.f32.mrb[109].mxu0  ;;  %7200 = vmatmul.mubr.msk.f32.gmra.mrb[70].mxu0 %vm1585_vm3, %v1256_v37  ;;  %v507_v40 = vld [vmem:[%s8756_s21 + $0x660] sm:$0xff]  ;;  %v5232_v63 = vpop.f32.mrb[119].mxu1  ;;  %v1271_v37 = vadd.f32 %v16563_v13, %v884_v18  ;;  %v1276_v18 = vadd.f32 %v16563_v13, %v889_v47 }
 0x325   : > { %v12199_v35 = vadd.f32 %v11674_v46, %v2698_v32  ;;  %3083 = vmatprep.mubr.f32.mxu0 %v16564_v39  ;;  %v894_v63 = vmul.f32 %v16562_v62, %v507_v40  ;;  %v899_v40 = vmul.f32 %v16562_v62, %v512_v54 }
 0x326   : > { %16618 = vst [vmem:[#allocation81_spill] sm:$0xff] %v12193_v21  ;;  %7473 = vmatmul.mubr.msk.f32.gmra.mrb[226].mxu1 %vm1585_vm3, %v1266_v43 }
 0x327   : > { %16619 = vst [vmem:[#allocation82_spill] sm:$0xff] %v12199_v35  ;;  %v2702_v48 = vpop.f32.mrb[110].mxu0  ;;  %7475 = vmatprep.mubr.msk.f32.mxu1 %vm1585_vm3, %v1271_v37 }
 0x328   : > { %v12210_v5 = vadd.f32 %v11677_v7, %v2702_v48  ;;  %v2704_v46 = vpop.f32.mrb[111].mxu0  ;;  %7201 = vmatmul.mubr.msk.f32.gmra.mrb[72].mxu0 %vm1585_vm3, %v1261_v53  ;;  %v12222_v7 = vpop.f32.mrb[120].mxu1  ;;  %v517_v48 = vld [vmem:[%s8756_s21 + $0x6b0] sm:$0xff] }
 0x329   : > { %v12216_v32 = vadd.f32 %v11680_v33, %v2704_v46  ;;  %3089 = vmatprep.mubr.f32.mxu0 %v16564_v39  ;;  %16623 = vst [vmem:[#allocation86_spill] sm:$0xff] %v12222_v7  ;;  %v5237_v53 = vpop.f32.mrb[121].mxu1  ;;  %v904_v7 = vmul.f32 %v16562_v62, %v517_v48  ;;  %v909_v48 = vmul.f32 %v16562_v62, %v522_v14  ;;  %v16631_v14 = vld [vmem:[#allocation7_spill] sm:$0xff] }
 0x32a   : > { %16621 = vst [vmem:[#allocation84_spill] sm:$0xff] %v12210_v5  ;;  %v1281_v53 = vadd.f32 %v16563_v13, %v894_v63  ;;  %7476 = vmatmul.mubr.msk.f32.gmra.mrb[228].mxu1 %vm1585_vm3, %v1276_v18  ;;  %v1286_v63 = vadd.f32 %v16563_v13, %v899_v40 }
 0x32b   : > { %16622 = vst [vmem:[#allocation85_spill] sm:$0xff] %v12216_v32  ;;  %v2708_v2 = vpop.f32.mrb[112].mxu0 }
 0x32c   : > { %v12228_v33 = vadd.f32 %v11688_v44, %v2708_v2  ;;  %v2710_v6 = vpop.f32.mrb[113].mxu0  ;;  %7202 = vmatmul.mubr.msk.f32.gmra.mrb[74].mxu0 %vm1585_vm3, %v1266_v43  ;;  %v12240_v44 = vpop.f32.mrb[122].mxu1  ;;  %v527_v2 = vld [vmem:[%s8756_s21 + $0x700] sm:$0xff]  ;;  %7478 = vmatprep.mubr.msk.f32.mxu1 %vm1585_vm3, %v1281_v53 }
 0x32d   : > { %v12234_v46 = vadd.f32 %v11692_v29, %v2710_v6  ;;  %3095 = vmatprep.mubr.f32.mxu0 %v16564_v39  ;;  %16626 = vst [vmem:[#allocation89_spill] sm:$0xff] %v12240_v44  ;;  %v5242_v43 = vpop.f32.mrb[123].mxu1  ;;  %v16628_v6 = vld [vmem:[#allocation5_spill] sm:$0xff]  ;;  %v914_v26 = vmul.f32 %v16562_v62, %v527_v2  ;;  %v919_v2 = vmul.f32 %v16562_v62, %v532_v51 }
 0x32e   : > { %16624 = vst [vmem:[#allocation87_spill] sm:$0xff] %v12228_v33  ;;  %v1291_v43 = vadd.f32 %v16563_v13, %v904_v7  ;;  %7479 = vmatmul.mubr.msk.f32.gmra.mrb[230].mxu1 %vm1585_vm3, %v1286_v63  ;;  %v1296_v7 = vadd.f32 %v16563_v13, %v909_v48  ;;  %v929_v48 = vmul.f32 %v16562_v62, %v542_v42 }
 0x32f   : > { %16625 = vst [vmem:[#allocation88_spill] sm:$0xff] %v12234_v46  ;;  %v2714_v47 = vpop.f32.mrb[114].mxu0 }
 0x330   : > { %v12246_v29 = vadd.f32 %v11695_v17, %v2714_v47  ;;  %v2716_v54 = vpop.f32.mrb[115].mxu0  ;;  %7203 = vmatmul.mubr.msk.f32.gmra.mrb[76].mxu0 %vm1585_vm3, %v1271_v37  ;;  %v12258_v17 = vpop.f32.mrb[124].mxu1  ;;  %v537_v47 = vld [vmem:[%s8756_s21 + $0x750] sm:$0xff]  ;;  %7481 = vmatprep.mubr.msk.f32.mxu1 %vm1585_vm3, %v1291_v43 }
 0x331   : > { %v12252_v44 = vadd.f32 %v16628_v6, %v2716_v54  ;;  %3101 = vmatprep.mubr.f32.mxu0 %v16564_v39  ;;  %16630 = vst [vmem:[#allocation91_spill] sm:$0xff] %v12258_v17  ;;  %v5247_v37 = vpop.f32.mrb[125].mxu1  ;;  %v924_v56 = vmul.f32 %v16562_v62, %v537_v47  ;;  %v16637_v47 = vld [vmem:[#allocation9_spill] sm:$0xff] }
 0x332   : > { %16627 = vst [vmem:[#allocation90_spill] sm:$0xff] %v12246_v29  ;;  %v1301_v37 = vadd.f32 %v16563_v13, %v914_v26  ;;  %v12276_v52 = vpop.f32.mrb[126].mxu1  ;;  %7482 = vmatmul.mubr.msk.f32.gmra.mrb[232].mxu1 %vm1585_vm3, %v1296_v7  ;;  %v1306_v26 = vadd.f32 %v16563_v13, %v919_v2 }
 0x333   : > { %16629 = vst [vmem:[#allocation5_spill] sm:$0xff] %v12252_v44  ;;  %v2720_v40 = vpop.f32.mrb[116].mxu0  ;;  %16635 = vst [vmem:[#allocation92_spill] sm:$0xff] %v12276_v52 }
 0x334   : > { %v12264_v54 = vadd.f32 %v16631_v14, %v2720_v40  ;;  %v2722_v6 = vpop.f32.mrb[117].mxu0  ;;  %7204 = vmatmul.mubr.msk.f32.gmra.mrb[78].mxu0 %vm1585_vm3, %v1276_v18  ;;  %v547_v40 = vld [vmem:[%s8756_s21 + $0x7a0] sm:$0xff]  ;;  %v5252_v14 = vpop.f32.mrb[127].mxu1  ;;  %7484 = vmatprep.mubr.msk.f32.mxu1 %vm1585_vm3, %v1301_v37 }
 0x335   : > { %v12270_v17 = vadd.f32 %v16633_v23, %v2722_v6  ;;  %3107 = vmatprep.mubr.f32.mxu0 %v16564_v39  ;;  %v1311_v14 = vadd.f32 %v16563_v13, %v924_v56  ;;  %v934_v52 = vmul.f32 %v16562_v62, %v547_v40  ;;  %v12293_v20 = vpop.f32.mrb[128].mxu1 }
 0x336   : > { %16632 = vst [vmem:[#allocation7_spill] sm:$0xff] %v12264_v54  ;;  %16639 = vst [vmem:[#allocation94_spill] sm:$0xff] %v12293_v20  ;;  %7485 = vmatmul.mubr.msk.f32.gmra.mrb[234].mxu1 %vm1585_vm3, %v1306_v26 }
 0x337   : > { %16634 = vst [vmem:[#allocation8_spill] sm:$0xff] %v12270_v17  ;;  %v2726_v18 = vpop.f32.mrb[118].mxu0  ;;  %7487 = vmatprep.mubr.msk.f32.mxu1 %vm1585_vm3, %v1311_v14  ;;  %v12307_v62 = vadd.f32 %v16563_v13, %v934_v52 }
 0x338   : > { %v12282_v51 = vadd.f32 %v11713_v30, %v2726_v18  ;;  %v2728_v23 = vpop.f32.mrb[119].mxu0  ;;  %7205 = vmatmul.mubr.msk.f32.gmra.mrb[80].mxu0 %vm1585_vm3, %v1281_v53  ;;  %v5257_v30 = vpop.f32.mrb[129].mxu1  ;;  %v16640_v53 = vld [vmem:[#allocation11_spill] sm:$0xff] }
 0x339   : > { %v12288_v6 = vadd.f32 %v16637_v47, %v2728_v23  ;;  %3113 = vmatprep.mubr.f32.mxu0 %v16564_v39  ;;  %v1316_v23 = vadd.f32 %v16563_v13, %v929_v48  ;;  %v16642_v47 = vld [vmem:[#allocation6_spill] sm:$0xff]  ;;  %v12309_v40 = vpop.f32.mrb[130].mxu1 }
 0x33a   : > { %16636 = vst [vmem:[#allocation93_spill] sm:$0xff] %v12282_v51  ;;  %16644 = vst [vmem:[#allocation95_spill] sm:$0xff] %v12309_v40  ;;  %v5262_v30 = vpop.f32.mrb[131].mxu1  ;;  %v16650_v40 = vld [vmem:[#allocation13_spill] sm:$0xff] }
 0x33b   : > { %16638 = vst [vmem:[#allocation9_spill] sm:$0xff] %v12288_v6  ;;  %v2732_v18 = vpop.f32.mrb[120].mxu0  ;;  %7488 = vmatmul.mubr.msk.f32.gmra.mrb[236].mxu1 %vm1585_vm3, %v1316_v23 }
 0x33c   : > { %v12298_v2 = vadd.f32 %v16640_v53, %v2732_v18  ;;  %v2734_v42 = vpop.f32.mrb[121].mxu0  ;;  %7206 = vmatmul.mubr.msk.f32.gmra.mrb[82].mxu0 %vm1585_vm3, %v1286_v63  ;;  %7490 = vmatprep.mubr.msk.f32.mxu1 %vm1585_vm3, %v12307_v62  ;;  %v16646_v53 = vld [vmem:[#allocation10_spill] sm:$0xff] }
 0x33d   : > { %v12303_v56 = vadd.f32 %v16642_v47, %v2734_v42  ;;  %3119 = vmatprep.mubr.f32.mxu0 %v16564_v39  ;;  %v12322_v13 = vpop.f32.mrb[132].mxu1  ;;  %v16649_v47 = vld [vmem:[#allocation12_spill] sm:$0xff] }
 0x33e   : > { %16641 = vst [vmem:[#allocation11_spill] sm:$0xff] %v12298_v2  ;;  %16648 = vst [vmem:[#allocation97_spill] sm:$0xff] %v12322_v13  ;;  %v5267_v52 = vpop.f32.mrb[133].mxu1  ;;  %v16656_v13 = vld [vmem:[#allocation14_spill] sm:$0xff] }
 0x33f   : > { %16643 = vst [vmem:[#allocation6_spill] sm:$0xff] %v12303_v56  ;;  %v2738_v18 = vpop.f32.mrb[122].mxu0  ;;  %7491 = vmatmul.mubr.msk.f32.gmra.mrb[238].mxu1 %vm1585_vm3, %v16649_v47 }
 0x340   : > { %v12315_v63 = vadd.f32 %v11731_v24, %v2738_v18  ;;  %v2740_v48 = vpop.f32.mrb[123].mxu0  ;;  %7207 = vmatmul.mubr.msk.f32.gmra.mrb[84].mxu0 %vm1585_vm3, %v1291_v43  ;;  %7493 = vmatprep.mubr.msk.f32.mxu1 %vm1585_vm3, %v16650_v40  ;;  %v16651_v24 = vld [vmem:[#allocation35_spill] sm:$0xff]  ;;  %v16653_v43 = vld [vmem:[#allocation36_spill] sm:$0xff] }
 0x341   : > { %v12319_v42 = vadd.f32 %v16646_v53, %v2740_v48  ;;  %3125 = vmatprep.mubr.f32.mxu0 %v16564_v39  ;;  %v12336_v53 = vpop.f32.mrb[134].mxu1 }
 0x342   : > { %16645 = vst [vmem:[#allocation96_spill] sm:$0xff] %v12315_v63  ;;  %16655 = vst [vmem:[#allocation35_spill] sm:$0xff] %v12336_v53  ;;  %v5272_v52 = vpop.f32.mrb[135].mxu1  ;;  %v16663_v53 = vld [vmem:[#allocation17_spill] sm:$0xff] }
 0x343   : > { %16647 = vst [vmem:[#allocation10_spill] sm:$0xff] %v12319_v42  ;;  %v2744_v30 = vpop.f32.mrb[124].mxu0  ;;  %7494 = vmatmul.mubr.msk.f32.gmra.mrb[240].mxu1 %vm1585_vm3, %v16656_v13  ;;  %v16662_v52 = vld [vmem:[#allocation16_spill] sm:$0xff] }
 0x344   : > { %v12329_v18 = vadd.f32 %v16651_v24, %v2744_v30  ;;  %v2746_v20 = vpop.f32.mrb[125].mxu0  ;;  %7208 = vmatmul.mubr.msk.f32.gmra.mrb[86].mxu0 %vm1585_vm3, %v1296_v7  ;;  %7496 = vmatprep.mubr.msk.f32.mxu1 %vm1585_vm3, %v16657_v41 }
 0x345   : > { %v12333_v48 = vadd.f32 %v16653_v43, %v2746_v20  ;;  %3131 = vmatprep.mubr.f32.mxu0 %v16564_v39  ;;  %v16659_v20 = vld [vmem:[#allocation37_spill] sm:$0xff]  ;;  %v12350_v24 = vpop.f32.mrb[136].mxu1 }
 0x346   : > { %16652 = vst [vmem:[#allocation12_spill] sm:$0xff] %v12329_v18  ;;  %16661 = vst [vmem:[#allocation15_spill] sm:$0xff] %v12350_v24  ;;  %v5277_v43 = vpop.f32.mrb[137].mxu1  ;;  %v16669_v24 = vld [vmem:[#allocation18_spill] sm:$0xff] }
 0x347   : > { %16654 = vst [vmem:[#allocation13_spill] sm:$0xff] %v12333_v48  ;;  %v2750_v47 = vpop.f32.mrb[126].mxu0  ;;  %7497 = vmatmul.mubr.msk.f32.gmra.mrb[242].mxu1 %vm1585_vm3, %v16662_v52 }
 0x348   : > { %v12343_v40 = vadd.f32 %v11749_v22, %v2750_v47  ;;  %v2752_v30 = vpop.f32.mrb[127].mxu0  ;;  %7209 = vmatmul.mubr.msk.f32.gmra.mrb[88].mxu0 %vm1585_vm3, %v1301_v37  ;;  %7499 = vmatprep.mubr.msk.f32.mxu1 %vm1585_vm3, %v16663_v53  ;;  %v16664_v22 = vld [vmem:[#allocation38_spill] sm:$0xff]  ;;  %v16666_v37 = vld [vmem:[#allocation39_spill] sm:$0xff] }
 0x349   : > { %v12347_v7 = vadd.f32 %v16659_v20, %v2752_v30  ;;  %3137 = vmatprep.mubr.f32.mxu0 %v16564_v39  ;;  %v12364_v20 = vpop.f32.mrb[138].mxu1 }
 0x34a   : > { %16658 = vst [vmem:[#allocation36_spill] sm:$0xff] %v12343_v40  ;;  %16668 = vst [vmem:[#allocation17_spill] sm:$0xff] %v12364_v20  ;;  %v5282_v43 = vpop.f32.mrb[139].mxu1  ;;  %v16676_v20 = vld [vmem:[#allocation21_spill] sm:$0xff] }
 0x34b   : > { %16660 = vst [vmem:[#allocation14_spill] sm:$0xff] %v12347_v7  ;;  %v2756_v13 = vpop.f32.mrb[128].mxu0  ;;  %7500 = vmatmul.mubr.msk.f32.gmra.mrb[244].mxu1 %vm1585_vm3, %v16669_v24  ;;  %v16670_v7 = vld [vmem:[#allocation19_spill] sm:$0xff]  ;;  %v16675_v43 = vld [vmem:[#allocation20_spill] sm:$0xff] }
 0x34c   : > { %v12357_v41 = vadd.f32 %v16664_v22, %v2756_v13  ;;  %v2758_v47 = vpop.f32.mrb[129].mxu0  ;;  %7210 = vmatmul.mubr.msk.f32.gmra.mrb[90].mxu0 %vm1585_vm3, %v1306_v26  ;;  %7502 = vmatprep.mubr.msk.f32.mxu1 %vm1585_vm3, %v16670_v7  ;;  %v16672_v26 = vld [vmem:[#allocation40_spill] sm:$0xff] }
 0x34d   : > { %v12361_v30 = vadd.f32 %v16666_v37, %v2758_v47  ;;  %3143 = vmatprep.mubr.f32.mxu0 %v16564_v39  ;;  %v12378_v47 = vpop.f32.mrb[140].mxu1 }
 0x34e   : > { %16665 = vst [vmem:[#allocation37_spill] sm:$0xff] %v12357_v41  ;;  %16674 = vst [vmem:[#allocation18_spill] sm:$0xff] %v12378_v47  ;;  %v5287_v37 = vpop.f32.mrb[141].mxu1  ;;  %v16682_v47 = vld [vmem:[#allocation22_spill] sm:$0xff] }
 0x34f   : > { %16667 = vst [vmem:[#allocation16_spill] sm:$0xff] %v12361_v30  ;;  %v2762_v52 = vpop.f32.mrb[130].mxu0  ;;  %7503 = vmatmul.mubr.msk.f32.gmra.mrb[246].mxu1 %vm1585_vm3, %v16675_v43 }
 0x350   : > { %v12371_v53 = vadd.f32 %v11767_v31, %v2762_v52  ;;  %v2764_v13 = vpop.f32.mrb[131].mxu0  ;;  %7211 = vmatmul.mubr.msk.f32.gmra.mrb[92].mxu0 %vm1585_vm3, %v1311_v14  ;;  %7505 = vmatprep.mubr.msk.f32.mxu1 %vm1585_vm3, %v16676_v20  ;;  %v16677_v31 = vld [vmem:[#allocation41_spill] sm:$0xff]  ;;  %v16679_v14 = vld [vmem:[#allocation42_spill] sm:$0xff] }
 0x351   : > { %v12375_v22 = vadd.f32 %v16672_v26, %v2764_v13  ;;  %3149 = vmatprep.mubr.f32.mxu0 %v16564_v39  ;;  %v12392_v26 = vpop.f32.mrb[142].mxu1 }
 0x352   : > { %16671 = vst [vmem:[#allocation38_spill] sm:$0xff] %v12371_v53  ;;  %16681 = vst [vmem:[#allocation20_spill] sm:$0xff] %v12392_v26  ;;  %v5292_v37 = vpop.f32.mrb[143].mxu1  ;;  %v16692_v26 = vld [vmem:[#allocation45_spill] sm:$0xff] }
 0x353   : > { %16673 = vst [vmem:[#allocation39_spill] sm:$0xff] %v12375_v22  ;;  %v2768_v24 = vpop.f32.mrb[132].mxu0  ;;  %7506 = vmatmul.mubr.msk.f32.gmra.mrb[248].mxu1 %vm1585_vm3, %v16682_v47  ;;  %v16683_v22 = vld [vmem:[#allocation23_spill] sm:$0xff]  ;;  %v16688_v37 = vld [vmem:[#allocation24_spill] sm:$0xff] }
 0x354   : > { %v12385_v7 = vadd.f32 %v16677_v31, %v2768_v24  ;;  %v2770_v52 = vpop.f32.mrb[133].mxu0  ;;  %7212 = vmatmul.mubr.msk.f32.gmra.mrb[94].mxu0 %vm1585_vm3, %v1316_v23  ;;  %7508 = vmatprep.mubr.msk.f32.mxu1 %vm1585_vm3, %v16683_v22  ;;  %v16685_v23 = vld [vmem:[#allocation43_spill] sm:$0xff]  ;;  %v16690_v22 = vld [vmem:[#allocation44_spill] sm:$0xff] }
 0x355   : > { %v12389_v13 = vadd.f32 %v16679_v14, %v2770_v52  ;;  %3155 = vmatprep.mubr.f32.mxu0 %v16564_v39  ;;  %v12406_v52 = vpop.f32.mrb[144].mxu1  ;;  %v16689_v39 = vld [vmem:[#allocation25_spill] sm:$0xff] }
 0x356   : > { %16678 = vst [vmem:[#allocation19_spill] sm:$0xff] %v12385_v7  ;;  %16687 = vst [vmem:[#allocation42_spill] sm:$0xff] %v12406_v52  ;;  %v5297_v14 = vpop.f32.mrb[145].mxu1  ;;  %v16696_v52 = vld [vmem:[#allocation27_spill] sm:$0xff] }
 0x357   : > { %16680 = vst [vmem:[#allocation40_spill] sm:$0xff] %v12389_v13  ;;  %v2774_v43 = vpop.f32.mrb[134].mxu0  ;;  %7509 = vmatmul.mubr.msk.f32.gmra.mrb[250].mxu1 %vm1585_vm3, %v16688_v37 }
 0x358   : > { %v12399_v20 = vadd.f32 %v11785_v9, %v2774_v43  ;;  %v2776_v24 = vpop.f32.mrb[135].mxu0  ;;  %7213 = vmatmul.mubr.msk.f32.gmra.mrb[96].mxu0 %vm1585_vm3, %v12307_v62  ;;  %7511 = vmatprep.mubr.msk.f32.mxu1 %vm1585_vm3, %v16689_v39 }
 0x359   : > { %v12404_v31 = vadd.f32 %v16685_v23, %v2776_v24  ;;  %v12418_v62 = vpop.f32.mrb[146].mxu1  ;;  %v16695_v23 = vld [vmem:[#allocation26_spill] sm:$0xff] }
 0x35a   : > { %16684 = vst [vmem:[#allocation21_spill] sm:$0xff] %v12399_v20  ;;  %16694 = vst [vmem:[#allocation43_spill] sm:$0xff] %v12418_v62  ;;  %v5302_v24 = vpop.f32.mrb[147].mxu1  ;;  %v16702_v62 = vld [vmem:[#allocation29_spill] sm:$0xff] }
 0x35b   : > { %16686 = vst [vmem:[#allocation41_spill] sm:$0xff] %v12404_v31  ;;  %v2780_v47 = vpop.f32.mrb[136].mxu0  ;;  %7512 = vmatmul.mubr.msk.f32.gmra.mrb[252].mxu1 %vm1585_vm3, %v16695_v23  ;;  %v16703_v23 = vld [vmem:[#allocation47_spill] sm:$0xff] }
 0x35c   : > { %v12413_v9 = vadd.f32 %v16690_v22, %v2780_v47  ;;  %v2782_v43 = vpop.f32.mrb[137].mxu0  ;;  %7514 = vmatprep.mubr.msk.f32.mxu1 %vm1585_vm3, %v16696_v52  ;;  %v16698_v47 = vld [vmem:[#allocation46_spill] sm:$0xff] }
 0x35d   : > { %v12416_v20 = vadd.f32 %v16692_v26, %v2782_v43  ;;  %v16701_v43 = vld [vmem:[#allocation28_spill] sm:$0xff] }
 0x35e   : > { %16691 = vst [vmem:[#allocation22_spill] sm:$0xff] %v12413_v9  ;;  %v12430_v9 = vpop.f32.mrb[148].mxu1 }
 0x35f   : > { %16693 = vst [vmem:[#allocation23_spill] sm:$0xff] %v12416_v20  ;;  %v2786_v14 = vpop.f32.mrb[138].mxu0  ;;  %16700 = vst [vmem:[#allocation44_spill] sm:$0xff] %v12430_v9  ;;  %v5307_v26 = vpop.f32.mrb[149].mxu1  ;;  %7515 = vmatmul.mubr.msk.f32.gmra.mrb[254].mxu1 %vm1585_vm3, %v16701_v43  ;;  %v16709_v9 = vld [vmem:[#allocation31_spill] sm:$0xff] }
 0x360   : > { %v12425_v37 = vadd.f32 %v11803_v34, %v2786_v14  ;;  %v2788_v39 = vpop.f32.mrb[139].mxu0  ;;  %7517 = vmatprep.mubr.msk.f32.mxu1 %vm1585_vm3, %v16702_v62  ;;  %v16705_v34 = vld [vmem:[#allocation48_spill] sm:$0xff] }
 0x361   : > { %v12428_v22 = vadd.f32 %v16698_v47, %v2788_v39  ;;  %v16708_v47 = vld [vmem:[#allocation30_spill] sm:$0xff] }
 0x362   : > { %16697 = vst [vmem:[#allocation24_spill] sm:$0xff] %v12425_v37  ;;  %v12442_v37 = vpop.f32.mrb[150].mxu1 }
 0x363   : > { %16699 = vst [vmem:[#allocation25_spill] sm:$0xff] %v12428_v22  ;;  %v2792_v24 = vpop.f32.mrb[140].mxu0  ;;  %16707 = vst [vmem:[#allocation27_spill] sm:$0xff] %v12442_v37  ;;  %v5312_v39 = vpop.f32.mrb[151].mxu1  ;;  %7518 = vmatmul.mubr.msk.f32.gmra.mrb[0].mxu1 %vm1585_vm3, %v16708_v47  ;;  %v16716_v47 = vld [vmem:[#allocation33_spill] sm:$0xff] }
 0x364   : > { %v12437_v20 = vadd.f32 %v16703_v23, %v2792_v24  ;;  %v2794_v52 = vpop.f32.mrb[141].mxu0  ;;  %7520 = vmatprep.mubr.msk.f32.mxu1 %vm1585_vm3, %v16709_v9  ;;  %v16711_v24 = vld [vmem:[#allocation49_spill] sm:$0xff] }
 0x365   : > { %v12440_v14 = vadd.f32 %v16705_v34, %v2794_v52  ;;  %v16714_v34 = vld [vmem:[#allocation32_spill] sm:$0xff] }
 0x366   : > { %16704 = vst [vmem:[#allocation45_spill] sm:$0xff] %v12437_v20  ;;  %v12454_v20 = vpop.f32.mrb[152].mxu1 }
 0x367   : > { %16706 = vst [vmem:[#allocation26_spill] sm:$0xff] %v12440_v14  ;;  %v2798_v26 = vpop.f32.mrb[142].mxu0  ;;  %16713 = vst [vmem:[#allocation29_spill] sm:$0xff] %v12454_v20  ;;  %v5317_v52 = vpop.f32.mrb[153].mxu1  ;;  %7521 = vmatmul.mubr.msk.f32.gmra.mrb[2].mxu1 %vm1585_vm3, %v16714_v34 }
 0x368   : > { %v12449_v43 = vadd.f32 %v11821_v60, %v2798_v26  ;;  %v2800_v62 = vpop.f32.mrb[143].mxu0  ;;  %7523 = vmatprep.mubr.msk.f32.mxu1 %vm1585_vm3, %v16716_v47  ;;  %v16719_v26 = vld [vmem:[#allocation34_spill] sm:$0xff] }
 0x369   : > { %v12452_v23 = vadd.f32 %v16711_v24, %v2800_v62  ;;  %v12464_v9 = vpop.f32.mrb[154].mxu1 }
 0x36a   : > { %16710 = vst [vmem:[#allocation46_spill] sm:$0xff] %v12449_v43  ;;  %16718 = vst [vmem:[#allocation30_spill] sm:$0xff] %v12464_v9  ;;  %v5322_v60 = vpop.f32.mrb[155].mxu1 }
 0x36b   : > { %16712 = vst [vmem:[#allocation28_spill] sm:$0xff] %v12452_v23  ;;  %v12458_v39 = vpop.f32.mrb[0].mxu0  ;;  %7524 = vmatmul.mubr.msk.f32.gmra.mrb[4].mxu1 %vm1585_vm3, %v16719_v26 }
 0x36c   : > { %16715 = vst [vmem:[#allocation47_spill] sm:$0xff] %v12458_v39  ;;  %v12462_v14 = vpop.f32.mrb[1].mxu0 }
 0x36d   : > { %16717 = vst [vmem:[#allocation48_spill] sm:$0xff] %v12462_v14  ;;  %v12472_v52 = vpop.f32.mrb[156].mxu1  ;;  %v3301_v60 = vsel %vm3300_vm4, %v12462_v14, inf }
 0x36e   : > { %16722 = vst [vmem:[#allocation32_spill] sm:$0xff] %v12472_v52  ;;  %v5327_v34 = vpop.f32.mrb[157].mxu1 }
 0x36f   : > { %v12468_v62 = vpop.f32.mrb[2].mxu0 }
 0x370   : > { %16720 = vst [vmem:[#allocation31_spill] sm:$0xff] %v12468_v62  ;;  %v12470_v24 = vpop.f32.mrb[3].mxu0 }
 0x371   : > { %16721 = vst [vmem:[#allocation49_spill] sm:$0xff] %v12470_v24  ;;  %v12484_v9 = vpop.f32.mrb[158].mxu1 }
 0x372   : > { %16725 = vst [vmem:[#allocation98_spill] sm:$0xff] %v12484_v9  ;;  %v5332_v20 = vpop.f32.mrb[159].mxu1 }
 0x373   : > { %v12474_v23 = vpop.f32.mrb[4].mxu0  ;;  %v3445_v20 = vsel %vm3300_vm4, %v12122_v55, inf }
 0x374   : > { %16723 = vst [vmem:[#allocation33_spill] sm:$0xff] %v12474_v23  ;;  %v3303_v47 = vmin.f32 %v12458_v39, %v12474_v23  ;;  %v12478_v43 = vpop.f32.mrb[5].mxu0  ;;  %v3302_v23 = vsel %vm3300_vm4, %v12470_v24, inf }
 0x375   : > { %16724 = vst [vmem:[#allocation34_spill] sm:$0xff] %v12478_v43  ;;  %v3304_v26 = vsel %vm3300_vm4, %v12478_v43, inf  ;;  %v12496_v14 = vpop.f32.mrb[160].mxu1 }
 0x376   : > { %v3305_v37 = vmin.f32 %v3301_v60, %v3304_v26  ;;  %16728 = vst [vmem:[#allocation101_spill] sm:$0xff] %v12496_v14  ;;  %v5337_v31 = vpop.f32.mrb[161].mxu1 }
 0x377   : > { %v12486_v52 = vpop.f32.mrb[6].mxu0 }
 0x378   : > { %16726 = vst [vmem:[#allocation99_spill] sm:$0xff] %v12486_v52  ;;  %v3306_v34 = vmin.f32 %v12468_v62, %v12486_v52  ;;  %v12490_v22 = vpop.f32.mrb[7].mxu0 }
 0x379   : > { %16727 = vst [vmem:[#allocation100_spill] sm:$0xff] %v12490_v22  ;;  %v3307_v39 = vsel %vm3300_vm4, %v12490_v22, inf  ;;  %v12507_v24 = vpop.f32.mrb[162].mxu1  ;;  %v3444_v22 = vmin.f32 %v3445_v20, %v12116_v8 }
 0x37a   : > { %v3308_v43 = vmin.f32 %v3302_v23, %v3307_v39  ;;  %16731 = vst [vmem:[#allocation104_spill] sm:$0xff] %v12507_v24  ;;  %v5342_v14 = vpop.f32.mrb[163].mxu1 }
 0x37b   : > { %v12500_v60 = vpop.f32.mrb[8].mxu0 }
 0x37c   : > { %16729 = vst [vmem:[#allocation102_spill] sm:$0xff] %v12500_v60  ;;  %v3309_v26 = vmin.f32 %v3303_v47, %v12500_v60  ;;  %v12503_v52 = vpop.f32.mrb[9].mxu0  ;;  %v3450_v60 = vmin.f32 %v3444_v22, %v12132_v59 }
 0x37d   : > { %16730 = vst [vmem:[#allocation103_spill] sm:$0xff] %v12503_v52  ;;  %v3310_v62 = vsel %vm3300_vm4, %v12503_v52, inf  ;;  %v12517_v55 = vpop.f32.mrb[164].mxu1 }
 0x37e   : > { %v3311_v9 = vmin.f32 %v3305_v37, %v3310_v62  ;;  %v5347_v13 = vpop.f32.mrb[165].mxu1  ;;  %v3456_v37 = vmin.f32 %v3450_v60, %v12147_v61 }
 0x37f   : > { %v12510_v23 = vpop.f32.mrb[10].mxu0 }
 0x380   : > { %16732 = vst [vmem:[#allocation105_spill] sm:$0xff] %v12510_v23  ;;  %v3312_v31 = vmin.f32 %v3306_v34, %v12510_v23  ;;  %v12513_v39 = vpop.f32.mrb[11].mxu0  ;;  %v3451_v34 = vsel %vm3300_vm4, %v12153_v25, inf }
 0x381   : > { %16733 = vst [vmem:[#allocation106_spill] sm:$0xff] %v12513_v39  ;;  %v3313_v47 = vsel %vm3300_vm4, %v12513_v39, inf  ;;  %v12530_v8 = vpop.f32.mrb[166].mxu1  ;;  %v3462_v13 = vmin.f32 %v3456_v37, %v3451_v34 }
 0x382   : > { %v3314_v52 = vmin.f32 %v3308_v43, %v3313_v47  ;;  %v5352_v22 = vpop.f32.mrb[167].mxu1 }
 0x383   : > { %v12520_v24 = vpop.f32.mrb[12].mxu0 }
 0x384   : > { %16734 = vst [vmem:[#allocation107_spill] sm:$0xff] %v12520_v24  ;;  %v3315_v14 = vmin.f32 %v3309_v26, %v12520_v24  ;;  %v12524_v62 = vpop.f32.mrb[13].mxu0 }
 0x385   : > { %16735 = vst [vmem:[#allocation108_spill] sm:$0xff] %v12524_v62  ;;  %v3316_v20 = vsel %vm3300_vm4, %v12524_v62, inf  ;;  %v12539_v61 = vpop.f32.mrb[168].mxu1  ;;  %v3468_v62 = vmin.f32 %v3462_v13, %v12162_v3 }
 0x386   : > { %v3317_v23 = vmin.f32 %v3311_v9, %v3316_v20  ;;  %v5357_v59 = vpop.f32.mrb[169].mxu1 }
 0x387   : > { %v12532_v43 = vpop.f32.mrb[14].mxu0 }
 0x388   : > { %16736 = vst [vmem:[#allocation109_spill] sm:$0xff] %v12532_v43  ;;  %v3318_v47 = vmin.f32 %v3312_v31, %v12532_v43  ;;  %v12535_v60 = vpop.f32.mrb[15].mxu0  ;;  %v3454_v31 = vsel %vm3300_vm4, %v12168_v49, inf }
 0x389   : > { %16737 = vst [vmem:[#allocation110_spill] sm:$0xff] %v12535_v60  ;;  %v3319_v26 = vsel %vm3300_vm4, %v12535_v60, inf  ;;  %v12551_v34 = vpop.f32.mrb[170].mxu1  ;;  %v3474_v59 = vmin.f32 %v3468_v62, %v3454_v31  ;;  %v3457_v62 = vsel %vm3300_vm4, %v12183_v12, inf }
 0x38a   : > { %v3320_v25 = vmin.f32 %v3314_v52, %v3319_v26  ;;  %v5362_v43 = vpop.f32.mrb[171].mxu1 }
 0x38b   : > { %v12541_v24 = vpop.f32.mrb[16].mxu0 }
 0x38c   : > { %16738 = vst [vmem:[#allocation111_spill] sm:$0xff] %v12541_v24  ;;  %v3321_v9 = vmin.f32 %v3315_v14, %v12541_v24  ;;  %v12545_v20 = vpop.f32.mrb[17].mxu0 }
 0x38d   : > { %16739 = vst [vmem:[#allocation112_spill] sm:$0xff] %v12545_v20  ;;  %v3322_v37 = vsel %vm3300_vm4, %v12545_v20, inf  ;;  %v12560_v3 = vpop.f32.mrb[172].mxu1  ;;  %v3446_v20 = vmin.f32 %v12177_v15, %v3474_v59 }
 0x38e   : > { %v3323_v22 = vmin.f32 %v3317_v23, %v3322_v37  ;;  %v5367_v24 = vpop.f32.mrb[173].mxu1 }
 0x38f   : > { %v12553_v52 = vpop.f32.mrb[18].mxu0  ;;  %v3452_v24 = vmin.f32 %v3446_v20, %v3457_v62  ;;  %v3460_v20 = vsel %vm3300_vm4, %v12199_v35, inf }
 0x390   : > { %16740 = vst [vmem:[#allocation113_spill] sm:$0xff] %v12553_v52  ;;  %v3324_v26 = vmin.f32 %v3318_v47, %v12553_v52  ;;  %v12556_v13 = vpop.f32.mrb[19].mxu0 }
 0x391   : > { %16741 = vst [vmem:[#allocation114_spill] sm:$0xff] %v12556_v13  ;;  %v3325_v14 = vsel %vm3300_vm4, %v12556_v13, inf  ;;  %v12572_v31 = vpop.f32.mrb[174].mxu1 }
 0x392   : > { %v3326_v49 = vmin.f32 %v3320_v25, %v3325_v14  ;;  %v5372_v52 = vpop.f32.mrb[175].mxu1 }
 0x393   : > { %v12562_v60 = vpop.f32.mrb[20].mxu0 }
 0x394   : > { %16742 = vst [vmem:[#allocation115_spill] sm:$0xff] %v12562_v60  ;;  %v3327_v23 = vmin.f32 %v3321_v9, %v12562_v60  ;;  %v12566_v43 = vpop.f32.mrb[21].mxu0 }
 0x395   : > { %16743 = vst [vmem:[#allocation116_spill] sm:$0xff] %v12566_v43  ;;  %v3328_v47 = vsel %vm3300_vm4, %v12566_v43, inf  ;;  %v12581_v15 = vpop.f32.mrb[176].mxu1  ;;  %v3458_v43 = vmin.f32 %v3452_v24, %v12193_v21 }
 0x396   : > { %v3329_v37 = vmin.f32 %v3323_v22, %v3328_v47  ;;  %v5377_v60 = vpop.f32.mrb[177].mxu1 }
 0x397   : > { %v12574_v25 = vpop.f32.mrb[22].mxu0  ;;  %v3464_v60 = vmin.f32 %v3458_v43, %v3460_v20  ;;  %v3463_v43 = vsel %vm3300_vm4, %v12216_v32, inf }
 0x398   : > { %16744 = vst [vmem:[#allocation117_spill] sm:$0xff] %v12574_v25  ;;  %v3330_v14 = vmin.f32 %v3324_v26, %v12574_v25  ;;  %v12577_v59 = vpop.f32.mrb[23].mxu0 }
 0x399   : > { %16745 = vst [vmem:[#allocation118_spill] sm:$0xff] %v12577_v59  ;;  %v3331_v9 = vsel %vm3300_vm4, %v12577_v59, inf  ;;  %v12593_v62 = vpop.f32.mrb[178].mxu1 }
 0x39a   : > { %v3332_v12 = vmin.f32 %v3326_v49, %v3331_v9  ;;  %v5382_v25 = vpop.f32.mrb[179].mxu1 }
 0x39b   : > { %v12583_v13 = vpop.f32.mrb[24].mxu0 }
 0x39c   : > { %16746 = vst [vmem:[#allocation119_spill] sm:$0xff] %v12583_v13  ;;  %v3333_v22 = vmin.f32 %v3327_v23, %v12583_v13  ;;  %v12587_v52 = vpop.f32.mrb[25].mxu0 }
 0x39d   : > { %16747 = vst [vmem:[#allocation120_spill] sm:$0xff] %v12587_v52  ;;  %v3334_v26 = vsel %vm3300_vm4, %v12587_v52, inf  ;;  %v12602_v21 = vpop.f32.mrb[180].mxu1  ;;  %v3470_v52 = vmin.f32 %v3464_v60, %v12210_v5 }
 0x39e   : > { %v3335_v47 = vmin.f32 %v3329_v37, %v3334_v26  ;;  %v5387_v13 = vpop.f32.mrb[181].mxu1 }
 0x39f   : > { %v12595_v49 = vpop.f32.mrb[26].mxu0  ;;  %v3476_v13 = vmin.f32 %v3470_v52, %v3463_v43  ;;  %v3466_v52 = vsel %vm3300_vm4, %v12234_v46, inf }
 0x3a0   : > { %16748 = vst [vmem:[#allocation121_spill] sm:$0xff] %v12595_v49  ;;  %v3336_v9 = vmin.f32 %v3330_v14, %v12595_v49  ;;  %v12598_v24 = vpop.f32.mrb[27].mxu0 }
 0x3a1   : > { %16749 = vst [vmem:[#allocation122_spill] sm:$0xff] %v12598_v24  ;;  %v3337_v23 = vsel %vm3300_vm4, %v12598_v24, inf  ;;  %v12614_v20 = vpop.f32.mrb[182].mxu1 }
 0x3a2   : > { %v3338_v35 = vmin.f32 %v3332_v12, %v3337_v23  ;;  %v5392_v49 = vpop.f32.mrb[183].mxu1 }
 0x3a3   : > { %v12604_v59 = vpop.f32.mrb[28].mxu0 }
 0x3a4   : > { %16750 = vst [vmem:[#allocation123_spill] sm:$0xff] %v12604_v59  ;;  %v3339_v37 = vmin.f32 %v3333_v22, %v12604_v59  ;;  %v12608_v25 = vpop.f32.mrb[29].mxu0 }
 0x3a5   : > { %16751 = vst [vmem:[#allocation124_spill] sm:$0xff] %v12608_v25  ;;  %v3340_v14 = vsel %vm3300_vm4, %v12608_v25, inf  ;;  %v12623_v5 = vpop.f32.mrb[184].mxu1  ;;  %v3447_v25 = vmin.f32 %v12228_v33, %v3476_v13  ;;  %v12642_v13 = vld [vmem:[%s16059_s5] ss:$0 sm:$0xff] }
 0x3a6   : > { %v3341_v26 = vmin.f32 %v3335_v47, %v3340_v14  ;;  %v5397_v59 = vpop.f32.mrb[185].mxu1 }
 0x3a7   : > { %v12616_v12 = vpop.f32.mrb[30].mxu0  ;;  %v3453_v59 = vmin.f32 %v3447_v25, %v3466_v52  ;;  %v16761_v25 = vld [vmem:[#allocation50_spill] sm:$0xff] }
 0x3a8   : > { %16752 = vst [vmem:[#allocation125_spill] sm:$0xff] %v12616_v12  ;;  %v3342_v23 = vmin.f32 %v3336_v9, %v12616_v12  ;;  %v12619_v60 = vpop.f32.mrb[31].mxu0  ;;  %v7850_v52 = vadd.f32 %v12642_v13, %v16761_v25 }
 0x3a9   : > { %16753 = vst [vmem:[#allocation126_spill] sm:$0xff] %v12619_v60  ;;  %v3343_v22 = vsel %vm3300_vm4, %v12619_v60, inf  ;;  %v12635_v43 = vpop.f32.mrb[186].mxu1  ;;  %v3459_v60 = vmin.f32 %v3453_v59, %v12246_v29 }
 0x3aa   : > { %v3344_v32 = vmin.f32 %v3338_v35, %v3343_v22  ;;  %16756 = vst [vmem:[#allocation129_spill] sm:$0xff] %v12635_v43  ;;  %v5402_v12 = vpop.f32.mrb[187].mxu1  ;;  %v16765_v43 = vld [vmem:[#allocation52_spill] sm:$0xff] }
 0x3ab   : > { %v12625_v24 = vpop.f32.mrb[32].mxu0  ;;  %v7852_v59 = vadd.f32 %v12642_v13, %v16765_v43 }
 0x3ac   : > { %16754 = vst [vmem:[#allocation127_spill] sm:$0xff] %v12625_v24  ;;  %v3345_v47 = vmin.f32 %v3339_v37, %v12625_v24  ;;  %v12629_v49 = vpop.f32.mrb[33].mxu0  ;;  %v16760_v24 = vld [vmem:[#allocation51_spill] sm:$0xff] }
 0x3ad   : > { %16755 = vst [vmem:[#allocation128_spill] sm:$0xff] %v12629_v49  ;;  %v3346_v9 = vsel %vm3300_vm4, %v12629_v49, inf  ;;  %v12649_v46 = vpop.f32.mrb[188].mxu1 }
 0x3ae   : > { %v3347_v14 = vmin.f32 %v3341_v26, %v3346_v9  ;;  %16759 = vst [vmem:[#allocation132_spill] sm:$0xff] %v12649_v46  ;;  %v7851_v26 = vadd.f32 %v12642_v13, %v16760_v24  ;;  %v5407_v9 = vpop.f32.mrb[189].mxu1 }
 0x3af   : > { %v12637_v35 = vpop.f32.mrb[34].mxu0 }
 0x3b0   : > { %16757 = vst [vmem:[#allocation130_spill] sm:$0xff] %v12637_v35  ;;  %v3348_v37 = vmin.f32 %v3342_v23, %v12637_v35  ;;  %v12645_v22 = vpop.f32.mrb[35].mxu0 }
 0x3b1   : > { %16758 = vst [vmem:[#allocation131_spill] sm:$0xff] %v12645_v22  ;;  %v3349_v33 = vsel %vm3300_vm4, %v12645_v22, inf  ;;  %v3469_v22 = vsel %vm3300_vm4, %v12252_v44, inf  ;;  %v7420_v24 = vpop.f32.mrb[190].mxu1 }
 0x3b2   : > { %v3350_v12 = vmin.f32 %v3344_v32, %v3349_v33  ;;  %v7853_v32 = vadd.f32 %v12642_v13, %v11851_v50  ;;  %v12667_v9 = vadd.f32 %v7851_v26, %v7420_v24  ;;  %v5475_v25 = vpop.f32.mrb[191].mxu1  ;;  %v16768_v24 = vld [vmem:[#allocation53_spill] sm:$0xff] }
 0x3b3   : > { %v12655_v49 = vpop.f32.mrb[36].mxu0  ;;  %v12673_v29 = vadd.f32 %v7850_v52, %v5475_v25  ;;  %v7854_v52 = vadd.f32 %v12642_v13, %v16768_v24 }
 0x3b4   : > { %16762 = vst [vmem:[#allocation51_spill] sm:$0xff] %v12655_v49  ;;  %v3351_v23 = vmin.f32 %v3345_v47, %v12655_v49  ;;  %v12659_v35 = vpop.f32.mrb[37].mxu0  ;;  %16764 = vst [vmem:[#allocation133_spill] sm:$0xff] %v12667_v9  ;;  %v3465_v49 = vmin.f32 %v3459_v60, %v3469_v22 }
 0x3b5   : > { %16763 = vst [vmem:[#allocation50_spill] sm:$0xff] %v12659_v35  ;;  %v3352_v39 = vsel %vm3300_vm4, %v12659_v35, inf  ;;  %16766 = vst [vmem:[#allocation52_spill] sm:$0xff] %v12673_v29  ;;  %v7423_v50 = vpop.f32.mrb[192].mxu1 }
 0x3b6   : > { %v3353_v33 = vmin.f32 %v3347_v14, %v3352_v39  ;;  %v7855_v39 = vadd.f32 %v12642_v13, %v11865_v38  ;;  %v12682_v26 = vadd.f32 %v7853_v32, %v7423_v50  ;;  %v5485_v43 = vpop.f32.mrb[193].mxu1  ;;  %v3472_v38 = vsel %vm3300_vm4, %v12270_v17, inf }
 0x3b7   : > { %v12671_v47 = vpop.f32.mrb[38].mxu0  ;;  %v12688_v60 = vadd.f32 %v7852_v59, %v5485_v43  ;;  %v7857_v32 = vadd.f32 %v12642_v13, %v11879_v16  ;;  %v16771_v43 = vld [vmem:[#allocation54_spill] sm:$0xff] }
 0x3b8   : > { %v3354_v44 = vmin.f32 %v3348_v37, %v12671_v47  ;;  %v12676_v46 = vpop.f32.mrb[39].mxu0  ;;  %16767 = vst [vmem:[#allocation134_spill] sm:$0xff] %v12682_v26  ;;  %v3471_v37 = vmin.f32 %v3465_v49, %v12264_v54  ;;  %v7856_v49 = vadd.f32 %v12642_v13, %v16771_v43  ;;  %v16775_v43 = vld [vmem:[#allocation55_spill] sm:$0xff] }
 0x3b9   : > { %v3355_v35 = vsel %vm3300_vm4, %v12676_v46, inf  ;;  %16769 = vst [vmem:[#allocation53_spill] sm:$0xff] %v12688_v60 }
 0x3ba   : > { %v3356_v14 = vmin.f32 %v3350_v12, %v3355_v35  ;;  %v7426_v12 = vpop.f32.mrb[194].mxu1  ;;  %v3477_v60 = vmin.f32 %v3471_v37, %v3472_v38 }
 0x3bb   : > { %v12686_v25 = vpop.f32.mrb[40].mxu0  ;;  %v12700_v24 = vadd.f32 %v7855_v39, %v7426_v12  ;;  %v5495_v59 = vpop.f32.mrb[195].mxu1 }
 0x3bc   : > { %v3357_v22 = vmin.f32 %v3351_v23, %v12686_v25  ;;  %v12692_v9 = vpop.f32.mrb[41].mxu0  ;;  %v12706_v26 = vadd.f32 %v7854_v52, %v5495_v59  ;;  %v7858_v52 = vadd.f32 %v12642_v13, %v16775_v43 }
 0x3bd   : > { %v3358_v35 = vsel %vm3300_vm4, %v12692_v9, inf  ;;  %16770 = vst [vmem:[#allocation135_spill] sm:$0xff] %v12700_v24  ;;  %v7429_v16 = vpop.f32.mrb[196].mxu1 }
 0x3be   : > { %v3359_v50 = vmin.f32 %v3353_v33, %v3358_v35  ;;  %16773 = vst [vmem:[#allocation136_spill] sm:$0xff] %v12706_v26  ;;  %v7859_v33 = vadd.f32 %v12642_v13, %v11893_v0  ;;  %v12715_v35 = vadd.f32 %v7857_v32, %v7429_v16  ;;  %v5505_v12 = vpop.f32.mrb[197].mxu1  ;;  %v3475_v0 = vsel %vm3300_vm4, %v12288_v6, inf }
 0x3bf   : > { %v12704_v23 = vpop.f32.mrb[42].mxu0  ;;  %v12721_v37 = vadd.f32 %v7856_v49, %v5505_v12  ;;  %v7861_v32 = vadd.f32 %v12642_v13, %v11907_v36  ;;  %v16779_v12 = vld [vmem:[#allocation56_spill] sm:$0xff] }
 0x3c0   : > { %16772 = vst [vmem:[#allocation54_spill] sm:$0xff] %v12704_v23  ;;  %v3360_v29 = vmin.f32 %v3354_v44, %v12704_v23  ;;  %v12709_v54 = vpop.f32.mrb[43].mxu0  ;;  %16774 = vst [vmem:[#allocation137_spill] sm:$0xff] %v12715_v35  ;;  %v3455_v44 = vmin.f32 %v12282_v51, %v3477_v60  ;;  %v7860_v60 = vadd.f32 %v12642_v13, %v16779_v12  ;;  %v16783_v12 = vld [vmem:[#allocation57_spill] sm:$0xff]  ;;  %v16899_v23 = vld [vmem:[#allocation28_spill] sm:$0xff] }
 0x3c1   : > { %v3361_v17 = vsel %vm3300_vm4, %v12709_v54, inf  ;;  %16777 = vst [vmem:[#allocation138_spill] sm:$0xff] %v12721_v37 }
 0x3c2   : > { %v3362_v39 = vmin.f32 %v3356_v14, %v3361_v17  ;;  %v7432_v14 = vpop.f32.mrb[198].mxu1  ;;  %v3461_v37 = vmin.f32 %v3455_v44, %v3475_v0 }
 0x3c3   : > { %v12719_v59 = vpop.f32.mrb[44].mxu0  ;;  %v12733_v43 = vadd.f32 %v7859_v33, %v7432_v14  ;;  %v5515_v49 = vpop.f32.mrb[199].mxu1 }
 0x3c4   : > { %16776 = vst [vmem:[#allocation55_spill] sm:$0xff] %v12719_v59  ;;  %v3363_v38 = vmin.f32 %v3357_v22, %v12719_v59  ;;  %v12725_v24 = vpop.f32.mrb[45].mxu0  ;;  %v12739_v35 = vadd.f32 %v7858_v52, %v5515_v49  ;;  %v7862_v52 = vadd.f32 %v12642_v13, %v16783_v12 }
 0x3c5   : > { %v3364_v17 = vsel %vm3300_vm4, %v12725_v24, inf  ;;  %16778 = vst [vmem:[#allocation139_spill] sm:$0xff] %v12733_v43  ;;  %v7435_v36 = vpop.f32.mrb[200].mxu1 }
 0x3c6   : > { %v3365_v16 = vmin.f32 %v3359_v50, %v3364_v17  ;;  %16781 = vst [vmem:[#allocation140_spill] sm:$0xff] %v12739_v35  ;;  %v7863_v50 = vadd.f32 %v12642_v13, %v11921_v27  ;;  %v12748_v17 = vadd.f32 %v7861_v32, %v7435_v36  ;;  %v5525_v14 = vpop.f32.mrb[201].mxu1  ;;  %v3478_v27 = vsel %vm3300_vm4, %v12303_v56, inf }
 0x3c7   : > { %v12737_v22 = vpop.f32.mrb[46].mxu0  ;;  %v12754_v44 = vadd.f32 %v7860_v60, %v5525_v14  ;;  %v7865_v32 = vadd.f32 %v12642_v13, %v11935_v4  ;;  %v16787_v14 = vld [vmem:[#allocation58_spill] sm:$0xff] }
 0x3c8   : > { %16780 = vst [vmem:[#allocation56_spill] sm:$0xff] %v12737_v22  ;;  %v3366_v26 = vmin.f32 %v3360_v29, %v12737_v22  ;;  %v12742_v51 = vpop.f32.mrb[47].mxu0  ;;  %16782 = vst [vmem:[#allocation141_spill] sm:$0xff] %v12748_v17  ;;  %v3467_v29 = vmin.f32 %v3461_v37, %v12298_v2  ;;  %v7864_v37 = vadd.f32 %v12642_v13, %v16787_v14  ;;  %v16887_v22 = vld [vmem:[#allocation26_spill] sm:$0xff] }
 0x3c9   : > { %v3367_v6 = vsel %vm3300_vm4, %v12742_v51, inf  ;;  %16785 = vst [vmem:[#allocation142_spill] sm:$0xff] %v12754_v44 }
 0x3ca   : > { %v3368_v33 = vmin.f32 %v3362_v39, %v3367_v6  ;;  %v7438_v39 = vpop.f32.mrb[202].mxu1  ;;  %v3473_v44 = vmin.f32 %v3467_v29, %v3478_v27 }
 0x3cb   : > { %v12752_v49 = vpop.f32.mrb[48].mxu0  ;;  %v12766_v12 = vadd.f32 %v7863_v50, %v7438_v39  ;;  %v5535_v60 = vpop.f32.mrb[203].mxu1 }
 0x3cc   : > { %16784 = vst [vmem:[#allocation57_spill] sm:$0xff] %v12752_v49  ;;  %v3369_v0 = vmin.f32 %v3363_v38, %v12752_v49  ;;  %v12758_v43 = vpop.f32.mrb[49].mxu0  ;;  %v12772_v17 = vadd.f32 %v7862_v52, %v5535_v60  ;;  %v7866_v52 = vadd.f32 %v12642_v13, %v11944_v28  ;;  %v7869_v28 = vadd.f32 %v12642_v13, %v11973_v58 }
 0x3cd   : > { %v3370_v6 = vsel %vm3300_vm4, %v12758_v43, inf  ;;  %16786 = vst [vmem:[#allocation143_spill] sm:$0xff] %v12766_v12  ;;  %v7441_v4 = vpop.f32.mrb[204].mxu1 }
 0x3ce   : > { %v3371_v36 = vmin.f32 %v3365_v16, %v3370_v6  ;;  %16789 = vst [vmem:[#allocation144_spill] sm:$0xff] %v12772_v17  ;;  %v7867_v16 = vadd.f32 %v12642_v13, %v11949_v45  ;;  %v12781_v6 = vadd.f32 %v7865_v32, %v7441_v4  ;;  %v5545_v39 = vpop.f32.mrb[205].mxu1  ;;  %v3481_v45 = vsel %vm3300_vm4, %v12319_v42, inf }
 0x3cf   : > { %v12770_v38 = vpop.f32.mrb[50].mxu0  ;;  %v12787_v29 = vadd.f32 %v7864_v37, %v5545_v39 }
 0x3d0   : > { %16788 = vst [vmem:[#allocation58_spill] sm:$0xff] %v12770_v38  ;;  %v3372_v35 = vmin.f32 %v3366_v26, %v12770_v38  ;;  %v12775_v2 = vpop.f32.mrb[51].mxu0  ;;  %16790 = vst [vmem:[#allocation145_spill] sm:$0xff] %v12781_v6  ;;  %v3479_v26 = vmin.f32 %v3473_v44, %v12315_v63  ;;  %v7868_v44 = vadd.f32 %v12642_v13, %v11960_v1  ;;  %v16875_v38 = vld [vmem:[#allocation25_spill] sm:$0xff] }
 0x3d1   : > { %v3373_v56 = vsel %vm3300_vm4, %v12775_v2, inf  ;;  %16792 = vst [vmem:[#allocation147_spill] sm:$0xff] %v12787_v29 }
 0x3d2   : > { %v3374_v50 = vmin.f32 %v3368_v33, %v3373_v56  ;;  %v7444_v33 = vpop.f32.mrb[206].mxu1  ;;  %v3480_v6 = vmin.f32 %v3481_v45, %v3479_v26 }
 0x3d3   : > { %v12785_v60 = vpop.f32.mrb[52].mxu0  ;;  %v12799_v4 = vadd.f32 %v7867_v16, %v7444_v33  ;;  %v5555_v37 = vpop.f32.mrb[207].mxu1 }
 0x3d4   : > { %16791 = vst [vmem:[#allocation146_spill] sm:$0xff] %v12785_v60  ;;  %v3375_v27 = vmin.f32 %v3369_v0, %v12785_v60  ;;  %v12791_v14 = vpop.f32.mrb[53].mxu0  ;;  %v12805_v39 = vadd.f32 %v7866_v52, %v5555_v37  ;;  %v7870_v52 = vadd.f32 %v12642_v13, %v11987_v57  ;;  %v7873_v57 = vadd.f32 %v12642_v13, %v12029_v10 }
 0x3d5   : > { %v3376_v56 = vsel %vm3300_vm4, %v12791_v14, inf  ;;  %16793 = vst [vmem:[#allocation148_spill] sm:$0xff] %v12799_v4  ;;  %v7447_v58 = vpop.f32.mrb[208].mxu1 }
 0x3d6   : > { %v3377_v32 = vmin.f32 %v3371_v36, %v3376_v56  ;;  %16795 = vst [vmem:[#allocation150_spill] sm:$0xff] %v12805_v39  ;;  %v7871_v36 = vadd.f32 %v12642_v13, %v12001_v19  ;;  %v12814_v56 = vadd.f32 %v7869_v28, %v7447_v58  ;;  %v5565_v1 = vpop.f32.mrb[209].mxu1  ;;  %v3484_v19 = vsel %vm3300_vm4, %v12333_v48, inf }
 0x3d7   : > { %v12803_v0 = vpop.f32.mrb[54].mxu0  ;;  %v12820_v26 = vadd.f32 %v7868_v44, %v5565_v1 }
 0x3d8   : > { %16794 = vst [vmem:[#allocation149_spill] sm:$0xff] %v12803_v0  ;;  %v3378_v12 = vmin.f32 %v3372_v35, %v12803_v0  ;;  %v12808_v29 = vpop.f32.mrb[55].mxu0  ;;  %16796 = vst [vmem:[#allocation151_spill] sm:$0xff] %v12814_v56  ;;  %v3482_v35 = vmin.f32 %v12329_v18, %v3480_v6  ;;  %v7872_v6 = vadd.f32 %v12642_v13, %v12015_v11  ;;  %v16807_v18 = vld [vmem:[#allocation14_spill] sm:$0xff]  ;;  %v16863_v0 = vld [vmem:[#allocation23_spill] sm:$0xff] }
 0x3d9   : > { %v3379_v17 = vsel %vm3300_vm4, %v12808_v29, inf  ;;  %16798 = vst [vmem:[#allocation153_spill] sm:$0xff] %v12820_v26 }
 0x3da   : > { %v3380_v16 = vmin.f32 %v3374_v50, %v3379_v17  ;;  %v7450_v50 = vpop.f32.mrb[210].mxu1  ;;  %v3483_v56 = vmin.f32 %v3484_v19, %v3482_v35 }
 0x3db   : > { %v12818_v33 = vpop.f32.mrb[56].mxu0  ;;  %v12832_v58 = vadd.f32 %v7871_v36, %v7450_v50  ;;  %v5575_v44 = vpop.f32.mrb[211].mxu1 }
 0x3dc   : > { %16797 = vst [vmem:[#allocation152_spill] sm:$0xff] %v12818_v33  ;;  %v3381_v45 = vmin.f32 %v3375_v27, %v12818_v33  ;;  %v12824_v37 = vpop.f32.mrb[57].mxu0  ;;  %v12838_v1 = vadd.f32 %v7870_v52, %v5575_v44 }
 0x3dd   : > { %v3382_v17 = vsel %vm3300_vm4, %v12824_v37, inf  ;;  %16799 = vst [vmem:[#allocation154_spill] sm:$0xff] %v12832_v58  ;;  %v7453_v10 = vpop.f32.mrb[212].mxu1  ;;  %v16804_v58 = vld [vmem:[#allocation59_spill] sm:$0xff] }
 0x3de   : > { %v3383_v28 = vmin.f32 %v3377_v32, %v3382_v17  ;;  %16801 = vst [vmem:[#allocation156_spill] sm:$0xff] %v12838_v1  ;;  %v16802_v32 = vld [vmem:[#allocation60_spill] sm:$0xff]  ;;  %v12847_v50 = vadd.f32 %v7873_v57, %v7453_v10  ;;  %v5585_v11 = vpop.f32.mrb[213].mxu1  ;;  %v7874_v52 = vadd.f32 %v12642_v13, %v16804_v58  ;;  %v16808_v57 = vld [vmem:[#allocation62_spill] sm:$0xff] }
 0x3df   : > { %v12836_v27 = vpop.f32.mrb[58].mxu0  ;;  %v7875_v36 = vadd.f32 %v12642_v13, %v16802_v32  ;;  %v12853_v35 = vadd.f32 %v7872_v6, %v5585_v11  ;;  %v3487_v32 = vsel %vm3300_vm4, %v16807_v18, inf  ;;  %v7877_v58 = vadd.f32 %v12642_v13, %v16808_v57  ;;  %v16810_v11 = vld [vmem:[#allocation61_spill] sm:$0xff] }
 0x3e0   : > { %16800 = vst [vmem:[#allocation155_spill] sm:$0xff] %v12836_v27  ;;  %v3384_v4 = vmin.f32 %v3378_v12, %v12836_v27  ;;  %v12841_v26 = vpop.f32.mrb[59].mxu0  ;;  %16803 = vst [vmem:[#allocation60_spill] sm:$0xff] %v12847_v50  ;;  %v3485_v12 = vmin.f32 %v12343_v40, %v3483_v56  ;;  %v7876_v56 = vadd.f32 %v12642_v13, %v16810_v11  ;;  %v16851_v27 = vld [vmem:[#allocation41_spill] sm:$0xff] }
 0x3e1   : > { %v3385_v39 = vsel %vm3300_vm4, %v12841_v26, inf  ;;  %16806 = vst [vmem:[#allocation157_spill] sm:$0xff] %v12853_v35 }
 0x3e2   : > { %v3386_v17 = vmin.f32 %v3380_v16, %v3385_v39  ;;  %v7456_v16 = vpop.f32.mrb[214].mxu1  ;;  %v3486_v40 = vmin.f32 %v3487_v32, %v3485_v12 }
 0x3e3   : > { %v12851_v44 = vpop.f32.mrb[60].mxu0  ;;  %v12865_v50 = vadd.f32 %v7875_v36, %v7456_v16  ;;  %v5595_v6 = vpop.f32.mrb[215].mxu1 }
 0x3e4   : > { %16805 = vst [vmem:[#allocation59_spill] sm:$0xff] %v12851_v44  ;;  %v3387_v19 = vmin.f32 %v3381_v45, %v12851_v44  ;;  %v12857_v1 = vpop.f32.mrb[61].mxu0  ;;  %v12871_v35 = vadd.f32 %v7874_v52, %v5595_v6 }
 0x3e5   : > { %v3388_v39 = vsel %vm3300_vm4, %v12857_v1, inf  ;;  %16809 = vst [vmem:[#allocation62_spill] sm:$0xff] %v12865_v50  ;;  %v7459_v57 = vpop.f32.mrb[216].mxu1  ;;  %v16815_v50 = vld [vmem:[#allocation63_spill] sm:$0xff] }
 0x3e6   : > { %v3389_v10 = vmin.f32 %v3383_v28, %v3388_v39  ;;  %16812 = vst [vmem:[#allocation158_spill] sm:$0xff] %v12871_v35  ;;  %v16813_v28 = vld [vmem:[#allocation64_spill] sm:$0xff]  ;;  %v12880_v16 = vadd.f32 %v7877_v58, %v7459_v57  ;;  %v5605_v11 = vpop.f32.mrb[217].mxu1  ;;  %v7878_v52 = vadd.f32 %v12642_v13, %v16815_v50 }
 0x3e7   : > { %v12869_v45 = vpop.f32.mrb[62].mxu0  ;;  %v7879_v36 = vadd.f32 %v12642_v13, %v16813_v28  ;;  %v12886_v12 = vadd.f32 %v7876_v56, %v5605_v11  ;;  %v3490_v28 = vsel %vm3300_vm4, %v12361_v30, inf  ;;  %v16818_v58 = vld [vmem:[#allocation68_spill] sm:$0xff]  ;;  %v16820_v11 = vld [vmem:[#allocation65_spill] sm:$0xff] }
 0x3e8   : > { %16811 = vst [vmem:[#allocation61_spill] sm:$0xff] %v12869_v45  ;;  %v3390_v18 = vmin.f32 %v3384_v4, %v12869_v45  ;;  %v12874_v63 = vpop.f32.mrb[63].mxu0  ;;  %16814 = vst [vmem:[#allocation64_spill] sm:$0xff] %v12880_v16  ;;  %v3488_v4 = vmin.f32 %v12357_v41, %v3486_v40  ;;  %v7881_v50 = vadd.f32 %v12642_v13, %v16818_v58 }
 0x3e9   : > { %v3391_v48 = vsel %vm3300_vm4, %v12874_v63, inf  ;;  %16817 = vst [vmem:[#allocation159_spill] sm:$0xff] %v12886_v12  ;;  %v7880_v40 = vadd.f32 %v12642_v13, %v16820_v11 }
 0x3ea   : > { %v3392_v39 = vmin.f32 %v3386_v17, %v3391_v48  ;;  %v7462_v17 = vpop.f32.mrb[218].mxu1  ;;  %v3489_v41 = vmin.f32 %v3490_v28, %v3488_v4 }
 0x3eb   : > { %v12884_v6 = vpop.f32.mrb[64].mxu0  ;;  %v12898_v16 = vadd.f32 %v7879_v36, %v7462_v17  ;;  %v5615_v56 = vpop.f32.mrb[219].mxu1 }
 0x3ec   : > { %16816 = vst [vmem:[#allocation63_spill] sm:$0xff] %v12884_v6  ;;  %v3393_v32 = vmin.f32 %v3387_v19, %v12884_v6  ;;  %v12890_v35 = vpop.f32.mrb[65].mxu0  ;;  %v12904_v12 = vadd.f32 %v7878_v52, %v5615_v56 }
 0x3ed   : > { %v3394_v48 = vsel %vm3300_vm4, %v12890_v35, inf  ;;  %16819 = vst [vmem:[#allocation68_spill] sm:$0xff] %v12898_v16  ;;  %v7465_v58 = vpop.f32.mrb[220].mxu1  ;;  %v16825_v16 = vld [vmem:[#allocation71_spill] sm:$0xff] }
 0x3ee   : > { %v3395_v57 = vmin.f32 %v3389_v10, %v3394_v48  ;;  %16822 = vst [vmem:[#allocation160_spill] sm:$0xff] %v12904_v12  ;;  %v16823_v10 = vld [vmem:[#allocation74_spill] sm:$0xff]  ;;  %v12913_v17 = vadd.f32 %v7881_v50, %v7465_v58  ;;  %v5625_v11 = vpop.f32.mrb[221].mxu1  ;;  %v7882_v52 = vadd.f32 %v12642_v13, %v16825_v16  ;;  %v16829_v50 = vld [vmem:[#allocation80_spill] sm:$0xff] }
 0x3ef   : > { %v12902_v19 = vpop.f32.mrb[66].mxu0  ;;  %v7883_v36 = vadd.f32 %v12642_v13, %v16823_v10  ;;  %v12919_v4 = vadd.f32 %v7880_v40, %v5625_v11  ;;  %v7885_v16 = vadd.f32 %v12642_v13, %v16829_v50  ;;  %v16831_v11 = vld [vmem:[#allocation77_spill] sm:$0xff] }
 0x3f0   : > { %16821 = vst [vmem:[#allocation65_spill] sm:$0xff] %v12902_v19  ;;  %v3396_v30 = vmin.f32 %v3390_v18, %v12902_v19  ;;  %v12907_v42 = vpop.f32.mrb[67].mxu0  ;;  %16824 = vst [vmem:[#allocation74_spill] sm:$0xff] %v12913_v17  ;;  %v3491_v18 = vmin.f32 %v12371_v53, %v3489_v41  ;;  %v16828_v19 = vld [vmem:[#allocation39_spill] sm:$0xff]  ;;  %v7884_v41 = vadd.f32 %v12642_v13, %v16831_v11 }
 0x3f1   : > { %v3397_v6 = vsel %vm3300_vm4, %v12907_v42, inf  ;;  %16827 = vst [vmem:[#allocation161_spill] sm:$0xff] %v12919_v4  ;;  %v3493_v10 = vsel %vm3300_vm4, %v16828_v19, inf }
 0x3f2   : > { %v3398_v48 = vmin.f32 %v3392_v39, %v3397_v6  ;;  %v7468_v6 = vpop.f32.mrb[222].mxu1  ;;  %v3492_v53 = vmin.f32 %v3493_v10, %v3491_v18 }
 0x3f3   : > { %v12917_v56 = vpop.f32.mrb[68].mxu0  ;;  %v12931_v17 = vadd.f32 %v7883_v36, %v7468_v6  ;;  %v5635_v40 = vpop.f32.mrb[223].mxu1 }
 0x3f4   : > { %16826 = vst [vmem:[#allocation71_spill] sm:$0xff] %v12917_v56  ;;  %v3399_v28 = vmin.f32 %v3393_v32, %v12917_v56  ;;  %v12923_v12 = vpop.f32.mrb[69].mxu0  ;;  %v12937_v4 = vadd.f32 %v7882_v52, %v5635_v40 }
 0x3f5   : > { %v3400_v39 = vsel %vm3300_vm4, %v12923_v12, inf  ;;  %16830 = vst [vmem:[#allocation80_spill] sm:$0xff] %v12931_v17  ;;  %v7471_v50 = vpop.f32.mrb[224].mxu1  ;;  %v16836_v17 = vld [vmem:[#allocation83_spill] sm:$0xff] }
 0x3f6   : > { %v3401_v58 = vmin.f32 %v3395_v57, %v3400_v39  ;;  %16833 = vst [vmem:[#allocation162_spill] sm:$0xff] %v12937_v4  ;;  %v16834_v57 = vld [vmem:[#allocation86_spill] sm:$0xff]  ;;  %v12946_v6 = vadd.f32 %v7885_v16, %v7471_v50  ;;  %v5645_v11 = vpop.f32.mrb[225].mxu1  ;;  %v7886_v52 = vadd.f32 %v12642_v13, %v16836_v17  ;;  %v16840_v16 = vld [vmem:[#allocation91_spill] sm:$0xff] }
 0x3f7   : > { %v12935_v32 = vpop.f32.mrb[70].mxu0  ;;  %v7887_v36 = vadd.f32 %v12642_v13, %v16834_v57  ;;  %v12952_v18 = vadd.f32 %v7884_v41, %v5645_v11  ;;  %v7889_v17 = vadd.f32 %v12642_v13, %v16840_v16  ;;  %v16842_v11 = vld [vmem:[#allocation89_spill] sm:$0xff] }
 0x3f8   : > { %16832 = vst [vmem:[#allocation77_spill] sm:$0xff] %v12935_v32  ;;  %v3402_v19 = vmin.f32 %v3396_v30, %v12935_v32  ;;  %v12940_v56 = vpop.f32.mrb[71].mxu0  ;;  %16835 = vst [vmem:[#allocation86_spill] sm:$0xff] %v12946_v6  ;;  %v3494_v30 = vmin.f32 %v12385_v7, %v3492_v53  ;;  %v16839_v32 = vld [vmem:[#allocation40_spill] sm:$0xff]  ;;  %v7888_v53 = vadd.f32 %v12642_v13, %v16842_v11 }
 0x3f9   : > { %v3403_v45 = vsel %vm3300_vm4, %v12940_v56, inf  ;;  %16838 = vst [vmem:[#allocation163_spill] sm:$0xff] %v12952_v18  ;;  %v3496_v57 = vsel %vm3300_vm4, %v16839_v32, inf }
 0x3fa   : > { %v3404_v39 = vmin.f32 %v3398_v48, %v3403_v45  ;;  %v7474_v48 = vpop.f32.mrb[226].mxu1  ;;  %v3495_v7 = vmin.f32 %v3496_v57, %v3494_v30 }
 0x3fb   : > { %v12950_v40 = vpop.f32.mrb[72].mxu0  ;;  %v12964_v6 = vadd.f32 %v7887_v36, %v7474_v48  ;;  %v5655_v41 = vpop.f32.mrb[227].mxu1 }
 0x3fc   : > { %16837 = vst [vmem:[#allocation83_spill] sm:$0xff] %v12950_v40  ;;  %v3405_v10 = vmin.f32 %v3399_v28, %v12950_v40  ;;  %v12956_v4 = vpop.f32.mrb[73].mxu0  ;;  %v12970_v18 = vadd.f32 %v7886_v52, %v5655_v41 }
 0x3fd   : > { %v3406_v45 = vsel %vm3300_vm4, %v12956_v4, inf  ;;  %16841 = vst [vmem:[#allocation91_spill] sm:$0xff] %v12964_v6  ;;  %v7477_v16 = vpop.f32.mrb[228].mxu1  ;;  %v16847_v6 = vld [vmem:[#allocation92_spill] sm:$0xff] }
 0x3fe   : > { %v3407_v50 = vmin.f32 %v3401_v58, %v3406_v45  ;;  %16844 = vst [vmem:[#allocation164_spill] sm:$0xff] %v12970_v18  ;;  %v16845_v58 = vld [vmem:[#allocation94_spill] sm:$0xff]  ;;  %v12979_v48 = vadd.f32 %v7889_v17, %v7477_v16  ;;  %v5665_v11 = vpop.f32.mrb[229].mxu1  ;;  %v7890_v52 = vadd.f32 %v12642_v13, %v16847_v6  ;;  %v16852_v17 = vld [vmem:[#allocation97_spill] sm:$0xff] }
 0x3ff   : > { %v12968_v28 = vpop.f32.mrb[74].mxu0  ;;  %v7891_v36 = vadd.f32 %v12642_v13, %v16845_v58  ;;  %v12985_v30 = vadd.f32 %v7888_v53, %v5665_v11  ;;  %v3499_v58 = vsel %vm3300_vm4, %v16851_v27, inf  ;;  %v7893_v6 = vadd.f32 %v12642_v13, %v16852_v17  ;;  %v16854_v11 = vld [vmem:[#allocation95_spill] sm:$0xff] }
 0x400   : > { %16843 = vst [vmem:[#allocation89_spill] sm:$0xff] %v12968_v28  ;;  %v3408_v32 = vmin.f32 %v3402_v19, %v12968_v28  ;;  %v12973_v40 = vpop.f32.mrb[75].mxu0  ;;  %16846 = vst [vmem:[#allocation94_spill] sm:$0xff] %v12979_v48  ;;  %v16850_v19 = vld [vmem:[#allocation21_spill] sm:$0xff] }
 0x401   : > { %v3409_v44 = vsel %vm3300_vm4, %v12973_v40, inf  ;;  %16849 = vst [vmem:[#allocation165_spill] sm:$0xff] %v12985_v30  ;;  %v3497_v57 = vmin.f32 %v16850_v19, %v3495_v7  ;;  %v7892_v7 = vadd.f32 %v12642_v13, %v16854_v11 }
 0x402   : > { %v3410_v45 = vmin.f32 %v3404_v39, %v3409_v44  ;;  %v7480_v39 = vpop.f32.mrb[230].mxu1 }
 0x403   : > { %v12983_v41 = vpop.f32.mrb[76].mxu0  ;;  %v12997_v48 = vadd.f32 %v7891_v36, %v7480_v39  ;;  %v5675_v53 = vpop.f32.mrb[231].mxu1  ;;  %v3498_v19 = vmin.f32 %v3499_v58, %v3497_v57 }
 0x404   : > { %16848 = vst [vmem:[#allocation92_spill] sm:$0xff] %v12983_v41  ;;  %v3411_v18 = vmin.f32 %v3405_v10, %v12983_v41  ;;  %v12989_v28 = vpop.f32.mrb[77].mxu0  ;;  %v13003_v30 = vadd.f32 %v7890_v52, %v5675_v53 }
 0x405   : > { %v3412_v44 = vsel %vm3300_vm4, %v12989_v28, inf  ;;  %16853 = vst [vmem:[#allocation97_spill] sm:$0xff] %v12997_v48  ;;  %v7483_v17 = vpop.f32.mrb[232].mxu1  ;;  %v16859_v48 = vld [vmem:[#allocation35_spill] sm:$0xff] }
 0x406   : > { %v3413_v16 = vmin.f32 %v3407_v50, %v3412_v44  ;;  %16856 = vst [vmem:[#allocation166_spill] sm:$0xff] %v13003_v30  ;;  %v16857_v50 = vld [vmem:[#allocation15_spill] sm:$0xff]  ;;  %v13012_v39 = vadd.f32 %v7893_v6, %v7483_v17  ;;  %v5685_v11 = vpop.f32.mrb[233].mxu1  ;;  %v7894_v52 = vadd.f32 %v12642_v13, %v16859_v48  ;;  %v16864_v6 = vld [vmem:[#allocation18_spill] sm:$0xff] }
 0x407   : > { %v13001_v10 = vpop.f32.mrb[78].mxu0  ;;  %v7895_v36 = vadd.f32 %v12642_v13, %v16857_v50  ;;  %v13018_v57 = vadd.f32 %v7892_v7, %v5685_v11  ;;  %v3502_v50 = vsel %vm3300_vm4, %v16863_v0, inf  ;;  %v7897_v48 = vadd.f32 %v12642_v13, %v16864_v6  ;;  %v16866_v11 = vld [vmem:[#allocation17_spill] sm:$0xff] }
 0x408   : > { %16855 = vst [vmem:[#allocation95_spill] sm:$0xff] %v13001_v10  ;;  %v3414_v27 = vmin.f32 %v3408_v32, %v13001_v10  ;;  %v13006_v41 = vpop.f32.mrb[79].mxu0  ;;  %16858 = vst [vmem:[#allocation15_spill] sm:$0xff] %v13012_v39  ;;  %v16862_v32 = vld [vmem:[#allocation22_spill] sm:$0xff] }
 0x409   : > { %v3415_v33 = vsel %vm3300_vm4, %v13006_v41, inf  ;;  %16861 = vst [vmem:[#allocation167_spill] sm:$0xff] %v13018_v57  ;;  %v3500_v58 = vmin.f32 %v16862_v32, %v3498_v19  ;;  %v7896_v19 = vadd.f32 %v12642_v13, %v16866_v11 }
 0x40a   : > { %v3416_v44 = vmin.f32 %v3410_v45, %v3415_v33  ;;  %v7486_v45 = vpop.f32.mrb[234].mxu1 }
 0x40b   : > { %v13016_v53 = vpop.f32.mrb[80].mxu0  ;;  %v13030_v39 = vadd.f32 %v7895_v36, %v7486_v45  ;;  %v5695_v7 = vpop.f32.mrb[235].mxu1  ;;  %v3501_v32 = vmin.f32 %v3502_v50, %v3500_v58 }
 0x40c   : > { %16860 = vst [vmem:[#allocation35_spill] sm:$0xff] %v13016_v53  ;;  %v3417_v30 = vmin.f32 %v3411_v18, %v13016_v53  ;;  %v13022_v10 = vpop.f32.mrb[81].mxu0  ;;  %v13036_v57 = vadd.f32 %v7894_v52, %v5695_v7 }
 0x40d   : > { %v3418_v33 = vsel %vm3300_vm4, %v13022_v10, inf  ;;  %16865 = vst [vmem:[#allocation18_spill] sm:$0xff] %v13030_v39  ;;  %v16871_v39 = vld [vmem:[#allocation20_spill] sm:$0xff] }
 0x40e   : > { %v3419_v17 = vmin.f32 %v3413_v16, %v3418_v33  ;;  %16868 = vst [vmem:[#allocation168_spill] sm:$0xff] %v13036_v57  ;;  %v7489_v6 = vpop.f32.mrb[236].mxu1  ;;  %v16869_v16 = vld [vmem:[#allocation42_spill] sm:$0xff]  ;;  %v7898_v52 = vadd.f32 %v12642_v13, %v16871_v39 }
 0x40f   : > { %v13034_v18 = vpop.f32.mrb[82].mxu0  ;;  %v7899_v36 = vadd.f32 %v12642_v13, %v16869_v16  ;;  %v13045_v45 = vadd.f32 %v7897_v48, %v7489_v6  ;;  %v5705_v11 = vpop.f32.mrb[237].mxu1  ;;  %v3505_v16 = vsel %vm3300_vm4, %v16875_v38, inf  ;;  %v16876_v48 = vld [vmem:[#allocation44_spill] sm:$0xff] }
 0x410   : > { %16867 = vst [vmem:[#allocation17_spill] sm:$0xff] %v13034_v18  ;;  %v3420_v0 = vmin.f32 %v3414_v27, %v13034_v18  ;;  %v13039_v53 = vpop.f32.mrb[83].mxu0  ;;  %v13051_v58 = vadd.f32 %v7896_v19, %v5705_v11  ;;  %v16874_v27 = vld [vmem:[#allocation24_spill] sm:$0xff]  ;;  %v7901_v39 = vadd.f32 %v12642_v13, %v16876_v48  ;;  %v16878_v11 = vld [vmem:[#allocation43_spill] sm:$0xff] }
 0x411   : > { %v3421_v60 = vsel %vm3300_vm4, %v13039_v53, inf  ;;  %16870 = vst [vmem:[#allocation42_spill] sm:$0xff] %v13045_v45  ;;  %v3503_v50 = vmin.f32 %v16874_v27, %v3501_v32  ;;  %v7900_v32 = vadd.f32 %v12642_v13, %v16878_v11 }
 0x412   : > { %v3422_v33 = vmin.f32 %v3416_v44, %v3421_v60  ;;  %16873 = vst [vmem:[#allocation169_spill] sm:$0xff] %v13051_v58  ;;  %v7492_v44 = vpop.f32.mrb[238].mxu1 }
 0x413   : > { %v13049_v7 = vpop.f32.mrb[84].mxu0  ;;  %v13063_v45 = vadd.f32 %v7899_v36, %v7492_v44  ;;  %v5715_v19 = vpop.f32.mrb[239].mxu1  ;;  %v3504_v27 = vmin.f32 %v3505_v16, %v3503_v50 }
 0x414   : > { %16872 = vst [vmem:[#allocation20_spill] sm:$0xff] %v13049_v7  ;;  %v3423_v57 = vmin.f32 %v3417_v30, %v13049_v7  ;;  %v13055_v18 = vpop.f32.mrb[85].mxu0  ;;  %v13069_v58 = vadd.f32 %v7898_v52, %v5715_v19 }
 0x415   : > { %v3424_v60 = vsel %vm3300_vm4, %v13055_v18, inf  ;;  %16877 = vst [vmem:[#allocation44_spill] sm:$0xff] %v13063_v45  ;;  %v16883_v45 = vld [vmem:[#allocation27_spill] sm:$0xff] }
 0x416   : > { %v3425_v6 = vmin.f32 %v3419_v17, %v3424_v60  ;;  %16880 = vst [vmem:[#allocation170_spill] sm:$0xff] %v13069_v58  ;;  %v7495_v48 = vpop.f32.mrb[240].mxu1  ;;  %v16881_v17 = vld [vmem:[#allocation29_spill] sm:$0xff]  ;;  %v7902_v52 = vadd.f32 %v12642_v13, %v16883_v45 }
 0x417   : > { %v13067_v30 = vpop.f32.mrb[86].mxu0  ;;  %v7903_v36 = vadd.f32 %v12642_v13, %v16881_v17  ;;  %v13078_v44 = vadd.f32 %v7901_v39, %v7495_v48  ;;  %v5725_v11 = vpop.f32.mrb[241].mxu1  ;;  %v3508_v17 = vsel %vm3300_vm4, %v16887_v22, inf  ;;  %v16888_v39 = vld [vmem:[#allocation32_spill] sm:$0xff] }
 0x418   : > { %16879 = vst [vmem:[#allocation43_spill] sm:$0xff] %v13067_v30  ;;  %v3426_v38 = vmin.f32 %v3420_v0, %v13067_v30  ;;  %v13072_v7 = vpop.f32.mrb[87].mxu0  ;;  %v13084_v50 = vadd.f32 %v7900_v32, %v5725_v11  ;;  %v16886_v0 = vld [vmem:[#allocation45_spill] sm:$0xff]  ;;  %v7905_v45 = vadd.f32 %v12642_v13, %v16888_v39  ;;  %v16890_v11 = vld [vmem:[#allocation30_spill] sm:$0xff] }
 0x419   : > { %v3427_v49 = vsel %vm3300_vm4, %v13072_v7, inf  ;;  %16882 = vst [vmem:[#allocation29_spill] sm:$0xff] %v13078_v44  ;;  %v3506_v16 = vmin.f32 %v16886_v0, %v3504_v27  ;;  %v7904_v27 = vadd.f32 %v12642_v13, %v16890_v11 }
 0x41a   : > { %v3428_v60 = vmin.f32 %v3422_v33, %v3427_v49  ;;  %16885 = vst [vmem:[#allocation171_spill] sm:$0xff] %v13084_v50  ;;  %v7498_v33 = vpop.f32.mrb[242].mxu1 }
 0x41b   : > { %v13082_v19 = vpop.f32.mrb[88].mxu0  ;;  %v13096_v44 = vadd.f32 %v7903_v36, %v7498_v33  ;;  %v5735_v32 = vpop.f32.mrb[243].mxu1  ;;  %v3507_v0 = vmin.f32 %v3508_v17, %v3506_v16 }
 0x41c   : > { %16884 = vst [vmem:[#allocation27_spill] sm:$0xff] %v13082_v19  ;;  %v3429_v58 = vmin.f32 %v3423_v57, %v13082_v19  ;;  %v13088_v30 = vpop.f32.mrb[89].mxu0  ;;  %v13102_v50 = vadd.f32 %v7902_v52, %v5735_v32 }
 0x41d   : > { %v3430_v49 = vsel %vm3300_vm4, %v13088_v30, inf  ;;  %16889 = vst [vmem:[#allocation32_spill] sm:$0xff] %v13096_v44  ;;  %v16895_v44 = vld [vmem:[#allocation98_spill] sm:$0xff] }
 0x41e   : > { %v3431_v48 = vmin.f32 %v3425_v6, %v3430_v49  ;;  %16892 = vst [vmem:[#allocation172_spill] sm:$0xff] %v13102_v50  ;;  %v7501_v39 = vpop.f32.mrb[244].mxu1  ;;  %v16893_v6 = vld [vmem:[#allocation101_spill] sm:$0xff]  ;;  %v7906_v52 = vadd.f32 %v12642_v13, %v16895_v44  ;;  %v7909_v44 = vadd.f32 %v12642_v13, %v12517_v55 }
 0x41f   : > { %v13100_v57 = vpop.f32.mrb[90].mxu0  ;;  %v7907_v36 = vadd.f32 %v12642_v13, %v16893_v6  ;;  %v13111_v33 = vadd.f32 %v7905_v45, %v7501_v39  ;;  %v5745_v11 = vpop.f32.mrb[245].mxu1  ;;  %v3511_v6 = vsel %vm3300_vm4, %v16899_v23, inf }
 0x420   : > { %16891 = vst [vmem:[#allocation30_spill] sm:$0xff] %v13100_v57  ;;  %v3432_v22 = vmin.f32 %v3426_v38, %v13100_v57  ;;  %v13105_v19 = vpop.f32.mrb[91].mxu0  ;;  %v13117_v16 = vadd.f32 %v7904_v27, %v5745_v11  ;;  %v16898_v38 = vld [vmem:[#allocation46_spill] sm:$0xff]  ;;  %v16901_v11 = vld [vmem:[#allocation104_spill] sm:$0xff] }
 0x421   : > { %v3433_v59 = vsel %vm3300_vm4, %v13105_v19, inf  ;;  %16894 = vst [vmem:[#allocation101_spill] sm:$0xff] %v13111_v33  ;;  %v3509_v17 = vmin.f32 %v16898_v38, %v3507_v0  ;;  %v7908_v0 = vadd.f32 %v12642_v13, %v16901_v11 }
 0x422   : > { %v3434_v49 = vmin.f32 %v3428_v60, %v3433_v59  ;;  %16897 = vst [vmem:[#allocation173_spill] sm:$0xff] %v13117_v16  ;;  %v7504_v60 = vpop.f32.mrb[246].mxu1 }
 0x423   : > { %v13115_v32 = vpop.f32.mrb[92].mxu0  ;;  %v13129_v39 = vadd.f32 %v7907_v36, %v7504_v60  ;;  %v5755_v27 = vpop.f32.mrb[247].mxu1  ;;  %v3510_v16 = vmin.f32 %v3511_v6, %v3509_v17 }
 0x424   : > { %16896 = vst [vmem:[#allocation98_spill] sm:$0xff] %v13115_v32  ;;  %v3435_v50 = vmin.f32 %v3429_v58, %v13115_v32  ;;  %v13121_v57 = vpop.f32.mrb[93].mxu0  ;;  %v13135_v33 = vadd.f32 %v7906_v52, %v5755_v27  ;;  %v7910_v52 = vadd.f32 %v12642_v13, %v12530_v8 }
 0x425   : > { %v3436_v59 = vsel %vm3300_vm4, %v13121_v57, inf  ;;  %16900 = vst [vmem:[#allocation174_spill] sm:$0xff] %v13129_v39 }
 0x426   : > { %v3437_v45 = vmin.f32 %v3431_v48, %v3436_v59  ;;  %16903 = vst [vmem:[#allocation175_spill] sm:$0xff] %v13135_v33  ;;  %v7507_v55 = vpop.f32.mrb[248].mxu1  ;;  %v7911_v48 = vadd.f32 %v12642_v13, %v12539_v61 }
 0x427   : > { %v13133_v58 = vpop.f32.mrb[94].mxu0  ;;  %v13144_v60 = vadd.f32 %v7909_v44, %v7507_v55  ;;  %v5765_v11 = vpop.f32.mrb[249].mxu1  ;;  %v16908_v55 = vld [vmem:[#allocation70_spill] sm:$0xff] }
 0x428   : > { %16902 = vst [vmem:[#allocation104_spill] sm:$0xff] %v13133_v58  ;;  %v3438_v38 = vmin.f32 %v3432_v22, %v13133_v58  ;;  %v13138_v23 = vpop.f32.mrb[95].mxu0  ;;  %v13150_v22 = vadd.f32 %v7908_v0, %v5765_v11  ;;  %v3448_v0 = vsel %vm3300_vm4, %v16908_v55, inf  ;;  %v16960_v55 = vld [vmem:[#allocation109_spill] sm:$0xff] }
 0x429   : > { %v3439_v32 = vsel %vm3300_vm4, %v13138_v23, inf  ;;  %16904 = vst [vmem:[#allocation176_spill] sm:$0xff] %v13144_v60 }
 0x42a   : > { %v3512_v36 = vmin.f32 %v3438_v38, %v3510_v16  ;;  %v3440_v59 = vmin.f32 %v3434_v49, %v3439_v32  ;;  %16906 = vst [vmem:[#allocation178_spill] sm:$0xff] %v13150_v22  ;;  %v7510_v16 = vpop.f32.mrb[250].mxu1  ;;  %v7913_v49 = vadd.f32 %v12642_v13, %v12560_v3  ;;  %v7912_v22 = vadd.f32 %v12642_v13, %v12551_v34 }
 0x42b   : > { %v13148_v17 = vpop.f32.mrb[96].mxu0  ;;  %v13159_v44 = vadd.f32 %v7911_v48, %v7510_v16  ;;  %v5775_v8 = vpop.f32.mrb[251].mxu1  ;;  %v7915_v3 = vadd.f32 %v12642_v13, %v12581_v15  ;;  %v7914_v48 = vadd.f32 %v12642_v13, %v12572_v31  ;;  %v7916_v34 = vadd.f32 %v12642_v13, %v12593_v62 }
 0x42c   : > { %16905 = vst [vmem:[#allocation177_spill] sm:$0xff] %v13148_v17  ;;  %v3513_v6 = vmin.f32 %v3440_v59, %v3512_v36  ;;  %v3441_v27 = vmin.f32 %v3435_v50, %v13148_v17  ;;  %v13153_v39 = vpop.f32.mrb[97].mxu0  ;;  %v13163_v36 = vadd.f32 %v7910_v52, %v5775_v8  ;;  %v7919_v15 = vadd.f32 %v12642_v13, %v12623_v5 }
 0x42d   : > { %v3442_v61 = vsel %vm3300_vm4, %v13153_v39, inf  ;;  %16907 = vst [vmem:[#allocation179_spill] sm:$0xff] %v13159_v44  ;;  %v7918_v31 = vadd.f32 %v12642_v13, %v12614_v20 }
 0x42e   : > { %v3514_v32 = vmin.f32 %v3441_v27, %v3513_v6  ;;  %v3443_v38 = vmin.f32 %v3437_v45, %v3442_v61  ;;  %16909 = vst [vmem:[#allocation180_spill] sm:$0xff] %v13163_v36  ;;  %v7513_v59 = vpop.f32.mrb[252].mxu1 }
 0x42f   : > { %v13165_v60 = vadd.f32 %v7913_v49, %v7513_v59  ;;  %v5785_v45 = vpop.f32.mrb[253].mxu1  ;;  %v7917_v49 = vadd.f32 %v12642_v13, %v12602_v21 }
 0x430   : > { %v3449_v50 = vmin.f32 %v3443_v38, %v3448_v0  ;;  %v13173_v6 = vadd.f32 %v7912_v22, %v5785_v45 }
 0x431   : > { %16910 = vst [vmem:[#allocation181_spill] sm:$0xff] %v13165_v60 }
 0x432   : > { %v3515_v11 = vmin.f32 %v3449_v50, %v3514_v32  ;;  %16911 = vst [vmem:[#allocation182_spill] sm:$0xff] %v13173_v6  ;;  %v7516_v52 = vpop.f32.mrb[254].mxu1  ;;  %v16914_v32 = vld [vmem:[#allocation132_spill] sm:$0xff]  ;;  %v16916_v50 = vld [vmem:[#allocation129_spill] sm:$0xff] }
 0x433   : > { %v13175_v27 = vadd.f32 %v7915_v3, %v7516_v52  ;;  %v5795_v61 = vpop.f32.mrb[255].mxu1  ;;  %v7921_v38 = vadd.f32 %v12642_v13, %v16914_v32  ;;  %v7920_v59 = vadd.f32 %v12642_v13, %v16916_v50  ;;  %v16925_v50 = vld [vmem:[#allocation34_spill] sm:$0xff] }
 0x434   : > { %3516 = vmin.xlane.f32.xlu0 %v3515_v11  ;;  %v13177_v16 = vadd.f32 %v7914_v48, %v5795_v61 }
 0x435   : > { %16912 = vst [vmem:[#allocation183_spill] sm:$0xff] %v13175_v27 }
 0x436   : > { %16913 = vst [vmem:[#allocation184_spill] sm:$0xff] %v13177_v16  ;;  %v7519_v22 = vpop.f32.mrb[0].mxu1 }
 0x437   : > { %v13189_v8 = vadd.f32 %v7917_v49, %v7519_v22  ;;  %v5805_v0 = vpop.f32.mrb[1].mxu1 }
 0x438   : > { %v13193_v21 = vadd.f32 %v7916_v34, %v5805_v0  ;;  %v16924_v0 = vld [vmem:[#allocation49_spill] sm:$0xff] }
 0x439   : > { %16915 = vst [vmem:[#allocation132_spill] sm:$0xff] %v13189_v8 }
 0x43a   : > { %16917 = vst [vmem:[#allocation129_spill] sm:$0xff] %v13193_v21  ;;  %v7522_v11 = vpop.f32.mrb[2].mxu1  ;;  %v8575_v21 = vmov 1.0  }
 0x43b   : > { %v13195_v62 = vadd.f32 %v7919_v15, %v7522_v11  ;;  %v5815_v3 = vpop.f32.mrb[3].mxu1  ;;  %v16928_v11 = vld [vmem:[#allocation106_spill] sm:$0xff] }
 0x43c   : > { %v13197_v5 = vadd.f32 %v7918_v31, %v5815_v3  ;;  %v16922_v31 = vld [vmem:[#allocation48_spill] sm:$0xff] }
 0x43d   : > { %16918 = vst [vmem:[#allocation185_spill] sm:$0xff] %v13195_v62  ;;  %v16929_v3 = vld [vmem:[#allocation108_spill] sm:$0xff]  ;;  %v16940_v62 = vld [vmem:[#allocation131_spill] sm:$0xff] }
 0x43e   : > { %16919 = vst [vmem:[#allocation186_spill] sm:$0xff] %v13197_v5  ;;  %v7525_v45 = vpop.f32.mrb[4].mxu1  ;;  %v16941_v5 = vld [vmem:[#allocation50_spill] sm:$0xff] }
 0x43f   : > { %v13199_v20 = vadd.f32 %v7921_v38, %v7525_v45  ;;  %v5825_v48 = vpop.f32.mrb[5].mxu1  ;;  %v16923_v38 = vld [vmem:[#allocation31_spill] sm:$0xff]  ;;  %v16930_v45 = vld [vmem:[#allocation110_spill] sm:$0xff] }
 0x440   : > { %v13201_v52 = vadd.f32 %v7920_v59, %v5825_v48  ;;  %v16926_v59 = vld [vmem:[#allocation100_spill] sm:$0xff] }
 0x441   : > { %16920 = vst [vmem:[#allocation187_spill] sm:$0xff] %v13199_v20  ;;  %v16931_v48 = vld [vmem:[#allocation112_spill] sm:$0xff]  ;;  %v16938_v20 = vld [vmem:[#allocation126_spill] sm:$0xff] }
 0x442   : > { %16921 = vst [vmem:[#allocation188_spill] sm:$0xff] %v13201_v52  ;;  %v16939_v52 = vld [vmem:[#allocation128_spill] sm:$0xff] }
 0x4c1   : > { %v3517_v61 = vpop.xlane.xlu0 %3516 }
 0x4c2   : > { %v3518_v49 = vrot.slane %v3517_v61, 4 }
 0x4c4   : > { %v3519_v22 = vmin.f32 %v3517_v61, %v3518_v49  ;;  %v16932_v61 = vld [vmem:[#allocation114_spill] sm:$0xff]  ;;  %v16933_v49 = vld [vmem:[#allocation116_spill] sm:$0xff] }
 0x4c6   : > { %v3520_v32 = vrot.slane %v3519_v22, 2 }
 0x4c8   : > { %v3521_v8 = vmin.f32 %v3519_v22, %v3520_v32  ;;  %v16934_v22 = vld [vmem:[#allocation118_spill] sm:$0xff]  ;;  %v16935_v32 = vld [vmem:[#allocation120_spill] sm:$0xff] }
 0x4ca   : > { %v3522_v13 = vrot.slane %v3521_v8, 1 }
 0x4cc   : > { %v3523_v34 = vmin.f32 %v3521_v8, %v3522_v13  ;;  %v16927_v8 = vld [vmem:[#allocation103_spill] sm:$0xff]  ;;  %v16936_v13 = vld [vmem:[#allocation122_spill] sm:$0xff] }
 0x4ce   : > { %8309 = vpush %v3523_v34  ;;  %v16937_v34 = vld [vmem:[#allocation124_spill] sm:$0xff] }
 0x4ff   : > { %s8310_s13 = spop %8309 }
 0x500   : > { %v13203_v15 = vstv %s8310_s13  ;;  %s7313_s13 = sshll.u32 %s8643_s9, 4  ;;  %s8576_s9 = smov [#allocation2]  }
 0x501   : > { %vm3527_vm5 = vcmp.eq.f32.partialorder %v16922_v31, %v13203_v15  ;;  %vm3528_vm6 = vcmp.eq.f32.partialorder %v16923_v38, %v13203_v15  ;;  %vm3529_vm7 = vcmp.eq.f32.partialorder %v16924_v0, %v13203_v15  ;;  %vm3531_vm8 = vcmp.eq.f32.partialorder %v16925_v50, %v13203_v15  ;;  %s16012_s19 = scalar_lea.hbm %s16062_s8, %s7313_s13  ;;  %s8512_s24 = sshll.u32 %s8576_s9, 4  ;;  %s8513_s24 = int_to_ptr.vmem [resolvable:$false] %s8512_s24 }
 0x502   : > { %vm3533_vm9 = vcmp.eq.f32.partialorder %v16926_v59, %v13203_v15  ;;  %vm3535_vm10 = vcmp.eq.f32.partialorder %v16927_v8, %v13203_v15  ;;  %vm3537_vm11 = vcmp.eq.f32.partialorder %v16928_v11, %v13203_v15  ;;  %vm3539_vm12 = vcmp.eq.f32.partialorder %v16929_v3, %v13203_v15  ;;  %s8514_s25 = scalar_lea.vmem %s8513_s24, 32 }
 0x503   : > { %vm3599_vm14 = vcmp.eq.f32.partialorder %v12956_v4, %v13203_v15  ;;  %vm3601_vm15 = vcmp.eq.f32.partialorder %v12973_v40, %v13203_v15  ;;  %vm3603_vm0 = vcmp.eq.f32.partialorder %v12989_v28, %v13203_v15  ;;  %v3672_v27 = vsel %vm3528_vm6, 0.0, %v8575_v21 }
 0x504   : > { %v3673_v16 = vsel %vm3529_vm7, 0.0, %v8575_v21  ;;  %vm3613_vm2 = vcmp.eq.f32.partialorder %v13072_v7, %v13203_v15  ;;  %vm3615_vm3 = vcmp.eq.f32.partialorder %v13088_v30, %v13203_v15  ;;  %vm3617_vm13 = vcmp.eq.f32.partialorder %v13105_v19, %v13203_v15  ;;  %v16999_v7 = vld [vmem:[#allocation127_spill] sm:$0xff] }
 0x505   : > { %vm3619_vm1 = vcmp.eq.f32.partialorder %v13121_v57, %v13203_v15  ;;  %v3818_v38 = vsel %vm3300_vm4, %v3673_v16, 0.0  ;;  %v13314_v0 = vsel %vm3527_vm5, 0.0, %v8575_v21  ;;  %v13320_v60 = vsel %vm3531_vm8, 0.0, %v8575_v21  ;;  %v16942_v16 = vld [vmem:[#allocation47_spill] sm:$0xff] }
 0x506   : > { %v13326_v6 = vsel %vm3533_vm9, 0.0, %v8575_v21  ;;  %vm3526_vm6 = vcmp.eq.f32.partialorder %v16942_v16, %v13203_v15  ;;  %vm3621_vm7 = vcmp.eq.f32.partialorder %v13138_v23, %v13203_v15  ;;  %vm3623_vm5 = vcmp.eq.f32.partialorder %v13153_v39, %v13203_v15 }
 0x507   : > { %v3819_v31 = vadd.f32 %v3818_v38, %v3672_v27  ;;  %v13338_v50 = vsel %vm3535_vm10, 0.0, %v8575_v21  ;;  %v13344_v59 = vsel %vm3537_vm11, 0.0, %v8575_v21  ;;  %v13350_v44 = vsel %vm3539_vm12, 0.0, %v8575_v21  ;;  %v16943_v27 = vld [vmem:[#allocation33_spill] sm:$0xff]  ;;  %v16944_v38 = vld [vmem:[#allocation99_spill] sm:$0xff] }
 0x508   : > { %vm16945_vm10 = vcmp.eq.f32.partialorder %v16930_v45, %v13203_v15  ;;  %vm16946_vm11 = vcmp.eq.f32.partialorder %v16931_v48, %v13203_v15  ;;  %vm16947_vm12 = vcmp.eq.f32.partialorder %v16932_v61, %v13203_v15  ;;  %vm16948_vm9 = vcmp.eq.f32.partialorder %v16933_v49, %v13203_v15  ;;  %v16949_v45 = vld [vmem:[#allocation102_spill] sm:$0xff] }
 0x509   : > { %v13360_v8 = vsel %vm16945_vm10, 0.0, %v8575_v21  ;;  %v13366_v11 = vsel %vm16946_vm11, 0.0, %v8575_v21  ;;  %v13372_v3 = vsel %vm16947_vm12, 0.0, %v8575_v21  ;;  %v13378_v36 = vsel %vm16948_vm9, 0.0, %v8575_v21  ;;  %3820 = vadd.xlane.f32.xlu1 %v3819_v31 }
 0x50a   : > { %vm16950_vm11 = vcmp.eq.f32.partialorder %v16934_v22, %v13203_v15  ;;  %vm16951_vm12 = vcmp.eq.f32.partialorder %v16935_v32, %v13203_v15  ;;  %vm16952_vm9 = vcmp.eq.f32.partialorder %v16936_v13, %v13203_v15  ;;  %vm16953_vm10 = vcmp.eq.f32.partialorder %v16937_v34, %v13203_v15  ;;  %v16954_v22 = vld [vmem:[#allocation105_spill] sm:$0xff] }
 0x50b   : > { %v13386_v48 = vsel %vm16950_vm11, 0.0, %v8575_v21  ;;  %v13392_v61 = vsel %vm16951_vm12, 0.0, %v8575_v21  ;;  %v13398_v49 = vsel %vm16952_vm9, 0.0, %v8575_v21  ;;  %v13404_v31 = vsel %vm16953_vm10, 0.0, %v8575_v21 }
 0x50c   : > { %vm16955_vm12 = vcmp.eq.f32.partialorder %v16938_v20, %v13203_v15  ;;  %vm16956_vm9 = vcmp.eq.f32.partialorder %v16939_v52, %v13203_v15  ;;  %vm16957_vm10 = vcmp.eq.f32.partialorder %v16940_v62, %v13203_v15  ;;  %vm16958_vm11 = vcmp.eq.f32.partialorder %v16941_v5, %v13203_v15  ;;  %v16959_v20 = vld [vmem:[#allocation107_spill] sm:$0xff] }
 0x50d   : > { %v13412_v32 = vsel %vm16955_vm12, 0.0, %v8575_v21  ;;  %v13418_v13 = vsel %vm16956_vm9, 0.0, %v8575_v21  ;;  %v13424_v34 = vsel %vm16957_vm10, 0.0, %v8575_v21  ;;  %v13430_v33 = vsel %vm16958_vm11, 0.0, %v8575_v21 }
 0x50e   : > { %vm16961_vm9 = vcmp.eq.f32.partialorder %v12676_v46, %v13203_v15  ;;  %vm16962_vm10 = vcmp.eq.f32.partialorder %v12692_v9, %v13203_v15  ;;  %vm16963_vm11 = vcmp.eq.f32.partialorder %v12709_v54, %v13203_v15  ;;  %vm16964_vm8 = vcmp.eq.f32.partialorder %v12725_v24, %v13203_v15  ;;  %v16965_v46 = vld [vmem:[#allocation111_spill] sm:$0xff] }
 0x50f   : > { %v13440_v52 = vsel %vm16961_vm9, 0.0, %v8575_v21  ;;  %v13446_v62 = vsel %vm16962_vm10, 0.0, %v8575_v21  ;;  %v13452_v5 = vsel %vm16963_vm11, 0.0, %v8575_v21  ;;  %v13458_v17 = vsel %vm16964_vm8, 0.0, %v8575_v21 }
 0x510   : > { %vm16966_vm10 = vcmp.eq.f32.partialorder %v12742_v51, %v13203_v15  ;;  %vm16967_vm11 = vcmp.eq.f32.partialorder %v12758_v43, %v13203_v15  ;;  %vm16968_vm8 = vcmp.eq.f32.partialorder %v12775_v2, %v13203_v15  ;;  %vm16969_vm9 = vcmp.eq.f32.partialorder %v12791_v14, %v13203_v15  ;;  %v16971_v51 = vld [vmem:[#allocation113_spill] sm:$0xff] }
 0x511   : > { %v13466_v9 = vsel %vm16966_vm10, 0.0, %v8575_v21  ;;  %v13472_v54 = vsel %vm16967_vm11, 0.0, %v8575_v21  ;;  %v13478_v24 = vsel %vm16968_vm8, 0.0, %v8575_v21  ;;  %v13484_v58 = vsel %vm16969_vm9, 0.0, %v8575_v21 }
 0x512   : > { %16970 = vst [vmem:[#allocation48_spill] sm:$0xff] %v13484_v58  ;;  %vm16972_vm11 = vcmp.eq.f32.partialorder %v12808_v29, %v13203_v15  ;;  %vm16974_vm8 = vcmp.eq.f32.partialorder %v12824_v37, %v13203_v15  ;;  %vm16975_vm9 = vcmp.eq.f32.partialorder %v12841_v26, %v13203_v15  ;;  %vm16976_vm10 = vcmp.eq.f32.partialorder %v12857_v1, %v13203_v15  ;;  %v16978_v29 = vld [vmem:[#allocation115_spill] sm:$0xff] }
 0x513   : > { %v13492_v43 = vsel %vm16972_vm11, 0.0, %v8575_v21  ;;  %v13498_v2 = vsel %vm16974_vm8, 0.0, %v8575_v21  ;;  %v13504_v14 = vsel %vm16975_vm9, 0.0, %v8575_v21  ;;  %v13510_v58 = vsel %vm16976_vm10, 0.0, %v8575_v21 }
 0x514   : > { %16973 = vst [vmem:[#allocation31_spill] sm:$0xff] %v13492_v43  ;;  %16977 = vst [vmem:[#allocation49_spill] sm:$0xff] %v13510_v58  ;;  %vm3546_vm11 = vcmp.eq.f32.partialorder %v16978_v29, %v13203_v15  ;;  %v16979_v43 = vld [vmem:[#allocation117_spill] sm:$0xff]  ;;  %vm16980_vm8 = vcmp.eq.f32.partialorder %v12874_v63, %v13203_v15  ;;  %vm16981_vm9 = vcmp.eq.f32.partialorder %v12890_v35, %v13203_v15  ;;  %v16985_v63 = vld [vmem:[#allocation119_spill] sm:$0xff]  ;;  %v13626_v30 = vsel %vm3621_vm7, 0.0, %v8575_v21 }
 0x515   : > { %v13520_v37 = vsel %vm16980_vm8, 0.0, %v8575_v21  ;;  %v13526_v26 = vsel %vm16981_vm9, 0.0, %v8575_v21  ;;  %vm16982_vm10 = vcmp.eq.f32.partialorder %v12907_v42, %v13203_v15  ;;  %vm16983_vm12 = vcmp.eq.f32.partialorder %v12923_v12, %v13203_v15  ;;  %17000 = vst [vmem:[#allocation112_spill] sm:$0xff] %v13626_v30 }
 0x516   : > { %v13532_v1 = vsel %vm16982_vm10, 0.0, %v8575_v21  ;;  %v13538_v58 = vsel %vm16983_vm12, 0.0, %v8575_v21  ;;  %vm3550_vm8 = vcmp.eq.f32.partialorder %v16985_v63, %v13203_v15  ;;  %vm16986_vm9 = vcmp.eq.f32.partialorder %v12940_v56, %v13203_v15  ;;  %v16988_v56 = vld [vmem:[#allocation121_spill] sm:$0xff]  ;;  %v17021_v63 = vld [vmem:[#allocation155_spill] sm:$0xff] }
 0x517   : > { %16984 = vst [vmem:[#allocation34_spill] sm:$0xff] %v13538_v58  ;;  %v13546_v35 = vsel %vm16986_vm9, 0.0, %v8575_v21  ;;  %v13552_v42 = vsel %vm3599_vm14, 0.0, %v8575_v21  ;;  %v13558_v12 = vsel %vm3601_vm15, 0.0, %v8575_v21  ;;  %v13564_v58 = vsel %vm3603_vm0, 0.0, %v8575_v21 }
 0x518   : > { %16987 = vst [vmem:[#allocation100_spill] sm:$0xff] %v13564_v58  ;;  %vm3552_vm12 = vcmp.eq.f32.partialorder %v16988_v56, %v13203_v15  ;;  %vm16989_vm14 = vcmp.eq.f32.partialorder %v13006_v41, %v13203_v15  ;;  %vm16991_vm15 = vcmp.eq.f32.partialorder %v13022_v10, %v13203_v15  ;;  %vm16992_vm0 = vcmp.eq.f32.partialorder %v13039_v53, %v13203_v15  ;;  %v16995_v41 = vld [vmem:[#allocation123_spill] sm:$0xff] }
 0x519   : > { %v13572_v4 = vsel %vm16989_vm14, 0.0, %v8575_v21  ;;  %v13578_v40 = vsel %vm16991_vm15, 0.0, %v8575_v21  ;;  %v13584_v28 = vsel %vm16992_vm0, 0.0, %v8575_v21  ;;  %vm16993_vm10 = vcmp.eq.f32.partialorder %v13055_v18, %v13203_v15 }
 0x51a   : > { %16990 = vst [vmem:[#allocation103_spill] sm:$0xff] %v13572_v4  ;;  %v13590_v58 = vsel %vm16993_vm10, 0.0, %v8575_v21  ;;  %vm3554_vm9 = vcmp.eq.f32.partialorder %v16995_v41, %v13203_v15  ;;  %v16996_v4 = vld [vmem:[#allocation125_spill] sm:$0xff]  ;;  %v13600_v10 = vsel %vm3613_vm2, 0.0, %v8575_v21  ;;  %v13606_v53 = vsel %vm3615_vm3, 0.0, %v8575_v21 }
 0x51b   : > { %16994 = vst [vmem:[#allocation106_spill] sm:$0xff] %v13590_v58  ;;  %vm3556_vm14 = vcmp.eq.f32.partialorder %v16996_v4, %v13203_v15  ;;  %v13612_v18 = vsel %vm3617_vm13, 0.0, %v8575_v21  ;;  %v13618_v58 = vsel %vm3619_vm1, 0.0, %v8575_v21  ;;  %vm3558_vm2 = vcmp.eq.f32.partialorder %v16999_v7, %v13203_v15 }
 0x51c   : > { %16997 = vst [vmem:[#allocation108_spill] sm:$0xff] %v13612_v18  ;;  %16998 = vst [vmem:[#allocation110_spill] sm:$0xff] %v13618_v58  ;;  %v13632_v19 = vsel %vm3623_vm5, 0.0, %v8575_v21  ;;  %v3670_v57 = vsel %vm3526_vm6, 0.0, %v8575_v21  ;;  %v3814_v58 = vsel %vm3300_vm4, %v13314_v0, 0.0  ;;  %v17002_v18 = vld [vmem:[#allocation130_spill] sm:$0xff]  ;;  %vm17003_vm1 = vcmp.eq.f32.partialorder %v16943_v27, %v13203_v15 }
 0x51d   : > { %17001 = vst [vmem:[#allocation114_spill] sm:$0xff] %v13632_v19  ;;  %vm3560_vm13 = vcmp.eq.f32.partialorder %v17002_v18, %v13203_v15  ;;  %v3815_v23 = vadd.f32 %v3814_v58, %v3670_v57  ;;  %v3674_v30 = vsel %vm17003_vm1, 0.0, %v8575_v21  ;;  %v3822_v39 = vsel %vm3300_vm4, %v13320_v60, 0.0  ;;  %v17005_v19 = vld [vmem:[#allocation51_spill] sm:$0xff] }
 0x51e   : > { %vm17004_vm3 = vcmp.eq.f32.partialorder %v16944_v38, %v13203_v15  ;;  %vm3562_vm6 = vcmp.eq.f32.partialorder %v17005_v19, %v13203_v15  ;;  %vm3564_vm7 = vcmp.eq.f32.partialorder %v12671_v47, %v13203_v15  ;;  %v3823_v58 = vadd.f32 %v3822_v39, %v3674_v30 }
 0x51f   : > { %v3676_v16 = vsel %vm17004_vm3, 0.0, %v8575_v21  ;;  %v3826_v0 = vsel %vm3300_vm4, %v13326_v6, 0.0  ;;  %vm17006_vm5 = vcmp.eq.f32.partialorder %v16949_v45, %v13203_v15  ;;  %v3830_v27 = vsel %vm3300_vm4, %v13338_v50, 0.0  ;;  %3816 = vadd.xlane.f32.xlu0 %v3815_v23  ;;  %v17008_v45 = vld [vmem:[#allocation54_spill] sm:$0xff] }
 0x520   : > { %v3678_v60 = vsel %vm17006_vm5, 0.0, %v8575_v21  ;;  %vm3566_vm15 = vcmp.eq.f32.partialorder %v12686_v25, %v13203_v15  ;;  %v3827_v38 = vadd.f32 %v3826_v0, %v3676_v16  ;;  %vm17007_vm0 = vcmp.eq.f32.partialorder %v16954_v22, %v13203_v15  ;;  %3824 = vadd.xlane.f32.xlu1 %v3823_v58  ;;  %v17012_v16 = vld [vmem:[#allocation56_spill] sm:$0xff] }
 0x521   : > { %v3831_v57 = vadd.f32 %v3830_v27, %v3678_v60  ;;  %v3680_v30 = vsel %vm17007_vm0, 0.0, %v8575_v21  ;;  %v3834_v6 = vsel %vm3300_vm4, %v13344_v59, 0.0  ;;  %vm3568_vm10 = vcmp.eq.f32.partialorder %v17008_v45, %v13203_v15  ;;  %v17011_v59 = vld [vmem:[#allocation55_spill] sm:$0xff] }
 0x522   : > { %v3835_v39 = vadd.f32 %v3834_v6, %v3680_v30  ;;  %vm17009_vm1 = vcmp.eq.f32.partialorder %v16959_v20, %v13203_v15  ;;  %v3838_v23 = vsel %vm3300_vm4, %v13350_v44, 0.0  ;;  %vm17010_vm3 = vcmp.eq.f32.partialorder %v16960_v55, %v13203_v15  ;;  %v17014_v55 = vld [vmem:[#allocation57_spill] sm:$0xff]  ;;  %v17016_v6 = vld [vmem:[#allocation58_spill] sm:$0xff] }
 0x523   : > { %v3682_v50 = vsel %vm17009_vm1, 0.0, %v8575_v21  ;;  %v3684_v22 = vsel %vm17010_vm3, 0.0, %v8575_v21  ;;  %v3842_v0 = vsel %vm3300_vm4, %v13360_v8, 0.0  ;;  %vm17013_vm1 = vcmp.eq.f32.partialorder %v16965_v46, %v13203_v15  ;;  %3828 = vadd.xlane.f32.xlu0 %v3827_v38  ;;  %v17019_v38 = vld [vmem:[#allocation149_spill] sm:$0xff] }
 0x524   : > { %v3839_v58 = vadd.f32 %v3838_v23, %v3682_v50  ;;  %v3686_v44 = vsel %vm17013_vm1, 0.0, %v8575_v21  ;;  %v3846_v20 = vsel %vm3300_vm4, %v13366_v11, 0.0  ;;  %vm3574_vm3 = vcmp.eq.f32.partialorder %v17014_v55, %v13203_v15  ;;  %3832 = vadd.xlane.f32.xlu1 %v3831_v57  ;;  %v17036_v55 = vld [vmem:[#allocation17_spill] sm:$0xff] }
 0x525   : > { %v3843_v60 = vadd.f32 %v3842_v0, %v3684_v22  ;;  %v3847_v27 = vadd.f32 %v3846_v20, %v3686_v44  ;;  %vm17015_vm0 = vcmp.eq.f32.partialorder %v16971_v51, %v13203_v15  ;;  %v3850_v8 = vsel %vm3300_vm4, %v13372_v3, 0.0  ;;  %v17018_v3 = vld [vmem:[#allocation146_spill] sm:$0xff]  ;;  %v17020_v22 = vld [vmem:[#allocation152_spill] sm:$0xff] }
 0x526   : > { %v3688_v30 = vsel %vm17015_vm0, 0.0, %v8575_v21  ;;  %v3690_v11 = vsel %vm3546_vm11, 0.0, %v8575_v21  ;;  %v3854_v50 = vsel %vm3300_vm4, %v13378_v36, 0.0  ;;  %vm17017_vm0 = vcmp.eq.f32.partialorder %v16979_v43, %v13203_v15 }
 0x527   : > { %v13706_v46 = vadd.f32 %v3850_v8, %v3688_v30  ;;  %v3692_v51 = vsel %vm17017_vm0, 0.0, %v8575_v21  ;;  %vm3578_vm1 = vcmp.eq.f32.partialorder %v17018_v3, %v13203_v15  ;;  %vm3580_vm5 = vcmp.eq.f32.partialorder %v17019_v38, %v13203_v15  ;;  %v17023_v8 = vld [vmem:[#allocation61_spill] sm:$0xff]  ;;  %3836 = vadd.xlane.f32.xlu0 %v3835_v39  ;;  %v17040_v3 = vld [vmem:[#allocation31_spill] sm:$0xff] }
 0x528   : > { %v13722_v23 = vadd.f32 %v3854_v50, %v3690_v11  ;;  %v3858_v29 = vsel %vm3300_vm4, %v13386_v48, 0.0  ;;  %v3694_v36 = vsel %vm3550_vm8, 0.0, %v8575_v21  ;;  %v3862_v43 = vsel %vm3300_vm4, %v13392_v61, 0.0  ;;  %v17024_v50 = vld [vmem:[#allocation63_spill] sm:$0xff]  ;;  %3840 = vadd.xlane.f32.xlu1 %v3839_v58 }
 0x529   : > { %vm3582_vm11 = vcmp.eq.f32.partialorder %v17020_v22, %v13203_v15  ;;  %v13734_v0 = vadd.f32 %v3858_v29, %v3692_v51  ;;  %v13736_v44 = vadd.f32 %v3862_v43, %v3694_v36  ;;  %v3696_v48 = vsel %vm3552_vm12, 0.0, %v8575_v21  ;;  %v17025_v29 = vld [vmem:[#allocation65_spill] sm:$0xff]  ;;  %v17042_v22 = vld [vmem:[#allocation30_spill] sm:$0xff] }
 0x52a   : > { %v3866_v57 = vsel %vm3300_vm4, %v13398_v49, 0.0  ;;  %vm3584_vm8 = vcmp.eq.f32.partialorder %v17021_v63, %v13203_v15  ;;  %v3698_v61 = vsel %vm3554_vm9, 0.0, %v8575_v21  ;;  %v3870_v30 = vsel %vm3300_vm4, %v13404_v31, 0.0  ;;  %v17022_v49 = vld [vmem:[#allocation59_spill] sm:$0xff]  ;;  %v17027_v43 = vld [vmem:[#allocation77_spill] sm:$0xff] }
 0x52b   : > { %v13746_v20 = vadd.f32 %v3866_v57, %v3696_v48  ;;  %v3700_v56 = vsel %vm3556_vm14, 0.0, %v8575_v21  ;;  %vm3586_vm12 = vcmp.eq.f32.partialorder %v17022_v49, %v13203_v15  ;;  %vm3588_vm0 = vcmp.eq.f32.partialorder %v17023_v8, %v13203_v15  ;;  %v17028_v57 = vld [vmem:[#allocation83_spill] sm:$0xff]  ;;  %3844 = vadd.xlane.f32.xlu0 %v3843_v60 }
 0x52c   : > { %v13762_v11 = vadd.f32 %v3870_v30, %v3698_v61  ;;  %v3874_v41 = vsel %vm3300_vm4, %v13412_v32, 0.0  ;;  %v3702_v31 = vsel %vm3558_vm2, 0.0, %v8575_v21  ;;  %v3878_v4 = vsel %vm3300_vm4, %v13418_v13, 0.0  ;;  %3848 = vadd.xlane.f32.xlu1 %v3847_v27  ;;  %v17033_v27 = vld [vmem:[#allocation95_spill] sm:$0xff] }
 0x52d   : > { %vm3590_vm9 = vcmp.eq.f32.partialorder %v17024_v50, %v13203_v15  ;;  %v13774_v51 = vadd.f32 %v3874_v41, %v3700_v56  ;;  %v13776_v39 = vadd.f32 %v3878_v4, %v3702_v31  ;;  %v3704_v32 = vsel %vm3560_vm13, 0.0, %v8575_v21  ;;  %v17029_v56 = vld [vmem:[#allocation89_spill] sm:$0xff]  ;;  %v17034_v4 = vld [vmem:[#allocation35_spill] sm:$0xff] }
 0x52e   : > { %v3882_v7 = vsel %vm3300_vm4, %v13424_v34, 0.0  ;;  %vm3592_vm14 = vcmp.eq.f32.partialorder %v17025_v29, %v13203_v15  ;;  %v3706_v58 = vsel %vm3562_vm6, 0.0, %v8575_v21  ;;  %v3886_v36 = vsel %vm3300_vm4, %v13430_v33, 0.0  ;;  %v17026_v34 = vld [vmem:[#allocation71_spill] sm:$0xff] }
 0x52f   : > { %v13786_v13 = vadd.f32 %v3882_v7, %v3704_v32  ;;  %v3708_v18 = vsel %vm3564_vm7, 0.0, %v8575_v21  ;;  %vm3594_vm2 = vcmp.eq.f32.partialorder %v17026_v34, %v13203_v15  ;;  %vm3596_vm13 = vcmp.eq.f32.partialorder %v17027_v43, %v13203_v15  ;;  %3852 = vadd.xlane.f32.xlu0 %v13706_v46  ;;  %v17039_v46 = vld [vmem:[#allocation43_spill] sm:$0xff] }
 0x530   : > { %v13802_v48 = vadd.f32 %v3886_v36, %v3706_v58  ;;  %v3890_v19 = vsel %vm3300_vm4, %v13440_v52, 0.0  ;;  %v3710_v33 = vsel %vm3566_vm15, 0.0, %v8575_v21  ;;  %v3894_v47 = vsel %vm3300_vm4, %v13446_v62, 0.0  ;;  %3856 = vadd.xlane.f32.xlu1 %v13722_v23 }
 0x531   : > { %v13814_v61 = vadd.f32 %v3890_v19, %v3708_v18  ;;  %v13816_v30 = vadd.f32 %v3894_v47, %v3710_v33  ;;  %v3712_v52 = vsel %vm3568_vm10, 0.0, %v8575_v21  ;;  %v3898_v25 = vsel %vm3300_vm4, %v13452_v5, 0.0  ;;  %v17032_v5 = vld [vmem:[#allocation92_spill] sm:$0xff] }
 0x532   : > { %v13826_v62 = vadd.f32 %v3898_v25, %v3712_v52  ;;  %vm17030_vm15 = vcmp.eq.f32.partialorder %v17011_v59, %v13203_v15  ;;  %v3902_v41 = vsel %vm3300_vm4, %v13458_v17, 0.0  ;;  %vm17031_vm10 = vcmp.eq.f32.partialorder %v17012_v16, %v13203_v15  ;;  %v17037_v18 = vld [vmem:[#allocation48_spill] sm:$0xff]  ;;  %v17041_v25 = vld [vmem:[#allocation27_spill] sm:$0xff] }
 0x533   : > { %v3714_v60 = vsel %vm17030_vm15, 0.0, %v8575_v21  ;;  %v3716_v45 = vsel %vm17031_vm10, 0.0, %v8575_v21  ;;  %vm3602_vm6 = vcmp.eq.f32.partialorder %v17032_v5, %v13203_v15  ;;  %vm3604_vm7 = vcmp.eq.f32.partialorder %v17033_v27, %v13203_v15  ;;  %3860 = vadd.xlane.f32.xlu0 %v13734_v0 }
 0x534   : > { %v13842_v31 = vadd.f32 %v3902_v41, %v3714_v60  ;;  %v3906_v59 = vsel %vm3300_vm4, %v13466_v9, 0.0  ;;  %v3718_v17 = vsel %vm3574_vm3, 0.0, %v8575_v21  ;;  %v3910_v16 = vsel %vm3300_vm4, %v13472_v54, 0.0  ;;  %3864 = vadd.xlane.f32.xlu1 %v13736_v44  ;;  %v17047_v44 = vld [vmem:[#allocation34_spill] sm:$0xff] }
 0x535   : > { %vm3606_vm15 = vcmp.eq.f32.partialorder %v17034_v4, %v13203_v15  ;;  %v13854_v32 = vadd.f32 %v3906_v59, %v3716_v45  ;;  %v13856_v7 = vadd.f32 %v3910_v16, %v3718_v17  ;;  %vm17035_vm10 = vcmp.eq.f32.partialorder %v17016_v6, %v13203_v15  ;;  %v17038_v6 = vld [vmem:[#allocation20_spill] sm:$0xff]  ;;  %v17043_v17 = vld [vmem:[#allocation49_spill] sm:$0xff] }
 0x536   : > { %v3720_v9 = vsel %vm17035_vm10, 0.0, %v8575_v21  ;;  %v3914_v58 = vsel %vm3300_vm4, %v13478_v24, 0.0  ;;  %v3722_v36 = vsel %vm3578_vm1, 0.0, %v8575_v21  ;;  %v3918_v19 = vsel %vm3300_vm4, %v17037_v18, 0.0  ;;  %v17046_v18 = vld [vmem:[#allocation177_spill] sm:$0xff] }
 0x537   : > { %v13867_v54 = vadd.f32 %v3914_v58, %v3720_v9  ;;  %v3724_v24 = vsel %vm3580_vm5, 0.0, %v8575_v21  ;;  %vm3610_vm10 = vcmp.eq.f32.partialorder %v17038_v6, %v13203_v15  ;;  %vm3612_vm3 = vcmp.eq.f32.partialorder %v17039_v46, %v13203_v15  ;;  %v17045_v9 = vld [vmem:[#allocation104_spill] sm:$0xff]  ;;  %3868 = vadd.xlane.f32.xlu0 %v13746_v20 }
 0x538   : > { %v13884_v33 = vadd.f32 %v3918_v19, %v3722_v36  ;;  %v3922_v47 = vsel %vm3300_vm4, %v17040_v3, 0.0  ;;  %v3726_v52 = vsel %vm3582_vm11, 0.0, %v8575_v21  ;;  %v3926_v38 = vsel %vm3300_vm4, %v13498_v2, 0.0  ;;  %3872 = vadd.xlane.f32.xlu1 %v13762_v11 }
 0x539   : > { %vm3614_vm5 = vcmp.eq.f32.partialorder %v17041_v25, %v13203_v15  ;;  %v13896_v60 = vadd.f32 %v3922_v47, %v3724_v24  ;;  %v13898_v41 = vadd.f32 %v3926_v38, %v3726_v52  ;;  %v3728_v23 = vsel %vm3584_vm8, 0.0, %v8575_v21  ;;  %v17055_v25 = vld [vmem:[#allocation110_spill] sm:$0xff] }
 0x53a   : > { %v3930_v45 = vsel %vm3300_vm4, %v13504_v14, 0.0  ;;  %vm3616_vm1 = vcmp.eq.f32.partialorder %v17042_v22, %v13203_v15  ;;  %v3730_v2 = vsel %vm3586_vm12, 0.0, %v8575_v21  ;;  %v3934_v16 = vsel %vm3300_vm4, %v17043_v17, 0.0  ;;  %v17044_v14 = vld [vmem:[#allocation98_spill] sm:$0xff]  ;;  %v17051_v17 = vld [vmem:[#allocation103_spill] sm:$0xff] }
 0x53b   : > { %v13908_v59 = vadd.f32 %v3930_v45, %v3728_v23  ;;  %v3732_v63 = vsel %vm3588_vm0, 0.0, %v8575_v21  ;;  %vm3618_vm11 = vcmp.eq.f32.partialorder %v17044_v14, %v13203_v15  ;;  %vm3620_vm8 = vcmp.eq.f32.partialorder %v17045_v9, %v13203_v15  ;;  %3876 = vadd.xlane.f32.xlu0 %v13774_v51 }
 0x53c   : > { %v13925_v58 = vadd.f32 %v3934_v16, %v3730_v2  ;;  %v3938_v49 = vsel %vm3300_vm4, %v13520_v37, 0.0  ;;  %v3734_v36 = vsel %vm3590_vm9, 0.0, %v8575_v21  ;;  %v3942_v8 = vsel %vm3300_vm4, %v13526_v26, 0.0  ;;  %3880 = vadd.xlane.f32.xlu1 %v13776_v39  ;;  %v17054_v39 = vld [vmem:[#allocation108_spill] sm:$0xff] }
 0x53d   : > { %vm3622_vm12 = vcmp.eq.f32.partialorder %v17046_v18, %v13203_v15  ;;  %v13938_v19 = vadd.f32 %v3938_v49, %v3732_v63  ;;  %v13940_v0 = vadd.f32 %v3942_v8, %v3734_v36  ;;  %v3736_v37 = vsel %vm3592_vm14, 0.0, %v8575_v21  ;;  %v17053_v8 = vld [vmem:[#allocation106_spill] sm:$0xff]  ;;  %v17066_v18 = vld [vmem:[#allocation79_spill] sm:$0xff] }
 0x53e   : > { %v3946_v50 = vsel %vm3300_vm4, %v13532_v1, 0.0  ;;  %v3738_v26 = vsel %vm3594_vm2, 0.0, %v8575_v21  ;;  %v3950_v3 = vsel %vm3300_vm4, %v17047_v44, 0.0  ;;  %v3740_v47 = vsel %vm3596_vm13, 0.0, %v8575_v21 }
 0x53f   : > { %v13948_v24 = vadd.f32 %v3946_v50, %v3736_v37  ;;  %v3951_v29 = vadd.f32 %v3950_v3, %v3738_v26  ;;  %v3954_v52 = vsel %vm3300_vm4, %v13546_v35, 0.0  ;;  %vm17048_vm0 = vcmp.eq.f32.partialorder %v17028_v57, %v13203_v15  ;;  %v17050_v57 = vld [vmem:[#allocation100_spill] sm:$0xff]  ;;  %3884 = vadd.xlane.f32.xlu0 %v13786_v13  ;;  %v17058_v13 = vld [vmem:[#allocation67_spill] sm:$0xff] }
 0x540   : > { %v3742_v1 = vsel %vm17048_vm0, 0.0, %v8575_v21  ;;  %v3958_v34 = vsel %vm3300_vm4, %v13552_v42, 0.0  ;;  %v3955_v38 = vadd.f32 %v3954_v52, %v3740_v47  ;;  %vm17049_vm9 = vcmp.eq.f32.partialorder %v17029_v56, %v13203_v15  ;;  %v17056_v52 = vld [vmem:[#allocation112_spill] sm:$0xff]  ;;  %3888 = vadd.xlane.f32.xlu1 %v13802_v48  ;;  %v17059_v48 = vld [vmem:[#allocation70_spill] sm:$0xff] }
 0x541   : > { %v3959_v23 = vadd.f32 %v3958_v34, %v3742_v1  ;;  %v3744_v43 = vsel %vm17049_vm9, 0.0, %v8575_v21  ;;  %v3962_v35 = vsel %vm3300_vm4, %v13558_v12, 0.0  ;;  %v3746_v42 = vsel %vm3602_vm6, 0.0, %v8575_v21  ;;  %v17057_v34 = vld [vmem:[#allocation114_spill] sm:$0xff] }
 0x542   : > { %v3963_v45 = vadd.f32 %v3962_v35, %v3744_v43  ;;  %v3966_v20 = vsel %vm3300_vm4, %v17050_v57, 0.0  ;;  %v3748_v56 = vsel %vm3604_vm7, 0.0, %v8575_v21  ;;  %v3970_v12 = vsel %vm3300_vm4, %v17051_v17, 0.0  ;;  %v17070_v17 = vld [vmem:[#allocation85_spill] sm:$0xff] }
 0x543   : > { %v3967_v2 = vadd.f32 %v3966_v20, %v3746_v42  ;;  %v3750_v11 = vsel %vm3606_vm15, 0.0, %v8575_v21  ;;  %v3974_v5 = vsel %vm3300_vm4, %v13578_v40, 0.0  ;;  %v3971_v16 = vadd.f32 %v3970_v12, %v3748_v56  ;;  %3892 = vadd.xlane.f32.xlu0 %v13814_v61  ;;  %v17060_v61 = vld [vmem:[#allocation66_spill] sm:$0xff] }
 0x544   : > { %v3975_v63 = vadd.f32 %v3974_v5, %v3750_v11  ;;  %vm17052_vm14 = vcmp.eq.f32.partialorder %v17036_v55, %v13203_v15  ;;  %v3978_v49 = vsel %vm3300_vm4, %v13584_v28, 0.0  ;;  %v3754_v4 = vsel %vm3610_vm10, 0.0, %v8575_v21  ;;  %3896 = vadd.xlane.f32.xlu1 %v13816_v30  ;;  %v17071_v11 = vld [vmem:[#allocation88_spill] sm:$0xff] }
 0x545   : > { %v3752_v27 = vsel %vm17052_vm14, 0.0, %v8575_v21  ;;  %v3982_v40 = vsel %vm3300_vm4, %v17053_v8, 0.0  ;;  %v3756_v55 = vsel %vm3612_vm3, 0.0, %v8575_v21  ;;  %v3986_v28 = vsel %vm3300_vm4, %v13600_v10, 0.0 }
 0x546   : > { %v3979_v36 = vadd.f32 %v3978_v49, %v3752_v27  ;;  %v3983_v37 = vadd.f32 %v3982_v40, %v3754_v4  ;;  %v3758_v51 = vsel %vm3614_vm5, 0.0, %v8575_v21  ;;  %v3990_v6 = vsel %vm3300_vm4, %v13606_v53, 0.0  ;;  %v17072_v49 = vld [vmem:[#allocation84_spill] sm:$0xff]  ;;  %v17073_v40 = vld [vmem:[#allocation87_spill] sm:$0xff] }
 0x547   : > { %v3987_v50 = vadd.f32 %v3986_v28, %v3756_v55  ;;  %v3991_v26 = vadd.f32 %v3990_v6, %v3758_v51  ;;  %v3760_v46 = vsel %vm3616_vm1, 0.0, %v8575_v21  ;;  %v3994_v44 = vsel %vm3300_vm4, %v17054_v39, 0.0  ;;  %3900 = vadd.xlane.f32.xlu0 %v13826_v62  ;;  %v17061_v62 = vld [vmem:[#allocation69_spill] sm:$0xff]  ;;  %v17075_v28 = vld [vmem:[#allocation8_spill] sm:$0xff] }
 0x548   : > { %v3995_v3 = vadd.f32 %v3994_v44, %v3760_v46  ;;  %v3762_v10 = vsel %vm3618_vm11, 0.0, %v8575_v21  ;;  %v3998_v47 = vsel %vm3300_vm4, %v17055_v25, 0.0  ;;  %v3764_v53 = vsel %vm3620_vm8, 0.0, %v8575_v21  ;;  %3904 = vadd.xlane.f32.xlu1 %v13842_v31  ;;  %v17074_v55 = vld [vmem:[#allocation5_spill] sm:$0xff]  ;;  %v17076_v46 = vld [vmem:[#allocation90_spill] sm:$0xff] }
 0x549   : > { %v3999_v22 = vadd.f32 %v3998_v47, %v3762_v10  ;;  %v4002_v1 = vsel %vm3300_vm4, %v17056_v52, 0.0  ;;  %v3766_v14 = vsel %vm3622_vm12, 0.0, %v8575_v21  ;;  %v4006_v43 = vsel %vm3300_vm4, %v17057_v34, 0.0  ;;  %v17077_v10 = vld [vmem:[#allocation7_spill] sm:$0xff]  ;;  %v17078_v25 = vld [vmem:[#allocation9_spill] sm:$0xff] }
 0x54a   : > { %v4003_v35 = vadd.f32 %v4002_v1, %v3764_v53  ;;  %v4007_v42 = vadd.f32 %v4006_v43, %v3766_v14  ;;  %vm3625_vm2 = vcmp.eq.f32.partialorder %v17058_v13, %v13203_v15  ;;  %vm3627_vm13 = vcmp.eq.f32.partialorder %v17059_v48, %v13203_v15  ;;  %v17079_v53 = vld [vmem:[#allocation6_spill] sm:$0xff]  ;;  %v17080_v34 = vld [vmem:[#allocation93_spill] sm:$0xff]  ;;  %v17081_v13 = vld [vmem:[#allocation11_spill] sm:$0xff] }
 0x54b   : > { %3908 = vadd.xlane.f32.xlu0 %v13854_v32  ;;  %vm3624_vm6 = vcmp.eq.f32.partialorder %v17060_v61, %v13203_v15  ;;  %v3769_v30 = vsel %vm3625_vm2, 0.0, %v8575_v21  ;;  %vm3626_vm7 = vcmp.eq.f32.partialorder %v17061_v62, %v13203_v15  ;;  %v3771_v31 = vsel %vm3627_vm13, 0.0, %v8575_v21  ;;  %v17062_v32 = vld [vmem:[#allocation73_spill] sm:$0xff]  ;;  %v17082_v48 = vld [vmem:[#allocation10_spill] sm:$0xff] }
 0x54c   : > { %3912 = vadd.xlane.f32.xlu1 %v13856_v7  ;;  %vm3629_vm15 = vcmp.eq.f32.partialorder %v17062_v32, %v13203_v15  ;;  %v17063_v7 = vld [vmem:[#allocation76_spill] sm:$0xff]  ;;  %vm3633_vm1 = vcmp.eq.f32.partialorder %v17066_v18, %v13203_v15  ;;  %vm3637_vm0 = vcmp.eq.f32.partialorder %v17070_v17, %v13203_v15  ;;  %vm3639_vm9 = vcmp.eq.f32.partialorder %v17071_v11, %v13203_v15 }
 0x54d   : > { %vm3631_vm3 = vcmp.eq.f32.partialorder %v17063_v7, %v13203_v15  ;;  %v3773_v9 = vsel %vm3629_vm15, 0.0, %v8575_v21  ;;  %v3777_v56 = vsel %vm3633_vm1, 0.0, %v8575_v21  ;;  %vm3636_vm14 = vcmp.eq.f32.partialorder %v17072_v49, %v13203_v15  ;;  %v17087_v18 = vld [vmem:[#allocation16_spill] sm:$0xff] }
 0x54e   : > { %v4026_v27 = vsel %vm3300_vm4, %v3777_v56, 0.0  ;;  %v3781_v8 = vsel %vm3637_vm0, 0.0, %v8575_v21  ;;  %vm3638_vm2 = vcmp.eq.f32.partialorder %v17073_v40, %v13203_v15  ;;  %vm3641_vm13 = vcmp.eq.f32.partialorder %v17074_v55, %v13203_v15  ;;  %v17090_v56 = vld [vmem:[#allocation39_spill] sm:$0xff]  ;;  %v17091_v17 = vld [vmem:[#allocation40_spill] sm:$0xff] }
 0x54f   : > { %3916 = vadd.xlane.f32.xlu0 %v13867_v54  ;;  %v3768_v54 = vsel %vm3624_vm6, 0.0, %v8575_v21  ;;  %vm3643_vm6 = vcmp.eq.f32.partialorder %v17075_v28, %v13203_v15  ;;  %v3782_v39 = vsel %vm3638_vm2, 0.0, %v8575_v21  ;;  %vm3642_vm15 = vcmp.eq.f32.partialorder %v17077_v10, %v13203_v15  ;;  %v17095_v55 = vld [vmem:[#allocation23_spill] sm:$0xff] }
 0x550   : > { %3920 = vadd.xlane.f32.xlu1 %v13884_v33  ;;  %v4010_v33 = vsel %vm3300_vm4, %v3769_v30, 0.0  ;;  %v3787_v47 = vsel %vm3643_vm6, 0.0, %v8575_v21  ;;  %v3786_v43 = vsel %vm3642_vm15, 0.0, %v8575_v21  ;;  %vm3646_vm1 = vcmp.eq.f32.partialorder %v17081_v13, %v13203_v15  ;;  %v17083_v30 = vld [vmem:[#allocation13_spill] sm:$0xff] }
 0x551   : > { %vm3657_vm6 = vcmp.eq.f32.partialorder %v17090_v56, %v13203_v15 }
 0x553   : > { %3924 = vadd.xlane.f32.xlu0 %v13896_v60  ;;  %v3770_v60 = vsel %vm3626_vm7, 0.0, %v8575_v21  ;;  %vm3640_vm7 = vcmp.eq.f32.partialorder %v17076_v46, %v13203_v15 }
 0x554   : > { %3928 = vadd.xlane.f32.xlu1 %v13898_v41  ;;  %v4014_v41 = vsel %vm3300_vm4, %v3771_v31, 0.0  ;;  %v3784_v1 = vsel %vm3640_vm7, 0.0, %v8575_v21  ;;  %vm3659_vm7 = vcmp.eq.f32.partialorder %v17091_v17, %v13203_v15 }
 0x555   : > { %v3803_v40 = vsel %vm3659_vm7, 0.0, %v8575_v21 }
 0x556   : > { %v4078_v46 = vsel %vm3300_vm4, %v3803_v40, 0.0  ;;  %v17107_v40 = vld [vmem:[#allocation136_spill] sm:$0xff] }
 0x557   : > { %3932 = vadd.xlane.f32.xlu0 %v13908_v59  ;;  %v17064_v59 = vld [vmem:[#allocation72_spill] sm:$0xff] }
 0x558   : > { %3936 = vadd.xlane.f32.xlu1 %v13925_v58  ;;  %vm3628_vm10 = vcmp.eq.f32.partialorder %v17064_v59, %v13203_v15  ;;  %v17065_v58 = vld [vmem:[#allocation75_spill] sm:$0xff]  ;;  %v17085_v59 = vld [vmem:[#allocation12_spill] sm:$0xff] }
 0x559   : > { %vm3630_vm5 = vcmp.eq.f32.partialorder %v17065_v58, %v13203_v15  ;;  %vm3650_vm0 = vcmp.eq.f32.partialorder %v17085_v59, %v13203_v15 }
 0x55a   : > { %v3774_v57 = vsel %vm3630_vm5, 0.0, %v8575_v21  ;;  %vm3644_vm5 = vcmp.eq.f32.partialorder %v17080_v34, %v13203_v15 }
 0x55b   : > { %3940 = vadd.xlane.f32.xlu0 %v13938_v19  ;;  %v3775_v19 = vsel %vm3631_vm3, 0.0, %v8575_v21  ;;  %vm3645_vm3 = vcmp.eq.f32.partialorder %v17078_v25, %v13203_v15  ;;  %v3788_v32 = vsel %vm3644_vm5, 0.0, %v8575_v21  ;;  %vm3663_vm5 = vcmp.eq.f32.partialorder %v17095_v55, %v13203_v15  ;;  %v17099_v25 = vld [vmem:[#allocation26_spill] sm:$0xff] }
 0x55c   : > { %3944 = vadd.xlane.f32.xlu1 %v13940_v0  ;;  %v17067_v0 = vld [vmem:[#allocation82_spill] sm:$0xff]  ;;  %v4022_v20 = vsel %vm3300_vm4, %v3775_v19, 0.0  ;;  %v3807_v10 = vsel %vm3663_vm5, 0.0, %v8575_v21 }
 0x55d   : > { %vm3635_vm11 = vcmp.eq.f32.partialorder %v17067_v0, %v13203_v15  ;;  %v4086_v34 = vsel %vm3300_vm4, %v3807_v10, 0.0 }
 0x55e   : > { %v3779_v12 = vsel %vm3635_vm11, 0.0, %v8575_v21  ;;  %vm3649_vm11 = vcmp.eq.f32.partialorder %v17082_v48, %v13203_v15 }
 0x55f   : > { %3948 = vadd.xlane.f32.xlu0 %v13948_v24  ;;  %v4011_v24 = vadd.f32 %v4010_v33, %v3768_v54  ;;  %v4030_v4 = vsel %vm3300_vm4, %v3779_v12, 0.0  ;;  %v17084_v54 = vld [vmem:[#allocation96_spill] sm:$0xff]  ;;  %v3790_v33 = vsel %vm3646_vm1, 0.0, %v8575_v21 }
 0x560   : > { %3952 = vadd.xlane.f32.xlu1 %v3951_v29  ;;  %v4015_v29 = vadd.f32 %v4014_v41, %v3770_v60  ;;  %v3793_v41 = vsel %vm3649_vm11, 0.0, %v8575_v21 }
 0x563   : > { %3956 = vadd.xlane.f32.xlu0 %v3955_v38  ;;  %v3772_v38 = vsel %vm3628_vm10, 0.0, %v8575_v21  ;;  %vm3647_vm10 = vcmp.eq.f32.partialorder %v17079_v53, %v13203_v15 }
 0x564   : > { %3960 = vadd.xlane.f32.xlu1 %v3959_v23  ;;  %v4018_v23 = vsel %vm3300_vm4, %v3773_v9, 0.0  ;;  %v3791_v61 = vsel %vm3647_vm10, 0.0, %v8575_v21  ;;  %v17086_v9 = vld [vmem:[#allocation14_spill] sm:$0xff] }
 0x565   : > { %v4019_v5 = vadd.f32 %v4018_v23, %v3772_v38  ;;  %v4054_v60 = vsel %vm3300_vm4, %v3791_v61, 0.0  ;;  %v17088_v38 = vld [vmem:[#allocation36_spill] sm:$0xff]  ;;  %v3794_v23 = vsel %vm3650_vm0, 0.0, %v8575_v21 }
 0x566   : > { %v4055_v0 = vadd.f32 %v4054_v60, %v3790_v33  ;;  %vm3652_vm2 = vcmp.eq.f32.partialorder %v17088_v38, %v13203_v15  ;;  %v17105_v38 = vld [vmem:[#allocation52_spill] sm:$0xff] }
 0x567   : > { %3964 = vadd.xlane.f32.xlu0 %v3963_v45  ;;  %v17068_v45 = vld [vmem:[#allocation78_spill] sm:$0xff] }
 0x568   : > { %3968 = vadd.xlane.f32.xlu1 %v3967_v2  ;;  %vm3632_vm8 = vcmp.eq.f32.partialorder %v17068_v45, %v13203_v15  ;;  %v17069_v2 = vld [vmem:[#allocation81_spill] sm:$0xff] }
 0x569   : > { %vm3634_vm12 = vcmp.eq.f32.partialorder %v17069_v2, %v13203_v15 }
 0x56b   : > { %3972 = vadd.xlane.f32.xlu0 %v3971_v16  ;;  %v4023_v16 = vadd.f32 %v4022_v20, %v3774_v57  ;;  %v17089_v20 = vld [vmem:[#allocation37_spill] sm:$0xff] }
 0x56c   : > { %3976 = vadd.xlane.f32.xlu1 %v3975_v63  ;;  %v3776_v63 = vsel %vm3632_vm8, 0.0, %v8575_v21  ;;  %vm3651_vm8 = vcmp.eq.f32.partialorder %v17083_v30, %v13203_v15 }
 0x56d   : > { %v4027_v51 = vadd.f32 %v4026_v27, %v3776_v63  ;;  %v3795_v58 = vsel %vm3651_vm8, 0.0, %v8575_v21  ;;  %v17092_v63 = vld [vmem:[#allocation38_spill] sm:$0xff] }
 0x56e   : > { %v4062_v45 = vsel %vm3300_vm4, %v3795_v58, 0.0  ;;  %vm3656_vm15 = vcmp.eq.f32.partialorder %v17092_v63, %v13203_v15 }
 0x56f   : > { %3980 = vadd.xlane.f32.xlu0 %v3979_v36  ;;  %v3778_v36 = vsel %vm3634_vm12, 0.0, %v8575_v21  ;;  %vm3648_vm12 = vcmp.eq.f32.partialorder %v17084_v54, %v13203_v15  ;;  %v4063_v11 = vadd.f32 %v4062_v45, %v3794_v23 }
 0x570   : > { %3984 = vadd.xlane.f32.xlu1 %v3983_v37  ;;  %v3783_v37 = vsel %vm3639_vm9, 0.0, %v8575_v21  ;;  %v4031_v6 = vadd.f32 %v4030_v4, %v3778_v36  ;;  %vm3653_vm9 = vcmp.eq.f32.partialorder %v17086_v9, %v13203_v15  ;;  %v3801_v36 = vsel %vm3657_vm6, 0.0, %v8575_v21  ;;  %v17093_v4 = vld [vmem:[#allocation19_spill] sm:$0xff] }
 0x571   : > { %v4038_v44 = vsel %vm3300_vm4, %v3783_v37, 0.0  ;;  %v3797_v57 = vsel %vm3653_vm9, 0.0, %v8575_v21  ;;  %vm4246_vm6 = vcmask 7168  }
 0x572   : > { %v4039_v52 = vadd.f32 %v4038_v44, %v3782_v39  ;;  %v17097_v44 = vld [vmem:[#allocation22_spill] sm:$0xff] }
 0x573   : > { %3988 = vadd.xlane.f32.xlu0 %v3987_v50  ;;  %v3780_v50 = vsel %vm3636_vm14, 0.0, %v8575_v21  ;;  %vm3655_vm14 = vcmp.eq.f32.partialorder %v17087_v18, %v13203_v15  ;;  %vm3662_vm11 = vcmp.eq.f32.partialorder %v17097_v44, %v13203_v15 }
 0x574   : > { %3992 = vadd.xlane.f32.xlu1 %v3991_v26  ;;  %v4034_v26 = vsel %vm3300_vm4, %v3781_v8, 0.0  ;;  %v3799_v2 = vsel %vm3655_vm14, 0.0, %v8575_v21  ;;  %v17094_v8 = vld [vmem:[#allocation41_spill] sm:$0xff] }
 0x575   : > { %v4070_v49 = vsel %vm3300_vm4, %v3799_v2, 0.0  ;;  %vm3661_vm10 = vcmp.eq.f32.partialorder %v17094_v8, %v13203_v15 }
 0x576   : > { %v3805_v39 = vsel %vm3661_vm10, 0.0, %v8575_v21 }
 0x577   : > { %3996 = vadd.xlane.f32.xlu0 %v3995_v3  ;;  %v3785_v3 = vsel %vm3641_vm13, 0.0, %v8575_v21  ;;  %vm3654_vm13 = vcmp.eq.f32.partialorder %v17089_v20, %v13203_v15 }
 0x578   : > { %4000 = vadd.xlane.f32.xlu1 %v3999_v22  ;;  %v4035_v22 = vadd.f32 %v4034_v26, %v3780_v50  ;;  %v4042_v14 = vsel %vm3300_vm4, %v3785_v3, 0.0  ;;  %v3798_v27 = vsel %vm3654_vm13, 0.0, %v8575_v21  ;;  %v17096_v50 = vld [vmem:[#allocation21_spill] sm:$0xff] }
 0x579   : > { %v4043_v62 = vadd.f32 %v4042_v14, %v3784_v1  ;;  %v4071_v28 = vadd.f32 %v4070_v49, %v3798_v27  ;;  %vm3660_vm1 = vcmp.eq.f32.partialorder %v17096_v50, %v13203_v15  ;;  %v17098_v3 = vld [vmem:[#allocation25_spill] sm:$0xff]  ;;  %v17100_v1 = vld [vmem:[#allocation24_spill] sm:$0xff]  ;;  %v3806_v14 = vsel %vm3662_vm11, 0.0, %v8575_v21 }
 0x57a   : > { %vm3665_vm8 = vcmp.eq.f32.partialorder %v17098_v3, %v13203_v15  ;;  %vm3664_vm0 = vcmp.eq.f32.partialorder %v17100_v1, %v13203_v15  ;;  %v4087_v61 = vadd.f32 %v4086_v34, %v3806_v14  ;;  %v17109_v1 = vld [vmem:[#allocation140_spill] sm:$0xff] }
 0x57b   : > { %4004 = vadd.xlane.f32.xlu0 %v4003_v35  ;;  %v4046_v35 = vsel %vm3300_vm4, %v3787_v47, 0.0  ;;  %v3808_v30 = vsel %vm3664_vm0, 0.0, %v8575_v21 }
 0x57c   : > { %4008 = vadd.xlane.f32.xlu1 %v4007_v42  ;;  %v3789_v42 = vsel %vm3645_vm3, 0.0, %v8575_v21  ;;  %v4047_v31 = vadd.f32 %v4046_v35, %v3786_v43  ;;  %vm3658_vm3 = vcmp.eq.f32.partialorder %v17093_v4, %v13203_v15  ;;  %v3809_v43 = vsel %vm3665_vm8, 0.0, %v8575_v21  ;;  %v17101_v35 = vld [vmem:[#allocation45_spill] sm:$0xff] }
 0x57d   : > { %v4050_v7 = vsel %vm3300_vm4, %v3789_v42, 0.0  ;;  %v3802_v26 = vsel %vm3658_vm3, 0.0, %v8575_v21  ;;  %vm3666_vm9 = vcmp.eq.f32.partialorder %v17101_v35, %v13203_v15  ;;  %v17102_v42 = vld [vmem:[#allocation28_spill] sm:$0xff] }
 0x57e   : > { %v4051_v19 = vadd.f32 %v4050_v7, %v3788_v32  ;;  %v4079_v53 = vadd.f32 %v4078_v46, %v3802_v26  ;;  %vm3669_vm14 = vcmp.eq.f32.partialorder %v17102_v42, %v13203_v15  ;;  %v3810_v32 = vsel %vm3666_vm9, 0.0, %v8575_v21 }
 0x57f   : > { %4012 = vadd.xlane.f32.xlu0 %v4011_v24  ;;  %v3792_v24 = vsel %vm3648_vm12, 0.0, %v8575_v21  ;;  %vm3667_vm12 = vcmp.eq.f32.partialorder %v17099_v25, %v13203_v15  ;;  %v3813_v54 = vsel %vm3669_vm14, 0.0, %v8575_v21 }
 0x580   : > { %4016 = vadd.xlane.f32.xlu1 %v4015_v29  ;;  %v4058_v29 = vsel %vm3300_vm4, %v3793_v41, 0.0  ;;  %v3811_v13 = vsel %vm3667_vm12, 0.0, %v8575_v21  ;;  %v4098_v9 = vsel %vm3300_vm4, %v3813_v54, 0.0 }
 0x581   : > { %v4059_v12 = vadd.f32 %v4058_v29, %v3792_v24  ;;  %v4094_v7 = vsel %vm3300_vm4, %v3811_v13, 0.0 }
 0x582   : > { %v4095_v41 = vadd.f32 %v4094_v7, %v3810_v32 }
 0x583   : > { %4020 = vadd.xlane.f32.xlu0 %v4019_v5  ;;  %v3796_v5 = vsel %vm3652_vm2, 0.0, %v8575_v21 }
 0x584   : > { %4024 = vadd.xlane.f32.xlu1 %v4023_v16  ;;  %v4066_v16 = vsel %vm3300_vm4, %v3797_v57, 0.0 }
 0x585   : > { %v4067_v37 = vadd.f32 %v4066_v16, %v3796_v5 }
 0x587   : > { %4028 = vadd.xlane.f32.xlu0 %v4027_v51  ;;  %v3800_v51 = vsel %vm3656_vm15, 0.0, %v8575_v21 }
 0x588   : > { %4032 = vadd.xlane.f32.xlu1 %v4031_v6  ;;  %v4074_v6 = vsel %vm3300_vm4, %v3801_v36, 0.0 }
 0x589   : > { %v4075_v47 = vadd.f32 %v4074_v6, %v3800_v51 }
 0x58b   : > { %4036 = vadd.xlane.f32.xlu0 %v4035_v22  ;;  %v3804_v22 = vsel %vm3660_vm1, 0.0, %v8575_v21 }
 0x58c   : > { %4040 = vadd.xlane.f32.xlu1 %v4039_v52  ;;  %v4082_v52 = vsel %vm3300_vm4, %v3805_v39, 0.0  ;;  %v17108_v39 = vld [vmem:[#allocation138_spill] sm:$0xff] }
 0x58d   : > { %v4083_v48 = vadd.f32 %v4082_v52, %v3804_v22 }
 0x58f   : > { %4044 = vadd.xlane.f32.xlu0 %v4043_v62  ;;  %v4090_v62 = vsel %vm3300_vm4, %v3809_v43, 0.0 }
 0x590   : > { %4048 = vadd.xlane.f32.xlu1 %v4047_v31  ;;  %v17103_v31 = vld [vmem:[#allocation46_spill] sm:$0xff]  ;;  %v4091_v60 = vadd.f32 %v4090_v62, %v3808_v30 }
 0x591   : > { %vm3668_vm2 = vcmp.eq.f32.partialorder %v17103_v31, %v13203_v15  ;;  %v17104_v15 = vmov 0.0   ;;  %v17110_v30 = vld [vmem:[#allocation142_spill] sm:$0xff] }
 0x592   : > { %v3812_v59 = vsel %vm3668_vm2, 0.0, %v8575_v21 }
 0x593   : > { %4052 = vadd.xlane.f32.xlu0 %v4051_v19  ;;  %v4099_v58 = vadd.f32 %v4098_v9, %v3812_v59  ;;  %v17112_v59 = vld [vmem:[#allocation144_spill] sm:$0xff] }
 0x594   : > { %4056 = vadd.xlane.f32.xlu1 %v4055_v0 }
 0x596   : > { %v3821_v33 = vpop.xlane.xlu1 %3820 }
 0x597   : > { %4060 = vadd.xlane.f32.xlu0 %v4059_v12  ;;  %vm4103_vm13 = vcmp.gt.f32.partialorder %v3821_v33, 98.0 }
 0x598   : > { %4064 = vadd.xlane.f32.xlu1 %v4063_v11  ;;  %v14223_v18 = vsel %vm4103_vm13, 1.0, %v17104_v15  ;;  %v17106_v11 = vld [vmem:[#allocation53_spill] sm:$0xff] }
 0x599   : > { %v4248_v0 = vsel %vm4246_vm6, %v14223_v18, 0.0 }
 0x59b   : > { %4068 = vadd.xlane.f32.xlu0 %v4067_v37 }
 0x59c   : > { %4072 = vadd.xlane.f32.xlu1 %v4071_v28 }
 0x59f   : > { %4076 = vadd.xlane.f32.xlu0 %v4075_v47 }
 0x5a0   : > { %4080 = vadd.xlane.f32.xlu1 %v4079_v53 }
 0x5a3   : > { %4084 = vadd.xlane.f32.xlu0 %v4083_v48 }
 0x5a4   : > { %4088 = vadd.xlane.f32.xlu1 %v4087_v61 }
 0x5a7   : > { %4092 = vadd.xlane.f32.xlu0 %v4091_v60 }
 0x5a8   : > { %4096 = vadd.xlane.f32.xlu1 %v4095_v41 }
 0x5ab   : > { %4100 = vadd.xlane.f32.xlu0 %v4099_v58 }
 0x5ac   : > { %v3817_v19 = vpop.xlane.xlu0 %3816 }
 0x5ad   : > { %vm4102_vm7 = vcmp.gt.f32.partialorder %v3817_v19, 98.0  ;;  %v3825_v24 = vpop.xlane.xlu1 %3824 }
 0x5ae   : > { %v14228_v29 = vsel %vm4102_vm7, 1.0, %v17104_v15  ;;  %vm4104_vm15 = vcmp.gt.f32.partialorder %v3825_v24, 98.0 }
 0x5af   : > { %v4247_v21 = vsel %vm4246_vm6, %v14228_v29, 0.0  ;;  %5834 = vadd.xlane.f32.xlu0 %v17105_v38  ;;  %v14234_v23 = vsel %vm4104_vm15, 1.0, %v17104_v15 }
 0x5b0   : > { %v4249_v45 = vadd.f32 %v4248_v0, %v4247_v21  ;;  %v4250_v57 = vsel %vm4246_vm6, %v14234_v23, 0.0  ;;  %v3829_v20 = vpop.xlane.xlu0 %3828 }
 0x5b1   : > { %vm4105_vm4 = vcmp.gt.f32.partialorder %v3829_v20, 98.0  ;;  %v3833_v56 = vpop.xlane.xlu1 %3832  ;;  %v17115_v20 = vld [vmem:[#allocation147_spill] sm:$0xff] }
 0x5b2   : > { %v4251_v2 = vadd.f32 %v4250_v57, %v4249_v45  ;;  %v14239_v17 = vsel %vm4105_vm4, 1.0, %v17104_v15  ;;  %vm4106_vm3 = vcmp.gt.f32.partialorder %v3833_v56, 98.0 }
 0x5b3   : > { %v4252_v12 = vsel %vm4246_vm6, %v14239_v17, 0.0  ;;  %5838 = vadd.xlane.f32.xlu0 %v17106_v11  ;;  %v14245_v5 = vsel %vm4106_vm3, 1.0, %v17104_v15 }
 0x5b4   : > { %v4253_v16 = vadd.f32 %v4252_v12, %v4251_v2  ;;  %v4254_v63 = vsel %vm4246_vm6, %v14245_v5, 0.0  ;;  %v3837_v27 = vpop.xlane.xlu0 %3836 }
 0x5b5   : > { %vm4107_vm10 = vcmp.gt.f32.partialorder %v3837_v27, 98.0  ;;  %v3841_v49 = vpop.xlane.xlu1 %3840 }
 0x5b6   : > { %v4255_v36 = vadd.f32 %v4254_v63, %v4253_v16  ;;  %v14250_v4 = vsel %vm4107_vm10, 1.0, %v17104_v15  ;;  %vm4108_vm5 = vcmp.gt.f32.partialorder %v3841_v49, 98.0 }
 0x5b7   : > { %v4256_v8 = vsel %vm4246_vm6, %v14250_v4, 0.0  ;;  %5842 = vadd.xlane.f32.xlu0 %v17107_v40  ;;  %v14256_v55 = vsel %vm4108_vm5, 1.0, %v17104_v15 }
 0x5b8   : > { %v4257_v37 = vadd.f32 %v4256_v8, %v4255_v36  ;;  %v4258_v28 = vsel %vm4246_vm6, %v14256_v55, 0.0  ;;  %v3845_v51 = vpop.xlane.xlu0 %3844  ;;  %v17118_v8 = vld [vmem:[#allocation150_spill] sm:$0xff] }
 0x5b9   : > { %vm4109_vm1 = vcmp.gt.f32.partialorder %v3845_v51, 98.0  ;;  %v3849_v6 = vpop.xlane.xlu1 %3848 }
 0x5ba   : > { %v4259_v50 = vadd.f32 %v4258_v28, %v4257_v37  ;;  %v14261_v26 = vsel %vm4109_vm1, 1.0, %v17104_v15  ;;  %vm4110_vm11 = vcmp.gt.f32.partialorder %v3849_v6, 98.0 }
 0x5bb   : > { %v4260_v46 = vsel %vm4246_vm6, %v14261_v26, 0.0  ;;  %5846 = vadd.xlane.f32.xlu0 %v17108_v39  ;;  %v14267_v44 = vsel %vm4110_vm11, 1.0, %v17104_v15 }
 0x5bc   : > { %v4261_v3 = vadd.f32 %v4260_v46, %v4259_v50  ;;  %v4262_v10 = vsel %vm4246_vm6, %v14267_v44, 0.0  ;;  %v3853_v25 = vpop.xlane.xlu0 %3852 }
 0x5bd   : > { %vm4111_vm8 = vcmp.gt.f32.partialorder %v3853_v25, 98.0  ;;  %v3857_v47 = vpop.xlane.xlu1 %3856  ;;  %v17121_v25 = vld [vmem:[#allocation153_spill] sm:$0xff] }
 0x5be   : > { %v4263_v53 = vadd.f32 %v4262_v10, %v4261_v3  ;;  %v14272_v22 = vsel %vm4111_vm8, 1.0, %v17104_v15  ;;  %vm4112_vm12 = vcmp.gt.f32.partialorder %v3857_v47, 98.0 }
 0x5bf   : > { %v4264_v52 = vsel %vm4246_vm6, %v14272_v22, 0.0  ;;  %5850 = vadd.xlane.f32.xlu0 %v17109_v1  ;;  %v14278_v14 = vsel %vm4112_vm12, 1.0, %v17104_v15 }
 0x5c0   : > { %v4265_v34 = vadd.f32 %v4264_v52, %v4263_v53  ;;  %v4266_v43 = vsel %vm4246_vm6, %v14278_v14, 0.0  ;;  %v3861_v35 = vpop.xlane.xlu0 %3860 }
 0x5c1   : > { %vm4113_vm0 = vcmp.gt.f32.partialorder %v3861_v35, 98.0  ;;  %v3865_v42 = vpop.xlane.xlu1 %3864 }
 0x5c2   : > { %v4267_v13 = vadd.f32 %v4266_v43, %v4265_v34  ;;  %v14283_v48 = vsel %vm4113_vm0, 1.0, %v17104_v15  ;;  %vm4114_vm9 = vcmp.gt.f32.partialorder %v3865_v42, 98.0 }
 0x5c3   : > { %v4268_v61 = vsel %vm4246_vm6, %v14283_v48, 0.0  ;;  %5854 = vadd.xlane.f32.xlu0 %v17110_v30  ;;  %v14289_v62 = vsel %vm4114_vm9, 1.0, %v17104_v15 }
 0x5c4   : > { %v4269_v31 = vadd.f32 %v4268_v61, %v4267_v13  ;;  %v4270_v32 = vsel %vm4246_vm6, %v14289_v62, 0.0  ;;  %v3869_v7 = vpop.xlane.xlu0 %3868  ;;  %v17124_v61 = vld [vmem:[#allocation156_spill] sm:$0xff] }
 0x5c5   : > { %vm4115_vm14 = vcmp.gt.f32.partialorder %v3869_v7, 98.0  ;;  %v3873_v54 = vpop.xlane.xlu1 %3872 }
 0x5c6   : > { %v4271_v33 = vadd.f32 %v4270_v32, %v4269_v31  ;;  %v14294_v60 = vsel %vm4115_vm14, 1.0, %v17104_v15  ;;  %vm4116_vm2 = vcmp.gt.f32.partialorder %v3873_v54, 98.0 }
 0x5c7   : > { %17111 = vst [vmem:[#allocation116_spill] sm:$0xff] %v14294_v60  ;;  %v4272_v41 = vsel %vm4246_vm6, %v14294_v60, 0.0  ;;  %5858 = vadd.xlane.f32.xlu0 %v17112_v59  ;;  %v14300_v9 = vsel %vm4116_vm2, 1.0, %v17104_v15 }
 0x5c8   : > { %17113 = vst [vmem:[#allocation118_spill] sm:$0xff] %v14300_v9  ;;  %v4273_v58 = vadd.f32 %v4272_v41, %v4271_v33  ;;  %v4274_v19 = vsel %vm4246_vm6, %v14300_v9, 0.0  ;;  %v3877_v0 = vpop.xlane.xlu0 %3876  ;;  %v17220_v9 = vld [vmem:[#allocation101_spill] sm:$0xff] }
 0x5c9   : > { %vm4117_vm13 = vcmp.gt.f32.partialorder %v3877_v0, 98.0  ;;  %v3881_v24 = vpop.xlane.xlu1 %3880  ;;  %v17127_v0 = vld [vmem:[#allocation157_spill] sm:$0xff] }
 0x5ca   : > { %v4275_v21 = vadd.f32 %v4274_v19, %v4273_v58  ;;  %v14305_v45 = vsel %vm4117_vm13, 1.0, %v17104_v15  ;;  %vm4118_vm7 = vcmp.gt.f32.partialorder %v3881_v24, 98.0 }
 0x5cb   : > { %17114 = vst [vmem:[#allocation120_spill] sm:$0xff] %v14305_v45  ;;  %v4276_v57 = vsel %vm4246_vm6, %v14305_v45, 0.0  ;;  %5862 = vadd.xlane.f32.xlu0 %v17115_v20  ;;  %v14311_v56 = vsel %vm4118_vm7, 1.0, %v17104_v15  ;;  %v17219_v45 = vld [vmem:[#allocation173_spill] sm:$0xff] }
 0x5cc   : > { %17116 = vst [vmem:[#allocation122_spill] sm:$0xff] %v14311_v56  ;;  %v4277_v2 = vadd.f32 %v4276_v57, %v4275_v21  ;;  %v4278_v12 = vsel %vm4246_vm6, %v14311_v56, 0.0  ;;  %v3885_v16 = vpop.xlane.xlu0 %3884  ;;  %v17217_v56 = vld [vmem:[#allocation172_spill] sm:$0xff] }
 0x5cd   : > { %vm4119_vm15 = vcmp.gt.f32.partialorder %v3885_v16, 98.0  ;;  %v3889_v63 = vpop.xlane.xlu1 %3888 }
 0x5ce   : > { %v4279_v27 = vadd.f32 %v4278_v12, %v4277_v2  ;;  %v14316_v49 = vsel %vm4119_vm15, 1.0, %v17104_v15  ;;  %vm4120_vm4 = vcmp.gt.f32.partialorder %v3889_v63, 98.0 }
 0x5cf   : > { %17117 = vst [vmem:[#allocation124_spill] sm:$0xff] %v14316_v49  ;;  %v4280_v36 = vsel %vm4246_vm6, %v14316_v49, 0.0  ;;  %5866 = vadd.xlane.f32.xlu0 %v17118_v8  ;;  %v14322_v37 = vsel %vm4120_vm4, 1.0, %v17104_v15  ;;  %v17211_v49 = vld [vmem:[#allocation169_spill] sm:$0xff] }
 0x5d0   : > { %17119 = vst [vmem:[#allocation126_spill] sm:$0xff] %v14322_v37  ;;  %v4281_v28 = vadd.f32 %v4280_v36, %v4279_v27  ;;  %v4282_v51 = vsel %vm4246_vm6, %v14322_v37, 0.0  ;;  %v3893_v6 = vpop.xlane.xlu0 %3892  ;;  %v17130_v36 = vld [vmem:[#allocation158_spill] sm:$0xff]  ;;  %v17209_v37 = vld [vmem:[#allocation168_spill] sm:$0xff] }
 0x5d1   : > { %vm4121_vm3 = vcmp.gt.f32.partialorder %v3893_v6, 98.0  ;;  %v3897_v50 = vpop.xlane.xlu1 %3896 }
 0x5d2   : > { %v4283_v46 = vadd.f32 %v4282_v51, %v4281_v28  ;;  %v14327_v3 = vsel %vm4121_vm3, 1.0, %v17104_v15  ;;  %vm4122_vm10 = vcmp.gt.f32.partialorder %v3897_v50, 98.0 }
 0x5d3   : > { %17120 = vst [vmem:[#allocation128_spill] sm:$0xff] %v14327_v3  ;;  %v4284_v10 = vsel %vm4246_vm6, %v14327_v3, 0.0  ;;  %5870 = vadd.xlane.f32.xlu0 %v17121_v25  ;;  %v14333_v47 = vsel %vm4122_vm10, 1.0, %v17104_v15  ;;  %v17207_v3 = vld [vmem:[#allocation167_spill] sm:$0xff] }
 0x5d4   : > { %17122 = vst [vmem:[#allocation131_spill] sm:$0xff] %v14333_v47  ;;  %v4285_v53 = vadd.f32 %v4284_v10, %v4283_v46  ;;  %v4286_v52 = vsel %vm4246_vm6, %v14333_v47, 0.0  ;;  %v3901_v34 = vpop.xlane.xlu0 %3900  ;;  %v17206_v47 = vld [vmem:[#allocation97_spill] sm:$0xff] }
 0x5d5   : > { %vm4123_vm5 = vcmp.gt.f32.partialorder %v3901_v34, 98.0  ;;  %v3905_v43 = vpop.xlane.xlu1 %3904  ;;  %v17133_v34 = vld [vmem:[#allocation159_spill] sm:$0xff] }
 0x5d6   : > { %v4287_v35 = vadd.f32 %v4286_v52, %v4285_v53  ;;  %v14338_v42 = vsel %vm4123_vm5, 1.0, %v17104_v15  ;;  %vm4124_vm1 = vcmp.gt.f32.partialorder %v3905_v43, 98.0 }
 0x5d7   : > { %17123 = vst [vmem:[#allocation50_spill] sm:$0xff] %v14338_v42  ;;  %v4288_v13 = vsel %vm4246_vm6, %v14338_v42, 0.0  ;;  %5874 = vadd.xlane.f32.xlu0 %v17124_v61  ;;  %v14344_v31 = vsel %vm4124_vm1, 1.0, %v17104_v15  ;;  %v17205_v42 = vld [vmem:[#allocation94_spill] sm:$0xff] }
 0x5d8   : > { %17125 = vst [vmem:[#allocation47_spill] sm:$0xff] %v14344_v31  ;;  %v4289_v32 = vadd.f32 %v4288_v13, %v4287_v35  ;;  %v4290_v7 = vsel %vm4246_vm6, %v14344_v31, 0.0  ;;  %v3909_v54 = vpop.xlane.xlu0 %3908 }
 0x5d9   : > { %vm4125_vm11 = vcmp.gt.f32.partialorder %v3909_v54, 98.0  ;;  %v3913_v33 = vpop.xlane.xlu1 %3912 }
 0x5da   : > { %v4291_v41 = vadd.f32 %v4290_v7, %v4289_v32  ;;  %v14349_v58 = vsel %vm4125_vm11, 1.0, %v17104_v15  ;;  %vm4126_vm8 = vcmp.gt.f32.partialorder %v3913_v33, 98.0 }
 0x5db   : > { %17126 = vst [vmem:[#allocation33_spill] sm:$0xff] %v14349_v58  ;;  %v4292_v19 = vsel %vm4246_vm6, %v14349_v58, 0.0  ;;  %5878 = vadd.xlane.f32.xlu0 %v17127_v0  ;;  %v14355_v24 = vsel %vm4126_vm8, 1.0, %v17104_v15 }
 0x5dc   : > { %17128 = vst [vmem:[#allocation99_spill] sm:$0xff] %v14355_v24  ;;  %v4293_v21 = vadd.f32 %v4292_v19, %v4291_v41  ;;  %v4294_v57 = vsel %vm4246_vm6, %v14355_v24, 0.0  ;;  %v3917_v2 = vpop.xlane.xlu0 %3916  ;;  %v17136_v19 = vld [vmem:[#allocation160_spill] sm:$0xff]  ;;  %v17202_v24 = vld [vmem:[#allocation86_spill] sm:$0xff] }
 0x5dd   : > { %vm4127_vm12 = vcmp.gt.f32.partialorder %v3917_v2, 98.0  ;;  %v3921_v12 = vpop.xlane.xlu1 %3920 }
 0x5de   : > { %v4295_v16 = vadd.f32 %v4294_v57, %v4293_v21  ;;  %v14360_v63 = vsel %vm4127_vm12, 1.0, %v17104_v15  ;;  %vm4128_vm0 = vcmp.gt.f32.partialorder %v3921_v12, 98.0 }
 0x5df   : > { %17129 = vst [vmem:[#allocation102_spill] sm:$0xff] %v14360_v63  ;;  %v4296_v27 = vsel %vm4246_vm6, %v14360_v63, 0.0  ;;  %5882 = vadd.xlane.f32.xlu0 %v17130_v36  ;;  %v14366_v28 = vsel %vm4128_vm0, 1.0, %v17104_v15 }
 0x5e0   : > { %17131 = vst [vmem:[#allocation105_spill] sm:$0xff] %v14366_v28  ;;  %v4297_v51 = vadd.f32 %v4296_v27, %v4295_v16  ;;  %v4298_v6 = vsel %vm4246_vm6, %v14366_v28, 0.0  ;;  %v3925_v50 = vpop.xlane.xlu0 %3924  ;;  %v17201_v28 = vld [vmem:[#allocation80_spill] sm:$0xff] }
 0x5e1   : > { %vm4129_vm9 = vcmp.gt.f32.partialorder %v3925_v50, 98.0  ;;  %v3929_v46 = vpop.xlane.xlu1 %3928  ;;  %v17139_v50 = vld [vmem:[#allocation161_spill] sm:$0xff] }
 0x5e2   : > { %v4299_v10 = vadd.f32 %v4298_v6, %v4297_v51  ;;  %v14371_v53 = vsel %vm4129_vm9, 1.0, %v17104_v15  ;;  %vm4130_vm14 = vcmp.gt.f32.partialorder %v3929_v46, 98.0 }
 0x5e3   : > { %17132 = vst [vmem:[#allocation107_spill] sm:$0xff] %v14371_v53  ;;  %v4300_v52 = vsel %vm4246_vm6, %v14371_v53, 0.0  ;;  %5886 = vadd.xlane.f32.xlu0 %v17133_v34  ;;  %v14377_v43 = vsel %vm4130_vm14, 1.0, %v17104_v15  ;;  %v17200_v53 = vld [vmem:[#allocation74_spill] sm:$0xff] }
 0x5e4   : > { %17134 = vst [vmem:[#allocation109_spill] sm:$0xff] %v14377_v43  ;;  %v4301_v35 = vadd.f32 %v4300_v52, %v4299_v10  ;;  %v4302_v13 = vsel %vm4246_vm6, %v14377_v43, 0.0  ;;  %v3933_v32 = vpop.xlane.xlu0 %3932  ;;  %v17199_v43 = vld [vmem:[#allocation68_spill] sm:$0xff] }
 0x5e5   : > { %vm4131_vm2 = vcmp.gt.f32.partialorder %v3933_v32, 98.0  ;;  %v3937_v7 = vpop.xlane.xlu1 %3936 }
 0x5e6   : > { %v4303_v54 = vadd.f32 %v4302_v13, %v4301_v35  ;;  %v14382_v33 = vsel %vm4131_vm2, 1.0, %v17104_v15  ;;  %vm4132_vm13 = vcmp.gt.f32.partialorder %v3937_v7, 98.0 }
 0x5e7   : > { %17135 = vst [vmem:[#allocation111_spill] sm:$0xff] %v14382_v33  ;;  %v4304_v41 = vsel %vm4246_vm6, %v14382_v33, 0.0  ;;  %5890 = vadd.xlane.f32.xlu0 %v17136_v19  ;;  %v14388_v21 = vsel %vm4132_vm13, 1.0, %v17104_v15  ;;  %v17187_v33 = vld [vmem:[#allocation135_spill] sm:$0xff] }
 0x5e8   : > { %17137 = vst [vmem:[#allocation113_spill] sm:$0xff] %v14388_v21  ;;  %v4305_v57 = vadd.f32 %v4304_v41, %v4303_v54  ;;  %v4306_v2 = vsel %vm4246_vm6, %v14388_v21, 0.0  ;;  %v3941_v12 = vpop.xlane.xlu0 %3940  ;;  %v17142_v41 = vld [vmem:[#allocation162_spill] sm:$0xff] }
 0x5e9   : > { %vm4133_vm7 = vcmp.gt.f32.partialorder %v3941_v12, 98.0  ;;  %v3945_v16 = vpop.xlane.xlu1 %3944 }
 0x5ea   : > { %v4307_v27 = vadd.f32 %v4306_v2, %v4305_v57  ;;  %v14393_v51 = vsel %vm4133_vm7, 1.0, %v17104_v15  ;;  %vm4134_vm15 = vcmp.gt.f32.partialorder %v3945_v16, 98.0 }
 0x5eb   : > { %17138 = vst [vmem:[#allocation115_spill] sm:$0xff] %v14393_v51  ;;  %v4308_v6 = vsel %vm4246_vm6, %v14393_v51, 0.0  ;;  %5894 = vadd.xlane.f32.xlu0 %v17139_v50  ;;  %v14399_v46 = vsel %vm4134_vm15, 1.0, %v17104_v15 }
 0x5ec   : > { %17140 = vst [vmem:[#allocation117_spill] sm:$0xff] %v14399_v46  ;;  %v4309_v10 = vadd.f32 %v4308_v6, %v4307_v27  ;;  %v4310_v52 = vsel %vm4246_vm6, %v14399_v46, 0.0  ;;  %v3949_v35 = vpop.xlane.xlu0 %3948 }
 0x5ed   : > { %vm4135_vm4 = vcmp.gt.f32.partialorder %v3949_v35, 98.0  ;;  %v3953_v13 = vpop.xlane.xlu1 %3952  ;;  %v17145_v35 = vld [vmem:[#allocation163_spill] sm:$0xff] }
 0x5ee   : > { %v4311_v32 = vadd.f32 %v4310_v52, %v4309_v10  ;;  %v14404_v7 = vsel %vm4135_vm4, 1.0, %v17104_v15  ;;  %vm4136_vm3 = vcmp.gt.f32.partialorder %v3953_v13, 98.0 }
 0x5ef   : > { %17141 = vst [vmem:[#allocation119_spill] sm:$0xff] %v14404_v7  ;;  %v4312_v54 = vsel %vm4246_vm6, %v14404_v7, 0.0  ;;  %5898 = vadd.xlane.f32.xlu0 %v17142_v41  ;;  %v14410_v57 = vsel %vm4136_vm3, 1.0, %v17104_v15 }
 0x5f0   : > { %17143 = vst [vmem:[#allocation121_spill] sm:$0xff] %v14410_v57  ;;  %v4313_v2 = vadd.f32 %v4312_v54, %v4311_v32  ;;  %v4314_v12 = vsel %vm4246_vm6, %v14410_v57, 0.0  ;;  %v3957_v16 = vpop.xlane.xlu0 %3956 }
 0x5f1   : > { %vm4137_vm10 = vcmp.gt.f32.partialorder %v3957_v16, 98.0  ;;  %v3961_v27 = vpop.xlane.xlu1 %3960 }
 0x5f2   : > { %v4315_v6 = vadd.f32 %v4314_v12, %v4313_v2  ;;  %v14415_v10 = vsel %vm4137_vm10, 1.0, %v17104_v15  ;;  %vm4138_vm5 = vcmp.gt.f32.partialorder %v3961_v27, 98.0 }
 0x5f3   : > { %17144 = vst [vmem:[#allocation123_spill] sm:$0xff] %v14415_v10  ;;  %v4316_v52 = vsel %vm4246_vm6, %v14415_v10, 0.0  ;;  %5902 = vadd.xlane.f32.xlu0 %v17145_v35  ;;  %v14421_v13 = vsel %vm4138_vm5, 1.0, %v17104_v15  ;;  %v17148_v10 = vld [vmem:[#allocation164_spill] sm:$0xff] }
 0x5f4   : > { %17146 = vst [vmem:[#allocation125_spill] sm:$0xff] %v14421_v13  ;;  %v4317_v32 = vadd.f32 %v4316_v52, %v4315_v6  ;;  %v4318_v54 = vsel %vm4246_vm6, %v14421_v13, 0.0  ;;  %v3965_v57 = vpop.xlane.xlu0 %3964  ;;  %v17214_v35 = vld [vmem:[#allocation44_spill] sm:$0xff] }
 0x5f5   : > { %vm4139_vm1 = vcmp.gt.f32.partialorder %v3965_v57, 98.0  ;;  %v3969_v16 = vpop.xlane.xlu1 %3968 }
 0x5f6   : > { %v4319_v2 = vadd.f32 %v4318_v54, %v4317_v32  ;;  %v14426_v12 = vsel %vm4139_vm1, 1.0, %v17104_v15  ;;  %vm4140_vm11 = vcmp.gt.f32.partialorder %v3969_v16, 98.0 }
 0x5f7   : > { %17147 = vst [vmem:[#allocation127_spill] sm:$0xff] %v14426_v12  ;;  %v4320_v27 = vsel %vm4246_vm6, %v14426_v12, 0.0  ;;  %5906 = vadd.xlane.f32.xlu0 %v17148_v10  ;;  %v14432_v7 = vsel %vm4140_vm11, 1.0, %v17104_v15  ;;  %v17151_v12 = vld [vmem:[#allocation165_spill] sm:$0xff]  ;;  %v17208_v10 = vld [vmem:[#allocation15_spill] sm:$0xff] }
 0x5f8   : > { %17149 = vst [vmem:[#allocation130_spill] sm:$0xff] %v14432_v7  ;;  %v4321_v6 = vadd.f32 %v4320_v27, %v4319_v2  ;;  %v4322_v52 = vsel %vm4246_vm6, %v14432_v7, 0.0  ;;  %v3973_v13 = vpop.xlane.xlu0 %3972 }
 0x5f9   : > { %vm4141_vm8 = vcmp.gt.f32.partialorder %v3973_v13, 98.0  ;;  %v3977_v57 = vpop.xlane.xlu1 %3976 }
 0x5fa   : > { %v4323_v32 = vadd.f32 %v4322_v52, %v4321_v6  ;;  %v14437_v54 = vsel %vm4141_vm8, 1.0, %v17104_v15  ;;  %vm4142_vm12 = vcmp.gt.f32.partialorder %v3977_v57, 98.0 }
 0x5fb   : > { %17150 = vst [vmem:[#allocation51_spill] sm:$0xff] %v14437_v54  ;;  %v4324_v16 = vsel %vm4246_vm6, %v14437_v54, 0.0  ;;  %5910 = vadd.xlane.f32.xlu0 %v17151_v12  ;;  %v14443_v46 = vsel %vm4142_vm12, 1.0, %v17104_v15  ;;  %v17154_v54 = vld [vmem:[#allocation166_spill] sm:$0xff] }
 0x5fc   : > { %17152 = vst [vmem:[#allocation54_spill] sm:$0xff] %v14443_v46  ;;  %v4325_v2 = vadd.f32 %v4324_v16, %v4323_v32  ;;  %v4326_v27 = vsel %vm4246_vm6, %v14443_v46, 0.0  ;;  %v3981_v7 = vpop.xlane.xlu0 %3980 }
 0x5fd   : > { %vm4143_vm0 = vcmp.gt.f32.partialorder %v3981_v7, 98.0  ;;  %v3985_v13 = vpop.xlane.xlu1 %3984 }
 0x5fe   : > { %v4327_v6 = vadd.f32 %v4326_v27, %v4325_v2  ;;  %v14448_v52 = vsel %vm4143_vm0, 1.0, %v17104_v15  ;;  %vm4144_vm9 = vcmp.gt.f32.partialorder %v3985_v13, 98.0 }
 0x5ff   : > { %17153 = vst [vmem:[#allocation55_spill] sm:$0xff] %v14448_v52  ;;  %v4328_v57 = vsel %vm4246_vm6, %v14448_v52, 0.0  ;;  %5914 = vadd.xlane.f32.xlu0 %v17154_v54  ;;  %v14454_v51 = vsel %vm4144_vm9, 1.0, %v17104_v15  ;;  %v17203_v54 = vld [vmem:[#allocation91_spill] sm:$0xff] }
 0x600   : > { %17155 = vst [vmem:[#allocation56_spill] sm:$0xff] %v14454_v51  ;;  %v4329_v32 = vadd.f32 %v4328_v57, %v4327_v6  ;;  %v4330_v16 = vsel %vm4246_vm6, %v14454_v51, 0.0  ;;  %v3989_v46 = vpop.xlane.xlu0 %3988 }
 0x601   : > { %vm4145_vm14 = vcmp.gt.f32.partialorder %v3989_v46, 98.0  ;;  %v3993_v7 = vpop.xlane.xlu1 %3992 }
 0x602   : > { %v4331_v2 = vadd.f32 %v4330_v16, %v4329_v32  ;;  %v14459_v27 = vsel %vm4145_vm14, 1.0, %v17104_v15  ;;  %vm4146_vm2 = vcmp.gt.f32.partialorder %v3993_v7, 98.0 }
 0x603   : > { %17156 = vst [vmem:[#allocation57_spill] sm:$0xff] %v14459_v27  ;;  %v4332_v13 = vsel %vm4246_vm6, %v14459_v27, 0.0  ;;  %v14464_v52 = vsel %vm4146_vm2, 1.0, %v17104_v15 }
 0x604   : > { %17157 = vst [vmem:[#allocation58_spill] sm:$0xff] %v14464_v52  ;;  %v4333_v21 = vadd.f32 %v4332_v13, %v4331_v2  ;;  %v4334_v6 = vsel %vm4246_vm6, %v14464_v52, 0.0  ;;  %v3997_v57 = vpop.xlane.xlu0 %3996 }
 0x605   : > { %vm4147_vm13 = vcmp.gt.f32.partialorder %v3997_v57, 98.0  ;;  %v4001_v51 = vpop.xlane.xlu1 %4000 }
 0x606   : > { %v4335_v46 = vadd.f32 %v4334_v6, %v4333_v21  ;;  %v14469_v32 = vsel %vm4147_vm13, 1.0, %v17104_v15  ;;  %vm4148_vm7 = vcmp.gt.f32.partialorder %v4001_v51, 98.0 }
 0x607   : > { %17158 = vst [vmem:[#allocation146_spill] sm:$0xff] %v14469_v32  ;;  %v4336_v16 = vsel %vm4246_vm6, %v14469_v32, 0.0  ;;  %v14474_v7 = vsel %vm4148_vm7, 1.0, %v17104_v15 }
 0x608   : > { %17159 = vst [vmem:[#allocation149_spill] sm:$0xff] %v14474_v7  ;;  %v4337_v27 = vadd.f32 %v4336_v16, %v4335_v46  ;;  %v4338_v2 = vsel %vm4246_vm6, %v14474_v7, 0.0  ;;  %v4005_v13 = vpop.xlane.xlu0 %4004 }
 0x609   : > { %vm4149_vm15 = vcmp.gt.f32.partialorder %v4005_v13, 98.0  ;;  %v4009_v52 = vpop.xlane.xlu1 %4008 }
 0x60a   : > { %v4339_v57 = vadd.f32 %v4338_v2, %v4337_v27  ;;  %v14479_v21 = vsel %vm4149_vm15, 1.0, %v17104_v15  ;;  %vm4150_vm4 = vcmp.gt.f32.partialorder %v4009_v52, 98.0 }
 0x60b   : > { %17160 = vst [vmem:[#allocation152_spill] sm:$0xff] %v14479_v21  ;;  %v4340_v51 = vsel %vm4246_vm6, %v14479_v21, 0.0  ;;  %v14484_v6 = vsel %vm4150_vm4, 1.0, %v17104_v15 }
 0x60c   : > { %17161 = vst [vmem:[#allocation155_spill] sm:$0xff] %v14484_v6  ;;  %v4341_v32 = vadd.f32 %v4340_v51, %v4339_v57  ;;  %v4342_v46 = vsel %vm4246_vm6, %v14484_v6, 0.0  ;;  %v4013_v16 = vpop.xlane.xlu0 %4012 }
 0x60d   : > { %vm4151_vm3 = vcmp.gt.f32.partialorder %v4013_v16, 98.0  ;;  %v4017_v7 = vpop.xlane.xlu1 %4016 }
 0x60e   : > { %v4343_v13 = vadd.f32 %v4342_v46, %v4341_v32  ;;  %v14489_v27 = vsel %vm4151_vm3, 1.0, %v17104_v15  ;;  %vm4152_vm10 = vcmp.gt.f32.partialorder %v4017_v7, 98.0 }
 0x60f   : > { %17162 = vst [vmem:[#allocation59_spill] sm:$0xff] %v14489_v27  ;;  %v4344_v52 = vsel %vm4246_vm6, %v14489_v27, 0.0  ;;  %v14494_v2 = vsel %vm4152_vm10, 1.0, %v17104_v15 }
 0x610   : > { %17163 = vst [vmem:[#allocation61_spill] sm:$0xff] %v14494_v2  ;;  %v4345_v21 = vadd.f32 %v4344_v52, %v4343_v13  ;;  %v4346_v57 = vsel %vm4246_vm6, %v14494_v2, 0.0  ;;  %v4021_v51 = vpop.xlane.xlu0 %4020 }
 0x611   : > { %vm4153_vm5 = vcmp.gt.f32.partialorder %v4021_v51, 98.0  ;;  %v4025_v6 = vpop.xlane.xlu1 %4024 }
 0x612   : > { %v4347_v16 = vadd.f32 %v4346_v57, %v4345_v21  ;;  %v14499_v32 = vsel %vm4153_vm5, 1.0, %v17104_v15  ;;  %vm4154_vm1 = vcmp.gt.f32.partialorder %v4025_v6, 98.0 }
 0x613   : > { %17164 = vst [vmem:[#allocation63_spill] sm:$0xff] %v14499_v32  ;;  %v4348_v7 = vsel %vm4246_vm6, %v14499_v32, 0.0  ;;  %v14504_v46 = vsel %vm4154_vm1, 1.0, %v17104_v15 }
 0x614   : > { %17165 = vst [vmem:[#allocation65_spill] sm:$0xff] %v14504_v46  ;;  %v4349_v27 = vadd.f32 %v4348_v7, %v4347_v16  ;;  %v4350_v13 = vsel %vm4246_vm6, %v14504_v46, 0.0  ;;  %v4029_v52 = vpop.xlane.xlu0 %4028 }
 0x615   : > { %vm4155_vm11 = vcmp.gt.f32.partialorder %v4029_v52, 98.0  ;;  %v4033_v2 = vpop.xlane.xlu1 %4032 }
 0x616   : > { %v4351_v51 = vadd.f32 %v4350_v13, %v4349_v27  ;;  %v14509_v21 = vsel %vm4155_vm11, 1.0, %v17104_v15  ;;  %vm4156_vm8 = vcmp.gt.f32.partialorder %v4033_v2, 98.0 }
 0x617   : > { %17166 = vst [vmem:[#allocation71_spill] sm:$0xff] %v14509_v21  ;;  %v4352_v6 = vsel %vm4246_vm6, %v14509_v21, 0.0  ;;  %v14514_v57 = vsel %vm4156_vm8, 1.0, %v17104_v15 }
 0x618   : > { %17167 = vst [vmem:[#allocation77_spill] sm:$0xff] %v14514_v57  ;;  %v4353_v32 = vadd.f32 %v4352_v6, %v4351_v51  ;;  %v4354_v16 = vsel %vm4246_vm6, %v14514_v57, 0.0  ;;  %v4037_v7 = vpop.xlane.xlu0 %4036 }
 0x619   : > { %vm4157_vm12 = vcmp.gt.f32.partialorder %v4037_v7, 98.0  ;;  %v4041_v46 = vpop.xlane.xlu1 %4040 }
 0x61a   : > { %v4355_v52 = vadd.f32 %v4354_v16, %v4353_v32  ;;  %v14519_v27 = vsel %vm4157_vm12, 1.0, %v17104_v15  ;;  %vm4158_vm0 = vcmp.gt.f32.partialorder %v4041_v46, 98.0 }
 0x61b   : > { %17168 = vst [vmem:[#allocation83_spill] sm:$0xff] %v14519_v27  ;;  %v4356_v2 = vsel %vm4246_vm6, %v14519_v27, 0.0  ;;  %v14524_v13 = vsel %vm4158_vm0, 1.0, %v17104_v15 }
 0x61c   : > { %17169 = vst [vmem:[#allocation89_spill] sm:$0xff] %v14524_v13  ;;  %v4357_v21 = vadd.f32 %v4356_v2, %v4355_v52  ;;  %v4358_v51 = vsel %vm4246_vm6, %v14524_v13, 0.0  ;;  %v4045_v6 = vpop.xlane.xlu0 %4044 }
 0x61d   : > { %vm4159_vm9 = vcmp.gt.f32.partialorder %v4045_v6, 98.0  ;;  %v4049_v57 = vpop.xlane.xlu1 %4048 }
 0x61e   : > { %v4359_v7 = vadd.f32 %v4358_v51, %v4357_v21  ;;  %v14529_v32 = vsel %vm4159_vm9, 1.0, %v17104_v15  ;;  %vm4160_vm14 = vcmp.gt.f32.partialorder %v4049_v57, 98.0 }
 0x61f   : > { %17170 = vst [vmem:[#allocation92_spill] sm:$0xff] %v14529_v32  ;;  %v4360_v46 = vsel %vm4246_vm6, %v14529_v32, 0.0  ;;  %v14534_v16 = vsel %vm4160_vm14, 1.0, %v17104_v15 }
 0x620   : > { %17171 = vst [vmem:[#allocation95_spill] sm:$0xff] %v14534_v16  ;;  %v4361_v27 = vadd.f32 %v4360_v46, %v4359_v7  ;;  %v4362_v52 = vsel %vm4246_vm6, %v14534_v16, 0.0  ;;  %v4053_v2 = vpop.xlane.xlu0 %4052 }
 0x621   : > { %vm4161_vm2 = vcmp.gt.f32.partialorder %v4053_v2, 98.0  ;;  %v4057_v13 = vpop.xlane.xlu1 %4056 }
 0x622   : > { %v4363_v6 = vadd.f32 %v4362_v52, %v4361_v27  ;;  %v14539_v21 = vsel %vm4161_vm2, 1.0, %v17104_v15  ;;  %vm4162_vm13 = vcmp.gt.f32.partialorder %v4057_v13, 98.0 }
 0x623   : > { %17172 = vst [vmem:[#allocation35_spill] sm:$0xff] %v14539_v21  ;;  %v4364_v57 = vsel %vm4246_vm6, %v14539_v21, 0.0  ;;  %v14544_v51 = vsel %vm4162_vm13, 1.0, %v17104_v15 }
 0x624   : > { %17173 = vst [vmem:[#allocation17_spill] sm:$0xff] %v14544_v51  ;;  %v4365_v32 = vadd.f32 %v4364_v57, %v4363_v6  ;;  %v4366_v7 = vsel %vm4246_vm6, %v14544_v51, 0.0  ;;  %v4061_v46 = vpop.xlane.xlu0 %4060 }
 0x625   : > { %vm4163_vm7 = vcmp.gt.f32.partialorder %v4061_v46, 98.0  ;;  %v4065_v16 = vpop.xlane.xlu1 %4064 }
 0x626   : > { %v4367_v2 = vadd.f32 %v4366_v7, %v4365_v32  ;;  %v14549_v27 = vsel %vm4163_vm7, 1.0, %v17104_v15  ;;  %vm4164_vm15 = vcmp.gt.f32.partialorder %v4065_v16, 98.0 }
 0x627   : > { %17174 = vst [vmem:[#allocation48_spill] sm:$0xff] %v14549_v27  ;;  %v4368_v13 = vsel %vm4246_vm6, %v14549_v27, 0.0  ;;  %v14554_v52 = vsel %vm4164_vm15, 1.0, %v17104_v15 }
 0x628   : > { %17175 = vst [vmem:[#allocation20_spill] sm:$0xff] %v14554_v52  ;;  %v4369_v21 = vadd.f32 %v4368_v13, %v4367_v2  ;;  %v4370_v6 = vsel %vm4246_vm6, %v14554_v52, 0.0  ;;  %v4069_v57 = vpop.xlane.xlu0 %4068 }
 0x629   : > { %vm4165_vm4 = vcmp.gt.f32.partialorder %v4069_v57, 98.0  ;;  %v4073_v51 = vpop.xlane.xlu1 %4072 }
 0x62a   : > { %v4371_v46 = vadd.f32 %v4370_v6, %v4369_v21  ;;  %v14559_v32 = vsel %vm4165_vm4, 1.0, %v17104_v15  ;;  %vm4166_vm3 = vcmp.gt.f32.partialorder %v4073_v51, 98.0 }
 0x62b   : > { %17176 = vst [vmem:[#allocation43_spill] sm:$0xff] %v14559_v32  ;;  %v4372_v16 = vsel %vm4246_vm6, %v14559_v32, 0.0  ;;  %v14564_v7 = vsel %vm4166_vm3, 1.0, %v17104_v15 }
 0x62c   : > { %17177 = vst [vmem:[#allocation31_spill] sm:$0xff] %v14564_v7  ;;  %v4373_v27 = vadd.f32 %v4372_v16, %v4371_v46  ;;  %v4374_v2 = vsel %vm4246_vm6, %v14564_v7, 0.0  ;;  %v4077_v13 = vpop.xlane.xlu0 %4076 }
 0x62d   : > { %vm4167_vm10 = vcmp.gt.f32.partialorder %v4077_v13, 98.0  ;;  %v4081_v52 = vpop.xlane.xlu1 %4080 }
 0x62e   : > { %v4375_v57 = vadd.f32 %v4374_v2, %v4373_v27  ;;  %v14569_v21 = vsel %vm4167_vm10, 1.0, %v17104_v15  ;;  %vm4168_vm5 = vcmp.gt.f32.partialorder %v4081_v52, 98.0 }
 0x62f   : > { %17178 = vst [vmem:[#allocation27_spill] sm:$0xff] %v14569_v21  ;;  %v4376_v51 = vsel %vm4246_vm6, %v14569_v21, 0.0  ;;  %v14574_v6 = vsel %vm4168_vm5, 1.0, %v17104_v15 }
 0x630   : > { %17179 = vst [vmem:[#allocation30_spill] sm:$0xff] %v14574_v6  ;;  %v4377_v32 = vadd.f32 %v4376_v51, %v4375_v57  ;;  %v4378_v46 = vsel %vm4246_vm6, %v14574_v6, 0.0  ;;  %v4085_v16 = vpop.xlane.xlu0 %4084 }
 0x631   : > { %vm4169_vm1 = vcmp.gt.f32.partialorder %v4085_v16, 98.0  ;;  %v4089_v7 = vpop.xlane.xlu1 %4088 }
 0x632   : > { %v4379_v13 = vadd.f32 %v4378_v46, %v4377_v32  ;;  %v14579_v27 = vsel %vm4169_vm1, 1.0, %v17104_v15  ;;  %vm4170_vm11 = vcmp.gt.f32.partialorder %v4089_v7, 98.0 }
 0x633   : > { %17180 = vst [vmem:[#allocation49_spill] sm:$0xff] %v14579_v27  ;;  %v4380_v52 = vsel %vm4246_vm6, %v14579_v27, 0.0  ;;  %v14584_v2 = vsel %vm4170_vm11, 1.0, %v17104_v15 }
 0x634   : > { %17181 = vst [vmem:[#allocation98_spill] sm:$0xff] %v14584_v2  ;;  %v4381_v21 = vadd.f32 %v4380_v52, %v4379_v13  ;;  %v4382_v57 = vsel %vm4246_vm6, %v14584_v2, 0.0  ;;  %v4093_v51 = vpop.xlane.xlu0 %4092  ;;  %v17185_v2 = vld [vmem:[#allocation133_spill] sm:$0xff] }
 0x635   : > { %vm4171_vm8 = vcmp.gt.f32.partialorder %v4093_v51, 98.0  ;;  %v4097_v6 = vpop.xlane.xlu1 %4096 }
 0x636   : > { %v4383_v16 = vadd.f32 %v4382_v57, %v4381_v21  ;;  %v14589_v32 = vsel %vm4171_vm8, 1.0, %v17104_v15  ;;  %vm4172_vm12 = vcmp.gt.f32.partialorder %v4097_v6, 98.0 }
 0x637   : > { %17182 = vst [vmem:[#allocation104_spill] sm:$0xff] %v14589_v32  ;;  %v4384_v7 = vsel %vm4246_vm6, %v14589_v32, 0.0  ;;  %v14594_v46 = vsel %vm4172_vm12, 1.0, %v17104_v15  ;;  %v17186_v32 = vld [vmem:[#allocation134_spill] sm:$0xff] }
 0x638   : > { %17183 = vst [vmem:[#allocation177_spill] sm:$0xff] %v14594_v46  ;;  %v4385_v27 = vadd.f32 %v4384_v7, %v4383_v16  ;;  %v4386_v13 = vsel %vm4246_vm6, %v14594_v46, 0.0  ;;  %v4101_v52 = vpop.xlane.xlu0 %4100  ;;  %v17188_v16 = vld [vmem:[#allocation137_spill] sm:$0xff]  ;;  %v17189_v7 = vld [vmem:[#allocation139_spill] sm:$0xff]  ;;  %v17198_v46 = vld [vmem:[#allocation64_spill] sm:$0xff] }
 0x639   : > { %vm4173_vm0 = vcmp.gt.f32.partialorder %v4101_v52, 98.0  ;;  %v17190_v52 = vld [vmem:[#allocation141_spill] sm:$0xff] }
 0x63a   : > { %v14599_v51 = vsel %vm4173_vm0, 1.0, %v17104_v15  ;;  %v4387_v21 = vadd.f32 %v4386_v13, %v4385_v27  ;;  %v17191_v15 = vld [vmem:[#allocation143_spill] sm:$0xff]  ;;  %v17192_v27 = vld [vmem:[#allocation145_spill] sm:$0xff]  ;;  %v17193_v13 = vld [vmem:[#allocation148_spill] sm:$0xff] }
 0x63b   : > { %17184 = vst [vmem:[#allocation34_spill] sm:$0xff] %v14599_v51  ;;  %v4388_v57 = vsel %vm4246_vm6, %v14599_v51, 0.0  ;;  %v17197_v51 = vld [vmem:[#allocation62_spill] sm:$0xff] }
 0x63c   : > { %v4389_v6 = vadd.f32 %v4388_v57, %v4387_v21  ;;  %v17194_v21 = vld [vmem:[#allocation151_spill] sm:$0xff]  ;;  %v17195_v57 = vld [vmem:[#allocation154_spill] sm:$0xff]  ;;  %v5835_v63 = vpop.xlane.xlu0 %5834 }
 0x63d   : > { %v5979_v58 = vmul.f32 0.0078125, %v5835_v63  ;;  %v17210_v63 = vld [vmem:[#allocation18_spill] sm:$0xff] }
 0x63e   : > { %4390 = vadd.xlane.f32.xlu1 %v4389_v6  ;;  %v17196_v6 = vld [vmem:[#allocation60_spill] sm:$0xff] }
 0x63f   : > { %v14623_v31 = vsub.f32 %v17105_v38, %v5979_v58  ;;  %v17212_v38 = vld [vmem:[#allocation42_spill] sm:$0xff] }
 0x640   : > { %v17213_v58 = vld [vmem:[#allocation170_spill] sm:$0xff] }
 0x641   : > { %17204 = vst [vmem:[#allocation100_spill] sm:$0xff] %v14623_v31  ;;  %v6123_v12 = vmul.f32 %v14623_v31, %v14623_v31  ;;  %v17215_v31 = vld [vmem:[#allocation171_spill] sm:$0xff] }
 0x642   : > { %5836 = vadd.xlane.f32.xlu1 %v17185_v2 }
 0x646   : > { %5840 = vadd.xlane.f32.xlu1 %v17186_v32 }
 0x64a   : > { %5844 = vadd.xlane.f32.xlu1 %v17187_v33 }
 0x64e   : > { %5848 = vadd.xlane.f32.xlu1 %v17188_v16 }
 0x652   : > { %5852 = vadd.xlane.f32.xlu1 %v17189_v7 }
 0x656   : > { %5856 = vadd.xlane.f32.xlu1 %v17190_v52 }
 0x65a   : > { %5860 = vadd.xlane.f32.xlu1 %v17191_v15 }
 0x65e   : > { %5864 = vadd.xlane.f32.xlu1 %v17192_v27 }
 0x662   : > { %5868 = vadd.xlane.f32.xlu1 %v17193_v13 }
 0x666   : > { %5872 = vadd.xlane.f32.xlu1 %v17194_v21 }
 0x66a   : > { %5876 = vadd.xlane.f32.xlu1 %v17195_v57 }
 0x66e   : > { %5880 = vadd.xlane.f32.xlu1 %v17196_v6 }
 0x672   : > { %5884 = vadd.xlane.f32.xlu1 %v17197_v51 }
 0x676   : > { %5888 = vadd.xlane.f32.xlu1 %v17198_v46 }
 0x67a   : > { %5892 = vadd.xlane.f32.xlu1 %v17199_v43 }
 0x67e   : > { %5896 = vadd.xlane.f32.xlu1 %v17200_v53 }
 0x682   : > { %5900 = vadd.xlane.f32.xlu1 %v17201_v28 }
 0x686   : > { %5904 = vadd.xlane.f32.xlu1 %v17202_v24 }
 0x68a   : > { %5908 = vadd.xlane.f32.xlu1 %v17203_v54 }
 0x68e   : > { %5912 = vadd.xlane.f32.xlu1 %v17205_v42 }
 0x692   : > { %6195 = vadd.xlane.f32.xlu1 %v6123_v12  ;;  %v17216_v12 = vld [vmem:[#allocation29_spill] sm:$0xff] }
 0x696   : > { %5916 = vadd.xlane.f32.xlu1 %v17206_v47 }
 0x69a   : > { %5918 = vadd.xlane.f32.xlu1 %v17207_v3  ;;  %v17218_v3 = vld [vmem:[#allocation32_spill] sm:$0xff] }
 0x69e   : > { %5920 = vadd.xlane.f32.xlu1 %v17208_v10 }
 0x6a2   : > { %5922 = vadd.xlane.f32.xlu1 %v17209_v37 }
 0x6a6   : > { %5924 = vadd.xlane.f32.xlu1 %v17210_v63  ;;  %v5839_v63 = vpop.xlane.xlu0 %5838 }
 0x6aa   : > { %5926 = vadd.xlane.f32.xlu1 %v17211_v49 }
 0x6ae   : > { %5928 = vadd.xlane.f32.xlu1 %v17212_v38 }
 0x6b2   : > { %5930 = vadd.xlane.f32.xlu1 %v17213_v58  ;;  %v5981_v58 = vmul.f32 0.0078125, %v5839_v63  ;;  %v17222_v63 = vld [vmem:[#allocation174_spill] sm:$0xff] }
 0x6b6   : > { %5932 = vadd.xlane.f32.xlu1 %v17214_v35 }
 0x6ba   : > { %5934 = vadd.xlane.f32.xlu1 %v17215_v31 }
 0x6be   : > { %5936 = vadd.xlane.f32.xlu1 %v17216_v12  ;;  %v17221_v12 = vld [vmem:[#allocation175_spill] sm:$0xff] }
 0x6c2   : > { %5938 = vadd.xlane.f32.xlu1 %v17217_v56 }
 0x6c6   : > { %5940 = vadd.xlane.f32.xlu1 %v17218_v3  ;;  %v14648_v3 = vsub.f32 %v17106_v11, %v5981_v58 }
 0x6c8   : > { %v6125_v11 = vmul.f32 %v14648_v3, %v14648_v3 }
 0x6ca   : > { %5942 = vadd.xlane.f32.xlu1 %v17219_v45 }
 0x6cb   : > { %v4391_v37 = vpop.xlane.xlu1 %4390 }
 0x6cc   : > { %v4392_v41 = vrot.slane %v4391_v37, 4 }
 0x6ce   : > { %v4393_v49 = vadd.f32 %v4392_v41, %v4391_v37  ;;  %5944 = vadd.xlane.f32.xlu1 %v17220_v9  ;;  %v5843_v9 = vpop.xlane.xlu0 %5842 }
 0x6cf   : > { %v5837_v38 = vpop.xlane.xlu1 %5836 }
 0x6d0   : > { %v5980_v53 = vmul.f32 0.0078125, %v5837_v38  ;;  %v4394_v35 = vrot.slane %v4393_v49, 2 }
 0x6d2   : > { %v14644_v31 = vsub.f32 %v17185_v2, %v5980_v53  ;;  %5946 = vadd.xlane.f32.xlu1 %v17221_v12  ;;  %v4395_v56 = vadd.f32 %v4394_v35, %v4393_v49  ;;  %v5983_v53 = vmul.f32 0.0078125, %v5843_v9  ;;  %v17223_v49 = vld [vmem:[#allocation178_spill] sm:$0xff]  ;;  %v17225_v9 = vld [vmem:[#allocation176_spill] sm:$0xff]  ;;  %v17229_v12 = vld [vmem:[#allocation179_spill] sm:$0xff] }
 0x6d3   : > { %v5841_v60 = vpop.xlane.xlu1 %5840 }
 0x6d4   : > { %v5982_v45 = vmul.f32 0.0078125, %v5841_v60  ;;  %v6124_v37 = vmul.f32 %v14644_v31, %v14644_v31  ;;  %v4396_v41 = vrot.slane %v4395_v56, 1  ;;  %v14660_v35 = vsub.f32 %v17107_v40, %v5983_v53 }
 0x6d6   : > { %6197 = vadd.xlane.f32.xlu0 %v6124_v37  ;;  %5948 = vadd.xlane.f32.xlu1 %v17222_v63  ;;  %v4397_v38 = vadd.f32 %v4396_v41, %v4395_v56  ;;  %v14654_v2 = vsub.f32 %v17186_v32, %v5982_v45  ;;  %17224 = vst [vmem:[#allocation103_spill] sm:$0xff] %v14660_v35  ;;  %v5847_v37 = vpop.xlane.xlu0 %5846 }
 0x6d7   : > { %v5845_v10 = vpop.xlane.xlu1 %5844  ;;  %v5985_v32 = vmul.f32 0.0078125, %v5847_v37 }
 0x6d8   : > { %8311 = vpush %v4397_v38  ;;  %v5984_v58 = vmul.f32 0.0078125, %v5845_v10  ;;  %v6126_v56 = vmul.f32 %v14654_v2, %v14654_v2  ;;  %v6127_v38 = vmul.f32 %v14660_v35, %v14660_v35  ;;  %v17232_v35 = vld [vmem:[#allocation181_spill] sm:$0xff] }
 0x6d9   : > { %v14672_v10 = vsub.f32 %v17108_v39, %v5985_v32 }
 0x6da   : > { %5950 = vadd.xlane.f32.xlu1 %v17223_v49  ;;  %6199 = vadd.xlane.f32.xlu0 %v6125_v11  ;;  %v14666_v41 = vsub.f32 %v17187_v33, %v5984_v58  ;;  %v17227_v11 = vld [vmem:[#allocation180_spill] sm:$0xff] }
 0x6db   : > { %v5849_v60 = vpop.xlane.xlu1 %5848  ;;  %17228 = vst [vmem:[#allocation108_spill] sm:$0xff] %v14672_v10 }
 0x6dc   : > { %17226 = vst [vmem:[#allocation106_spill] sm:$0xff] %v14666_v41  ;;  %v5986_v53 = vmul.f32 0.0078125, %v5849_v60  ;;  %v6128_v49 = vmul.f32 %v14666_v41, %v14666_v41 }
 0x6de   : > { %5952 = vadd.xlane.f32.xlu1 %v17225_v9  ;;  %6201 = vadd.xlane.f32.xlu0 %v6126_v56  ;;  %v5851_v56 = vpop.xlane.xlu0 %5850  ;;  %v14678_v37 = vsub.f32 %v17188_v16, %v5986_v53 }
 0x6df   : > { %v5853_v45 = vpop.xlane.xlu1 %5852  ;;  %v5987_v58 = vmul.f32 0.0078125, %v5851_v56 }
 0x6e0   : > { %17230 = vst [vmem:[#allocation110_spill] sm:$0xff] %v14678_v37  ;;  %v5988_v32 = vmul.f32 0.0078125, %v5853_v45  ;;  %v6130_v41 = vmul.f32 %v14678_v37, %v14678_v37 }
 0x6e1   : > { %v14684_v60 = vsub.f32 %v17109_v1, %v5987_v58 }
 0x6e2   : > { %5954 = vadd.xlane.f32.xlu1 %v17227_v11  ;;  %6203 = vadd.xlane.f32.xlu0 %v6127_v38  ;;  %v6129_v38 = vmul.f32 %v14672_v10, %v14672_v10  ;;  %v17231_v11 = vld [vmem:[#allocation182_spill] sm:$0xff]  ;;  %v14690_v56 = vsub.f32 %v17189_v7, %v5988_v32  ;;  %v17236_v10 = vld [vmem:[#allocation183_spill] sm:$0xff] }
 0x6e3   : > { %v5857_v40 = vpop.xlane.xlu1 %5856 }
 0x6e4   : > { %17233 = vst [vmem:[#allocation112_spill] sm:$0xff] %v14690_v56  ;;  %v5990_v58 = vmul.f32 0.0078125, %v5857_v40  ;;  %v6132_v37 = vmul.f32 %v14690_v56, %v14690_v56 }
 0x6e6   : > { %5956 = vadd.xlane.f32.xlu1 %v17229_v12  ;;  %6205 = vadd.xlane.f32.xlu0 %v6128_v49  ;;  %v5855_v49 = vpop.xlane.xlu0 %5854 }
 0x6e7   : > { %v5861_v33 = vpop.xlane.xlu1 %5860  ;;  %v5989_v53 = vmul.f32 0.0078125, %v5855_v49  ;;  %v14702_v49 = vsub.f32 %v17190_v52, %v5990_v58 }
 0x6e9   : > { %v14696_v45 = vsub.f32 %v17110_v30, %v5989_v53  ;;  %17237 = vst [vmem:[#allocation67_spill] sm:$0xff] %v14702_v49  ;;  %v5992_v53 = vmul.f32 0.0078125, %v5861_v33 }
 0x6ea   : > { %5958 = vadd.xlane.f32.xlu1 %v17231_v11  ;;  %6207 = vadd.xlane.f32.xlu0 %v6129_v38  ;;  %v6131_v38 = vmul.f32 %v14684_v60, %v14684_v60  ;;  %v17234_v11 = vld [vmem:[#allocation184_spill] sm:$0xff] }
 0x6eb   : > { %v5865_v39 = vpop.xlane.xlu1 %5864  ;;  %17235 = vst [vmem:[#allocation114_spill] sm:$0xff] %v14696_v45 }
 0x6ee   : > { %5960 = vadd.xlane.f32.xlu1 %v17232_v35  ;;  %6209 = vadd.xlane.f32.xlu0 %v6130_v41  ;;  %v5859_v41 = vpop.xlane.xlu0 %5858 }
 0x6ef   : > { %v5869_v16 = vpop.xlane.xlu1 %5868  ;;  %v5991_v32 = vmul.f32 0.0078125, %v5859_v41  ;;  %v17240_v41 = vld [vmem:[#allocation132_spill] sm:$0xff] }
 0x6f1   : > { %v14710_v40 = vsub.f32 %v17112_v59, %v5991_v32  ;;  %v5994_v32 = vmul.f32 0.0078125, %v5865_v39 }
 0x6f2   : > { %5962 = vadd.xlane.f32.xlu1 %v17234_v11  ;;  %6211 = vadd.xlane.f32.xlu0 %v6131_v38  ;;  %v6133_v38 = vmul.f32 %v14696_v45, %v14696_v45  ;;  %v17238_v11 = vld [vmem:[#allocation129_spill] sm:$0xff]  ;;  %v5863_v56 = vpop.xlane.xlu0 %5862  ;;  %v14718_v45 = vsub.f32 %v17191_v15, %v5992_v53 }
 0x6f3   : > { %v5873_v1 = vpop.xlane.xlu1 %5872  ;;  %17239 = vst [vmem:[#allocation70_spill] sm:$0xff] %v14710_v40  ;;  %v5993_v58 = vmul.f32 0.0078125, %v5863_v56  ;;  %v17244_v56 = vld [vmem:[#allocation185_spill] sm:$0xff] }
 0x6f4   : > { %17241 = vst [vmem:[#allocation66_spill] sm:$0xff] %v14718_v45 }
 0x6f5   : > { %v14726_v33 = vsub.f32 %v17115_v20, %v5993_v58  ;;  %v5996_v58 = vmul.f32 0.0078125, %v5869_v16 }
 0x6f6   : > { %5964 = vadd.xlane.f32.xlu1 %v17236_v10  ;;  %6213 = vadd.xlane.f32.xlu0 %v6132_v37  ;;  %v6134_v37 = vmul.f32 %v14702_v49, %v14702_v49  ;;  %v5867_v49 = vpop.xlane.xlu0 %5866 }
 0x6f7   : > { %v5877_v7 = vpop.xlane.xlu1 %5876  ;;  %17243 = vst [vmem:[#allocation69_spill] sm:$0xff] %v14726_v33  ;;  %v5995_v53 = vmul.f32 0.0078125, %v5867_v49  ;;  %v17247_v49 = vld [vmem:[#allocation187_spill] sm:$0xff] }
 0x6f9   : > { %v14742_v39 = vsub.f32 %v17118_v8, %v5995_v53  ;;  %v5998_v53 = vmul.f32 0.0078125, %v5873_v1  ;;  %v6000_v1 = vmul.f32 0.0078125, %v5877_v7 }
 0x6fa   : > { %5966 = vadd.xlane.f32.xlu1 %v17238_v11  ;;  %6215 = vadd.xlane.f32.xlu0 %v6133_v38  ;;  %v6135_v38 = vmul.f32 %v14710_v40, %v14710_v40  ;;  %v17242_v11 = vld [vmem:[#allocation186_spill] sm:$0xff]  ;;  %v14734_v40 = vsub.f32 %v17192_v27, %v5994_v32 }
 0x6fb   : > { %v14707_v30 = vpop.xlane.xlu1 %5880 }
 0x6fc   : > { %17245 = vst [vmem:[#allocation73_spill] sm:$0xff] %v14734_v40 }
 0x6fe   : > { %5968 = vadd.xlane.f32.xlu1 %v17240_v41  ;;  %6217 = vadd.xlane.f32.xlu0 %v6134_v37  ;;  %v6136_v37 = vmul.f32 %v14718_v45, %v14718_v45  ;;  %v5871_v45 = vpop.xlane.xlu0 %5870 }
 0x6ff   : > { %v14715_v52 = vpop.xlane.xlu1 %5884  ;;  %v5997_v32 = vmul.f32 0.0078125, %v5871_v45 }
 0x701   : > { %v14755_v16 = vsub.f32 %v17121_v25, %v5997_v32 }
 0x702   : > { %5970 = vadd.xlane.f32.xlu1 %v17242_v11  ;;  %6219 = vadd.xlane.f32.xlu0 %v6135_v38  ;;  %v6137_v38 = vmul.f32 %v14726_v33, %v14726_v33  ;;  %v17246_v11 = vld [vmem:[#allocation188_spill] sm:$0xff]  ;;  %v14750_v33 = vsub.f32 %v17193_v13, %v5996_v58  ;;  %v14762_v13 = vsub.f32 %v17194_v21, %v5998_v53 }
 0x703   : > { %v14723_v59 = vpop.xlane.xlu1 %5888  ;;  %17248 = vst [vmem:[#allocation76_spill] sm:$0xff] %v14755_v16  ;;  %v6141_v58 = vmul.f32 %v14755_v16, %v14755_v16  ;;  %v14776_v53 = vsub.f32 %v17195_v57, %v6000_v1 }
 0x704   : > { %17249 = vst [vmem:[#allocation72_spill] sm:$0xff] %v14762_v13  ;;  %v6142_v32 = vmul.f32 %v14762_v13, %v14762_v13  ;;  %v6002_v13 = vmul.f32 0.0078125, %v14707_v30 }
 0x705   : > { %17251 = vst [vmem:[#allocation79_spill] sm:$0xff] %v14776_v53 }
 0x706   : > { %5972 = vadd.xlane.f32.xlu1 %v17244_v56  ;;  %6221 = vadd.xlane.f32.xlu0 %v6136_v37  ;;  %v6138_v37 = vmul.f32 %v14734_v40, %v14734_v40  ;;  %v6140_v40 = vmul.f32 %v14750_v33, %v14750_v33 }
 0x707   : > { %v14731_v15 = vpop.xlane.xlu1 %5892 }
 0x709   : > { %s8312_s23 = spop %8311 }
 0x70a   : > { %5974 = vadd.xlane.f32.xlu1 %v17246_v11  ;;  %6223 = vadd.xlane.f32.xlu0 %v6137_v38  ;;  %v6139_v38 = vmul.f32 %v14742_v39, %v14742_v39  ;;  %v5875_v11 = vpop.xlane.xlu0 %5874  ;;  %p4399_p11 = scmp.eq.f32.partialorder %s8312_s23, 0.0  ;;  %s297_s23 = scalar_lea.vmem [#allocation2], %s296_s12 }
 0x70b   : > { %v14739_v20 = vpop.xlane.xlu1 %5896  ;;  %v5999_v45 = vmul.f32 0.0078125, %v5875_v11 }
 0x70c   : > { %s4400_s17 = scalar_select %p4399_p11, 1, 0 }
 0x70d   : > { %v14769_v25 = vsub.f32 %v17124_v61, %v5999_v45 }
 0x70e   : > { %5976 = vadd.xlane.f32.xlu1 %v17247_v49  ;;  %6225 = vadd.xlane.f32.xlu0 %v6138_v37 }
 0x70f   : > { %v14747_v27 = vpop.xlane.xlu1 %5900  ;;  %17250 = vst [vmem:[#allocation75_spill] sm:$0xff] %v14769_v25 }
 0x712   : > { %6227 = vadd.xlane.f32.xlu0 %v6139_v38 }
 0x713   : > { %v5905_v8 = vpop.xlane.xlu1 %5904 }
 0x714   : > { %v6014_v16 = vmul.f32 0.0078125, %v5905_v8 }
 0x716   : > { %6229 = vadd.xlane.f32.xlu0 %v6140_v40  ;;  %v5879_v40 = vpop.xlane.xlu0 %5878 }
 0x717   : > { %v14759_v37 = vpop.xlane.xlu1 %5908  ;;  %v6001_v21 = vmul.f32 0.0078125, %v5879_v40  ;;  %v14791_v40 = vsub.f32 %v17196_v6, %v6002_v13 }
 0x719   : > { %v14783_v7 = vsub.f32 %v17127_v0, %v6001_v21  ;;  %17253 = vst [vmem:[#allocation78_spill] sm:$0xff] %v14791_v40  ;;  %v6004_v21 = vmul.f32 0.0078125, %v14715_v52  ;;  %v6146_v6 = vmul.f32 %v14791_v40, %v14791_v40 }
 0x71a   : > { %6231 = vadd.xlane.f32.xlu0 %v6141_v58  ;;  %v6143_v58 = vmul.f32 %v14769_v25, %v14769_v25  ;;  %v5883_v45 = vpop.xlane.xlu0 %5882 }
 0x71b   : > { %v14766_v38 = vpop.xlane.xlu1 %5912  ;;  %17252 = vst [vmem:[#allocation82_spill] sm:$0xff] %v14783_v7  ;;  %v6003_v1 = vmul.f32 0.0078125, %v5883_v45  ;;  %v6145_v25 = vmul.f32 %v14783_v7, %v14783_v7  ;;  %v14818_v45 = vsub.f32 %v17197_v51, %v6004_v21 }
 0x71d   : > { %17257 = vst [vmem:[#allocation85_spill] sm:$0xff] %v14818_v45 }
 0x71e   : > { %6233 = vadd.xlane.f32.xlu0 %v6142_v32  ;;  %v6144_v32 = vmul.f32 %v14776_v53, %v14776_v53  ;;  %v5887_v0 = vpop.xlane.xlu0 %5886 }
 0x71f   : > { %v14773_v11 = vpop.xlane.xlu1 %6195 }
 0x722   : > { %6235 = vadd.xlane.f32.xlu0 %v6143_v58  ;;  %v4401_v58 = vstv %s4400_s17  ;;  %s7103_s17 = sshll.u32 %s297_s23, 4  ;;  %s16014_s17 = int_to_ptr.vmem [resolvable:$true] %s7103_s17 }
 0x723   : > { %v14780_v61 = vpop.xlane.xlu1 %5916  ;;  %vm14796_vm9 = vcmp.eq.s32.totalorder %v4401_v58, 1  ;;  %s8508_s22 = scalar_lea.vmem %s16014_s17, 16  ;;  %p8515_p1 = scmp.lt.s32.totalorder %s16014_s17, %s8513_s24 }
 0x724   : > { %v14810_v13 = vsel %vm14796_vm9, 1.0, %v14228_v29  ;;  %v14815_v52 = vsel %vm14796_vm9, 1.0, %v14223_v18  ;;  %v14831_v18 = vsel %vm14796_vm9, 1.0, %v14234_v23  ;;  %v6012_v23 = vmul.f32 0.0078125, %v14747_v27  ;;  %p8509_p12 = scmp.ne.s32.totalorder %s16014_s17, %s8508_s22  ;;  %p8516_p2 = scmp.lt.s32.totalorder %s8514_s25, %s8508_s22 }
 0x725   : > { %v6934_v29 = vsel %vm4246_vm6, %v14810_v13, 0.0  ;;  %v6935_v40 = vsel %vm4246_vm6, %v14815_v52, 0.0 }
 0x726   : > { %6237 = vadd.xlane.f32.xlu0 %v6144_v32  ;;  %v14803_v32 = vsub.f32 %v17130_v36, %v6003_v1  ;;  %v5891_v1 = vpop.xlane.xlu0 %5890  ;;  %v6936_v7 = vadd.f32 %v6935_v40, %v6934_v29  ;;  %v6016_v40 = vmul.f32 0.0078125, %v14759_v37  ;;  %v14880_v37 = vsel %vm14796_vm9, 1.0, %v14256_v55  ;;  %p8510_p13 = pnand %p8509_p12, %p8660_p5  ;;  %p8517_p3 = por %p8516_p2, %p8515_p1 }
 0x727   : > { %v14788_v57 = vpop.xlane.xlu1 %5918  ;;  %v6007_v27 = vmul.f32 0.0078125, %v5891_v1 }
 0x728   : > { %17256 = vst [vmem:[#allocation81_spill] sm:$0xff] %v14803_v32  ;;  %v6147_v58 = vmul.f32 %v14803_v32, %v14803_v32  ;;  %v14844_v32 = vsel %vm14796_vm9, 1.0, %v14239_v17  ;;  %v14858_v17 = vsub.f32 %v17202_v24, %v6014_v16  ;;  %v14873_v24 = vsel %vm14796_vm9, 1.0, %v14250_v4  ;;  %p8511_p0 = pneg %p8510_p13 }
 0x729   : > { %v6939_v8 = vsel %vm4246_vm6, %v14844_v32, 0.0  ;;  %v6943_v55 = vsel %vm4246_vm6, %v14873_v24, 0.0 }
 0x72a   : > { %6239 = vadd.xlane.f32.xlu0 %v6145_v25  ;;  %v6005_v25 = vmul.f32 0.0078125, %v5887_v0  ;;  %v6006_v0 = vmul.f32 0.0078125, %v14723_v59  ;;  %v6937_v59 = vsel %vm4246_vm6, %v14831_v18, 0.0  ;;  %17260 = vst [vmem:[#allocation87_spill] sm:$0xff] %v14858_v17  ;;  %v6158_v4 = vmul.f32 %v14858_v17, %v14858_v17  ;;  %p8518_p4 = pnand %p8517_p3, %p8511_p0 }
 0x72b   : > { %v14800_v53 = vpop.xlane.xlu1 %5920 }
 0x72c   : > { %v14834_v51 = vsub.f32 %v17133_v34, %v6005_v25  ;;  %v14850_v34 = vsel %vm14796_vm9, 1.0, %v14245_v5  ;;  %v5895_v25 = vpop.xlane.xlu0 %5894 }
 0x72d   : > { %v6941_v1 = vsel %vm4246_vm6, %v14850_v34, 0.0 }
 0x72e   : > { %6241 = vadd.xlane.f32.xlu0 %v6146_v6  ;;  %17258 = vst [vmem:[#allocation88_spill] sm:$0xff] %v14834_v51  ;;  %v6148_v6 = vmul.f32 %v14818_v45, %v14818_v45  ;;  %v14855_v45 = vsub.f32 %v17201_v28, %v6012_v23  ;;  %v6149_v29 = vmul.f32 %v14834_v51, %v14834_v51 }
 0x72f   : > { %v14820_v36 = vpop.xlane.xlu1 %5922  ;;  %v14891_v23 = vsub.f32 %v17136_v19, %v6007_v27  ;;  %v14906_v19 = vsel %vm14796_vm9, 1.0, %v14267_v44  ;;  %v6945_v27 = vsel %vm4246_vm6, %v14880_v37, 0.0 }
 0x730   : > { %17259 = vst [vmem:[#allocation84_spill] sm:$0xff] %v14855_v45  ;;  %v6156_v16 = vmul.f32 %v14855_v45, %v14855_v45  ;;  %v17278_v45 = vld [vmem:[#allocation120_spill] sm:$0xff] }
 0x731   : > { %17263 = vst [vmem:[#allocation90_spill] sm:$0xff] %v14891_v23 }
 0x732   : > { %6243 = vadd.xlane.f32.xlu0 %v6147_v58  ;;  %v6938_v58 = vadd.f32 %v6937_v59, %v6936_v7  ;;  %v14868_v7 = vsub.f32 %v17198_v46, %v6006_v0  ;;  %6261 = vadd.xlane.f32.xlu1 %v6156_v16  ;;  %v14885_v46 = vsub.f32 %v17203_v54, %v6016_v40  ;;  %v6018_v0 = vmul.f32 0.0078125, %v14766_v38 }
 0x733   : > { %v14837_v21 = vpop.xlane.xlu1 %5924  ;;  %v14899_v54 = vsel %vm14796_vm9, 1.0, %v14261_v26  ;;  %v6009_v16 = vmul.f32 0.0078125, %v5895_v25  ;;  %v6949_v25 = vsel %vm4246_vm6, %v14906_v19, 0.0 }
 0x734   : > { %17261 = vst [vmem:[#allocation5_spill] sm:$0xff] %v14868_v7  ;;  %v6940_v28 = vadd.f32 %v6939_v8, %v6938_v58  ;;  %17262 = vst [vmem:[#allocation8_spill] sm:$0xff] %v14885_v46  ;;  %v5899_v58 = vpop.xlane.xlu0 %5898  ;;  %v6008_v8 = vmul.f32 0.0078125, %v14731_v15  ;;  %v6150_v38 = vmul.f32 %v14868_v7, %v14868_v7  ;;  %v14911_v15 = vsub.f32 %v17205_v42, %v6018_v0 }
 0x735   : > { %v6160_v26 = vmul.f32 %v14885_v46, %v14885_v46  ;;  %v14926_v42 = vsel %vm14796_vm9, 1.0, %v14272_v22  ;;  %v6151_v0 = vmul.f32 %v14891_v23, %v14891_v23 }
 0x736   : > { %6245 = vadd.xlane.f32.xlu0 %v6148_v6  ;;  %v6942_v6 = vadd.f32 %v6941_v1, %v6940_v28  ;;  %6265 = vadd.xlane.f32.xlu1 %v6158_v4  ;;  %17264 = vst [vmem:[#allocation7_spill] sm:$0xff] %v14911_v15  ;;  %v6020_v28 = vmul.f32 0.0078125, %v14780_v61  ;;  %v6947_v1 = vsel %vm4246_vm6, %v14899_v54, 0.0  ;;  %v14933_v61 = vsel %vm14796_vm9, 1.0, %v14278_v14 }
 0x737   : > { %v14863_v5 = vpop.xlane.xlu1 %5926  ;;  %v6951_v14 = vsel %vm4246_vm6, %v14926_v42, 0.0 }
 0x738   : > { %v6944_v40 = vadd.f32 %v6943_v55, %v6942_v6  ;;  %v14921_v6 = vsub.f32 %v17199_v43, %v6008_v8  ;;  %v5903_v55 = vpop.xlane.xlu0 %5902  ;;  %v6162_v8 = vmul.f32 %v14911_v15, %v14911_v15  ;;  %v14940_v22 = vsub.f32 %v17206_v47, %v6020_v28  ;;  %v17274_v15 = vld [vmem:[#allocation18_spill] sm:$0xff] }
 0x739   : > { %v6013_v17 = vmul.f32 0.0078125, %v5903_v55 }
 0x73a   : > { %6247 = vadd.xlane.f32.xlu0 %v6149_v29  ;;  %v6946_v29 = vadd.f32 %v6945_v27, %v6944_v40  ;;  %17265 = vst [vmem:[#allocation9_spill] sm:$0xff] %v14921_v6  ;;  %6269 = vadd.xlane.f32.xlu1 %v6160_v26  ;;  %17266 = vst [vmem:[#allocation6_spill] sm:$0xff] %v14940_v22  ;;  %v6022_v40 = vmul.f32 0.0078125, %v14800_v53  ;;  %v6010_v26 = vmul.f32 0.0078125, %v14739_v20  ;;  %v6953_v53 = vsel %vm4246_vm6, %v14933_v61, 0.0 }
 0x73b   : > { %v5929_v59 = vpop.xlane.xlu1 %5928  ;;  %v6152_v47 = vmul.f32 %v14921_v6, %v14921_v6  ;;  %v6024_v20 = vmul.f32 0.0078125, %v14837_v21 }
 0x73c   : > { %v6948_v4 = vadd.f32 %v6947_v1, %v6946_v29  ;;  %v14951_v29 = vsel %vm14796_vm9, 1.0, %v14283_v48  ;;  %v6164_v48 = vmul.f32 %v14940_v22, %v14940_v22 }
 0x73e   : > { %6249 = vadd.xlane.f32.xlu0 %v6150_v38  ;;  %v6950_v43 = vadd.f32 %v6949_v25, %v6948_v4  ;;  %v14944_v38 = vsub.f32 %v17139_v50, %v6009_v16  ;;  %v14959_v50 = vsel %vm14796_vm9, 1.0, %v14289_v62  ;;  %6273 = vadd.xlane.f32.xlu1 %v6162_v8  ;;  %v17268_v16 = vld [vmem:[#allocation15_spill] sm:$0xff]  ;;  %v6955_v25 = vsel %vm4246_vm6, %v14951_v29, 0.0 }
 0x73f   : > { %v14918_v44 = vpop.xlane.xlu1 %5930  ;;  %v14966_v4 = vsub.f32 %v17268_v16, %v6022_v40  ;;  %v6957_v16 = vsel %vm4246_vm6, %v14959_v50, 0.0 }
 0x740   : > { %17267 = vst [vmem:[#allocation93_spill] sm:$0xff] %v14944_v38  ;;  %v6952_v1 = vadd.f32 %v6951_v14, %v6950_v43  ;;  %v5907_v43 = vpop.xlane.xlu0 %5906  ;;  %v17270_v14 = vld [vmem:[#allocation116_spill] sm:$0xff]  ;;  %v6153_v21 = vmul.f32 %v14944_v38, %v14944_v38 }
 0x741   : > { %17269 = vst [vmem:[#allocation11_spill] sm:$0xff] %v14966_v4  ;;  %v14976_v8 = vsel %vm14796_vm9, 1.0, %v17270_v14  ;;  %v6166_v14 = vmul.f32 %v14966_v4, %v14966_v4 }
 0x742   : > { %6251 = vadd.xlane.f32.xlu0 %v6151_v0  ;;  %v6954_v28 = vadd.f32 %v6953_v53, %v6952_v1  ;;  %v6011_v0 = vmul.f32 0.0078125, %v5899_v58  ;;  %v17271_v1 = vld [vmem:[#allocation74_spill] sm:$0xff]  ;;  %6277 = vadd.xlane.f32.xlu1 %v6164_v48  ;;  %v15003_v48 = vsel %vm14796_vm9, 1.0, %v17278_v45 }
 0x743   : > { %v5933_v27 = vpop.xlane.xlu1 %5932  ;;  %v14979_v53 = vsub.f32 %v17271_v1, %v6010_v26  ;;  %v14993_v26 = vsub.f32 %v17274_v15, %v6024_v20  ;;  %v17279_v20 = vld [vmem:[#allocation122_spill] sm:$0xff] }
 0x744   : > { %v6956_v40 = vadd.f32 %v6955_v25, %v6954_v28  ;;  %v6026_v28 = vmul.f32 0.0078125, %v5929_v59  ;;  %v17276_v25 = vld [vmem:[#allocation162_spill] sm:$0xff]  ;;  %v15010_v59 = vsel %vm14796_vm9, 1.0, %v17279_v20 }
 0x745   : > { %17272 = vst [vmem:[#allocation10_spill] sm:$0xff] %v14979_v53  ;;  %17275 = vst [vmem:[#allocation13_spill] sm:$0xff] %v14993_v26  ;;  %v14996_v1 = vsub.f32 %v17276_v25, %v6011_v0  ;;  %v6154_v15 = vmul.f32 %v14979_v53, %v14979_v53  ;;  %v6168_v55 = vmul.f32 %v14993_v26, %v14993_v26  ;;  %v17280_v45 = vld [vmem:[#allocation42_spill] sm:$0xff]  ;;  %v17282_v53 = vld [vmem:[#allocation163_spill] sm:$0xff] }
 0x746   : > { %6253 = vadd.xlane.f32.xlu0 %v6152_v47  ;;  %v17273_v47 = vld [vmem:[#allocation118_spill] sm:$0xff]  ;;  %v6958_v22 = vadd.f32 %v6957_v16, %v6956_v40  ;;  %6281 = vadd.xlane.f32.xlu1 %v6166_v14  ;;  %v15017_v25 = vsub.f32 %v17280_v45, %v6026_v28  ;;  %v15026_v38 = vsub.f32 %v17282_v53, %v6013_v17  ;;  %v6015_v14 = vmul.f32 0.0078125, %v5907_v43  ;;  %v17288_v43 = vld [vmem:[#allocation44_spill] sm:$0xff] }
 0x747   : > { %v14971_v62 = vpop.xlane.xlu1 %5934  ;;  %v14986_v58 = vsel %vm14796_vm9, 1.0, %v17273_v47  ;;  %17277 = vst [vmem:[#allocation96_spill] sm:$0xff] %v14996_v1  ;;  %v6959_v47 = vsel %vm4246_vm6, %v14976_v8, 0.0  ;;  %v6155_v20 = vmul.f32 %v14996_v1, %v14996_v1  ;;  %v6965_v45 = vsel %vm4246_vm6, %v15010_v59, 0.0 }
 0x748   : > { %v6960_v40 = vadd.f32 %v6959_v47, %v6958_v22  ;;  %v6961_v0 = vsel %vm4246_vm6, %v14986_v58, 0.0  ;;  %17281 = vst [vmem:[#allocation12_spill] sm:$0xff] %v15017_v25  ;;  %v6028_v22 = vmul.f32 0.0078125, %v5933_v27  ;;  %v6963_v47 = vsel %vm4246_vm6, %v15003_v48, 0.0  ;;  %17283 = vst [vmem:[#allocation14_spill] sm:$0xff] %v15026_v38  ;;  %v17286_v27 = vld [vmem:[#allocation126_spill] sm:$0xff] }
 0x749   : > { %v6170_v17 = vmul.f32 %v15017_v25, %v15017_v25 }
 0x74a   : > { %6255 = vadd.xlane.f32.xlu0 %v6153_v21  ;;  %v5911_v21 = vpop.xlane.xlu0 %5910  ;;  %v6962_v16 = vadd.f32 %v6961_v0, %v6960_v40  ;;  %v17284_v40 = vld [vmem:[#allocation124_spill] sm:$0xff]  ;;  %6285 = vadd.xlane.f32.xlu1 %v6168_v55  ;;  %v15043_v53 = vsub.f32 %v17288_v43, %v6028_v22  ;;  %v17294_v22 = vld [vmem:[#allocation131_spill] sm:$0xff] }
 0x74b   : > { %v5937_v46 = vpop.xlane.xlu1 %5936  ;;  %v15031_v0 = vsel %vm14796_vm9, 1.0, %v17284_v40  ;;  %v6017_v40 = vmul.f32 0.0078125, %v5911_v21 }
 0x74c   : > { %17285 = vst [vmem:[#allocation16_spill] sm:$0xff] %v15031_v0  ;;  %v6964_v28 = vadd.f32 %v6963_v47, %v6962_v16  ;;  %17289 = vst [vmem:[#allocation37_spill] sm:$0xff] %v15043_v53  ;;  %v6030_v1 = vmul.f32 0.0078125, %v5937_v46  ;;  %v6967_v16 = vsel %vm4246_vm6, %v15031_v0, 0.0  ;;  %v6157_v46 = vmul.f32 %v15026_v38, %v15026_v38  ;;  %v17350_v0 = vld [vmem:[#allocation130_spill] sm:$0xff] }
 0x74d   : > { %v6172_v43 = vmul.f32 %v15043_v53, %v15043_v53 }
 0x74e   : > { %6257 = vadd.xlane.f32.xlu0 %v6154_v15  ;;  %v15036_v15 = vsel %vm14796_vm9, 1.0, %v17286_v27  ;;  %v6966_v26 = vadd.f32 %v6965_v45, %v6964_v28  ;;  %v17290_v27 = vld [vmem:[#allocation164_spill] sm:$0xff]  ;;  %v5915_v23 = vpop.xlane.xlu0 %5914  ;;  %6289 = vadd.xlane.f32.xlu1 %v6170_v17 }
 0x74f   : > { %v15021_v4 = vpop.xlane.xlu1 %5938  ;;  %17287 = vst [vmem:[#allocation36_spill] sm:$0xff] %v15036_v15  ;;  %v15050_v6 = vsub.f32 %v17290_v27, %v6015_v14  ;;  %v17292_v28 = vld [vmem:[#allocation128_spill] sm:$0xff]  ;;  %v6969_v21 = vsel %vm4246_vm6, %v15036_v15, 0.0  ;;  %v17296_v27 = vld [vmem:[#allocation29_spill] sm:$0xff]  ;;  %v6019_v25 = vmul.f32 0.0078125, %v5915_v23  ;;  %v17302_v23 = vld [vmem:[#allocation47_spill] sm:$0xff] }
 0x750   : > { %v15055_v55 = vsel %vm14796_vm9, 1.0, %v17292_v28  ;;  %v6968_v45 = vadd.f32 %v6967_v16, %v6966_v26  ;;  %v15069_v28 = vsub.f32 %v17296_v27, %v6030_v1  ;;  %v17298_v26 = vld [vmem:[#allocation165_spill] sm:$0xff]  ;;  %v17348_v15 = vld [vmem:[#allocation32_spill] sm:$0xff] }
 0x751   : > { %17291 = vst [vmem:[#allocation39_spill] sm:$0xff] %v15050_v6  ;;  %17293 = vst [vmem:[#allocation40_spill] sm:$0xff] %v15055_v55  ;;  %v15072_v16 = vsub.f32 %v17298_v26, %v6017_v40  ;;  %v6971_v38 = vsel %vm4246_vm6, %v15055_v55, 0.0  ;;  %v6159_v1 = vmul.f32 %v15050_v6, %v15050_v6  ;;  %v17306_v6 = vld [vmem:[#allocation33_spill] sm:$0xff] }
 0x752   : > { %6259 = vadd.xlane.f32.xlu0 %v6155_v20  ;;  %v15064_v20 = vsel %vm14796_vm9, 1.0, %v17294_v22  ;;  %v6970_v14 = vadd.f32 %v6969_v21, %v6968_v45  ;;  %17297 = vst [vmem:[#allocation19_spill] sm:$0xff] %v15069_v28  ;;  %v17300_v22 = vld [vmem:[#allocation50_spill] sm:$0xff]  ;;  %v6339_v45 = vmul.f32 0.0078125, %v14773_v11  ;;  %6293 = vadd.xlane.f32.xlu1 %v6172_v43  ;;  %v6174_v26 = vmul.f32 %v15069_v28, %v15069_v28 }
 0x753   : > { %v15047_v47 = vpop.xlane.xlu1 %5940  ;;  %17295 = vst [vmem:[#allocation38_spill] sm:$0xff] %v15064_v20  ;;  %17299 = vst [vmem:[#allocation41_spill] sm:$0xff] %v15072_v16  ;;  %v15081_v17 = vsel %vm14796_vm9, 1.0, %v17300_v22  ;;  %v6973_v40 = vsel %vm4246_vm6, %v15064_v20, 0.0  ;;  %v17304_v22 = vld [vmem:[#allocation166_spill] sm:$0xff]  ;;  %v6161_v53 = vmul.f32 %v15072_v16, %v15072_v16 }
 0x754   : > { %17301 = vst [vmem:[#allocation23_spill] sm:$0xff] %v15081_v17  ;;  %v6972_v21 = vadd.f32 %v6971_v38, %v6970_v14  ;;  %v15096_v11 = vsub.f32 %v17304_v22, %v6019_v25  ;;  %v6975_v38 = vsel %vm4246_vm6, %v15081_v17, 0.0  ;;  %v6411_v43 = vadd.f32 1e-06, %v6339_v45  ;;  %v17310_v16 = vld [vmem:[#allocation102_spill] sm:$0xff]  ;;  %v17322_v17 = vld [vmem:[#allocation111_spill] sm:$0xff] }
 0x756   : > { %6263 = vadd.xlane.f32.xlu0 %v6157_v46  ;;  %v15091_v46 = vsel %vm14796_vm9, 1.0, %v17302_v23  ;;  %v6974_v27 = vadd.f32 %v6973_v40, %v6972_v21  ;;  %17305 = vst [vmem:[#allocation22_spill] sm:$0xff] %v15096_v11  ;;  %v15107_v21 = vsel %vm14796_vm9, 1.0, %v17306_v6  ;;  %v6021_v40 = vmul.f32 0.0078125, %v14788_v57  ;;  %v17308_v23 = vld [vmem:[#allocation99_spill] sm:$0xff]  ;;  %6297 = vadd.xlane.f32.xlu1 %v6174_v26 }
 0x757   : > { %v15076_v7 = vpop.xlane.xlu1 %5942  ;;  %17303 = vst [vmem:[#allocation21_spill] sm:$0xff] %v15091_v46  ;;  %17307 = vst [vmem:[#allocation25_spill] sm:$0xff] %v15107_v21  ;;  %v6977_v25 = vsel %vm4246_vm6, %v15091_v46, 0.0  ;;  %v15115_v22 = vsel %vm14796_vm9, 1.0, %v17308_v23  ;;  %v15120_v6 = vsel %vm14796_vm9, 1.0, %v17310_v16  ;;  %v6979_v57 = vsel %vm4246_vm6, %v15107_v21, 0.0 }
 0x758   : > { %17309 = vst [vmem:[#allocation26_spill] sm:$0xff] %v15115_v22  ;;  %17311 = vst [vmem:[#allocation24_spill] sm:$0xff] %v15120_v6  ;;  %8358 = vrsqrt.f32 %v6411_v43  ;;  %v6981_v26 = vsel %vm4246_vm6, %v15115_v22, 0.0  ;;  %v17314_v16 = vld [vmem:[#allocation105_spill] sm:$0xff]  ;;  %v17316_v46 = vld [vmem:[#allocation107_spill] sm:$0xff] }
 0x759   : > { %v15142_v43 = vsel %vm14796_vm9, 1.0, %v17316_v46 }
 0x75a   : > { %6267 = vadd.xlane.f32.xlu0 %v6159_v1  ;;  %v6976_v1 = vadd.f32 %v6975_v38, %v6974_v27  ;;  %v6163_v27 = vmul.f32 %v15096_v11, %v15096_v11  ;;  %v17312_v38 = vld [vmem:[#allocation167_spill] sm:$0xff]  ;;  %17317 = vst [vmem:[#allocation46_spill] sm:$0xff] %v15142_v43  ;;  %v17318_v11 = vld [vmem:[#allocation168_spill] sm:$0xff] }
 0x75b   : > { %v15100_v14 = vpop.xlane.xlu1 %5944  ;;  %v15129_v23 = vsub.f32 %v17312_v38, %v6021_v40 }
 0x75c   : > { %v6978_v28 = vadd.f32 %v6977_v25, %v6976_v1  ;;  %v15137_v25 = vsel %vm14796_vm9, 1.0, %v17314_v16 }
 0x75d   : > { %17313 = vst [vmem:[#allocation45_spill] sm:$0xff] %v15129_v23  ;;  %17315 = vst [vmem:[#allocation28_spill] sm:$0xff] %v15137_v25  ;;  %v6985_v46 = vsel %vm4246_vm6, %v15137_v25, 0.0 }
 0x75e   : > { %6271 = vadd.xlane.f32.xlu0 %v6161_v53  ;;  %v6980_v1 = vadd.f32 %v6979_v57, %v6978_v28  ;;  %v6023_v53 = vmul.f32 0.0078125, %v14820_v36  ;;  %v6983_v28 = vsel %vm4246_vm6, %v15120_v6, 0.0  ;;  %v6025_v36 = vmul.f32 0.0078125, %v14863_v5 }
 0x75f   : > { %v15124_v45 = vpop.xlane.xlu1 %5946 }
 0x760   : > { %v6982_v21 = vadd.f32 %v6981_v26, %v6980_v1  ;;  %v15150_v22 = vsub.f32 %v17318_v11, %v6023_v53  ;;  %v17320_v1 = vld [vmem:[#allocation109_spill] sm:$0xff]  ;;  %v15164_v11 = vsel %vm14796_vm9, 1.0, %v17322_v17 }
 0x761   : > { %v15159_v26 = vsel %vm14796_vm9, 1.0, %v17320_v1  ;;  %17323 = vst [vmem:[#allocation136_spill] sm:$0xff] %v15164_v11  ;;  %v17324_v53 = vld [vmem:[#allocation169_spill] sm:$0xff] }
 0x762   : > { %6275 = vadd.xlane.f32.xlu0 %v6163_v27  ;;  %v6984_v38 = vadd.f32 %v6983_v28, %v6982_v21  ;;  %17319 = vst [vmem:[#allocation52_spill] sm:$0xff] %v15150_v22  ;;  %v6165_v27 = vmul.f32 %v15129_v23, %v15129_v23  ;;  %17321 = vst [vmem:[#allocation53_spill] sm:$0xff] %v15159_v26  ;;  %v6987_v21 = vsel %vm4246_vm6, %v15142_v43, 0.0  ;;  %v6989_v17 = vsel %vm4246_vm6, %v15159_v26, 0.0  ;;  %v17328_v43 = vld [vmem:[#allocation115_spill] sm:$0xff] }
 0x763   : > { %v15147_v40 = vpop.xlane.xlu1 %5948  ;;  %v6198_v57 = vpop.xlane.xlu0 %6197  ;;  %v15169_v28 = vsub.f32 %v17324_v53, %v6025_v36 }
 0x764   : > { %v6340_v16 = vmul.f32 0.0078125, %v6198_v57  ;;  %v6986_v5 = vadd.f32 %v6985_v46, %v6984_v38  ;;  %v6027_v57 = vmul.f32 0.0078125, %v14918_v44  ;;  %v17326_v46 = vld [vmem:[#allocation113_spill] sm:$0xff] }
 0x765   : > { %17325 = vst [vmem:[#allocation138_spill] sm:$0xff] %v15169_v28  ;;  %v15181_v36 = vsel %vm14796_vm9, 1.0, %v17326_v46  ;;  %v6169_v46 = vmul.f32 %v15169_v28, %v15169_v28 }
 0x766   : > { %v6412_v6 = vadd.f32 1e-06, %v6340_v16  ;;  %6279 = vadd.xlane.f32.xlu0 %v6165_v27  ;;  %v6988_v25 = vadd.f32 %v6987_v21, %v6986_v5  ;;  %v6167_v16 = vmul.f32 %v15150_v22, %v15150_v22  ;;  %v8359_v27 = vpop.eup %8358  ;;  %17327 = vst [vmem:[#allocation140_spill] sm:$0xff] %v15181_v36  ;;  %v6991_v5 = vsel %vm4246_vm6, %v15164_v11, 0.0  ;;  %v17330_v21 = vld [vmem:[#allocation170_spill] sm:$0xff]  ;;  %v17333_v11 = vld [vmem:[#allocation117_spill] sm:$0xff] }
 0x767   : > { %v15172_v23 = vpop.xlane.xlu1 %5950  ;;  %v6200_v1 = vpop.xlane.xlu0 %6199 }
 0x768   : > { %8360 = vrsqrt.f32 %v6412_v6  ;;  %v6341_v38 = vmul.f32 0.0078125, %v6200_v1  ;;  %v6990_v53 = vadd.f32 %v6989_v17, %v6988_v25  ;;  %v15186_v6 = vsel %vm14796_vm9, 1.0, %v17328_v43  ;;  %v17332_v17 = vld [vmem:[#allocation100_spill] sm:$0xff] }
 0x769   : > { %17329 = vst [vmem:[#allocation142_spill] sm:$0xff] %v15186_v6  ;;  %v15191_v1 = vsub.f32 %v17330_v21, %v6027_v57  ;;  %v6993_v43 = vsel %vm4246_vm6, %v15181_v36, 0.0  ;;  %v6555_v51 = vmul.f32 %v8359_v27, %v17332_v17  ;;  %v15204_v57 = vsel %vm14796_vm9, 1.0, %v17333_v11  ;;  %v15209_v21 = vld [vmem:[%s16060_s6] ss:$0 sm:$0xff]  ;;  %v17337_v36 = vld [vmem:[#allocation171_spill] sm:$0xff] }
 0x76a   : > { %v6413_v44 = vadd.f32 1e-06, %v6341_v38  ;;  %6283 = vadd.xlane.f32.xlu0 %v6167_v16  ;;  %v6992_v25 = vadd.f32 %v6991_v5, %v6990_v53  ;;  %v6029_v38 = vmul.f32 0.0078125, %v14971_v62  ;;  %17334 = vst [vmem:[#allocation147_spill] sm:$0xff] %v15204_v57  ;;  %v17335_v62 = vld [vmem:[#allocation119_spill] sm:$0xff]  ;;  %v6995_v27 = vsel %vm4246_vm6, %v15186_v6, 0.0 }
 0x76b   : > { %17331 = vst [vmem:[#allocation144_spill] sm:$0xff] %v15191_v1  ;;  %v15193_v22 = vpop.xlane.xlu1 %5952  ;;  %v6202_v26 = vpop.xlane.xlu0 %6201  ;;  %v6171_v17 = vmul.f32 %v15191_v1, %v15191_v1  ;;  %v17339_v6 = vld [vmem:[#allocation121_spill] sm:$0xff] }
 0x76c   : > { %8362 = vrsqrt.f32 %v6413_v44  ;;  %v6342_v16 = vmul.f32 0.0078125, %v6202_v26  ;;  %v6994_v53 = vadd.f32 %v6993_v43, %v6992_v25  ;;  %v15214_v26 = vsel %vm14796_vm9, 1.0, %v17335_v62 }
 0x76d   : > { %17336 = vst [vmem:[#allocation150_spill] sm:$0xff] %v15214_v26  ;;  %v15225_v25 = vsub.f32 %v17337_v36, %v6029_v38  ;;  %v6634_v43 = vmul.f32 %v15209_v21, %v6555_v51  ;;  %v15234_v20 = vsel %vm14796_vm9, 1.0, %v17339_v6  ;;  %v6999_v51 = vsel %vm4246_vm6, %v15214_v26, 0.0  ;;  %v17345_v26 = vld [vmem:[#allocation125_spill] sm:$0xff] }
 0x76e   : > { %v6414_v5 = vadd.f32 1e-06, %v6342_v16  ;;  %6287 = vadd.xlane.f32.xlu0 %v6169_v46  ;;  %v6996_v28 = vadd.f32 %v6995_v27, %v6994_v53  ;;  %v6031_v46 = vmul.f32 0.0078125, %v15021_v4  ;;  %v6997_v16 = vsel %vm4246_vm6, %v15204_v57, 0.0  ;;  %17340 = vst [vmem:[#allocation156_spill] sm:$0xff] %v15234_v20  ;;  %v17341_v4 = vld [vmem:[#allocation123_spill] sm:$0xff] }
 0x76f   : > { %v15218_v44 = vpop.xlane.xlu1 %5954  ;;  %v15220_v11 = vpop.xlane.xlu0 %6203  ;;  %17338 = vst [vmem:[#allocation153_spill] sm:$0xff] %v15225_v25  ;;  %v15239_v53 = vld [vmem:[%s16061_s7] ss:$0 sm:$0xff]  ;;  %v15244_v38 = vsel %vm14796_vm9, 1.0, %v17341_v4 }
 0x770   : > { %8364 = vrsqrt.f32 %v6414_v5  ;;  %v6998_v36 = vadd.f32 %v6997_v16, %v6996_v28  ;;  %17342 = vst [vmem:[#allocation157_spill] sm:$0xff] %v15244_v38  ;;  %v17343_v57 = vld [vmem:[#allocation172_spill] sm:$0xff]  ;;  %v6032_v28 = vmul.f32 0.0078125, %v15047_v47  ;;  %v7001_v16 = vsel %vm4246_vm6, %v15234_v20, 0.0 }
 0x771   : > { %v15254_v55 = vsub.f32 %v17343_v57, %v6031_v46  ;;  %v6713_v4 = vadd.f32 %v15239_v53, %v6634_v43  ;;  %v17347_v46 = vld [vmem:[#allocation127_spill] sm:$0xff] }
 0x772   : > { %v8361_v62 = vpop.eup %8360  ;;  %6291 = vadd.xlane.f32.xlu0 %v6171_v17  ;;  %v7000_v1 = vadd.f32 %v6999_v51, %v6998_v36  ;;  %v6173_v17 = vmul.f32 %v15225_v25, %v15225_v25  ;;  %v15266_v36 = vsel %vm14796_vm9, 1.0, %v17345_v26  ;;  %v15271_v47 = vsel %vm14796_vm9, 1.0, %v17347_v46 }
 0x773   : > { %v6556_v5 = vmul.f32 %v8361_v62, %v14644_v31  ;;  %v15249_v27 = vpop.xlane.xlu1 %5956  ;;  %v15251_v6 = vpop.xlane.xlu0 %6205  ;;  %17344 = vst [vmem:[#allocation158_spill] sm:$0xff] %v15254_v55  ;;  %17346 = vst [vmem:[#allocation159_spill] sm:$0xff] %v15266_v36  ;;  %v7003_v51 = vsel %vm4246_vm6, %v15244_v38, 0.0  ;;  %v7005_v46 = vsel %vm4246_vm6, %v15266_v36, 0.0 }
 0x774   : > { %v7002_v57 = vadd.f32 %v7001_v16, %v7000_v1  ;;  %v15282_v1 = vsub.f32 %v17348_v15, %v6032_v28  ;;  %v6175_v16 = vmul.f32 %v15254_v55, %v15254_v55  ;;  %v15295_v15 = vsel %vm14796_vm9, 1.0, %v17350_v0  ;;  %v17351_v28 = vld [vmem:[#allocation51_spill] sm:$0xff]  ;;  %v17353_v55 = vld [vmem:[#allocation101_spill] sm:$0xff] }
 0x775   : > { %v6635_v31 = vmul.f32 %v15209_v21, %v6556_v5 }
 0x776   : > { %v8363_v62 = vpop.eup %8362  ;;  %6295 = vadd.xlane.f32.xlu0 %v6173_v17  ;;  %v7004_v26 = vadd.f32 %v7003_v51, %v7002_v57  ;;  %17349 = vst [vmem:[#allocation160_spill] sm:$0xff] %v15282_v1  ;;  %v6034_v17 = vmul.f32 0.0078125, %v15100_v14  ;;  %v15300_v14 = vsel %vm14796_vm9, 1.0, %v17351_v28  ;;  %v6036_v28 = vmul.f32 0.0078125, %v15147_v40 }
 0x777   : > { %v6714_v43 = vadd.f32 %v15239_v53, %v6635_v31  ;;  %v6557_v5 = vmul.f32 %v8363_v62, %v14648_v3  ;;  %v15277_v25 = vpop.xlane.xlu1 %5958  ;;  %v15279_v20 = vpop.xlane.xlu0 %6207  ;;  %v6785_v31 = vmul.f32 %v6713_v4, %v14810_v13  ;;  %17352 = vst [vmem:[#allocation161_spill] sm:$0xff] %v15300_v14  ;;  %v7007_v13 = vsel %vm4246_vm6, %v15271_v47, 0.0 }
 0x778   : > { %v7006_v57 = vadd.f32 %v7005_v46, %v7004_v26  ;;  %v15309_v36 = vsub.f32 %v17353_v55, %v6034_v17  ;;  %v6176_v26 = vmul.f32 %v15282_v1, %v15282_v1  ;;  %v17357_v55 = vld [vmem:[#allocation55_spill] sm:$0xff]  ;;  %v7011_v17 = vsel %vm4246_vm6, %v15300_v14, 0.0  ;;  %v17372_v1 = vld [vmem:[#allocation152_spill] sm:$0xff] }
 0x779   : > { %v6786_v3 = vmul.f32 %v6714_v43, %v14815_v52  ;;  %v6636_v62 = vmul.f32 %v15209_v21, %v6557_v5  ;;  %v15326_v40 = vsel %vm14796_vm9, 1.0, %v17357_v55 }
 0x77a   : > { %v8365_v38 = vpop.eup %8364  ;;  %6299 = vadd.xlane.f32.xlu0 %v6175_v16  ;;  %v7008_v0 = vadd.f32 %v7007_v13, %v7006_v57  ;;  %17354 = vst [vmem:[#allocation133_spill] sm:$0xff] %v15309_v36  ;;  %v7009_v16 = vsel %vm4246_vm6, %v15295_v15, 0.0  ;;  %17358 = vst [vmem:[#allocation135_spill] sm:$0xff] %v15326_v40 }
 0x77b   : > { %v6857_v4 = vadd.f32 %v6786_v3, %v6785_v31  ;;  %v6715_v52 = vadd.f32 %v15239_v53, %v6636_v62  ;;  %v6558_v51 = vmul.f32 %v8365_v38, %v14654_v2  ;;  %v5961_v43 = vpop.xlane.xlu1 %5960  ;;  %v15306_v5 = vpop.xlane.xlu0 %6209  ;;  %v17355_v2 = vld [vmem:[#allocation54_spill] sm:$0xff] }
 0x77c   : > { %v15321_v38 = vsel %vm14796_vm9, 1.0, %v17355_v2  ;;  %v7010_v3 = vadd.f32 %v7009_v16, %v7008_v0  ;;  %v6038_v0 = vmul.f32 0.0078125, %v15193_v22  ;;  %v7015_v22 = vsel %vm4246_vm6, %v15326_v40, 0.0  ;;  %v17417_v40 = vld [vmem:[#allocation49_spill] sm:$0xff] }
 0x77d   : > { %v6787_v46 = vmul.f32 %v6715_v52, %v14831_v18  ;;  %v6637_v31 = vmul.f32 %v15209_v21, %v6558_v51  ;;  %17356 = vst [vmem:[#allocation134_spill] sm:$0xff] %v15321_v38  ;;  %v15336_v51 = vsub.f32 %v17222_v63, %v6036_v28  ;;  %v7013_v16 = vsel %vm4246_vm6, %v15321_v38, 0.0 }
 0x77e   : > { %6301 = vadd.xlane.f32.xlu0 %v6176_v26  ;;  %v7012_v52 = vadd.f32 %v7011_v17, %v7010_v3  ;;  %v6178_v26 = vmul.f32 %v15309_v36, %v15309_v36  ;;  %v17362_v3 = vld [vmem:[#allocation57_spill] sm:$0xff]  ;;  %v6345_v38 = vmul.f32 0.0078125, %v15279_v20 }
 0x77f   : > { %v6858_v62 = vadd.f32 %v6857_v4, %v6787_v46  ;;  %v6716_v18 = vadd.f32 %v15239_v53, %v6637_v31  ;;  %v15331_v57 = vpop.xlane.xlu1 %5962  ;;  %v15333_v13 = vpop.xlane.xlu0 %6211  ;;  %17359 = vst [vmem:[#allocation137_spill] sm:$0xff] %v15336_v51  ;;  %v17360_v46 = vld [vmem:[#allocation56_spill] sm:$0xff]  ;;  %v15352_v63 = vsel %vm14796_vm9, 1.0, %v17362_v3  ;;  %v17367_v3 = vld [vmem:[#allocation146_spill] sm:$0xff] }
 0x780   : > { %v15347_v31 = vsel %vm14796_vm9, 1.0, %v17360_v46  ;;  %v7014_v2 = vadd.f32 %v7013_v16, %v7012_v52  ;;  %17363 = vst [vmem:[#allocation141_spill] sm:$0xff] %v15352_v63  ;;  %v6040_v52 = vmul.f32 0.0078125, %v15249_v27  ;;  %v17365_v46 = vld [vmem:[#allocation58_spill] sm:$0xff]  ;;  %v7019_v27 = vsel %vm4246_vm6, %v15352_v63, 0.0  ;;  %v17413_v63 = vld [vmem:[#allocation27_spill] sm:$0xff] }
 0x781   : > { %v6788_v4 = vmul.f32 %v6716_v18, %v14844_v32  ;;  %17361 = vst [vmem:[#allocation139_spill] sm:$0xff] %v15347_v31  ;;  %v15361_v18 = vsub.f32 %v17225_v9, %v6038_v0  ;;  %v7017_v16 = vsel %vm4246_vm6, %v15347_v31, 0.0  ;;  %v15376_v9 = vsel %vm14796_vm9, 1.0, %v17367_v3  ;;  %v17415_v31 = vld [vmem:[#allocation30_spill] sm:$0xff] }
 0x782   : > { %6305 = vadd.xlane.f32.xlu0 %v6178_v26  ;;  %v7016_v32 = vadd.f32 %v7015_v22, %v7014_v2  ;;  %v6180_v26 = vmul.f32 %v15336_v51, %v15336_v51  ;;  %17368 = vst [vmem:[#allocation148_spill] sm:$0xff] %v15376_v9  ;;  %v15385_v51 = vsub.f32 %v17229_v12, %v6040_v52  ;;  %v7023_v12 = vsel %vm4246_vm6, %v15376_v9, 0.0  ;;  %v17377_v9 = vld [vmem:[#allocation59_spill] sm:$0xff] }
 0x783   : > { %v15356_v28 = vadd.f32 %v6858_v62, %v6788_v4  ;;  %v5965_v55 = vpop.xlane.xlu1 %5964  ;;  %v15358_v17 = vpop.xlane.xlu0 %6213  ;;  %17364 = vst [vmem:[#allocation143_spill] sm:$0xff] %v15361_v18  ;;  %v15371_v62 = vsel %vm14796_vm9, 1.0, %v17365_v46  ;;  %v6042_v46 = vmul.f32 0.0078125, %v5961_v43  ;;  %v6417_v14 = vadd.f32 1e-06, %v6345_v38 }
 0x784   : > { %17366 = vst [vmem:[#allocation145_spill] sm:$0xff] %v15371_v62  ;;  %v7018_v4 = vadd.f32 %v7017_v16, %v7016_v32  ;;  %17369 = vst [vmem:[#allocation151_spill] sm:$0xff] %v15385_v51  ;;  %v6182_v32 = vmul.f32 %v15361_v18, %v15361_v18  ;;  %v17370_v16 = vld [vmem:[#allocation149_spill] sm:$0xff] }
 0x785   : > { %v15394_v3 = vsel %vm14796_vm9, 1.0, %v17370_v16  ;;  %v15406_v18 = vsub.f32 %v17232_v35, %v6042_v46 }
 0x786   : > { %6309 = vadd.xlane.f32.xlu0 %v6180_v26  ;;  %v7020_v22 = vadd.f32 %v7019_v27, %v7018_v4  ;;  %v7021_v26 = vsel %vm4246_vm6, %v15371_v62, 0.0  ;;  %17371 = vst [vmem:[#allocation154_spill] sm:$0xff] %v15394_v3  ;;  %v15399_v4 = vsel %vm14796_vm9, 1.0, %v17372_v1  ;;  %v6044_v62 = vmul.f32 0.0078125, %v5965_v55 }
 0x787   : > { %v15380_v0 = vpop.xlane.xlu1 %5966  ;;  %v15382_v2 = vpop.xlane.xlu0 %6215  ;;  %17373 = vst [vmem:[#allocation60_spill] sm:$0xff] %v15399_v4  ;;  %17374 = vst [vmem:[#allocation62_spill] sm:$0xff] %v15406_v18  ;;  %v7027_v35 = vsel %vm4246_vm6, %v15399_v4, 0.0 }
 0x788   : > { %v7022_v36 = vadd.f32 %v7021_v26, %v7020_v22  ;;  %v6184_v22 = vmul.f32 %v15385_v51, %v15385_v51  ;;  %v17375_v26 = vld [vmem:[#allocation155_spill] sm:$0xff]  ;;  %v15429_v51 = vsub.f32 %v17236_v10, %v6044_v62 }
 0x789   : > { %v15415_v1 = vsel %vm14796_vm9, 1.0, %v17375_v26 }
 0x78a   : > { %6313 = vadd.xlane.f32.xlu0 %v6182_v32  ;;  %v7024_v27 = vadd.f32 %v7023_v12, %v7022_v36  ;;  %v7025_v32 = vsel %vm4246_vm6, %v15394_v3, 0.0  ;;  %17376 = vst [vmem:[#allocation64_spill] sm:$0xff] %v15415_v1  ;;  %v15420_v36 = vsel %vm14796_vm9, 1.0, %v17377_v9  ;;  %17379 = vst [vmem:[#allocation80_spill] sm:$0xff] %v15429_v51  ;;  %v17380_v9 = vld [vmem:[#allocation61_spill] sm:$0xff]  ;;  %v17382_v3 = vld [vmem:[#allocation63_spill] sm:$0xff] }
 0x78b   : > { %v5969_v43 = vpop.xlane.xlu1 %5968  ;;  %v15403_v52 = vpop.xlane.xlu0 %6217  ;;  %17378 = vst [vmem:[#allocation68_spill] sm:$0xff] %v15420_v36  ;;  %v7031_v10 = vsel %vm4246_vm6, %v15420_v36, 0.0 }
 0x78c   : > { %v7026_v16 = vadd.f32 %v7025_v32, %v7024_v27  ;;  %v6046_v26 = vmul.f32 0.0078125, %v5969_v43  ;;  %v6186_v27 = vmul.f32 %v15406_v18, %v15406_v18  ;;  %v15438_v32 = vsel %vm14796_vm9, 1.0, %v17380_v9 }
 0x78d   : > { %17381 = vst [vmem:[#allocation86_spill] sm:$0xff] %v15438_v32 }
 0x78e   : > { %6317 = vadd.xlane.f32.xlu0 %v6184_v22  ;;  %v7028_v12 = vadd.f32 %v7027_v35, %v7026_v16  ;;  %v7029_v22 = vsel %vm4246_vm6, %v15415_v1, 0.0  ;;  %v15443_v16 = vsel %vm14796_vm9, 1.0, %v17382_v3  ;;  %v15450_v18 = vsub.f32 %v17240_v41, %v6046_v26  ;;  %v17387_v26 = vld [vmem:[#allocation71_spill] sm:$0xff] }
 0x78f   : > { %v15424_v55 = vpop.xlane.xlu1 %5970  ;;  %v15426_v46 = vpop.xlane.xlu0 %6219  ;;  %17383 = vst [vmem:[#allocation91_spill] sm:$0xff] %v15443_v16 }
 0x790   : > { %v7030_v4 = vadd.f32 %v7029_v22, %v7028_v12  ;;  %17384 = vst [vmem:[#allocation94_spill] sm:$0xff] %v15450_v18  ;;  %v6188_v12 = vmul.f32 %v15429_v51, %v15429_v51  ;;  %v17385_v22 = vld [vmem:[#allocation65_spill] sm:$0xff] }
 0x791   : > { %v15459_v3 = vsel %vm14796_vm9, 1.0, %v17385_v22 }
 0x792   : > { %6321 = vadd.xlane.f32.xlu0 %v6186_v27  ;;  %v7032_v35 = vadd.f32 %v7031_v10, %v7030_v4  ;;  %v7033_v27 = vsel %vm4246_vm6, %v15438_v32, 0.0  ;;  %17386 = vst [vmem:[#allocation97_spill] sm:$0xff] %v15459_v3  ;;  %v7035_v4 = vsel %vm4246_vm6, %v15443_v16, 0.0 }
 0x793   : > { %v5973_v62 = vpop.xlane.xlu1 %5972  ;;  %v15447_v43 = vpop.xlane.xlu0 %6221 }
 0x794   : > { %v6048_v1 = vmul.f32 0.0078125, %v5973_v62  ;;  %v7034_v9 = vadd.f32 %v7033_v27, %v7032_v35  ;;  %v15470_v62 = vsel %vm14796_vm9, 1.0, %v17387_v26  ;;  %v6190_v35 = vmul.f32 %v15450_v18, %v15450_v18  ;;  %v17390_v27 = vld [vmem:[#allocation77_spill] sm:$0xff] }
 0x795   : > { %17388 = vst [vmem:[#allocation174_spill] sm:$0xff] %v15470_v62  ;;  %v15482_v22 = vsel %vm14796_vm9, 1.0, %v17390_v27  ;;  %v7039_v26 = vsel %vm4246_vm6, %v15470_v62, 0.0 }
 0x796   : > { %6325 = vadd.xlane.f32.xlu0 %v6188_v12  ;;  %v7036_v51 = vadd.f32 %v7035_v4, %v7034_v9  ;;  %v15473_v32 = vsub.f32 %v17244_v56, %v6048_v1  ;;  %v7037_v12 = vsel %vm4246_vm6, %v15459_v3, 0.0  ;;  %17391 = vst [vmem:[#allocation179_spill] sm:$0xff] %v15482_v22  ;;  %v17392_v56 = vld [vmem:[#allocation83_spill] sm:$0xff] }
 0x797   : > { %v15463_v10 = vpop.xlane.xlu1 %5974  ;;  %v15465_v41 = vpop.xlane.xlu0 %6223  ;;  %v15491_v1 = vsel %vm14796_vm9, 1.0, %v17392_v56 }
 0x798   : > { %17389 = vst [vmem:[#allocation176_spill] sm:$0xff] %v15473_v32  ;;  %v7038_v16 = vadd.f32 %v7037_v12, %v7036_v51  ;;  %17393 = vst [vmem:[#allocation181_spill] sm:$0xff] %v15491_v1  ;;  %v6192_v36 = vmul.f32 %v15473_v32, %v15473_v32  ;;  %v7041_v51 = vsel %vm4246_vm6, %v15482_v22, 0.0  ;;  %v17409_v22 = vld [vmem:[#allocation43_spill] sm:$0xff] }
 0x79a   : > { %6329 = vadd.xlane.f32.xlu0 %v6190_v35  ;;  %v7040_v18 = vadd.f32 %v7039_v26, %v7038_v16  ;;  %v17394_v35 = vld [vmem:[#allocation89_spill] sm:$0xff]  ;;  %v7043_v16 = vsel %vm4246_vm6, %v15491_v1, 0.0 }
 0x79b   : > { %v5977_v9 = vpop.xlane.xlu1 %5976  ;;  %v15486_v4 = vpop.xlane.xlu0 %6225  ;;  %v15500_v12 = vsel %vm14796_vm9, 1.0, %v17394_v35 }
 0x79c   : > { %v6050_v3 = vmul.f32 0.0078125, %v5977_v9  ;;  %17395 = vst [vmem:[#allocation183_spill] sm:$0xff] %v15500_v12  ;;  %v7042_v27 = vadd.f32 %v7041_v51, %v7040_v18  ;;  %v17397_v9 = vld [vmem:[#allocation92_spill] sm:$0xff]  ;;  %v7045_v18 = vsel %vm4246_vm6, %v15500_v12, 0.0  ;;  %v17403_v12 = vld [vmem:[#allocation17_spill] sm:$0xff] }
 0x79d   : > { %v15512_v56 = vsel %vm14796_vm9, 1.0, %v17397_v9  ;;  %v17401_v9 = vld [vmem:[#allocation35_spill] sm:$0xff] }
 0x79e   : > { %v15503_v62 = vsub.f32 %v17247_v49, %v6050_v3  ;;  %6333 = vadd.xlane.f32.xlu0 %v6192_v36  ;;  %17398 = vst [vmem:[#allocation185_spill] sm:$0xff] %v15512_v56  ;;  %v7044_v32 = vadd.f32 %v7043_v16, %v7042_v27  ;;  %v17399_v49 = vld [vmem:[#allocation95_spill] sm:$0xff]  ;;  %v7047_v51 = vsel %vm4246_vm6, %v15512_v56, 0.0  ;;  %v15530_v27 = vsel %vm14796_vm9, 1.0, %v17401_v9  ;;  %v17405_v56 = vld [vmem:[#allocation48_spill] sm:$0xff] }
 0x79f   : > { %v15507_v26 = vpop.xlane.xlu0 %6227  ;;  %v15521_v36 = vsel %vm14796_vm9, 1.0, %v17399_v49  ;;  %17402 = vst [vmem:[#allocation15_spill] sm:$0xff] %v15530_v27  ;;  %v15537_v49 = vsel %vm14796_vm9, 1.0, %v17403_v12  ;;  %v15546_v9 = vsel %vm14796_vm9, 1.0, %v17405_v56  ;;  %v15562_v56 = vsel %vm14796_vm9, 1.0, %v17409_v22 }
 0x7a0   : > { %17396 = vst [vmem:[#allocation132_spill] sm:$0xff] %v15503_v62  ;;  %v6194_v35 = vmul.f32 %v15503_v62, %v15503_v62  ;;  %17400 = vst [vmem:[#allocation187_spill] sm:$0xff] %v15521_v36  ;;  %v7046_v3 = vadd.f32 %v7045_v18, %v7044_v32  ;;  %v7049_v62 = vsel %vm4246_vm6, %v15521_v36, 0.0  ;;  %v17407_v36 = vld [vmem:[#allocation20_spill] sm:$0xff]  ;;  %v15578_v22 = vsel %vm14796_vm9, 1.0, %v17413_v63 }
 0x7a1   : > { %17404 = vst [vmem:[#allocation116_spill] sm:$0xff] %v15537_v49  ;;  %17406 = vst [vmem:[#allocation74_spill] sm:$0xff] %v15546_v9  ;;  %v15553_v12 = vsel %vm14796_vm9, 1.0, %v17407_v36  ;;  %v15595_v63 = vsel %vm14796_vm9, 1.0, %v17417_v40 }
 0x7a2   : > { %6337 = vadd.xlane.f32.xlu0 %v6194_v35  ;;  %v7048_v16 = vadd.f32 %v7047_v51, %v7046_v3  ;;  %v7051_v35 = vsel %vm4246_vm6, %v15530_v27, 0.0  ;;  %v7053_v51 = vsel %vm4246_vm6, %v15537_v49, 0.0  ;;  %17408 = vst [vmem:[#allocation118_spill] sm:$0xff] %v15553_v12  ;;  %17410 = vst [vmem:[#allocation18_spill] sm:$0xff] %v15562_v56  ;;  %v17411_v49 = vld [vmem:[#allocation31_spill] sm:$0xff] }
 0x7a3   : > { %v15525_v1 = vpop.xlane.xlu0 %6229  ;;  %v15569_v36 = vsel %vm14796_vm9, 1.0, %v17411_v49  ;;  %17414 = vst [vmem:[#allocation120_spill] sm:$0xff] %v15578_v22  ;;  %v15586_v49 = vsel %vm14796_vm9, 1.0, %v17415_v31  ;;  %17418 = vst [vmem:[#allocation42_spill] sm:$0xff] %v15595_v63  ;;  %v17419_v31 = vld [vmem:[#allocation98_spill] sm:$0xff] }
 0x7a4   : > { %v7050_v32 = vadd.f32 %v7049_v62, %v7048_v16  ;;  %v7055_v16 = vsel %vm4246_vm6, %v15546_v9, 0.0  ;;  %17412 = vst [vmem:[#allocation162_spill] sm:$0xff] %v15569_v36  ;;  %17416 = vst [vmem:[#allocation122_spill] sm:$0xff] %v15586_v49 }
 0x7a6   : > { %v7052_v3 = vadd.f32 %v7051_v35, %v7050_v32  ;;  %v7057_v35 = vsel %vm4246_vm6, %v15553_v12, 0.0  ;;  %v6343_v12 = vmul.f32 0.0078125, %v15220_v11  ;;  %v7065_v11 = vsel %vm4246_vm6, %v15586_v49, 0.0 }
 0x7a7   : > { %v15541_v18 = vpop.xlane.xlu0 %6231 }
 0x7a8   : > { %v7054_v62 = vadd.f32 %v7053_v51, %v7052_v3  ;;  %v7059_v51 = vsel %vm4246_vm6, %v15562_v56, 0.0 }
 0x7aa   : > { %v7056_v32 = vadd.f32 %v7055_v16, %v7054_v62  ;;  %v7061_v16 = vsel %vm4246_vm6, %v15569_v36, 0.0  ;;  %v6344_v36 = vmul.f32 0.0078125, %v15251_v6 }
 0x7ab   : > { %v15557_v27 = vpop.xlane.xlu0 %6233 }
 0x7ac   : > { %v7058_v3 = vadd.f32 %v7057_v35, %v7056_v32  ;;  %v7063_v35 = vsel %vm4246_vm6, %v15578_v22, 0.0  ;;  %v7067_v22 = vsel %vm4246_vm6, %v15595_v63, 0.0 }
 0x7ae   : > { %v7060_v62 = vadd.f32 %v7059_v51, %v7058_v3  ;;  %v6415_v51 = vadd.f32 1e-06, %v6343_v12 }
 0x7af   : > { %v15573_v9 = vpop.xlane.xlu0 %6235 }
 0x7b0   : > { %v7062_v32 = vadd.f32 %v7061_v16, %v7060_v62  ;;  %v15603_v62 = vsel %vm14796_vm9, 1.0, %v17419_v31  ;;  %8366 = vrsqrt.f32 %v6415_v51  ;;  %v6416_v31 = vadd.f32 1e-06, %v6344_v36 }
 0x7b1   : > { %17420 = vst [vmem:[#allocation163_spill] sm:$0xff] %v15603_v62  ;;  %v7069_v6 = vsel %vm4246_vm6, %v15603_v62, 0.0  ;;  %v17427_v62 = vld [vmem:[#allocation173_spill] sm:$0xff] }
 0x7b2   : > { %v7064_v3 = vadd.f32 %v7063_v35, %v7062_v32  ;;  %v17421_v32 = vld [vmem:[#allocation104_spill] sm:$0xff]  ;;  %8368 = vrsqrt.f32 %v6416_v31  ;;  %v6349_v31 = vmul.f32 0.0078125, %v15382_v2  ;;  %v6351_v2 = vmul.f32 0.0078125, %v15426_v46 }
 0x7b3   : > { %v15590_v56 = vpop.xlane.xlu0 %6237  ;;  %v15613_v35 = vsel %vm14796_vm9, 1.0, %v17421_v32  ;;  %v6347_v32 = vmul.f32 0.0078125, %v15333_v13  ;;  %8370 = vrsqrt.f32 %v6417_v14  ;;  %v17428_v14 = vld [vmem:[#allocation175_spill] sm:$0xff] }
 0x7b4   : > { %v7066_v16 = vadd.f32 %v7065_v11, %v7064_v3  ;;  %17422 = vst [vmem:[#allocation124_spill] sm:$0xff] %v15613_v35  ;;  %v6346_v3 = vmul.f32 0.0078125, %v15306_v5  ;;  %v17423_v11 = vld [vmem:[#allocation177_spill] sm:$0xff]  ;;  %v7071_v49 = vsel %vm4246_vm6, %v15613_v35, 0.0  ;;  %v6033_v5 = vmul.f32 0.0078125, %v15076_v7 }
 0x7b5   : > { %v15621_v63 = vsel %vm14796_vm9, 1.0, %v17423_v11  ;;  %v6419_v13 = vadd.f32 1e-06, %v6347_v32  ;;  %v6348_v7 = vmul.f32 0.0078125, %v15358_v17  ;;  %v17429_v17 = vld [vmem:[#allocation103_spill] sm:$0xff] }
 0x7b6   : > { %v7068_v12 = vadd.f32 %v7067_v22, %v7066_v16  ;;  %17424 = vst [vmem:[#allocation126_spill] sm:$0xff] %v15621_v63  ;;  %v17425_v16 = vld [vmem:[#allocation34_spill] sm:$0xff]  ;;  %v7073_v11 = vsel %vm4246_vm6, %v15621_v63, 0.0  ;;  %v15641_v30 = vsub.f32 %v17427_v62, %v6033_v5  ;;  %v6350_v62 = vmul.f32 0.0078125, %v15403_v52 }
 0x7b7   : > { %v15608_v40 = vpop.xlane.xlu0 %6239  ;;  %v15631_v36 = vsel %vm14796_vm9, 1.0, %v17425_v16  ;;  %v6035_v16 = vmul.f32 0.0078125, %v15124_v45  ;;  %v6423_v46 = vadd.f32 1e-06, %v6351_v2 }
 0x7b8   : > { %v7070_v20 = vadd.f32 %v7069_v6, %v7068_v12  ;;  %17426 = vst [vmem:[#allocation44_spill] sm:$0xff] %v15631_v36  ;;  %v6418_v12 = vadd.f32 1e-06, %v6346_v3  ;;  %v7075_v38 = vsel %vm4246_vm6, %v15631_v36, 0.0  ;;  %v6177_v45 = vmul.f32 %v15641_v30, %v15641_v30  ;;  %v17434_v36 = vld [vmem:[#allocation110_spill] sm:$0xff] }
 0x7b9   : > { %v15648_v32 = vsub.f32 %v17428_v14, %v6035_v16  ;;  %v6422_v16 = vadd.f32 1e-06, %v6350_v62  ;;  %v17432_v62 = vld [vmem:[#allocation180_spill] sm:$0xff] }
 0x7ba   : > { %v7072_v51 = vadd.f32 %v7071_v49, %v7070_v20  ;;  %8372 = vrsqrt.f32 %v6418_v12  ;;  %v8367_v3 = vpop.eup %8366  ;;  %v6037_v20 = vmul.f32 0.0078125, %v15172_v23  ;;  %v6421_v12 = vadd.f32 1e-06, %v6349_v31  ;;  %v17430_v23 = vld [vmem:[#allocation178_spill] sm:$0xff] }
 0x7bb   : > { %v15626_v22 = vpop.xlane.xlu0 %6241  ;;  %8374 = vrsqrt.f32 %v6419_v13  ;;  %v6039_v13 = vmul.f32 0.0078125, %v15218_v44  ;;  %v6179_v52 = vmul.f32 %v15648_v32, %v15648_v32  ;;  %v17431_v31 = vld [vmem:[#allocation106_spill] sm:$0xff]  ;;  %v6353_v44 = vmul.f32 0.0078125, %v15465_v41 }
 0x7bc   : > { %v7074_v6 = vadd.f32 %v7073_v11, %v7072_v51  ;;  %v6420_v51 = vadd.f32 1e-06, %v6348_v7  ;;  %v6559_v11 = vmul.f32 %v8367_v3, %v17429_v17 }
 0x7bd   : > { %v15672_v17 = vsub.f32 %v17432_v62, %v6039_v13  ;;  %v6425_v13 = vadd.f32 1e-06, %v6353_v44  ;;  %v17435_v62 = vld [vmem:[#allocation182_spill] sm:$0xff]  ;;  %v17436_v44 = vld [vmem:[#allocation184_spill] sm:$0xff] }
 0x7be   : > { %v7076_v49 = vadd.f32 %v7075_v38, %v7074_v6  ;;  %v8369_v6 = vpop.eup %8368  ;;  %v15658_v38 = vsub.f32 %v17430_v23, %v6037_v20  ;;  %8376 = vrsqrt.f32 %v6420_v51  ;;  %v6638_v3 = vmul.f32 %v15209_v21, %v6559_v11  ;;  %v17433_v23 = vld [vmem:[#allocation108_spill] sm:$0xff] }
 0x7bf   : > { %v15638_v35 = vpop.xlane.xlu0 %6243  ;;  %v8371_v7 = vpop.eup %8370  ;;  %v6560_v14 = vmul.f32 %v8369_v6, %v17431_v31  ;;  %8378 = vrsqrt.f32 %v6421_v12  ;;  %v6043_v12 = vmul.f32 0.0078125, %v15331_v57 }
 0x7c0   : > { %7077 = vadd.xlane.f32.xlu1 %v7076_v49  ;;  %v6352_v49 = vmul.f32 0.0078125, %v15447_v43  ;;  %v6181_v51 = vmul.f32 %v15658_v38, %v15658_v38  ;;  %v6041_v43 = vmul.f32 0.0078125, %v15277_v25  ;;  %v6561_v11 = vmul.f32 %v8371_v7, %v17433_v23 }
 0x7c1   : > { %8380 = vrsqrt.f32 %v6422_v16  ;;  %v6717_v31 = vadd.f32 %v15239_v53, %v6638_v3  ;;  %v6639_v41 = vmul.f32 %v15209_v21, %v6560_v14  ;;  %v6355_v25 = vmul.f32 0.0078125, %v15507_v26 }
 0x7c2   : > { %v6424_v2 = vadd.f32 1e-06, %v6352_v49  ;;  %8382 = vrsqrt.f32 %v6423_v46  ;;  %v15683_v7 = vsub.f32 %v17435_v62, %v6041_v43  ;;  %v6640_v16 = vmul.f32 %v15209_v21, %v6561_v11  ;;  %v17438_v62 = vld [vmem:[#allocation114_spill] sm:$0xff] }
 0x7c3   : > { %v15653_v5 = vpop.xlane.xlu0 %6245  ;;  %v6789_v46 = vmul.f32 %v6717_v31, %v14850_v34  ;;  %v6718_v26 = vadd.f32 %v15239_v53, %v6639_v41  ;;  %v6357_v43 = vmul.f32 0.0078125, %v15541_v18 }
 0x7c4   : > { %6303 = vadd.xlane.f32.xlu1 %v6177_v45  ;;  %v8373_v20 = vpop.eup %8372  ;;  %8384 = vrsqrt.f32 %v6424_v2  ;;  %v6719_v11 = vadd.f32 %v15239_v53, %v6640_v16  ;;  %v6185_v34 = vmul.f32 %v15683_v7, %v15683_v7  ;;  %v17437_v2 = vld [vmem:[#allocation112_spill] sm:$0xff] }
 0x7c5   : > { %v8375_v6 = vpop.eup %8374  ;;  %v6562_v63 = vmul.f32 %v8373_v20, %v17434_v36  ;;  %v6356_v36 = vmul.f32 0.0078125, %v15525_v1  ;;  %8386 = vrsqrt.f32 %v6425_v13  ;;  %v6860_v41 = vadd.f32 %v15356_v28, %v6789_v46 }
 0x7c6   : > { %v6563_v57 = vmul.f32 %v8375_v6, %v14684_v60  ;;  %v6427_v60 = vadd.f32 1e-06, %v6355_v25  ;;  %v6045_v6 = vmul.f32 0.0078125, %v15380_v0  ;;  %v6790_v18 = vmul.f32 %v6718_v26, %v14873_v24  ;;  %v17439_v24 = vld [vmem:[#allocation129_spill] sm:$0xff]  ;;  %v17440_v26 = vld [vmem:[#allocation67_spill] sm:$0xff] }
 0x7c7   : > { %v15666_v45 = vpop.xlane.xlu0 %6247  ;;  %v6641_v20 = vmul.f32 %v15209_v21, %v6562_v63 }
 0x7c8   : > { %6307 = vadd.xlane.f32.xlu1 %v6179_v52  ;;  %v6354_v52 = vmul.f32 0.0078125, %v15486_v4  ;;  %v6183_v4 = vmul.f32 %v15672_v17, %v15672_v17  ;;  %v8377_v14 = vpop.eup %8376  ;;  %v6642_v1 = vmul.f32 %v15209_v21, %v6563_v57  ;;  %v6429_v57 = vadd.f32 1e-06, %v6357_v43 }
 0x7c9   : > { %v8379_v23 = vpop.eup %8378  ;;  %v6564_v63 = vmul.f32 %v8377_v14, %v17437_v2  ;;  %v6720_v13 = vadd.f32 %v15239_v53, %v6641_v20  ;;  %v6047_v14 = vmul.f32 0.0078125, %v15424_v55  ;;  %v17442_v2 = vld [vmem:[#allocation186_spill] sm:$0xff] }
 0x7ca   : > { %v6426_v3 = vadd.f32 1e-06, %v6354_v52  ;;  %v6358_v52 = vmul.f32 0.0078125, %v15557_v27  ;;  %v6565_v16 = vmul.f32 %v8379_v23, %v17438_v62  ;;  %v6721_v28 = vadd.f32 %v15239_v53, %v6642_v1  ;;  %v17441_v1 = vld [vmem:[#allocation70_spill] sm:$0xff] }
 0x7cb   : > { %v15689_v49 = vpop.xlane.xlu0 %6249  ;;  %v8381_v31 = vpop.eup %8380  ;;  %v6643_v46 = vmul.f32 %v15209_v21, %v6564_v63  ;;  %v6792_v43 = vmul.f32 %v6720_v13, %v14899_v54  ;;  %v15729_v63 = vsub.f32 %v17442_v2, %v6047_v14  ;;  %v17443_v13 = vld [vmem:[#allocation66_spill] sm:$0xff]  ;;  %v6363_v14 = vmul.f32 0.0078125, %v15638_v35 }
 0x7cc   : > { %6311 = vadd.xlane.f32.xlu1 %v6181_v51  ;;  %v15696_v51 = vsub.f32 %v17436_v44, %v6043_v12  ;;  %8388 = vrsqrt.f32 %v6426_v3  ;;  %v6428_v12 = vadd.f32 1e-06, %v6356_v36  ;;  %v8383_v27 = vpop.eup %8382  ;;  %v6791_v3 = vmul.f32 %v6719_v11, %v14880_v37 }
 0x7cd   : > { %8390 = vrsqrt.f32 %v6427_v60  ;;  %v15718_v36 = vsub.f32 %v17439_v24, %v6045_v6  ;;  %v6566_v20 = vmul.f32 %v8381_v31, %v17440_v26  ;;  %v6430_v44 = vadd.f32 1e-06, %v6358_v52 }
 0x7ce   : > { %v6187_v0 = vmul.f32 %v15696_v51, %v15696_v51  ;;  %8392 = vrsqrt.f32 %v6428_v12  ;;  %v6861_v60 = vadd.f32 %v6860_v41, %v6790_v18  ;;  %v6360_v37 = vmul.f32 0.0078125, %v15590_v56  ;;  %v8385_v23 = vpop.eup %8384 }
 0x7cf   : > { %v15711_v25 = vpop.xlane.xlu0 %6251  ;;  %v6644_v11 = vmul.f32 %v15209_v21, %v6565_v16  ;;  %v6567_v6 = vmul.f32 %v8383_v27, %v17441_v1  ;;  %8394 = vrsqrt.f32 %v6429_v57  ;;  %v6361_v12 = vmul.f32 0.0078125, %v15608_v40  ;;  %v8387_v56 = vpop.eup %8386  ;;  %v17444_v27 = vld [vmem:[#allocation188_spill] sm:$0xff] }
 0x7d0   : > { %6315 = vadd.xlane.f32.xlu1 %v6183_v4  ;;  %v6359_v4 = vmul.f32 0.0078125, %v15573_v9  ;;  %v6049_v9 = vmul.f32 0.0078125, %v15463_v10  ;;  %v6189_v54 = vmul.f32 %v15718_v36, %v15718_v36  ;;  %v6793_v52 = vmul.f32 %v6721_v28, %v14906_v19  ;;  %v17445_v19 = vld [vmem:[#allocation69_spill] sm:$0xff] }
 0x7d1   : > { %v6722_v31 = vadd.f32 %v15239_v53, %v6643_v46  ;;  %v6645_v41 = vmul.f32 %v15209_v21, %v6566_v20  ;;  %8396 = vrsqrt.f32 %v6430_v44  ;;  %v6432_v62 = vadd.f32 1e-06, %v6360_v37 }
 0x7d2   : > { %v6431_v55 = vadd.f32 1e-06, %v6359_v4  ;;  %v6362_v16 = vmul.f32 0.0078125, %v15626_v22  ;;  %v6723_v57 = vadd.f32 %v15239_v53, %v6644_v11  ;;  %v6646_v4 = vmul.f32 %v15209_v21, %v6567_v6 }
 0x7d3   : > { %v15734_v10 = vpop.xlane.xlu0 %6253  ;;  %v6569_v28 = vmul.f32 %v8387_v56, %v17445_v19  ;;  %v6433_v24 = vadd.f32 1e-06, %v6361_v12  ;;  %v6191_v46 = vmul.f32 %v15729_v63, %v15729_v63  ;;  %v6794_v20 = vmul.f32 %v6722_v31, %v14926_v42 }
 0x7d4   : > { %6319 = vadd.xlane.f32.xlu1 %v6185_v34  ;;  %v6862_v34 = vadd.f32 %v6861_v60, %v6791_v3  ;;  %v15744_v3 = vsub.f32 %v17444_v27, %v6049_v9  ;;  %8398 = vrsqrt.f32 %v6431_v55  ;;  %v6724_v44 = vadd.f32 %v15239_v53, %v6645_v41 }
 0x7d5   : > { %8400 = vrsqrt.f32 %v6432_v62  ;;  %v6434_v37 = vadd.f32 1e-06, %v6362_v16  ;;  %v6795_v35 = vmul.f32 %v6723_v57, %v14933_v61  ;;  %v6725_v1 = vadd.f32 %v15239_v53, %v6646_v4 }
 0x7d6   : > { %v6863_v18 = vadd.f32 %v6862_v34, %v6792_v43  ;;  %v8389_v40 = vpop.eup %8388  ;;  %v17446_v43 = vld [vmem:[#allocation73_spill] sm:$0xff]  ;;  %v6364_v6 = vmul.f32 0.0078125, %v15653_v5  ;;  %v6193_v42 = vmul.f32 %v15744_v3, %v15744_v3  ;;  %v6648_v55 = vmul.f32 %v15209_v21, %v6569_v28 }
 0x7d7   : > { %v8391_v26 = vpop.eup %8390  ;;  %v6570_v9 = vmul.f32 %v8389_v40, %v17446_v43  ;;  %8402 = vrsqrt.f32 %v6433_v24  ;;  %v6435_v2 = vadd.f32 1e-06, %v6363_v14  ;;  %v6796_v56 = vmul.f32 %v6724_v44, %v14951_v29 }
 0x7d8   : > { %6323 = vadd.xlane.f32.xlu1 %v6187_v0  ;;  %v6568_v0 = vmul.f32 %v8385_v23, %v17443_v13  ;;  %v6864_v22 = vadd.f32 %v6863_v18, %v6793_v52  ;;  %v6256_v23 = vpop.xlane.xlu0 %6255  ;;  %v8393_v11 = vpop.eup %8392  ;;  %v6571_v34 = vmul.f32 %v8391_v26, %v14742_v39  ;;  %v6365_v52 = vmul.f32 0.0078125, %v15666_v45  ;;  %v17447_v45 = vld [vmem:[#allocation76_spill] sm:$0xff] }
 0x7d9   : > { %v8395_v12 = vpop.eup %8394  ;;  %v6649_v31 = vmul.f32 %v15209_v21, %v6570_v9  ;;  %v6572_v5 = vmul.f32 %v8393_v11, %v14750_v33  ;;  %8404 = vrsqrt.f32 %v6434_v37  ;;  %v6797_v39 = vmul.f32 %v6725_v1, %v14959_v50 }
 0x7da   : > { %v6647_v60 = vmul.f32 %v15209_v21, %v6568_v0  ;;  %v6436_v13 = vadd.f32 1e-06, %v6364_v6  ;;  %v6366_v0 = vmul.f32 0.0078125, %v15689_v49  ;;  %v6727_v62 = vadd.f32 %v15239_v53, %v6648_v55  ;;  %v17448_v49 = vld [vmem:[#allocation72_spill] sm:$0xff] }
 0x7db   : > { %v8397_v41 = vpop.eup %8396  ;;  %v6650_v29 = vmul.f32 %v15209_v21, %v6571_v34  ;;  %v6573_v16 = vmul.f32 %v8395_v12, %v17447_v45  ;;  %8406 = vrsqrt.f32 %v6435_v2  ;;  %v6437_v33 = vadd.f32 1e-06, %v6365_v52  ;;  %v17451_v52 = vld [vmem:[#allocation82_spill] sm:$0xff] }
 0x7dc   : > { %6327 = vadd.xlane.f32.xlu1 %v6189_v54  ;;  %v6865_v54 = vadd.f32 %v6864_v22, %v6794_v20  ;;  %v6726_v61 = vadd.f32 %v15239_v53, %v6647_v60  ;;  %v6258_v40 = vpop.xlane.xlu0 %6257  ;;  %v6367_v27 = vmul.f32 0.0078125, %v15711_v25  ;;  %v6728_v50 = vadd.f32 %v15239_v53, %v6649_v31  ;;  %v17449_v60 = vld [vmem:[#allocation75_spill] sm:$0xff] }
 0x7dd   : > { %v6651_v28 = vmul.f32 %v15209_v21, %v6572_v5  ;;  %v6574_v24 = vmul.f32 %v8397_v41, %v17448_v49  ;;  %8408 = vrsqrt.f32 %v6436_v13  ;;  %v6368_v26 = vmul.f32 0.0078125, %v15734_v10 }
 0x7de   : > { %v6866_v18 = vadd.f32 %v6865_v54, %v6795_v35  ;;  %v8399_v57 = vpop.eup %8398  ;;  %v6798_v19 = vmul.f32 %v6726_v61, %v14976_v8  ;;  %v6799_v20 = vmul.f32 %v6727_v62, %v14986_v58  ;;  %v6729_v44 = vadd.f32 %v15239_v53, %v6650_v29  ;;  %v17453_v62 = vld [vmem:[#allocation78_spill] sm:$0xff] }
 0x7df   : > { %v8401_v22 = vpop.eup %8400  ;;  %v6652_v25 = vmul.f32 %v15209_v21, %v6573_v16  ;;  %v6575_v8 = vmul.f32 %v8399_v57, %v17449_v60  ;;  %8410 = vrsqrt.f32 %v6437_v33  ;;  %v6439_v43 = vadd.f32 1e-06, %v6367_v27  ;;  %v6262_v16 = vpop.xlane.xlu1 %6261  ;;  %v17457_v60 = vld [vmem:[#allocation38_spill] sm:$0xff] }
 0x7e0   : > { %6331 = vadd.xlane.f32.xlu1 %v6191_v46  ;;  %v6867_v4 = vadd.f32 %v6866_v18, %v6796_v56  ;;  %v6438_v46 = vadd.f32 1e-06, %v6366_v0  ;;  %v6369_v9 = vmul.f32 0.0078125, %v6256_v23  ;;  %v6800_v35 = vmul.f32 %v6728_v50, %v15003_v48  ;;  %v6260_v6 = vpop.xlane.xlu0 %6259  ;;  %v17452_v18 = vld [vmem:[#allocation16_spill] sm:$0xff] }
 0x7e1   : > { %v8403_v37 = vpop.eup %8402  ;;  %v6730_v1 = vadd.f32 %v15239_v53, %v6651_v28  ;;  %v6653_v10 = vmul.f32 %v15209_v21, %v6574_v24  ;;  %v6440_v55 = vadd.f32 1e-06, %v6368_v26  ;;  %v6370_v34 = vmul.f32 0.0078125, %v6258_v40  ;;  %v17454_v40 = vld [vmem:[#allocation36_spill] sm:$0xff] }
 0x7e2   : > { %v6868_v14 = vadd.f32 %v6867_v4, %v6797_v39  ;;  %8412 = vrsqrt.f32 %v6438_v46  ;;  %v6801_v54 = vmul.f32 %v6729_v44, %v15010_v59  ;;  %v6731_v23 = vadd.f32 %v15239_v53, %v6652_v25 }
 0x7e3   : > { %v8405_v2 = vpop.eup %8404  ;;  %v6654_v56 = vmul.f32 %v15209_v21, %v6575_v8  ;;  %v6577_v48 = vmul.f32 %v8403_v37, %v17451_v52  ;;  %8414 = vrsqrt.f32 %v6439_v43  ;;  %v6441_v61 = vadd.f32 1e-06, %v6369_v9  ;;  %v17458_v43 = vld [vmem:[#allocation85_spill] sm:$0xff] }
 0x7e4   : > { %6335 = vadd.xlane.f32.xlu1 %v6193_v42  ;;  %v6869_v11 = vadd.f32 %v6868_v14, %v6798_v19  ;;  %v17450_v42 = vld [vmem:[#allocation79_spill] sm:$0xff]  ;;  %v6371_v31 = vmul.f32 0.0078125, %v6260_v6  ;;  %v6802_v39 = vmul.f32 %v6730_v1, %v17452_v18  ;;  %v6732_v13 = vadd.f32 %v15239_v53, %v6653_v10  ;;  %v17455_v19 = vld [vmem:[#allocation81_spill] sm:$0xff]  ;;  %v6264_v49 = vpop.xlane.xlu0 %6263  ;;  %v17456_v14 = vld [vmem:[#allocation40_spill] sm:$0xff] }
 0x7e5   : > { %v6576_v58 = vmul.f32 %v8401_v22, %v17450_v42  ;;  %v8407_v5 = vpop.eup %8406  ;;  %v6578_v29 = vmul.f32 %v8405_v2, %v17453_v62  ;;  %8416 = vrsqrt.f32 %v6440_v55  ;;  %v6442_v59 = vadd.f32 1e-06, %v6370_v34  ;;  %v17459_v10 = vld [vmem:[#allocation88_spill] sm:$0xff]  ;;  %v17460_v34 = vld [vmem:[#allocation23_spill] sm:$0xff]  ;;  %v17461_v52 = vld [vmem:[#allocation5_spill] sm:$0xff] }
 0x7e6   : > { %v6870_v12 = vadd.f32 %v6869_v11, %v6799_v20  ;;  %v6803_v57 = vmul.f32 %v6731_v23, %v17454_v40  ;;  %v6733_v4 = vadd.f32 %v15239_v53, %v6654_v56  ;;  %v6656_v27 = vmul.f32 %v15209_v21, %v6577_v48  ;;  %v6266_v23 = vpop.xlane.xlu1 %6265 }
 0x7e7   : > { %v6655_v0 = vmul.f32 %v15209_v21, %v6576_v58  ;;  %v8409_v33 = vpop.eup %8408  ;;  %v6579_v50 = vmul.f32 %v8407_v5, %v17455_v19  ;;  %8418 = vrsqrt.f32 %v6441_v61  ;;  %v6443_v28 = vadd.f32 1e-06, %v6371_v31  ;;  %v17462_v5 = vld [vmem:[#allocation21_spill] sm:$0xff] }
 0x7e8   : > { %v6871_v41 = vadd.f32 %v6870_v12, %v6800_v35  ;;  %v6804_v46 = vmul.f32 %v6732_v13, %v17456_v14  ;;  %v6372_v22 = vmul.f32 0.0078125, %v6262_v16  ;;  %v6657_v44 = vmul.f32 %v15209_v21, %v6578_v29  ;;  %v17464_v16 = vld [vmem:[#allocation25_spill] sm:$0xff] }
 0x7e9   : > { %v8411_v26 = vpop.eup %8410  ;;  %v6734_v20 = vadd.f32 %v15239_v53, %v6655_v0  ;;  %8420 = vrsqrt.f32 %v6442_v59  ;;  %v6805_v8 = vmul.f32 %v6733_v4, %v17457_v60  ;;  %v6580_v9 = vmul.f32 %v8409_v33, %v17458_v43  ;;  %v17463_v0 = vld [vmem:[#allocation90_spill] sm:$0xff]  ;;  %v17465_v33 = vld [vmem:[#allocation9_spill] sm:$0xff]  ;;  %v17468_v43 = vld [vmem:[#allocation24_spill] sm:$0xff] }
 0x7ea   : > { %v6872_v45 = vadd.f32 %v6871_v41, %v6801_v54  ;;  %v6735_v11 = vadd.f32 %v15239_v53, %v6656_v27  ;;  %v6658_v35 = vmul.f32 %v15209_v21, %v6579_v50  ;;  %8422 = vrsqrt.f32 %v6443_v28  ;;  %v6268_v54 = vpop.xlane.xlu0 %6267  ;;  %v17466_v28 = vld [vmem:[#allocation26_spill] sm:$0xff] }
 0x7eb   : > { %v6373_v1 = vmul.f32 0.0078125, %v6264_v49  ;;  %v6581_v6 = vmul.f32 %v8411_v26, %v17459_v10  ;;  %v6444_v58 = vadd.f32 1e-06, %v6372_v22  ;;  %v6806_v2 = vmul.f32 %v6734_v20, %v17460_v34  ;;  %v15822_v26 = vld [vmem:[%s16060_s6] ss:$0 sm:$0xff]  ;;  %v17467_v20 = vld [vmem:[#allocation93_spill] sm:$0xff] }
 0x7ec   : > { %v6873_v24 = vadd.f32 %v6872_v45, %v6802_v39  ;;  %v8413_v37 = vpop.eup %8412  ;;  %v6736_v12 = vadd.f32 %v15239_v53, %v6657_v44  ;;  %v6659_v56 = vmul.f32 %v15209_v21, %v6580_v9  ;;  %v6807_v41 = vmul.f32 %v6735_v11, %v17462_v5 }
 0x7ed   : > { %v8415_v42 = vpop.eup %8414  ;;  %v6582_v48 = vmul.f32 %v8413_v37, %v17461_v52  ;;  %v6737_v18 = vadd.f32 %v15239_v53, %v6658_v35  ;;  %v6445_v39 = vadd.f32 1e-06, %v6373_v1  ;;  %v6660_v13 = vmul.f32 %v15209_v21, %v6581_v6  ;;  %v17469_v35 = vld [vmem:[#allocation10_spill] sm:$0xff] }
 0x7ee   : > { %v6874_v25 = vadd.f32 %v6873_v24, %v6803_v57  ;;  %v6583_v62 = vmul.f32 %v8415_v42, %v17463_v0  ;;  %8424 = vrsqrt.f32 %v6444_v58  ;;  %v6374_v59 = vmul.f32 0.0078125, %v6266_v23  ;;  %v6272_v14 = vpop.xlane.xlu0 %6271  ;;  %v17470_v42 = vld [vmem:[#allocation28_spill] sm:$0xff]  ;;  %v17472_v52 = vld [vmem:[#allocation46_spill] sm:$0xff] }
 0x7ef   : > { %v8417_v61 = vpop.eup %8416  ;;  %v6808_v40 = vmul.f32 %v6736_v12, %v17464_v16  ;;  %v6738_v57 = vadd.f32 %v15239_v53, %v6659_v56  ;;  %v6661_v4 = vmul.f32 %v15209_v21, %v6582_v48  ;;  %v6809_v49 = vmul.f32 %v6737_v18, %v17466_v28  ;;  %v17471_v12 = vld [vmem:[#allocation96_spill] sm:$0xff] }
 0x7f0   : > { %v6875_v55 = vadd.f32 %v6874_v25, %v6804_v46  ;;  %v6584_v27 = vmul.f32 %v8417_v61, %v17465_v33  ;;  %8426 = vrsqrt.f32 %v6445_v39  ;;  %v6375_v24 = vmul.f32 0.0078125, %v6268_v54  ;;  %v17473_v39 = vld [vmem:[#allocation53_spill] sm:$0xff] }
 0x7f1   : > { %v8419_v29 = vpop.eup %8418  ;;  %v6739_v46 = vadd.f32 %v15239_v53, %v6660_v13  ;;  %v6662_v22 = vmul.f32 %v15822_v26, %v6583_v62  ;;  %v6446_v25 = vadd.f32 1e-06, %v6374_v59  ;;  %v6810_v9 = vmul.f32 %v6738_v57, %v17468_v43 }
 0x7f2   : > { %v6876_v31 = vadd.f32 %v6875_v55, %v6805_v8  ;;  %v6585_v21 = vmul.f32 %v8419_v29, %v17467_v20  ;;  %v6270_v8 = vpop.xlane.xlu1 %6269  ;;  %v6740_v37 = vadd.f32 %v15239_v53, %v6661_v4  ;;  %v6663_v11 = vmul.f32 %v15822_v26, %v6584_v27  ;;  %v15834_v55 = vld [vmem:[%s16061_s7] ss:$0 sm:$0xff]  ;;  %v6276_v23 = vpop.xlane.xlu0 %6275 }
 0x7f3   : > { %v8421_v19 = vpop.eup %8420  ;;  %v6447_v6 = vadd.f32 1e-06, %v6375_v24  ;;  %v6811_v58 = vmul.f32 %v6739_v46, %v17470_v42  ;;  %v6741_v34 = vadd.f32 %v15834_v55, %v6662_v22  ;;  %8428 = vrsqrt.f32 %v6446_v25  ;;  %v17475_v4 = vld [vmem:[#allocation136_spill] sm:$0xff]  ;;  %v17477_v46 = vld [vmem:[#allocation14_spill] sm:$0xff] }
 0x7f4   : > { %v6877_v45 = vadd.f32 %v6876_v31, %v6806_v2  ;;  %v8423_v44 = vpop.eup %8422  ;;  %v6586_v1 = vmul.f32 %v8421_v19, %v17469_v35  ;;  %v6664_v2 = vmul.f32 %v15822_v26, %v6585_v21  ;;  %v6376_v53 = vmul.f32 0.0078125, %v6270_v8  ;;  %v17478_v25 = vld [vmem:[#allocation142_spill] sm:$0xff] }
 0x7f5   : > { %v6587_v54 = vmul.f32 %v8423_v44, %v17471_v12  ;;  %v6812_v48 = vmul.f32 %v6740_v37, %v17472_v52  ;;  %v6742_v61 = vadd.f32 %v15834_v55, %v6663_v11  ;;  %8430 = vrsqrt.f32 %v6447_v6  ;;  %v17479_v37 = vld [vmem:[#allocation147_spill] sm:$0xff] }
 0x7f6   : > { %v6878_v50 = vadd.f32 %v6877_v45, %v6807_v41  ;;  %v6665_v31 = vmul.f32 %v15822_v26, %v6586_v1  ;;  %v6377_v41 = vmul.f32 0.0078125, %v6272_v14  ;;  %v6813_v13 = vmul.f32 %v6741_v34, %v17473_v39  ;;  %v17474_v45 = vld [vmem:[#allocation84_spill] sm:$0xff]  ;;  %v17481_v52 = vld [vmem:[#allocation39_spill] sm:$0xff] }
 0x7f7   : > { %v6743_v0 = vadd.f32 %v15834_v55, %v6664_v2  ;;  %v6666_v62 = vmul.f32 %v15822_v26, %v6587_v54  ;;  %v6448_v59 = vadd.f32 1e-06, %v6376_v53  ;;  %v6814_v33 = vmul.f32 %v6742_v61, %v17475_v4  ;;  %v17482_v61 = vld [vmem:[#allocation150_spill] sm:$0xff] }
 0x7f8   : > { %v6879_v60 = vadd.f32 %v6878_v50, %v6808_v40  ;;  %v8425_v5 = vpop.eup %8424  ;;  %v6274_v40 = vpop.xlane.xlu1 %6273  ;;  %v6744_v27 = vadd.f32 %v15834_v55, %v6665_v31  ;;  %v6449_v19 = vadd.f32 1e-06, %v6377_v41  ;;  %v6379_v43 = vmul.f32 0.0078125, %v6276_v23 }
 0x7f9   : > { %v6588_v16 = vmul.f32 %v8425_v5, %v17474_v45  ;;  %v6280_v50 = vpop.xlane.xlu0 %6279  ;;  %v6745_v14 = vadd.f32 %v15834_v55, %v6666_v62  ;;  %8432 = vrsqrt.f32 %v6448_v59  ;;  %v6378_v20 = vmul.f32 0.0078125, %v6274_v40  ;;  %v17484_v40 = vld [vmem:[#allocation8_spill] sm:$0xff] }
 0x7fa   : > { %v6880_v10 = vadd.f32 %v6879_v60, %v6809_v49  ;;  %v8427_v29 = vpop.eup %8426  ;;  %v17476_v49 = vld [vmem:[#allocation140_spill] sm:$0xff]  ;;  %v6816_v60 = vmul.f32 %v6744_v27, %v17478_v25  ;;  %8434 = vrsqrt.f32 %v6449_v19  ;;  %v6451_v54 = vadd.f32 1e-06, %v6379_v43  ;;  %v17487_v25 = vld [vmem:[#allocation159_spill] sm:$0xff] }
 0x7fb   : > { %v6815_v24 = vmul.f32 %v6743_v0, %v17476_v49  ;;  %v6589_v22 = vmul.f32 %v8427_v29, %v17477_v46  ;;  %v6667_v21 = vmul.f32 %v15822_v26, %v6588_v16  ;;  %v6817_v11 = vmul.f32 %v6745_v14, %v17479_v37  ;;  %v17483_v0 = vld [vmem:[#allocation156_spill] sm:$0xff]  ;;  %v17486_v14 = vld [vmem:[#allocation157_spill] sm:$0xff] }
 0x7fc   : > { %v6881_v56 = vadd.f32 %v6880_v10, %v6810_v9  ;;  %v6450_v10 = vadd.f32 1e-06, %v6378_v20  ;;  %v6278_v2 = vpop.xlane.xlu1 %6277 }
 0x7fd   : > { %v8429_v8 = vpop.eup %8428  ;;  %v6668_v35 = vmul.f32 %v15822_v26, %v6589_v22  ;;  %v6284_v6 = vpop.xlane.xlu0 %6283  ;;  %v6746_v42 = vadd.f32 %v15834_v55, %v6667_v21 }
 0x7fe   : > { %v6882_v18 = vadd.f32 %v6881_v56, %v6811_v58  ;;  %v17480_v58 = vld [vmem:[#allocation87_spill] sm:$0xff]  ;;  %8436 = vrsqrt.f32 %v6450_v10  ;;  %v6383_v21 = vmul.f32 0.0078125, %v6284_v6 }
 0x7ff   : > { %v8431_v1 = vpop.eup %8430  ;;  %v6590_v34 = vmul.f32 %v8429_v8, %v17480_v58  ;;  %v6747_v56 = vadd.f32 %v15834_v55, %v6668_v35  ;;  %v6818_v31 = vmul.f32 %v6746_v42, %v17482_v61  ;;  %8438 = vrsqrt.f32 %v6451_v54 }
 0x800   : > { %v6883_v57 = vadd.f32 %v6882_v18, %v6812_v48  ;;  %v6591_v23 = vmul.f32 %v8431_v1, %v17481_v52  ;;  %v6380_v48 = vmul.f32 0.0078125, %v6278_v2  ;;  %v6381_v18 = vmul.f32 0.0078125, %v6280_v50  ;;  %v6282_v4 = vpop.xlane.xlu1 %6281  ;;  %v17489_v2 = vld [vmem:[#allocation22_spill] sm:$0xff] }
 0x801   : > { %v6669_v5 = vmul.f32 %v15822_v26, %v6590_v34  ;;  %v6288_v39 = vpop.xlane.xlu0 %6287  ;;  %v6819_v62 = vmul.f32 %v6747_v56, %v17483_v0  ;;  %v6382_v50 = vmul.f32 0.0078125, %v6282_v4  ;;  %v6455_v10 = vadd.f32 1e-06, %v6383_v21  ;;  %v17494_v21 = vld [vmem:[#allocation11_spill] sm:$0xff] }
 0x802   : > { %v6884_v28 = vadd.f32 %v6883_v57, %v6813_v13  ;;  %v6670_v29 = vmul.f32 %v15822_v26, %v6591_v23  ;;  %v6452_v45 = vadd.f32 1e-06, %v6380_v48  ;;  %v6385_v52 = vmul.f32 0.0078125, %v6288_v39 }
 0x803   : > { %v8433_v41 = vpop.eup %8432  ;;  %v6748_v16 = vadd.f32 %v15834_v55, %v6669_v5 }
 0x804   : > { %v6885_v44 = vadd.f32 %v6884_v28, %v6814_v33  ;;  %v8435_v59 = vpop.eup %8434  ;;  %v6592_v57 = vmul.f32 %v8433_v41, %v17484_v40  ;;  %v6453_v33 = vadd.f32 1e-06, %v6381_v18  ;;  %v6749_v19 = vadd.f32 %v15834_v55, %v6670_v29  ;;  %v17485_v28 = vld [vmem:[#allocation41_spill] sm:$0xff]  ;;  %v6286_v1 = vpop.xlane.xlu1 %6285 }
 0x805   : > { %v6593_v49 = vmul.f32 %v8435_v59, %v17485_v28  ;;  %8440 = vrsqrt.f32 %v6452_v45  ;;  %v6820_v46 = vmul.f32 %v6748_v16, %v17486_v14  ;;  %v6384_v6 = vmul.f32 0.0078125, %v6286_v1  ;;  %v17491_v45 = vld [vmem:[#allocation45_spill] sm:$0xff] }
 0x806   : > { %v6886_v9 = vadd.f32 %v6885_v44, %v6815_v24  ;;  %v6292_v24 = vpop.xlane.xlu0 %6291  ;;  %v6671_v22 = vmul.f32 %v15822_v26, %v6592_v57  ;;  %8442 = vrsqrt.f32 %v6453_v33  ;;  %v6457_v29 = vadd.f32 1e-06, %v6385_v52  ;;  %v17492_v40 = vld [vmem:[#allocation161_spill] sm:$0xff] }
 0x807   : > { %v6672_v8 = vmul.f32 %v15822_v26, %v6593_v49  ;;  %v6456_v5 = vadd.f32 1e-06, %v6384_v6  ;;  %v6387_v33 = vmul.f32 0.0078125, %v6292_v24  ;;  %v17493_v49 = vld [vmem:[#allocation134_spill] sm:$0xff] }
 0x808   : > { %v6887_v12 = vadd.f32 %v6886_v9, %v6816_v60  ;;  %v8437_v20 = vpop.eup %8436  ;;  %v6821_v60 = vmul.f32 %v6749_v19, %v17487_v25  ;;  %v6454_v9 = vadd.f32 1e-06, %v6382_v50  ;;  %v6750_v37 = vadd.f32 %v15834_v55, %v6671_v22 }
 0x809   : > { %v8439_v43 = vpop.eup %8438  ;;  %v6751_v34 = vadd.f32 %v15834_v55, %v6672_v8 }
 0x80a   : > { %v6888_v53 = vadd.f32 %v6887_v12, %v6817_v11  ;;  %v17488_v11 = vld [vmem:[#allocation7_spill] sm:$0xff]  ;;  %v6296_v42 = vpop.xlane.xlu0 %6295  ;;  %v6595_v12 = vmul.f32 %v8439_v43, %v17489_v2  ;;  %8444 = vrsqrt.f32 %v6454_v9  ;;  %v6822_v54 = vmul.f32 %v6750_v37, %v15271_v47  ;;  %v17495_v9 = vld [vmem:[#allocation52_spill] sm:$0xff] }
 0x80b   : > { %v6594_v35 = vmul.f32 %v8437_v20, %v17488_v11  ;;  %8446 = vrsqrt.f32 %v6455_v10  ;;  %v6823_v48 = vmul.f32 %v6751_v34, %v15295_v15  ;;  %v17496_v11 = vld [vmem:[#allocation135_spill] sm:$0xff]  ;;  %v6389_v10 = vmul.f32 0.0078125, %v6296_v42 }
 0x80c   : > { %v6889_v13 = vadd.f32 %v6888_v53, %v6818_v31  ;;  %v6674_v61 = vmul.f32 %v15822_v26, %v6595_v12  ;;  %8448 = vrsqrt.f32 %v6456_v5  ;;  %v17497_v12 = vld [vmem:[#allocation139_spill] sm:$0xff] }
 0x80d   : > { %v6673_v53 = vmul.f32 %v15822_v26, %v6594_v35  ;;  %8450 = vrsqrt.f32 %v6457_v29 }
 0x80e   : > { %v6890_v27 = vadd.f32 %v6889_v13, %v6819_v62  ;;  %v6300_v41 = vpop.xlane.xlu0 %6299  ;;  %v17490_v13 = vld [vmem:[#allocation6_spill] sm:$0xff]  ;;  %v6290_v62 = vpop.xlane.xlu1 %6289  ;;  %v6753_v59 = vadd.f32 %v15834_v55, %v6674_v61  ;;  %v6461_v61 = vadd.f32 1e-06, %v6389_v10  ;;  %v17506_v10 = vld [vmem:[#allocation37_spill] sm:$0xff] }
 0x80f   : > { %v8441_v56 = vpop.eup %8440  ;;  %v6752_v18 = vadd.f32 %v15834_v55, %v6673_v53  ;;  %v6386_v39 = vmul.f32 0.0078125, %v6290_v62  ;;  %v17500_v62 = vld [vmem:[#allocation141_spill] sm:$0xff] }
 0x810   : > { %v6891_v44 = vadd.f32 %v6890_v27, %v6820_v46  ;;  %v8443_v31 = vpop.eup %8442  ;;  %v6596_v0 = vmul.f32 %v8441_v56, %v17490_v13  ;;  %v6825_v50 = vmul.f32 %v6753_v59, %v17493_v49  ;;  %v17499_v13 = vld [vmem:[#allocation138_spill] sm:$0xff]  ;;  %v6391_v59 = vmul.f32 0.0078125, %v6300_v41  ;;  %v17502_v49 = vld [vmem:[#allocation12_spill] sm:$0xff] }
 0x811   : > { %v6597_v16 = vmul.f32 %v8443_v31, %v17491_v45  ;;  %v6824_v15 = vmul.f32 %v6752_v18, %v17492_v40  ;;  %v6458_v22 = vadd.f32 1e-06, %v6386_v39  ;;  %v17501_v40 = vld [vmem:[#allocation145_spill] sm:$0xff]  ;;  %v17503_v41 = vld [vmem:[#allocation144_spill] sm:$0xff] }
 0x812   : > { %v6892_v58 = vadd.f32 %v6891_v44, %v6821_v60  ;;  %v6675_v57 = vmul.f32 %v15822_v26, %v6596_v0  ;;  %v6302_v27 = vpop.xlane.xlu0 %6301  ;;  %v6294_v19 = vpop.xlane.xlu1 %6293  ;;  %v6459_v60 = vadd.f32 1e-06, %v6387_v33 }
 0x813   : > { %v6676_v14 = vmul.f32 %v15822_v26, %v6597_v16  ;;  %v6388_v25 = vmul.f32 0.0078125, %v6294_v19  ;;  %8452 = vrsqrt.f32 %v6458_v22  ;;  %v6392_v33 = vmul.f32 0.0078125, %v6302_v27 }
 0x814   : > { %v6893_v23 = vadd.f32 %v6892_v58, %v6822_v54  ;;  %v8445_v4 = vpop.eup %8444  ;;  %v6754_v20 = vadd.f32 %v15834_v55, %v6675_v57  ;;  %8454 = vrsqrt.f32 %v6459_v60 }
 0x815   : > { %v8447_v46 = vpop.eup %8446  ;;  %v6598_v44 = vmul.f32 %v8445_v4, %v17494_v21  ;;  %v6755_v43 = vadd.f32 %v15834_v55, %v6676_v14  ;;  %v6460_v34 = vadd.f32 1e-06, %v6388_v25  ;;  %v6463_v14 = vadd.f32 1e-06, %v6391_v59  ;;  %v17504_v25 = vld [vmem:[#allocation148_spill] sm:$0xff] }
 0x816   : > { %v6894_v47 = vadd.f32 %v6893_v23, %v6823_v48  ;;  %v6599_v24 = vmul.f32 %v8447_v46, %v17495_v9  ;;  %v6306_v37 = vpop.xlane.xlu0 %6305  ;;  %v6826_v35 = vmul.f32 %v6754_v20, %v17496_v11  ;;  %v8449_v58 = vpop.eup %8448  ;;  %v17498_v23 = vld [vmem:[#allocation13_spill] sm:$0xff] }
 0x817   : > { %v6677_v1 = vmul.f32 %v15822_v26, %v6598_v44  ;;  %v6827_v6 = vmul.f32 %v6755_v43, %v17497_v12  ;;  %v8451_v53 = vpop.eup %8450  ;;  %v6298_v56 = vpop.xlane.xlu1 %6297  ;;  %v6600_v48 = vmul.f32 %v8449_v58, %v17498_v23  ;;  %8456 = vrsqrt.f32 %v6460_v34 }
 0x818   : > { %v6895_v28 = vadd.f32 %v6894_v47, %v6824_v15  ;;  %v6678_v54 = vmul.f32 %v15822_v26, %v6599_v24  ;;  %v6390_v5 = vmul.f32 0.0078125, %v6298_v56  ;;  %v6601_v0 = vmul.f32 %v8451_v53, %v17499_v13  ;;  %v17505_v24 = vld [vmem:[#allocation154_spill] sm:$0xff] }
 0x819   : > { %v6756_v52 = vadd.f32 %v15834_v55, %v6677_v1  ;;  %v6679_v47 = vmul.f32 %v15822_v26, %v6600_v48  ;;  %8458 = vrsqrt.f32 %v6461_v61  ;;  %v6464_v44 = vadd.f32 1e-06, %v6392_v33 }
 0x81a   : > { %v6896_v8 = vadd.f32 %v6895_v28, %v6825_v50  ;;  %v6310_v31 = vpop.xlane.xlu0 %6309  ;;  %v6757_v42 = vadd.f32 %v15834_v55, %v6678_v54  ;;  %v6462_v16 = vadd.f32 1e-06, %v6390_v5  ;;  %v6680_v57 = vmul.f32 %v15822_v26, %v6601_v0 }
 0x81b   : > { %v6828_v29 = vmul.f32 %v6756_v52, %v17500_v62  ;;  %v6758_v28 = vadd.f32 %v15834_v55, %v6679_v47  ;;  %v6394_v1 = vmul.f32 0.0078125, %v6306_v37  ;;  %v17509_v47 = vld [vmem:[#allocation64_spill] sm:$0xff] }
 0x81c   : > { %v6897_v2 = vadd.f32 %v6896_v8, %v6826_v35  ;;  %v6829_v15 = vmul.f32 %v6757_v42, %v17501_v40  ;;  %8460 = vrsqrt.f32 %v6462_v16  ;;  %v6759_v22 = vadd.f32 %v15834_v55, %v6680_v57  ;;  %v17510_v16 = vld [vmem:[#allocation19_spill] sm:$0xff] }
 0x81d   : > { %v8453_v45 = vpop.eup %8452  ;;  %v6830_v60 = vmul.f32 %v6758_v28, %v17504_v25  ;;  %8462 = vrsqrt.f32 %v6463_v14  ;;  %v6466_v56 = vadd.f32 1e-06, %v6394_v1  ;;  %v17511_v28 = vld [vmem:[#allocation158_spill] sm:$0xff] }
 0x81e   : > { %v6898_v18 = vadd.f32 %v6897_v2, %v6827_v6  ;;  %v8455_v4 = vpop.eup %8454  ;;  %v6314_v19 = vpop.xlane.xlu0 %6313  ;;  %v6602_v50 = vmul.f32 %v8453_v45, %v17502_v49  ;;  %v6831_v11 = vmul.f32 %v6759_v22, %v17505_v24  ;;  %8464 = vrsqrt.f32 %v6464_v44  ;;  %v17507_v2 = vld [vmem:[#allocation153_spill] sm:$0xff]  ;;  %v17514_v24 = vld [vmem:[#allocation86_spill] sm:$0xff] }
 0x81f   : > { %v6603_v20 = vmul.f32 %v8455_v4, %v17503_v41  ;;  %v6396_v6 = vmul.f32 0.0078125, %v6310_v31  ;;  %v6398_v23 = vmul.f32 0.0078125, %v6314_v19  ;;  %8466 = vrsqrt.f32 %v6466_v56 }
 0x820   : > { %v6899_v39 = vadd.f32 %v6898_v18, %v6828_v29  ;;  %v6681_v8 = vmul.f32 %v15822_v26, %v6602_v50  ;;  %v17508_v18 = vld [vmem:[#allocation60_spill] sm:$0xff] }
 0x821   : > { %v8457_v21 = vpop.eup %8456  ;;  %v6682_v35 = vmul.f32 %v15822_v26, %v6603_v20  ;;  %v6468_v0 = vadd.f32 1e-06, %v6396_v6  ;;  %v6470_v40 = vadd.f32 1e-06, %v6398_v23  ;;  %v17512_v20 = vld [vmem:[#allocation68_spill] sm:$0xff] }
 0x822   : > { %v6900_v46 = vadd.f32 %v6899_v39, %v6829_v15  ;;  %v6318_v27 = vpop.xlane.xlu0 %6317  ;;  %v6604_v58 = vmul.f32 %v8457_v21, %v17506_v10  ;;  %v6760_v34 = vadd.f32 %v15834_v55, %v6681_v8 }
 0x823   : > { %v8459_v43 = vpop.eup %8458  ;;  %v6761_v53 = vadd.f32 %v15834_v55, %v6682_v35  ;;  %8468 = vrsqrt.f32 %v6468_v0  ;;  %v6400_v50 = vmul.f32 0.0078125, %v6318_v27  ;;  %v17516_v0 = vld [vmem:[#allocation91_spill] sm:$0xff] }
 0x824   : > { %v6901_v9 = vadd.f32 %v6900_v46, %v6830_v60  ;;  %v6605_v12 = vmul.f32 %v8459_v43, %v17507_v2  ;;  %v6683_v52 = vmul.f32 %v15822_v26, %v6604_v58  ;;  %v6832_v37 = vmul.f32 %v6760_v34, %v17508_v18  ;;  %v17513_v60 = vld [vmem:[#allocation160_spill] sm:$0xff] }
 0x825   : > { %v6833_v31 = vmul.f32 %v6761_v53, %v17509_v47  ;;  %8470 = vrsqrt.f32 %v6470_v40  ;;  %v6472_v27 = vadd.f32 1e-06, %v6400_v50 }
 0x826   : > { %v6902_v54 = vadd.f32 %v6901_v9, %v6831_v11  ;;  %v6322_v48 = vpop.xlane.xlu0 %6321  ;;  %v8461_v5 = vpop.eup %8460  ;;  %v6684_v13 = vmul.f32 %v15822_v26, %v6605_v12  ;;  %v6762_v45 = vadd.f32 %v15834_v55, %v6683_v52 }
 0x827   : > { %v8463_v62 = vpop.eup %8462  ;;  %v6606_v39 = vmul.f32 %v8461_v5, %v17510_v16  ;;  %v6402_v10 = vmul.f32 0.0078125, %v6322_v48 }
 0x828   : > { %v6903_v29 = vadd.f32 %v6902_v54, %v6832_v37  ;;  %v8465_v33 = vpop.eup %8464  ;;  %v6763_v19 = vadd.f32 %v15834_v55, %v6684_v13  ;;  %v6607_v49 = vmul.f32 %v8463_v62, %v17511_v28  ;;  %v6834_v21 = vmul.f32 %v6762_v45, %v17512_v20  ;;  %v17515_v37 = vld [vmem:[#allocation133_spill] sm:$0xff] }
 0x829   : > { %v6685_v44 = vmul.f32 %v15822_v26, %v6606_v39  ;;  %v6608_v8 = vmul.f32 %v8465_v33, %v17513_v60  ;;  %v8467_v6 = vpop.eup %8466  ;;  %v6474_v5 = vadd.f32 1e-06, %v6402_v10 }
 0x82a   : > { %v6326_v14 = vpop.xlane.xlu0 %6325  ;;  %v6904_v46 = vadd.f32 %v6903_v29, %v6833_v31  ;;  %v6835_v11 = vmul.f32 %v6763_v19, %v17514_v24  ;;  %v6686_v35 = vmul.f32 %v15822_v26, %v6607_v49 }
 0x82b   : > { %v6764_v54 = vadd.f32 %v15834_v55, %v6685_v44  ;;  %v6687_v53 = vmul.f32 %v15822_v26, %v6608_v8  ;;  %v6404_v23 = vmul.f32 0.0078125, %v6326_v14  ;;  %v17519_v14 = vld [vmem:[#allocation174_spill] sm:$0xff] }
 0x82c   : > { %v6905_v1 = vadd.f32 %v6904_v46, %v6834_v21  ;;  %v6765_v52 = vadd.f32 %v15834_v55, %v6686_v35 }
 0x82d   : > { %v8469_v48 = vpop.eup %8468  ;;  %v6836_v62 = vmul.f32 %v6764_v54, %v17516_v0  ;;  %v6766_v29 = vadd.f32 %v15834_v55, %v6687_v53  ;;  %v6476_v16 = vadd.f32 1e-06, %v6404_v23 }
 0x82e   : > { %v6330_v2 = vpop.xlane.xlu0 %6329 }
 0x82f   : > { %v8471_v31 = vpop.eup %8470  ;;  %v6406_v39 = vmul.f32 0.0078125, %v6330_v2  ;;  %v6838_v46 = vmul.f32 %v6766_v29, %v17519_v14 }
 0x831   : > { %v6478_v21 = vadd.f32 1e-06, %v6406_v39  ;;  %v17525_v39 = vld [vmem:[#allocation185_spill] sm:$0xff] }
 0x832   : > { %v6334_v40 = vpop.xlane.xlu0 %6333 }
 0x833   : > { %v6408_v44 = vmul.f32 0.0078125, %v6334_v40 }
 0x835   : > { %v6480_v2 = vadd.f32 1e-06, %v6408_v44 }
 0x84d   : > { %v7078_v61 = vpop.xlane.xlu1 %7077 }
 0x84e   : > { %v7079_v42 = vrot.slane %v7078_v61, 4 }
 0x850   : > { %v7080_v59 = vadd.f32 %v7079_v42, %v7078_v61  ;;  %v6906_v61 = vadd.f32 %v6905_v1, %v6835_v11  ;;  %v6610_v42 = vmul.f32 %v8467_v6, %v17515_v37  ;;  %v6338_v11 = vpop.xlane.xlu0 %6337 }
 0x851   : > { %v6304_v15 = vpop.xlane.xlu1 %6303 }
 0x852   : > { %v7081_v57 = vrot.slane %v7080_v59, 2  ;;  %v6393_v4 = vmul.f32 0.0078125, %v6304_v15  ;;  %v6689_v28 = vmul.f32 %v15822_v26, %v6610_v42 }
 0x854   : > { %v6465_v22 = vadd.f32 1e-06, %v6393_v4  ;;  %v7082_v41 = vadd.f32 %v7081_v57, %v7080_v59  ;;  %v17517_v59 = vld [vmem:[#allocation97_spill] sm:$0xff]  ;;  %v6907_v57 = vadd.f32 %v6906_v61, %v6836_v62  ;;  %v6410_v61 = vmul.f32 0.0078125, %v6338_v11 }
 0x855   : > { %v6308_v25 = vpop.xlane.xlu1 %6307  ;;  %v6837_v45 = vmul.f32 %v6765_v52, %v17517_v59  ;;  %v17518_v4 = vld [vmem:[#allocation137_spill] sm:$0xff]  ;;  %v17522_v52 = vld [vmem:[#allocation151_spill] sm:$0xff] }
 0x856   : > { %8472 = vrsqrt.f32 %v6465_v22  ;;  %v6395_v43 = vmul.f32 0.0078125, %v6308_v25  ;;  %v7083_v9 = vrot.slane %v7082_v41, 1  ;;  %v6612_v33 = vmul.f32 %v8469_v48, %v17518_v4  ;;  %v17520_v22 = vld [vmem:[#allocation143_spill] sm:$0xff] }
 0x857   : > { %v6908_v8 = vadd.f32 %v6907_v57, %v6837_v45  ;;  %v6482_v57 = vadd.f32 1e-06, %v6410_v61 }
 0x858   : > { %v6467_v58 = vadd.f32 1e-06, %v6395_v43  ;;  %v7084_v34 = vadd.f32 %v7083_v9, %v7082_v41  ;;  %v6614_v41 = vmul.f32 %v8471_v31, %v17520_v22  ;;  %v6691_v43 = vmul.f32 %v15822_v26, %v6612_v33  ;;  %v17526_v33 = vld [vmem:[#allocation62_spill] sm:$0xff]  ;;  %v17527_v22 = vld [vmem:[#allocation15_spill] sm:$0xff] }
 0x859   : > { %v6312_v12 = vpop.xlane.xlu1 %6311  ;;  %v6909_v10 = vadd.f32 %v6908_v8, %v6838_v46 }
 0x85a   : > { %8474 = vrsqrt.f32 %v6467_v58  ;;  %v6397_v56 = vmul.f32 0.0078125, %v6312_v12  ;;  %8313 = vpush %v7084_v34  ;;  %v6693_v58 = vmul.f32 %v15822_v26, %v6614_v41  ;;  %v17521_v12 = vld [vmem:[#allocation179_spill] sm:$0xff] }
 0x85b   : > { %8476 = vrsqrt.f32 %v6472_v27 }
 0x85c   : > { %v6469_v18 = vadd.f32 1e-06, %v6397_v56  ;;  %v6770_v56 = vadd.f32 %v15834_v55, %v6691_v43  ;;  %v6772_v62 = vadd.f32 %v15834_v55, %v6693_v58  ;;  %v17529_v43 = vld [vmem:[#allocation80_spill] sm:$0xff] }
 0x85d   : > { %v6316_v13 = vpop.xlane.xlu1 %6315  ;;  %v17530_v58 = vld [vmem:[#allocation116_spill] sm:$0xff] }
 0x85e   : > { %8478 = vrsqrt.f32 %v6469_v18  ;;  %v6399_v47 = vmul.f32 0.0078125, %v6316_v13  ;;  %v6842_v40 = vmul.f32 %v6770_v56, %v17525_v39  ;;  %v6844_v41 = vmul.f32 %v6772_v62, %v17527_v22 }
 0x85f   : > { %8480 = vrsqrt.f32 %v6474_v5 }
 0x860   : > { %v8473_v15 = vpop.eup %8472  ;;  %v6471_v19 = vadd.f32 1e-06, %v6399_v47  ;;  %v17524_v47 = vld [vmem:[#allocation183_spill] sm:$0xff] }
 0x861   : > { %v6609_v49 = vmul.f32 %v8473_v15, %v15641_v30  ;;  %v6320_v50 = vpop.xlane.xlu1 %6319  ;;  %v6768_v30 = vadd.f32 %v15834_v55, %v6689_v28 }
 0x862   : > { %8482 = vrsqrt.f32 %v6471_v19  ;;  %v6401_v20 = vmul.f32 0.0078125, %v6320_v50 }
 0x863   : > { %8484 = vrsqrt.f32 %v6476_v16  ;;  %v6688_v25 = vmul.f32 %v15822_v26, %v6609_v49 }
 0x864   : > { %v8475_v60 = vpop.eup %8474  ;;  %v6473_v9 = vadd.f32 1e-06, %v6401_v20  ;;  %v17528_v20 = vld [vmem:[#allocation187_spill] sm:$0xff] }
 0x865   : > { %v8477_v24 = vpop.eup %8476  ;;  %v6767_v35 = vadd.f32 %v15834_v55, %v6688_v25  ;;  %v6611_v27 = vmul.f32 %v8475_v60, %v15648_v32  ;;  %v6324_v1 = vpop.xlane.xlu1 %6323  ;;  %v17523_v32 = vld [vmem:[#allocation181_spill] sm:$0xff] }
 0x866   : > { %8486 = vrsqrt.f32 %v6473_v9  ;;  %v6403_v34 = vmul.f32 0.0078125, %v6324_v1  ;;  %v6616_v23 = vmul.f32 %v8477_v24, %v17522_v52  ;;  %v6840_v18 = vmul.f32 %v6768_v30, %v17523_v32  ;;  %v17532_v52 = vld [vmem:[#allocation94_spill] sm:$0xff] }
 0x867   : > { %8488 = vrsqrt.f32 %v6478_v21  ;;  %v6839_v6 = vmul.f32 %v6767_v35, %v17521_v12  ;;  %v6690_v54 = vmul.f32 %v15822_v26, %v6611_v27 }
 0x868   : > { %v8479_v53 = vpop.eup %8478  ;;  %v6475_v5 = vadd.f32 1e-06, %v6403_v34  ;;  %v6695_v15 = vmul.f32 %v15822_v26, %v6616_v23 }
 0x869   : > { %v6910_v48 = vadd.f32 %v6909_v10, %v6839_v6  ;;  %v6769_v37 = vadd.f32 %v15834_v55, %v6690_v54  ;;  %v6613_v42 = vmul.f32 %v8479_v53, %v15658_v38  ;;  %v6328_v13 = vpop.xlane.xlu1 %6327  ;;  %v8481_v0 = vpop.eup %8480  ;;  %v17531_v54 = vld [vmem:[#allocation74_spill] sm:$0xff] }
 0x86a   : > { %8490 = vrsqrt.f32 %v6475_v5  ;;  %v6405_v29 = vmul.f32 0.0078125, %v6328_v13  ;;  %v6618_v19 = vmul.f32 %v8481_v0, %v17526_v33  ;;  %v6774_v8 = vadd.f32 %v15834_v55, %v6695_v15 }
 0x86b   : > { %8492 = vrsqrt.f32 %v6480_v2  ;;  %v6841_v31 = vmul.f32 %v6769_v37, %v17524_v47  ;;  %v6911_v59 = vadd.f32 %v6910_v48, %v6840_v18  ;;  %v6692_v45 = vmul.f32 %v15822_v26, %v6613_v42  ;;  %v17533_v37 = vld [vmem:[#allocation118_spill] sm:$0xff] }
 0x86c   : > { %v8483_v16 = vpop.eup %8482  ;;  %v6477_v4 = vadd.f32 1e-06, %v6405_v29  ;;  %v6846_v53 = vmul.f32 %v6774_v8, %v17531_v54  ;;  %v17543_v54 = vld [vmem:[#allocation126_spill] sm:$0xff] }
 0x86d   : > { %v8485_v38 = vpop.eup %8484  ;;  %v6912_v28 = vadd.f32 %v6911_v59, %v6841_v31  ;;  %v6771_v49 = vadd.f32 %v15834_v55, %v6692_v45  ;;  %v6615_v50 = vmul.f32 %v8483_v16, %v15672_v17  ;;  %v6332_v14 = vpop.xlane.xlu1 %6331  ;;  %v6697_v17 = vmul.f32 %v15822_v26, %v6618_v19  ;;  %v17534_v31 = vld [vmem:[#allocation176_spill] sm:$0xff]  ;;  %v17535_v45 = vld [vmem:[#allocation18_spill] sm:$0xff] }
 0x86e   : > { %8494 = vrsqrt.f32 %v6477_v4  ;;  %v6407_v46 = vmul.f32 0.0078125, %v6332_v14  ;;  %v6620_v9 = vmul.f32 %v8485_v38, %v17529_v43  ;;  %v17540_v43 = vld [vmem:[#allocation42_spill] sm:$0xff] }
 0x86f   : > { %v6843_v21 = vmul.f32 %v6771_v49, %v17528_v20  ;;  %v6913_v44 = vadd.f32 %v6912_v28, %v6842_v40  ;;  %v6694_v25 = vmul.f32 %v15822_v26, %v6615_v50  ;;  %8496 = vrsqrt.f32 %v6482_v57  ;;  %v17536_v57 = vld [vmem:[#allocation162_spill] sm:$0xff]  ;;  %v17537_v28 = vld [vmem:[#allocation120_spill] sm:$0xff] }
 0x870   : > { %v8487_v60 = vpop.eup %8486  ;;  %v6479_v24 = vadd.f32 1e-06, %v6407_v46  ;;  %v6699_v56 = vmul.f32 %v15822_v26, %v6620_v9  ;;  %v6776_v32 = vadd.f32 %v15834_v55, %v6697_v17  ;;  %v17538_v46 = vld [vmem:[#allocation132_spill] sm:$0xff] }
 0x871   : > { %v8489_v30 = vpop.eup %8488  ;;  %v6914_v11 = vadd.f32 %v6913_v44, %v6843_v21  ;;  %v6773_v35 = vadd.f32 %v15834_v55, %v6694_v25  ;;  %v6617_v27 = vmul.f32 %v8487_v60, %v15683_v7  ;;  %v6336_v1 = vpop.xlane.xlu1 %6335  ;;  %v17539_v21 = vld [vmem:[#allocation122_spill] sm:$0xff] }
 0x872   : > { %8498 = vrsqrt.f32 %v6479_v24  ;;  %v6409_v10 = vmul.f32 0.0078125, %v6336_v1  ;;  %v6622_v23 = vmul.f32 %v8489_v30, %v17532_v52  ;;  %v6778_v29 = vadd.f32 %v15834_v55, %v6699_v56  ;;  %v17544_v52 = vld [vmem:[#allocation44_spill] sm:$0xff] }
 0x873   : > { %v6845_v34 = vmul.f32 %v6773_v35, %v17530_v58  ;;  %v6915_v2 = vadd.f32 %v6914_v11, %v6844_v41  ;;  %v6696_v12 = vmul.f32 %v15822_v26, %v6617_v27  ;;  %v6848_v16 = vmul.f32 %v6776_v32, %v17535_v45  ;;  %v17541_v27 = vld [vmem:[#allocation163_spill] sm:$0xff]  ;;  %v17542_v58 = vld [vmem:[#allocation124_spill] sm:$0xff] }
 0x874   : > { %v8491_v6 = vpop.eup %8490  ;;  %v6481_v61 = vadd.f32 1e-06, %v6409_v10  ;;  %v6701_v47 = vmul.f32 %v15822_v26, %v6622_v23  ;;  %v6850_v49 = vmul.f32 %v6778_v29, %v17537_v28 }
 0x875   : > { %v8493_v5 = vpop.eup %8492  ;;  %v6916_v7 = vadd.f32 %v6915_v2, %v6845_v34  ;;  %v6775_v18 = vadd.f32 %v15834_v55, %v6696_v12  ;;  %v6619_v48 = vmul.f32 %v8491_v6, %v15696_v51 }
 0x876   : > { %8500 = vrsqrt.f32 %v6481_v61  ;;  %v6624_v59 = vmul.f32 %v8493_v5, %v17534_v31  ;;  %v6780_v50 = vadd.f32 %v15834_v55, %v6701_v47 }
 0x877   : > { %v6847_v42 = vmul.f32 %v6775_v18, %v17533_v37  ;;  %v6917_v13 = vadd.f32 %v6916_v7, %v6846_v53  ;;  %v6698_v0 = vmul.f32 %v15822_v26, %v6619_v48 }
 0x878   : > { %v8495_v62 = vpop.eup %8494  ;;  %v6703_v14 = vmul.f32 %v15822_v26, %v6624_v59  ;;  %v6852_v9 = vmul.f32 %v6780_v50, %v17540_v43 }
 0x879   : > { %v6918_v39 = vadd.f32 %v6917_v13, %v6847_v42  ;;  %v6777_v40 = vadd.f32 %v15834_v55, %v6698_v0  ;;  %v6621_v51 = vmul.f32 %v8495_v62, %v15718_v36  ;;  %v8497_v15 = vpop.eup %8496 }
 0x87a   : > { %v6626_v22 = vmul.f32 %v8497_v15, %v17538_v46  ;;  %v6782_v24 = vadd.f32 %v15834_v55, %v6703_v14 }
 0x87b   : > { %v6849_v4 = vmul.f32 %v6777_v40, %v17536_v57  ;;  %v6919_v38 = vadd.f32 %v6918_v39, %v6848_v16  ;;  %v6700_v33 = vmul.f32 %v15822_v26, %v6621_v51 }
 0x87c   : > { %v8499_v19 = vpop.eup %8498  ;;  %v6705_v30 = vmul.f32 %v15822_v26, %v6626_v22  ;;  %v6854_v34 = vmul.f32 %v6782_v24, %v17542_v58 }
 0x87d   : > { %v6920_v41 = vadd.f32 %v6919_v38, %v6849_v4  ;;  %v6779_v20 = vadd.f32 %v15834_v55, %v6700_v33  ;;  %v6623_v36 = vmul.f32 %v8499_v19, %v15729_v63 }
 0x87e   : > { %v6784_v2 = vadd.f32 %v15834_v55, %v6705_v30 }
 0x87f   : > { %v6851_v44 = vmul.f32 %v6779_v20, %v17539_v21  ;;  %v6921_v25 = vadd.f32 %v6920_v41, %v6850_v49  ;;  %v6702_v60 = vmul.f32 %v15822_v26, %v6623_v36 }
 0x880   : > { %v8501_v8 = vpop.eup %8500  ;;  %v6856_v23 = vmul.f32 %v6784_v2, %v17544_v52 }
 0x881   : > { %v6922_v17 = vadd.f32 %v6921_v25, %v6851_v44  ;;  %v6781_v11 = vadd.f32 %v15834_v55, %v6702_v60  ;;  %v6625_v35 = vmul.f32 %v8501_v8, %v15744_v3 }
 0x883   : > { %v6853_v1 = vmul.f32 %v6781_v11, %v17541_v27  ;;  %v6704_v63 = vmul.f32 %v15822_v26, %v6625_v35  ;;  %v6923_v10 = vadd.f32 %v6922_v17, %v6852_v9 }
 0x885   : > { %v6783_v12 = vadd.f32 %v15834_v55, %v6704_v63  ;;  %v6924_v6 = vadd.f32 %v6923_v10, %v6853_v1 }
 0x887   : > { %v6855_v53 = vmul.f32 %v6783_v12, %v17543_v54  ;;  %v6925_v56 = vadd.f32 %v6924_v6, %v6854_v34 }
 0x889   : > { %v6926_v3 = vadd.f32 %v6925_v56, %v6855_v53 }
 0x88b   : > { %s8314_s21 = spop %8313  ;;  %v6927_v61 = vadd.f32 %v6926_v3, %v6856_v23 }
 0x88c   : > { %v7086_v5 = vstv %s8314_s21 }
 0x88d   : > { %8502 = vrcp.f32 %v7086_v5  ;;  %v6928_v26 = vrot.slane %v6927_v61, 4 }
 0x88f   : > { %v6929_v32 = vadd.f32 %v6928_v26, %v6927_v61 }
 0x891   : > { %v6930_v7 = vrot.slane %v6929_v32, 2 }
 0x893   : > { %v6931_v18 = vadd.f32 %v6930_v7, %v6929_v32 }
 0x895   : > { %v6932_v48 = vrot.slane %v6931_v18, 1 }
 0x897   : > { %v8503_v55 = vpop.eup %8502  ;;  %v6933_v37 = vadd.f32 %v6932_v48, %v6931_v18 }
 0x899   : > { %v7088_v42 = vmul.f32 %v8503_v55, %v6933_v37 }
 0x89b   : > { %7089 = vst [vmem:[%s297_s23] sm:$0x1] %v7088_v42 }
 0x89c   : > { %8521 = shalt.err (!%p8518_p4)
}
 0x89d   : > { %s8522_s26 = scalar_lea.hbm %s16012_s19, 16  ;;  %s8526_s13 = scalar_lea.hbm %s16062_s8, 32 }
 0x89e   : > { %p8523_p7 = scmp.ne.s32.totalorder %s16012_s19, %s8522_s26  ;;  %p8527_p10 = scmp.lt.u32.totalorder %s16012_s19, %s16062_s8 }
 0x89f   : > { %p8528_p11 = scmp.lt.u32.totalorder %s8526_s13, %s8522_s26  ;;  %p8530_p13 = scmp.lt.u32.totalorder %s8522_s26, %s16012_s19 }
 0x8a0   : > { %p8524_p8 = pnand %p8523_p7, %p8660_p5 }
 0x8a1   : > { %p8529_p12 = por %p8528_p11, %p8527_p10 }
 0x8a2   : > { %p8525_p9 = pneg %p8524_p8 }
 0x8a3   : > { %p8531_p0 = por %p8530_p13, %p8529_p12 }
 0x8a5   : > { %p8532_p1 = pnand %p8531_p0, %p8525_p9 }
 0x8a7   : > { %8535 = shalt.err (!%p8532_p1)
}
 0x8a8   : > { %8315 = dma.vmem_to_hbm [thread:$0]  (%p8660_p5), %s16014_s17, 16, %s16012_s19, %s7091_s20  }
 0x8a9 PF: > { %p8321_p2 = scmp.ge.s32.totalorder %s8570_s30, 2  ;;  %s7115_s10 = sand.u32 1, %s8558_s27  }
 0x8aa   : > { %s7116_s22 = scalar_lea.sflag [#allocation3], %s7115_s10 }
 0x8ab   : > { %p8318_p3 = pnand %p8321_p2, %p8664_p6 }
 0x8ad   : > { %8553 = dma.done.wait (!%p8318_p3), %s7116_s22, 16  }
 0x8ae   : > { %8555 = vsyncadd (!%p8318_p3), %s7116_s22, 4294967280  ;;  %p18_p4 = scmp.ge.s32.totalorder %s8647_s11, 4   ;;  %s17545_s27 = smov %s8562_s28 }
 0x8af   : > { %s17546_s28 = smov %s8566_s29  ;;  %s17547_s29 = smov %s8658_s14 }
 0x8b0   : > { %s17548_s30 = smov %s8647_s11  ;;  %20 = sbr.rel (!%p18_p4) target bundleno = 3 (0x3), region = 87 }
 0x8b7   :  { %7120 = vsyncpa [#allocation3], 1 }
 0x8b8   :  { %7122 = vsyncpa [#allocation3 + $0x1], 1 }

</bundles_post_ra>
